<compile_context>
chip_gen: v7x
topology: tpu7x:2x2x1
jax: 0.10.0
libtpu: 0.0.40
codegen_flags: <defaults>
</compile_context>

<pallas_src>
import functools

import jax
import jax.numpy as jnp
from jax.experimental import pallas as pl
from jax.experimental.pallas import tpu as pltpu


def _round_up(x, m):
    return ((x + m - 1) // m) * m


def _pick_tk(kp):
    """Largest K tile (multiple of 128, <= 1024) that evenly divides kp."""
    q = kp // 128
    for d in range(min(q, 8), 0, -1):
        if q % d == 0:
            return 128 * d
    return 128


def _megacore_count():
    # v7x has 2 TensorCores per chip; give the scheduler >=2 parallel steps.
    try:
        kind = jax.devices()[0].device_kind.lower()
        if "v7" in kind:
            return 2
    except Exception:
        pass
    return 1


_MEGACORE = _megacore_count()


# ----------------------------------------------------------------------------
# Fused MXU matmul kernel:
#   out = relu?( (A @ W_folded) + bias [+ residual] )
#   * A (bf16 activations) x W (bf16, BN-scale pre-folded, pre-padded).
#   * single-K: dot -> epilogue in registers -> one store of the output tile.
#   * multi-K : f32 VMEM accumulator, k==0 writes the dot directly (no
#     zero-init pass), epilogue + single output store in the last k step.
# ----------------------------------------------------------------------------
def _fused_matmul_kernel(*refs, relu, has_residual, multi_k):
    if multi_k:
        if has_residual:
            a_ref, b_ref, c_ref, r_ref, o_ref, acc_ref = refs
        else:
            a_ref, b_ref, c_ref, o_ref, acc_ref = refs
            r_ref = None
    else:
        if has_residual:
            a_ref, b_ref, c_ref, r_ref, o_ref = refs
        else:
            a_ref, b_ref, c_ref, o_ref = refs
            r_ref = None

    def epilogue(acc):
        y = acc + c_ref[...]
        if r_ref is not None:
            y = y + r_ref[...].astype(jnp.float32)
        if relu:
            y = jnp.maximum(y, 0.0)
        return y.astype(o_ref.dtype)

    if not multi_k:
        acc = jnp.dot(a_ref[...], b_ref[...],
                      preferred_element_type=jnp.float32)
        o_ref[...] = epilogue(acc)
        return

    k = pl.program_id(2)
    part = jnp.dot(a_ref[...], b_ref[...], preferred_element_type=jnp.float32)

    @pl.when(k == 0)
    def _():
        acc_ref[...] = part

    @pl.when(k > 0)
    def _():
        acc_ref[...] += part

    @pl.when(k == pl.num_programs(2) - 1)
    def _():
        o_ref[...] = epilogue(acc_ref[...])


def prepare_linear(w2d, scale, bias_vec):
    """Fold BN scale into the weight, pad to lane/K tiles, cast to bf16. Once."""
    K, N = w2d.shape
    Kp = _round_up(K, 128)
    Np = _round_up(N, 128)
    w_f = w2d.astype(jnp.float32) * scale.astype(jnp.float32)[None, :]
    wp = jnp.pad(w_f, ((0, Kp - K), (0, Np - N))).astype(jnp.bfloat16)
    bp = jnp.pad(bias_vec.astype(jnp.float32), (0, Np - N)).reshape(1, Np)
    return {'w': wp, 'b': bp, 'k': K, 'n': N}


def fused_matmul(a, prep, residual=None, relu=False, out_dtype=jnp.bfloat16):
    """relu?((a @ w_folded) + bias (+ residual)) with pre-prepared weights.

    a: [M, K] (cast to bf16), prep['w']: [Kp, Np] bf16, prep['b']: [1, Np] f32,
    residual: [M, N] (bf16) or None.  Returns [M, N] in out_dtype.
    """
    M, K = a.shape
    wp, bp = prep['w'], prep['b']
    Kp, Np = wp.shape
    N = prep['n']
    assert K == prep['k']

    tm = min(256, _round_up(M, 16))         # bf16 sublane-friendly, no dead M pad
    if _MEGACORE >= 2 and M >= 32:
        # Keep >= 2 row blocks so both v7x TensorCores get work.
        tm = min(tm, _round_up((M + 1) // 2, 16))
    tn = min(256, Np)
    Mp = _round_up(M, tm)
    tk = _pick_tk(Kp)
    nk = Kp // tk
    multi_k = nk > 1

    a_p = a.astype(jnp.bfloat16)
    if Mp != M or Kp != K:
        a_p = jnp.pad(a_p, ((0, Mp - M), (0, Kp - K)))

    has_residual = residual is not None
    operands = [a_p, wp, bp]
    if has_residual:
        r_p = residual.astype(jnp.bfloat16)
        if Mp != M or Np != N:
            r_p = jnp.pad(r_p, ((0, Mp - M), (0, Np - N)))
        operands.append(r_p)

    kern = functools.partial(_fused_matmul_kernel, relu=relu,
                             has_residual=has_residual, multi_k=multi_k)

    if multi_k:
        grid = (Mp // tm, Np // tn, nk)
        in_specs = [
            pl.BlockSpec((tm, tk), lambda i, j, k: (i, k)),
            pl.BlockSpec((tk, tn), lambda i, j, k: (k, j)),
            pl.BlockSpec((1, tn), lambda i, j, k: (0, j)),
        ]
        if has_residual:
            in_specs.append(pl.BlockSpec((tm, tn), lambda i, j, k: (i, j)))
        out_spec = pl.BlockSpec((tm, tn), lambda i, j, k: (i, j))
        scratch = [pltpu.VMEM((tm, tn), jnp.float32)]
        semantics = ("parallel", "parallel", "arbitrary")
    else:
        grid = (Mp // tm, Np // tn)
        in_specs = [
            pl.BlockSpec((tm, Kp), lambda i, j: (i, 0)),
            pl.BlockSpec((Kp, tn), lambda i, j: (0, j)),
            pl.BlockSpec((1, tn), lambda i, j: (0, j)),
        ]
        if has_residual:
            in_specs.append(pl.BlockSpec((tm, tn), lambda i, j: (i, j)))
        out_spec = pl.BlockSpec((tm, tn), lambda i, j: (i, j))
        scratch = []
        semantics = ("parallel", "parallel")

    out = pl.pallas_call(
        kern,
        out_shape=jax.ShapeDtypeStruct((Mp, Np), out_dtype),
        grid_spec=pltpu.PrefetchScalarGridSpec(
            num_scalar_prefetch=0,
            grid=grid,
            in_specs=in_specs,
            out_specs=out_spec,
            scratch_shapes=scratch),
        compiler_params=pltpu.CompilerParams(dimension_semantics=semantics),
    )(*operands)

    if Mp == M and Np == N:
        return out                      # no slice / extra HBM copy needed
    return out[:M, :N]


# ----------------------------------------------------------------------------
# 3x3 / stride-2 max-pool: one stacked [taps, rows, 128] lane-dense operand
# ----------------------------------------------------------------------------
def _maxpool_kernel(x_ref, o_ref, *, taps):
    m = x_ref[0]
    for t in range(1, taps):
        m = jnp.maximum(m, x_ref[t])
    o_ref[...] = m


def maxpool_3x3_s2(x):
    N, H, W, C = x.shape
    k, s, pad = 3, 2, 1
    OH = (H + 2 * pad - k) // s + 1
    OW = (W + 2 * pad - k) // s + 1
    xp = jnp.pad(x, ((0, 0), (pad, pad), (pad, pad), (0, 0)),
                 constant_values=-jnp.inf)
    views = []
    for kh in range(k):
        for kw in range(k):
            v = xp[:, kh:kh + (OH - 1) * s + 1:s, kw:kw + (OW - 1) * s + 1:s, :]
            views.append(v.reshape(-1))
    taps = len(views)
    total = N * OH * OW * C
    rows = _round_up(total, 128) // 128
    br = min(512, _round_up(rows, 8))
    rows_p = _round_up(rows, br)

    stacked = jnp.stack(views, axis=0)                       # [taps, total]
    if rows_p * 128 != total:
        stacked = jnp.pad(stacked, ((0, 0), (0, rows_p * 128 - total)))
    stacked = stacked.reshape(taps, rows_p, 128)

    # TODO(synk): a single windowed-read kernel over the padded NHWC map would
    # avoid materializing the 9 strided tap views in HBM entirely.
    out = pl.pallas_call(
        functools.partial(_maxpool_kernel, taps=taps),
        out_shape=jax.ShapeDtypeStruct((rows_p, 128), x.dtype),
        grid=(rows_p // br,),
        in_specs=[pl.BlockSpec((taps, br, 128), lambda i: (0, i, 0))],
        out_specs=pl.BlockSpec((br, 128), lambda i: (i, 0)),
        compiler_params=pltpu.CompilerParams(
            dimension_semantics=("parallel",)),
    )(stacked)
    return out.reshape(-1)[:total].reshape(N, OH, OW, C)


# ----------------------------------------------------------------------------
# Fused global average pool (AdaptiveAvgPool2d((1,1))) + fc + bias
# ----------------------------------------------------------------------------
def _gap_fc_kernel(x_ref, w_ref, b_ref, o_ref):
    pooled = jnp.mean(x_ref[...].astype(jnp.float32), axis=1)      # [N, C]
    o_ref[...] = jnp.dot(pooled, w_ref[...],
                         preferred_element_type=jnp.float32) + b_ref[...]


def gap_fc(x_nhwc, fc_prep):
    # TODO(synk): single-block kernel; add a batch/spatial grid for inputs that
    # would not fit the full [N, H*W, C] feature map in VMEM.
    N, H, W, C = x_nhwc.shape
    wp, bp, n_out = fc_prep['w'], fc_prep['b'], fc_prep['n']
    x3 = x_nhwc.reshape(N, H * W, C)
    out = pl.pallas_call(
        _gap_fc_kernel,
        out_shape=jax.ShapeDtypeStruct((N, wp.shape[1]), jnp.float32),
    )(x3, wp, bp)
    return out[:, :n_out]


# ----------------------------------------------------------------------------
# ResNet-18 building blocks (glue in plain JAX, compute in the kernels above)
# ----------------------------------------------------------------------------
def conv_bn(x, prep, stride, padding, relu, residual=None):
    """Conv (NHWC, bf16) + folded BN (+residual) (+ReLU) as one fused matmul."""
    N, H, W, Cin = x.shape
    KH, KW = prep['khkw']
    Cout = prep['n']
    OH = (H + 2 * padding - KH) // stride + 1
    OW = (W + 2 * padding - KW) // stride + 1

    # im2col in bf16.
    # TODO(synk): replace im2col with an implicit-GEMM index_map so LHS tiles
    # are DMA'd directly from the padded NHWC activation (removes the KH*KW x
    # patch-materialization HBM amplification for 3x3 convs).
    xb = x.astype(jnp.bfloat16)
    if padding:
        xb = jnp.pad(xb, ((0, 0), (padding, padding), (padding, padding),
                          (0, 0)))
    if KH == 1 and KW == 1:
        patches = xb[:, ::stride, ::stride, :].reshape(N * OH * OW, Cin)
    else:
        cols = []
        for kh in range(KH):
            for kw in range(KW):
                cols.append(xb[:, kh:kh + (OH - 1) * stride + 1:stride,
                               kw:kw + (OW - 1) * stride + 1:stride, :])
        # patch ordering (kh, kw, cin) matches w.reshape(KH*KW*Cin, Cout)
        patches = jnp.stack(cols, axis=3).reshape(N * OH * OW, KH * KW * Cin)
    y = fused_matmul(patches, prep, residual=residual, relu=relu,
                     out_dtype=jnp.bfloat16)
    return y.reshape(N, OH, OW, Cout)


def basic_block(x, p, stride):
    n = x.shape[0]
    out1 = conv_bn(x, p['conv1'], stride, 1, relu=True)
    if 'down' in p:
        identity = conv_bn(x, p['down'], stride, 0, relu=False)
    else:
        identity = x
    _, oh, ow, cout = out1.shape
    res2d = identity.reshape(n * oh * ow, cout)
    # Residual add + final ReLU fused into the 2nd conv's matmul epilogue.
    return conv_bn(out1, p['conv2'], 1, 1, relu=True, residual=res2d)


def resnet18_forward(prepared, x_nchw):
    """CracksRecognitionModel.forward: resnet18 backbone + fc(512 -> 2)."""
    x = jnp.transpose(x_nchw, (0, 2, 3, 1)).astype(jnp.bfloat16)  # NCHW->NHWC
    x = conv_bn(x, prepared['conv1'], stride=2, padding=3, relu=True)
    x = maxpool_3x3_s2(x)
    for li, layer in enumerate(['layer1', 'layer2', 'layer3', 'layer4']):
        for bi, blk in enumerate(prepared[layer]):
            stride = 2 if (li > 0 and bi == 0) else 1
            x = basic_block(x, blk, stride)
    return gap_fc(x, prepared['fc'])                               # [N, 2] f32


# ----------------------------------------------------------------------------
# One-time parameter preparation (fold BN, reshape/pad/cast conv weights)
# ----------------------------------------------------------------------------
def prepare_params(params):
    def conv_prep(w, bn):
        gamma, beta, mean, var = bn
        scale = gamma * jax.lax.rsqrt(var + 1e-5)
        bias = beta - mean * scale
        KH, KW, Cin, Cout = w.shape
        prep = prepare_linear(w.reshape(KH * KW * Cin, Cout), scale, bias)
        prep['khkw'] = (KH, KW)
        return prep

    def block_prep(bp):
        out = {'conv1': conv_prep(bp['conv1_w'], bp['bn1']),
               'conv2': conv_prep(bp['conv2_w'], bp['bn2'])}
        if 'down_w' in bp:
            out['down'] = conv_prep(bp['down_w'], bp['down_bn'])
        return out

    fc_w = params['fc_w'].astype(jnp.float32)          # [512, 2]
    fc_b = params['fc_b'].astype(jnp.float32)          # [2]
    n_out = fc_w.shape[1]
    np_out = _round_up(n_out, 128)
    fc = {'w': jnp.pad(fc_w, ((0, 0), (0, np_out - n_out))),
          'b': jnp.pad(fc_b, (0, np_out - n_out)).reshape(1, np_out),
          'n': n_out}

    return {
        'conv1': conv_prep(params['conv1_w'], params['bn1']),
        'layer1': [block_prep(b) for b in params['layer1']],
        'layer2': [block_prep(b) for b in params['layer2']],
        'layer3': [block_prep(b) for b in params['layer3']],
        'layer4': [block_prep(b) for b in params['layer4']],
        'fc': fc,
    }


# ----------------------------------------------------------------------------
# Deterministic synthetic parameter initialization (resnet18 shapes)
# ----------------------------------------------------------------------------
def init_params(key):
    counter = [0]

    def nxt():
        counter[0] += 1
        return jax.random.fold_in(key, counter[0])

    def conv_w(kh, kw, cin, cout):
        fan_in = kh * kw * cin
        std = (2.0 / fan_in) ** 0.5
        return std * jax.random.normal(nxt(), (kh, kw, cin, cout), jnp.float32)

    def bn(c):
        gamma = 1.0 + 0.1 * jax.random.normal(nxt(), (c,), jnp.float32)
        beta = 0.1 * jax.random.normal(nxt(), (c,), jnp.float32)
        mean = 0.1 * jax.random.normal(nxt(), (c,), jnp.float32)
        var = 1.0 + 0.1 * jnp.abs(jax.random.normal(nxt(), (c,), jnp.float32))
        return (gamma, beta, mean, var)

    def block(cin, cout, downsample):
        p = {'conv1_w': conv_w(3, 3, cin, cout), 'bn1': bn(cout),
             'conv2_w': conv_w(3, 3, cout, cout), 'bn2': bn(cout)}
        if downsample:
            p['down_w'] = conv_w(1, 1, cin, cout)
            p['down_bn'] = bn(cout)
        return p

    bound = 1.0 / (512.0 ** 0.5)
    params = {
        'conv1_w': conv_w(7, 7, 3, 64),
        'bn1': bn(64),
        'layer1': [block(64, 64, False), block(64, 64, False)],
        'layer2': [block(64, 128, True), block(128, 128, False)],
        'layer3': [block(128, 256, True), block(256, 256, False)],
        'layer4': [block(256, 512, True), block(512, 512, False)],
        'fc_w': jax.random.uniform(nxt(), (512, 2), jnp.float32, -bound, bound),
        'fc_b': jax.random.uniform(nxt(), (2,), jnp.float32, -bound, bound),
    }
    return params


# ----------------------------------------------------------------------------
if __name__ == "__main__":
    key = jax.random.PRNGKey(0)
    params = init_params(key)
    prepared = prepare_params(params)      # one-time weight folding / padding

    # Small ImageNet-style input: batch=2, 3 channels, 32x32 spatial (NCHW).
    x = jax.random.normal(jax.random.fold_in(key, 12345), (2, 3, 32, 32),
                          jnp.float32)

    fwd = jax.jit(lambda xx: resnet18_forward(prepared, xx))
    out = jax.block_until_ready(fwd(x))
    assert out.shape == (2, 2) and out.dtype == jnp.float32
    print("KERNEL_OK")
</pallas_src>

<mosaic_0001>
module attributes {stable_mosaic.version = 11 : i64} {
  func.func @_fused_matmul_kernel(%arg0: i32, %arg1: i32, %arg2: memref<256x256xbf16, #tpu.memory_space<vmem>>, %arg3: memref<256x128xbf16, #tpu.memory_space<vmem>>, %arg4: memref<1x128xf32, #tpu.memory_space<vmem>>, %arg5: memref<256x128xbf16, #tpu.memory_space<vmem>>) attributes {dimension_semantics = [#tpu.dimension_semantics<parallel>, #tpu.dimension_semantics<parallel>], iteration_bounds = array<i64: 2, 1>, scalar_prefetch = 0 : i64, scratch_operands = 0 : i64, tpu.core_type = #tpu.core_type<tc>, window_params = [{transform_indices = @transform_0, window_bounds = array<i64: 256, 256>}, {transform_indices = @transform_1, window_bounds = array<i64: 256, 128>}, {transform_indices = @transform_2, window_bounds = array<i64: 1, 128>}, {transform_indices = @transform_3, window_bounds = array<i64: 256, 128>}]} {
    %c0 = arith.constant 0 : index
    %c0_0 = arith.constant 0 : index
    %0 = vector.load %arg2[%c0, %c0_0] : memref<256x256xbf16, #tpu.memory_space<vmem>>, vector<256x256xbf16>
    %c0_1 = arith.constant 0 : index
    %c0_2 = arith.constant 0 : index
    %1 = vector.load %arg3[%c0_1, %c0_2] : memref<256x128xbf16, #tpu.memory_space<vmem>>, vector<256x128xbf16>
    %cst = arith.constant dense<0.000000e+00> : vector<256x128xf32>
    %2 = tpu.matmul %0, %1, %cst {dimension_numbers = #tpu.dot_dimension_numbers<[1], [0], [0], [1], [0, 0, 1, 1], [], []>} : vector<256x256xbf16>, vector<256x128xbf16>, vector<256x128xf32> -> vector<256x128xf32>
    %c0_3 = arith.constant 0 : index
    %c0_4 = arith.constant 0 : index
    %3 = vector.load %arg4[%c0_3, %c0_4] : memref<1x128xf32, #tpu.memory_space<vmem>>, vector<1x128xf32>
    %4 = vector.broadcast %3 : vector<1x128xf32> to vector<256x128xf32>
    %5 = arith.addf %2, %4 : vector<256x128xf32>
    %cst_5 = arith.constant 0.000000e+00 : f32
    %6 = vector.broadcast %cst_5 : f32 to vector<256x128xf32>
    %7 = arith.maximumf %5, %6 : vector<256x128xf32>
    %8 = arith.truncf %7 : vector<256x128xf32> to vector<256x128xbf16>
    %c0_6 = arith.constant 0 : index
    %c0_7 = arith.constant 0 : index
    %9 = vector.load %arg5[%c0_6, %c0_7] : memref<256x128xbf16, #tpu.memory_space<vmem>>, vector<256x128xbf16>
    tpu.vector_store %arg5[%c0_6, %c0_7], %8 {strides = array<i32>} : memref<256x128xbf16, #tpu.memory_space<vmem>>, vector<256x128xbf16>,
    return
  }
  func.func @transform_0(%arg0: i32, %arg1: i32) -> (i32, i32) {
    %c0_i32 = arith.constant 0 : i32
    %c0_i32_0 = arith.constant 0 : i32
    return %arg0, %c0_i32 : i32, i32
  }
  func.func @transform_1(%arg0: i32, %arg1: i32) -> (i32, i32) {
    %c0_i32 = arith.constant 0 : i32
    %c0_i32_0 = arith.constant 0 : i32
    return %c0_i32, %arg1 : i32, i32
  }
  func.func @transform_2(%arg0: i32, %arg1: i32) -> (i32, i32) {
    %c0_i32 = arith.constant 0 : i32
    %c0_i32_0 = arith.constant 0 : i32
    return %c0_i32, %arg1 : i32, i32
  }
  func.func @transform_3(%arg0: i32, %arg1: i32) -> (i32, i32) {
    %c0_i32 = arith.constant 0 : i32
    return %arg0, %arg1 : i32, i32
  }
}

module attributes {stable_mosaic.version = 11 : i64} {
  func.func @_maxpool_kernel(%arg0: i32, %arg1: memref<9x64x128xbf16, #tpu.memory_space<vmem>>, %arg2: memref<64x128xbf16, #tpu.memory_space<vmem>>) attributes {dimension_semantics = [#tpu.dimension_semantics<parallel>], iteration_bounds = array<i64: 1>, scalar_prefetch = 0 : i64, scratch_operands = 0 : i64, tpu.core_type = #tpu.core_type<tc>, window_params = [{transform_indices = @transform_0, window_bounds = array<i64: 9, 64, 128>}, {transform_indices = @transform_1, window_bounds = array<i64: 64, 128>}]} {
    %c0 = arith.constant 0 : index
    %c0_0 = arith.constant 0 : index
    %c0_1 = arith.constant 0 : index
    %0 = vector.load %arg1[%c0, %c0_0, %c0_1] : memref<9x64x128xbf16, #tpu.memory_space<vmem>>, vector<1x64x128xbf16>
    %1 = vector.shape_cast %0 : vector<1x64x128xbf16> to vector<64x128xbf16>
    %c1 = arith.constant 1 : index
    %c0_2 = arith.constant 0 : index
    %c0_3 = arith.constant 0 : index
    %2 = vector.load %arg1[%c1, %c0_2, %c0_3] : memref<9x64x128xbf16, #tpu.memory_space<vmem>>, vector<1x64x128xbf16>
    %3 = vector.shape_cast %2 : vector<1x64x128xbf16> to vector<64x128xbf16>
    %4 = arith.maximumf %1, %3 : vector<64x128xbf16>
    %c2 = arith.constant 2 : index
    %c0_4 = arith.constant 0 : index
    %c0_5 = arith.constant 0 : index
    %5 = vector.load %arg1[%c2, %c0_4, %c0_5] : memref<9x64x128xbf16, #tpu.memory_space<vmem>>, vector<1x64x128xbf16>
    %6 = vector.shape_cast %5 : vector<1x64x128xbf16> to vector<64x128xbf16>
    %7 = arith.maximumf %4, %6 : vector<64x128xbf16>
    %c3 = arith.constant 3 : index
    %c0_6 = arith.constant 0 : index
    %c0_7 = arith.constant 0 : index
    %8 = vector.load %arg1[%c3, %c0_6, %c0_7] : memref<9x64x128xbf16, #tpu.memory_space<vmem>>, vector<1x64x128xbf16>
    %9 = vector.shape_cast %8 : vector<1x64x128xbf16> to vector<64x128xbf16>
    %10 = arith.maximumf %7, %9 : vector<64x128xbf16>
    %c4 = arith.constant 4 : index
    %c0_8 = arith.constant 0 : index
    %c0_9 = arith.constant 0 : index
    %11 = vector.load %arg1[%c4, %c0_8, %c0_9] : memref<9x64x128xbf16, #tpu.memory_space<vmem>>, vector<1x64x128xbf16>
    %12 = vector.shape_cast %11 : vector<1x64x128xbf16> to vector<64x128xbf16>
    %13 = arith.maximumf %10, %12 : vector<64x128xbf16>
    %c5 = arith.constant 5 : index
    %c0_10 = arith.constant 0 : index
    %c0_11 = arith.constant 0 : index
    %14 = vector.load %arg1[%c5, %c0_10, %c0_11] : memref<9x64x128xbf16, #tpu.memory_space<vmem>>, vector<1x64x128xbf16>
    %15 = vector.shape_cast %14 : vector<1x64x128xbf16> to vector<64x128xbf16>
    %16 = arith.maximumf %13, %15 : vector<64x128xbf16>
    %c6 = arith.constant 6 : index
    %c0_12 = arith.constant 0 : index
    %c0_13 = arith.constant 0 : index
    %17 = vector.load %arg1[%c6, %c0_12, %c0_13] : memref<9x64x128xbf16, #tpu.memory_space<vmem>>, vector<1x64x128xbf16>
    %18 = vector.shape_cast %17 : vector<1x64x128xbf16> to vector<64x128xbf16>
    %19 = arith.maximumf %16, %18 : vector<64x128xbf16>
    %c7 = arith.constant 7 : index
    %c0_14 = arith.constant 0 : index
    %c0_15 = arith.constant 0 : index
    %20 = vector.load %arg1[%c7, %c0_14, %c0_15] : memref<9x64x128xbf16, #tpu.memory_space<vmem>>, vector<1x64x128xbf16>
    %21 = vector.shape_cast %20 : vector<1x64x128xbf16> to vector<64x128xbf16>
    %22 = arith.maximumf %19, %21 : vector<64x128xbf16>
    %c8 = arith.constant 8 : index
    %c0_16 = arith.constant 0 : index
    %c0_17 = arith.constant 0 : index
    %23 = vector.load %arg1[%c8, %c0_16, %c0_17] : memref<9x64x128xbf16, #tpu.memory_space<vmem>>, vector<1x64x128xbf16>
    %24 = vector.shape_cast %23 : vector<1x64x128xbf16> to vector<64x128xbf16>
    %25 = arith.maximumf %22, %24 : vector<64x128xbf16>
    %c0_18 = arith.constant 0 : index
    %c0_19 = arith.constant 0 : index
    %26 = vector.load %arg2[%c0_18, %c0_19] : memref<64x128xbf16, #tpu.memory_space<vmem>>, vector<64x128xbf16>
    tpu.vector_store %arg2[%c0_18, %c0_19], %25 {strides = array<i32>} : memref<64x128xbf16, #tpu.memory_space<vmem>>, vector<64x128xbf16>,
    return
  }
  func.func @transform_0(%arg0: i32) -> (i32, i32, i32) {
    %c0_i32 = arith.constant 0 : i32
    %c0_i32_0 = arith.constant 0 : i32
    %c0_i32_1 = arith.constant 0 : i32
    return %c0_i32, %arg0, %c0_i32_0 : i32, i32, i32
  }
  func.func @transform_1(%arg0: i32) -> (i32, i32) {
    %c0_i32 = arith.constant 0 : i32
    %c0_i32_0 = arith.constant 0 : i32
    return %arg0, %c0_i32 : i32, i32
  }
}

module attributes {stable_mosaic.version = 11 : i64} {
  func.func @_fused_matmul_kernel(%arg0: i32, %arg1: i32, %arg2: memref<128x640xbf16, #tpu.memory_space<vmem>>, %arg3: memref<640x128xbf16, #tpu.memory_space<vmem>>, %arg4: memref<1x128xf32, #tpu.memory_space<vmem>>, %arg5: memref<128x128xbf16, #tpu.memory_space<vmem>>) attributes {dimension_semantics = [#tpu.dimension_semantics<parallel>, #tpu.dimension_semantics<parallel>], iteration_bounds = array<i64: 1, 1>, scalar_prefetch = 0 : i64, scratch_operands = 0 : i64, tpu.core_type = #tpu.core_type<tc>, window_params = [{transform_indices = @transform_0, window_bounds = array<i64: 128, 640>}, {transform_indices = @transform_1, window_bounds = array<i64: 640, 128>}, {transform_indices = @transform_2, window_bounds = array<i64: 1, 128>}, {transform_indices = @transform_3, window_bounds = array<i64: 128, 128>}]} {
    %c0 = arith.constant 0 : index
    %c0_0 = arith.constant 0 : index
    %0 = vector.load %arg2[%c0, %c0_0] : memref<128x640xbf16, #tpu.memory_space<vmem>>, vector<128x640xbf16>
    %c0_1 = arith.constant 0 : index
    %c0_2 = arith.constant 0 : index
    %1 = vector.load %arg3[%c0_1, %c0_2] : memref<640x128xbf16, #tpu.memory_space<vmem>>, vector<640x128xbf16>
    %cst = arith.constant dense<0.000000e+00> : vector<128x128xf32>
    %2 = tpu.matmul %0, %1, %cst {dimension_numbers = #tpu.dot_dimension_numbers<[1], [0], [0], [1], [0, 0, 1, 1], [], []>} : vector<128x640xbf16>, vector<640x128xbf16>, vector<128x128xf32> -> vector<128x128xf32>
    %c0_3 = arith.constant 0 : index
    %c0_4 = arith.constant 0 : index
    %3 = vector.load %arg4[%c0_3, %c0_4] : memref<1x128xf32, #tpu.memory_space<vmem>>, vector<1x128xf32>
    %4 = vector.broadcast %3 : vector<1x128xf32> to vector<128x128xf32>
    %5 = arith.addf %2, %4 : vector<128x128xf32>
    %cst_5 = arith.constant 0.000000e+00 : f32
    %6 = vector.broadcast %cst_5 : f32 to vector<128x128xf32>
    %7 = arith.maximumf %5, %6 : vector<128x128xf32>
    %8 = arith.truncf %7 : vector<128x128xf32> to vector<128x128xbf16>
    %c0_6 = arith.constant 0 : index
    %c0_7 = arith.constant 0 : index
    %9 = vector.load %arg5[%c0_6, %c0_7] : memref<128x128xbf16, #tpu.memory_space<vmem>>, vector<128x128xbf16>
    tpu.vector_store %arg5[%c0_6, %c0_7], %8 {strides = array<i32>} : memref<128x128xbf16, #tpu.memory_space<vmem>>, vector<128x128xbf16>,
    return
  }
  func.func @transform_0(%arg0: i32, %arg1: i32) -> (i32, i32) {
    %c0_i32 = arith.constant 0 : i32
    %c0_i32_0 = arith.constant 0 : i32
    return %arg0, %c0_i32 : i32, i32
  }
  func.func @transform_1(%arg0: i32, %arg1: i32) -> (i32, i32) {
    %c0_i32 = arith.constant 0 : i32
    %c0_i32_0 = arith.constant 0 : i32
    return %c0_i32, %arg1 : i32, i32
  }
  func.func @transform_2(%arg0: i32, %arg1: i32) -> (i32, i32) {
    %c0_i32 = arith.constant 0 : i32
    %c0_i32_0 = arith.constant 0 : i32
    return %c0_i32, %arg1 : i32, i32
  }
  func.func @transform_3(%arg0: i32, %arg1: i32) -> (i32, i32) {
    %c0_i32 = arith.constant 0 : i32
    return %arg0, %arg1 : i32, i32
  }
}

module attributes {stable_mosaic.version = 11 : i64} {
  func.func @_fused_matmul_kernel(%arg0: i32, %arg1: i32, %arg2: memref<128x640xbf16, #tpu.memory_space<vmem>>, %arg3: memref<640x128xbf16, #tpu.memory_space<vmem>>, %arg4: memref<1x128xf32, #tpu.memory_space<vmem>>, %arg5: memref<128x128xbf16, #tpu.memory_space<vmem>>, %arg6: memref<128x128xbf16, #tpu.memory_space<vmem>>) attributes {dimension_semantics = [#tpu.dimension_semantics<parallel>, #tpu.dimension_semantics<parallel>], iteration_bounds = array<i64: 1, 1>, scalar_prefetch = 0 : i64, scratch_operands = 0 : i64, tpu.core_type = #tpu.core_type<tc>, window_params = [{transform_indices = @transform_0, window_bounds = array<i64: 128, 640>}, {transform_indices = @transform_1, window_bounds = array<i64: 640, 128>}, {transform_indices = @transform_2, window_bounds = array<i64: 1, 128>}, {transform_indices = @transform_3, window_bounds = array<i64: 128, 128>}, {transform_indices = @transform_4, window_bounds = array<i64: 128, 128>}]} {
    %c0 = arith.constant 0 : index
    %c0_0 = arith.constant 0 : index
    %0 = vector.load %arg2[%c0, %c0_0] : memref<128x640xbf16, #tpu.memory_space<vmem>>, vector<128x640xbf16>
    %c0_1 = arith.constant 0 : index
    %c0_2 = arith.constant 0 : index
    %1 = vector.load %arg3[%c0_1, %c0_2] : memref<640x128xbf16, #tpu.memory_space<vmem>>, vector<640x128xbf16>
    %cst = arith.constant dense<0.000000e+00> : vector<128x128xf32>
    %2 = tpu.matmul %0, %1, %cst {dimension_numbers = #tpu.dot_dimension_numbers<[1], [0], [0], [1], [0, 0, 1, 1], [], []>} : vector<128x640xbf16>, vector<640x128xbf16>, vector<128x128xf32> -> vector<128x128xf32>
    %c0_3 = arith.constant 0 : index
    %c0_4 = arith.constant 0 : index
    %3 = vector.load %arg4[%c0_3, %c0_4] : memref<1x128xf32, #tpu.memory_space<vmem>>, vector<1x128xf32>
    %4 = vector.broadcast %3 : vector<1x128xf32> to vector<128x128xf32>
    %5 = arith.addf %2, %4 : vector<128x128xf32>
    %c0_5 = arith.constant 0 : index
    %c0_6 = arith.constant 0 : index
    %6 = vector.load %arg5[%c0_5, %c0_6] : memref<128x128xbf16, #tpu.memory_space<vmem>>, vector<128x128xbf16>
    %7 = arith.extf %6 : vector<128x128xbf16> to vector<128x128xf32>
    %8 = arith.addf %5, %7 : vector<128x128xf32>
    %cst_7 = arith.constant 0.000000e+00 : f32
    %9 = vector.broadcast %cst_7 : f32 to vector<128x128xf32>
    %10 = arith.maximumf %8, %9 : vector<128x128xf32>
    %11 = arith.truncf %10 : vector<128x128xf32> to vector<128x128xbf16>
    %c0_8 = arith.constant 0 : index
    %c0_9 = arith.constant 0 : index
    %12 = vector.load %arg6[%c0_8, %c0_9] : memref<128x128xbf16, #tpu.memory_space<vmem>>, vector<128x128xbf16>
    tpu.vector_store %arg6[%c0_8, %c0_9], %11 {strides = array<i32>} : memref<128x128xbf16, #tpu.memory_space<vmem>>, vector<128x128xbf16>,
    return
  }
  func.func @transform_0(%arg0: i32, %arg1: i32) -> (i32, i32) {
    %c0_i32 = arith.constant 0 : i32
    %c0_i32_0 = arith.constant 0 : i32
    return %arg0, %c0_i32 : i32, i32
  }
  func.func @transform_1(%arg0: i32, %arg1: i32) -> (i32, i32) {
    %c0_i32 = arith.constant 0 : i32
    %c0_i32_0 = arith.constant 0 : i32
    return %c0_i32, %arg1 : i32, i32
  }
  func.func @transform_2(%arg0: i32, %arg1: i32) -> (i32, i32) {
    %c0_i32 = arith.constant 0 : i32
    %c0_i32_0 = arith.constant 0 : i32
    return %c0_i32, %arg1 : i32, i32
  }
  func.func @transform_3(%arg0: i32, %arg1: i32) -> (i32, i32) {
    %c0_i32 = arith.constant 0 : i32
    return %arg0, %arg1 : i32, i32
  }
  func.func @transform_4(%arg0: i32, %arg1: i32) -> (i32, i32) {
    %c0_i32 = arith.constant 0 : i32
    return %arg0, %arg1 : i32, i32
  }
}

module attributes {stable_mosaic.version = 11 : i64} {
  func.func @_fused_matmul_kernel(%arg0: i32, %arg1: i32, %arg2: memref<32x640xbf16, #tpu.memory_space<vmem>>, %arg3: memref<640x128xbf16, #tpu.memory_space<vmem>>, %arg4: memref<1x128xf32, #tpu.memory_space<vmem>>, %arg5: memref<32x128xbf16, #tpu.memory_space<vmem>>) attributes {dimension_semantics = [#tpu.dimension_semantics<parallel>, #tpu.dimension_semantics<parallel>], iteration_bounds = array<i64: 1, 1>, scalar_prefetch = 0 : i64, scratch_operands = 0 : i64, tpu.core_type = #tpu.core_type<tc>, window_params = [{transform_indices = @transform_0, window_bounds = array<i64: 32, 640>}, {transform_indices = @transform_1, window_bounds = array<i64: 640, 128>}, {transform_indices = @transform_2, window_bounds = array<i64: 1, 128>}, {transform_indices = @transform_3, window_bounds = array<i64: 32, 128>}]} {
    %c0 = arith.constant 0 : index
    %c0_0 = arith.constant 0 : index
    %0 = vector.load %arg2[%c0, %c0_0] : memref<32x640xbf16, #tpu.memory_space<vmem>>, vector<32x640xbf16>
    %c0_1 = arith.constant 0 : index
    %c0_2 = arith.constant 0 : index
    %1 = vector.load %arg3[%c0_1, %c0_2] : memref<640x128xbf16, #tpu.memory_space<vmem>>, vector<640x128xbf16>
    %cst = arith.constant dense<0.000000e+00> : vector<32x128xf32>
    %2 = tpu.matmul %0, %1, %cst {dimension_numbers = #tpu.dot_dimension_numbers<[1], [0], [0], [1], [0, 0, 1, 1], [], []>} : vector<32x640xbf16>, vector<640x128xbf16>, vector<32x128xf32> -> vector<32x128xf32>
    %c0_3 = arith.constant 0 : index
    %c0_4 = arith.constant 0 : index
    %3 = vector.load %arg4[%c0_3, %c0_4] : memref<1x128xf32, #tpu.memory_space<vmem>>, vector<1x128xf32>
    %4 = vector.broadcast %3 : vector<1x128xf32> to vector<32x128xf32>
    %5 = arith.addf %2, %4 : vector<32x128xf32>
    %cst_5 = arith.constant 0.000000e+00 : f32
    %6 = vector.broadcast %cst_5 : f32 to vector<32x128xf32>
    %7 = arith.maximumf %5, %6 : vector<32x128xf32>
    %8 = arith.truncf %7 : vector<32x128xf32> to vector<32x128xbf16>
    %c0_6 = arith.constant 0 : index
    %c0_7 = arith.constant 0 : index
    %9 = vector.load %arg5[%c0_6, %c0_7] : memref<32x128xbf16, #tpu.memory_space<vmem>>, vector<32x128xbf16>
    tpu.vector_store %arg5[%c0_6, %c0_7], %8 {strides = array<i32>} : memref<32x128xbf16, #tpu.memory_space<vmem>>, vector<32x128xbf16>,
    return
  }
  func.func @transform_0(%arg0: i32, %arg1: i32) -> (i32, i32) {
    %c0_i32 = arith.constant 0 : i32
    %c0_i32_0 = arith.constant 0 : i32
    return %arg0, %c0_i32 : i32, i32
  }
  func.func @transform_1(%arg0: i32, %arg1: i32) -> (i32, i32) {
    %c0_i32 = arith.constant 0 : i32
    %c0_i32_0 = arith.constant 0 : i32
    return %c0_i32, %arg1 : i32, i32
  }
  func.func @transform_2(%arg0: i32, %arg1: i32) -> (i32, i32) {
    %c0_i32 = arith.constant 0 : i32
    %c0_i32_0 = arith.constant 0 : i32
    return %c0_i32, %arg1 : i32, i32
  }
  func.func @transform_3(%arg0: i32, %arg1: i32) -> (i32, i32) {
    %c0_i32 = arith.constant 0 : i32
    return %arg0, %arg1 : i32, i32
  }
}

module attributes {stable_mosaic.version = 11 : i64} {
  func.func @_fused_matmul_kernel(%arg0: i32, %arg1: i32, %arg2: memref<32x128xbf16, #tpu.memory_space<vmem>>, %arg3: memref<128x128xbf16, #tpu.memory_space<vmem>>, %arg4: memref<1x128xf32, #tpu.memory_space<vmem>>, %arg5: memref<32x128xbf16, #tpu.memory_space<vmem>>) attributes {dimension_semantics = [#tpu.dimension_semantics<parallel>, #tpu.dimension_semantics<parallel>], iteration_bounds = array<i64: 1, 1>, scalar_prefetch = 0 : i64, scratch_operands = 0 : i64, tpu.core_type = #tpu.core_type<tc>, window_params = [{transform_indices = @transform_0, window_bounds = array<i64: 32, 128>}, {transform_indices = @transform_1, window_bounds = array<i64: 128, 128>}, {transform_indices = @transform_2, window_bounds = array<i64: 1, 128>}, {transform_indices = @transform_3, window_bounds = array<i64: 32, 128>}]} {
    %c0 = arith.constant 0 : index
    %c0_0 = arith.constant 0 : index
    %0 = vector.load %arg2[%c0, %c0_0] : memref<32x128xbf16, #tpu.memory_space<vmem>>, vector<32x128xbf16>
    %c0_1 = arith.constant 0 : index
    %c0_2 = arith.constant 0 : index
    %1 = vector.load %arg3[%c0_1, %c0_2] : memref<128x128xbf16, #tpu.memory_space<vmem>>, vector<128x128xbf16>
    %cst = arith.constant dense<0.000000e+00> : vector<32x128xf32>
    %2 = tpu.matmul %0, %1, %cst {dimension_numbers = #tpu.dot_dimension_numbers<[1], [0], [0], [1], [0, 0, 1, 1], [], []>} : vector<32x128xbf16>, vector<128x128xbf16>, vector<32x128xf32> -> vector<32x128xf32>
    %c0_3 = arith.constant 0 : index
    %c0_4 = arith.constant 0 : index
    %3 = vector.load %arg4[%c0_3, %c0_4] : memref<1x128xf32, #tpu.memory_space<vmem>>, vector<1x128xf32>
    %4 = vector.broadcast %3 : vector<1x128xf32> to vector<32x128xf32>
    %5 = arith.addf %2, %4 : vector<32x128xf32>
    %6 = arith.truncf %5 : vector<32x128xf32> to vector<32x128xbf16>
    %c0_5 = arith.constant 0 : index
    %c0_6 = arith.constant 0 : index
    %7 = vector.load %arg5[%c0_5, %c0_6] : memref<32x128xbf16, #tpu.memory_space<vmem>>, vector<32x128xbf16>
    tpu.vector_store %arg5[%c0_5, %c0_6], %6 {strides = array<i32>} : memref<32x128xbf16, #tpu.memory_space<vmem>>, vector<32x128xbf16>,
    return
  }
  func.func @transform_0(%arg0: i32, %arg1: i32) -> (i32, i32) {
    %c0_i32 = arith.constant 0 : i32
    %c0_i32_0 = arith.constant 0 : i32
    return %arg0, %c0_i32 : i32, i32
  }
  func.func @transform_1(%arg0: i32, %arg1: i32) -> (i32, i32) {
    %c0_i32 = arith.constant 0 : i32
    %c0_i32_0 = arith.constant 0 : i32
    return %c0_i32, %arg1 : i32, i32
  }
  func.func @transform_2(%arg0: i32, %arg1: i32) -> (i32, i32) {
    %c0_i32 = arith.constant 0 : i32
    %c0_i32_0 = arith.constant 0 : i32
    return %c0_i32, %arg1 : i32, i32
  }
  func.func @transform_3(%arg0: i32, %arg1: i32) -> (i32, i32) {
    %c0_i32 = arith.constant 0 : i32
    return %arg0, %arg1 : i32, i32
  }
}

module attributes {stable_mosaic.version = 11 : i64} {
  func.func @_fused_matmul_kernel(%arg0: i32, %arg1: i32, %arg2: i32, %arg3: memref<32x384xbf16, #tpu.memory_space<vmem>>, %arg4: memref<384x128xbf16, #tpu.memory_space<vmem>>, %arg5: memref<1x128xf32, #tpu.memory_space<vmem>>, %arg6: memref<32x128xbf16, #tpu.memory_space<vmem>>, %arg7: memref<32x128xbf16, #tpu.memory_space<vmem>>, %arg8: memref<32x128xf32, #tpu.memory_space<vmem>>) attributes {dimension_semantics = [#tpu.dimension_semantics<parallel>, #tpu.dimension_semantics<parallel>, #tpu.dimension_semantics<arbitrary>], iteration_bounds = array<i64: 1, 1, 3>, scalar_prefetch = 0 : i64, scratch_operands = 1 : i64, tpu.core_type = #tpu.core_type<tc>, window_params = [{transform_indices = @transform_0, window_bounds = array<i64: 32, 384>}, {transform_indices = @transform_1, window_bounds = array<i64: 384, 128>}, {transform_indices = @transform_2, window_bounds = array<i64: 1, 128>}, {transform_indices = @transform_3, window_bounds = array<i64: 32, 128>}, {transform_indices = @transform_4, window_bounds = array<i64: 32, 128>}]} {
    %c0 = arith.constant 0 : index
    %c0_0 = arith.constant 0 : index
    %0 = vector.load %arg3[%c0, %c0_0] : memref<32x384xbf16, #tpu.memory_space<vmem>>, vector<32x384xbf16>
    %c0_1 = arith.constant 0 : index
    %c0_2 = arith.constant 0 : index
    %1 = vector.load %arg4[%c0_1, %c0_2] : memref<384x128xbf16, #tpu.memory_space<vmem>>, vector<384x128xbf16>
    %cst = arith.constant dense<0.000000e+00> : vector<32x128xf32>
    %2 = tpu.matmul %0, %1, %cst {dimension_numbers = #tpu.dot_dimension_numbers<[1], [0], [0], [1], [0, 0, 1, 1], [], []>} : vector<32x384xbf16>, vector<384x128xbf16>, vector<32x128xf32> -> vector<32x128xf32>
    %c0_i32 = arith.constant 0 : i32
    %3 = arith.cmpi eq, %arg2, %c0_i32 : i32
    %4 = arith.extui %3 : i1 to i32
    %c0_i32_3 = arith.constant 0 : i32
    %5 = arith.cmpi ne, %4, %c0_i32_3 : i32
    scf.if %5 {
      %c0_7 = arith.constant 0 : index
      %c0_8 = arith.constant 0 : index
      %12 = vector.load %arg8[%c0_7, %c0_8] : memref<32x128xf32, #tpu.memory_space<vmem>>, vector<32x128xf32>
      tpu.vector_store %arg8[%c0_7, %c0_8], %2 {strides = array<i32>} : memref<32x128xf32, #tpu.memory_space<vmem>>, vector<32x128xf32>,
    } else {
    }
    %c0_i32_4 = arith.constant 0 : i32
    %6 = arith.cmpi sgt, %arg2, %c0_i32_4 : i32
    %7 = arith.extui %6 : i1 to i32
    %c0_i32_5 = arith.constant 0 : i32
    %8 = arith.cmpi ne, %7, %c0_i32_5 : i32
    scf.if %8 {
      %c0_7 = arith.constant 0 : index
      %c0_8 = arith.constant 0 : index
      %12 = vector.load %arg8[%c0_7, %c0_8] : memref<32x128xf32, #tpu.memory_space<vmem>>, vector<32x128xf32>
      %13 = arith.addf %12, %2 : vector<32x128xf32>
      %c0_9 = arith.constant 0 : index
      %c0_10 = arith.constant 0 : index
      %14 = vector.load %arg8[%c0_9, %c0_10] : memref<32x128xf32, #tpu.memory_space<vmem>>, vector<32x128xf32>
      tpu.vector_store %arg8[%c0_9, %c0_10], %13 {strides = array<i32>} : memref<32x128xf32, #tpu.memory_space<vmem>>, vector<32x128xf32>,
    } else {
    }
    %c2_i32 = arith.constant 2 : i32
    %9 = arith.cmpi eq, %arg2, %c2_i32 : i32
    %10 = arith.extui %9 : i1 to i32
    %c0_i32_6 = arith.constant 0 : i32
    %11 = arith.cmpi ne, %10, %c0_i32_6 : i32
    scf.if %11 {
      %c0_7 = arith.constant 0 : index
      %c0_8 = arith.constant 0 : index
      %12 = vector.load %arg8[%c0_7, %c0_8] : memref<32x128xf32, #tpu.memory_space<vmem>>, vector<32x128xf32>
      %c0_9 = arith.constant 0 : index
      %c0_10 = arith.constant 0 : index
      %13 = vector.load %arg5[%c0_9, %c0_10] : memref<1x128xf32, #tpu.memory_space<vmem>>, vector<1x128xf32>
      %14 = vector.broadcast %13 : vector<1x128xf32> to vector<32x128xf32>
      %15 = arith.addf %12, %14 : vector<32x128xf32>
      %c0_11 = arith.constant 0 : index
      %c0_12 = arith.constant 0 : index
      %16 = vector.load %arg6[%c0_11, %c0_12] : memref<32x128xbf16, #tpu.memory_space<vmem>>, vector<32x128xbf16>
      %17 = arith.extf %16 : vector<32x128xbf16> to vector<32x128xf32>
      %18 = arith.addf %15, %17 : vector<32x128xf32>
      %cst_13 = arith.constant 0.000000e+00 : f32
      %19 = vector.broadcast %cst_13 : f32 to vector<32x128xf32>
      %20 = arith.maximumf %18, %19 : vector<32x128xf32>
      %21 = arith.truncf %20 : vector<32x128xf32> to vector<32x128xbf16>
      %c0_14 = arith.constant 0 : index
      %c0_15 = arith.constant 0 : index
      %22 = vector.load %arg7[%c0_14, %c0_15] : memref<32x128xbf16, #tpu.memory_space<vmem>>, vector<32x128xbf16>
      tpu.vector_store %arg7[%c0_14, %c0_15], %21 {strides = array<i32>} : memref<32x128xbf16, #tpu.memory_space<vmem>>, vector<32x128xbf16>,
    } else {
    }
    return
  }
  func.func @transform_0(%arg0: i32, %arg1: i32, %arg2: i32) -> (i32, i32) {
    %c0_i32 = arith.constant 0 : i32
    return %arg0, %arg2 : i32, i32
  }
  func.func @transform_1(%arg0: i32, %arg1: i32, %arg2: i32) -> (i32, i32) {
    %c0_i32 = arith.constant 0 : i32
    return %arg2, %arg1 : i32, i32
  }
  func.func @transform_2(%arg0: i32, %arg1: i32, %arg2: i32) -> (i32, i32) {
    %c0_i32 = arith.constant 0 : i32
    %c0_i32_0 = arith.constant 0 : i32
    return %c0_i32, %arg1 : i32, i32
  }
  func.func @transform_3(%arg0: i32, %arg1: i32, %arg2: i32) -> (i32, i32) {
    %c0_i32 = arith.constant 0 : i32
    return %arg0, %arg1 : i32, i32
  }
  func.func @transform_4(%arg0: i32, %arg1: i32, %arg2: i32) -> (i32, i32) {
    %c0_i32 = arith.constant 0 : i32
    return %arg0, %arg1 : i32, i32
  }
}

module attributes {stable_mosaic.version = 11 : i64} {
  func.func @_fused_matmul_kernel(%arg0: i32, %arg1: i32, %arg2: i32, %arg3: memref<32x384xbf16, #tpu.memory_space<vmem>>, %arg4: memref<384x128xbf16, #tpu.memory_space<vmem>>, %arg5: memref<1x128xf32, #tpu.memory_space<vmem>>, %arg6: memref<32x128xbf16, #tpu.memory_space<vmem>>, %arg7: memref<32x128xf32, #tpu.memory_space<vmem>>) attributes {dimension_semantics = [#tpu.dimension_semantics<parallel>, #tpu.dimension_semantics<parallel>, #tpu.dimension_semantics<arbitrary>], iteration_bounds = array<i64: 1, 1, 3>, scalar_prefetch = 0 : i64, scratch_operands = 1 : i64, tpu.core_type = #tpu.core_type<tc>, window_params = [{transform_indices = @transform_0, window_bounds = array<i64: 32, 384>}, {transform_indices = @transform_1, window_bounds = array<i64: 384, 128>}, {transform_indices = @transform_2, window_bounds = array<i64: 1, 128>}, {transform_indices = @transform_3, window_bounds = array<i64: 32, 128>}]} {
    %c0 = arith.constant 0 : index
    %c0_0 = arith.constant 0 : index
    %0 = vector.load %arg3[%c0, %c0_0] : memref<32x384xbf16, #tpu.memory_space<vmem>>, vector<32x384xbf16>
    %c0_1 = arith.constant 0 : index
    %c0_2 = arith.constant 0 : index
    %1 = vector.load %arg4[%c0_1, %c0_2] : memref<384x128xbf16, #tpu.memory_space<vmem>>, vector<384x128xbf16>
    %cst = arith.constant dense<0.000000e+00> : vector<32x128xf32>
    %2 = tpu.matmul %0, %1, %cst {dimension_numbers = #tpu.dot_dimension_numbers<[1], [0], [0], [1], [0, 0, 1, 1], [], []>} : vector<32x384xbf16>, vector<384x128xbf16>, vector<32x128xf32> -> vector<32x128xf32>
    %c0_i32 = arith.constant 0 : i32
    %3 = arith.cmpi eq, %arg2, %c0_i32 : i32
    %4 = arith.extui %3 : i1 to i32
    %c0_i32_3 = arith.constant 0 : i32
    %5 = arith.cmpi ne, %4, %c0_i32_3 : i32
    scf.if %5 {
      %c0_7 = arith.constant 0 : index
      %c0_8 = arith.constant 0 : index
      %12 = vector.load %arg7[%c0_7, %c0_8] : memref<32x128xf32, #tpu.memory_space<vmem>>, vector<32x128xf32>
      tpu.vector_store %arg7[%c0_7, %c0_8], %2 {strides = array<i32>} : memref<32x128xf32, #tpu.memory_space<vmem>>, vector<32x128xf32>,
    } else {
    }
    %c0_i32_4 = arith.constant 0 : i32
    %6 = arith.cmpi sgt, %arg2, %c0_i32_4 : i32
    %7 = arith.extui %6 : i1 to i32
    %c0_i32_5 = arith.constant 0 : i32
    %8 = arith.cmpi ne, %7, %c0_i32_5 : i32
    scf.if %8 {
      %c0_7 = arith.constant 0 : index
      %c0_8 = arith.constant 0 : index
      %12 = vector.load %arg7[%c0_7, %c0_8] : memref<32x128xf32, #tpu.memory_space<vmem>>, vector<32x128xf32>
      %13 = arith.addf %12, %2 : vector<32x128xf32>
      %c0_9 = arith.constant 0 : index
      %c0_10 = arith.constant 0 : index
      %14 = vector.load %arg7[%c0_9, %c0_10] : memref<32x128xf32, #tpu.memory_space<vmem>>, vector<32x128xf32>
      tpu.vector_store %arg7[%c0_9, %c0_10], %13 {strides = array<i32>} : memref<32x128xf32, #tpu.memory_space<vmem>>, vector<32x128xf32>,
    } else {
    }
    %c2_i32 = arith.constant 2 : i32
    %9 = arith.cmpi eq, %arg2, %c2_i32 : i32
    %10 = arith.extui %9 : i1 to i32
    %c0_i32_6 = arith.constant 0 : i32
    %11 = arith.cmpi ne, %10, %c0_i32_6 : i32
    scf.if %11 {
      %c0_7 = arith.constant 0 : index
      %c0_8 = arith.constant 0 : index
      %12 = vector.load %arg7[%c0_7, %c0_8] : memref<32x128xf32, #tpu.memory_space<vmem>>, vector<32x128xf32>
      %c0_9 = arith.constant 0 : index
      %c0_10 = arith.constant 0 : index
      %13 = vector.load %arg5[%c0_9, %c0_10] : memref<1x128xf32, #tpu.memory_space<vmem>>, vector<1x128xf32>
      %14 = vector.broadcast %13 : vector<1x128xf32> to vector<32x128xf32>
      %15 = arith.addf %12, %14 : vector<32x128xf32>
      %cst_11 = arith.constant 0.000000e+00 : f32
      %16 = vector.broadcast %cst_11 : f32 to vector<32x128xf32>
      %17 = arith.maximumf %15, %16 : vector<32x128xf32>
      %18 = arith.truncf %17 : vector<32x128xf32> to vector<32x128xbf16>
      %c0_12 = arith.constant 0 : index
      %c0_13 = arith.constant 0 : index
      %19 = vector.load %arg6[%c0_12, %c0_13] : memref<32x128xbf16, #tpu.memory_space<vmem>>, vector<32x128xbf16>
      tpu.vector_store %arg6[%c0_12, %c0_13], %18 {strides = array<i32>} : memref<32x128xbf16, #tpu.memory_space<vmem>>, vector<32x128xbf16>,
    } else {
    }
    return
  }
  func.func @transform_0(%arg0: i32, %arg1: i32, %arg2: i32) -> (i32, i32) {
    %c0_i32 = arith.constant 0 : i32
    return %arg0, %arg2 : i32, i32
  }
  func.func @transform_1(%arg0: i32, %arg1: i32, %arg2: i32) -> (i32, i32) {
    %c0_i32 = arith.constant 0 : i32
    return %arg2, %arg1 : i32, i32
  }
  func.func @transform_2(%arg0: i32, %arg1: i32, %arg2: i32) -> (i32, i32) {
    %c0_i32 = arith.constant 0 : i32
    %c0_i32_0 = arith.constant 0 : i32
    return %c0_i32, %arg1 : i32, i32
  }
  func.func @transform_3(%arg0: i32, %arg1: i32, %arg2: i32) -> (i32, i32) {
    %c0_i32 = arith.constant 0 : i32
    return %arg0, %arg1 : i32, i32
  }
}

module attributes {stable_mosaic.version = 11 : i64} {
  func.func @_fused_matmul_kernel(%arg0: i32, %arg1: i32, %arg2: i32, %arg3: memref<16x384xbf16, #tpu.memory_space<vmem>>, %arg4: memref<384x256xbf16, #tpu.memory_space<vmem>>, %arg5: memref<1x256xf32, #tpu.memory_space<vmem>>, %arg6: memref<16x256xbf16, #tpu.memory_space<vmem>>, %arg7: memref<16x256xf32, #tpu.memory_space<vmem>>) attributes {dimension_semantics = [#tpu.dimension_semantics<parallel>, #tpu.dimension_semantics<parallel>, #tpu.dimension_semantics<arbitrary>], iteration_bounds = array<i64: 1, 1, 3>, scalar_prefetch = 0 : i64, scratch_operands = 1 : i64, tpu.core_type = #tpu.core_type<tc>, window_params = [{transform_indices = @transform_0, window_bounds = array<i64: 16, 384>}, {transform_indices = @transform_1, window_bounds = array<i64: 384, 256>}, {transform_indices = @transform_2, window_bounds = array<i64: 1, 256>}, {transform_indices = @transform_3, window_bounds = array<i64: 16, 256>}]} {
    %c0 = arith.constant 0 : index
    %c0_0 = arith.constant 0 : index
    %0 = vector.load %arg3[%c0, %c0_0] : memref<16x384xbf16, #tpu.memory_space<vmem>>, vector<16x384xbf16>
    %c0_1 = arith.constant 0 : index
    %c0_2 = arith.constant 0 : index
    %1 = vector.load %arg4[%c0_1, %c0_2] : memref<384x256xbf16, #tpu.memory_space<vmem>>, vector<384x256xbf16>
    %cst = arith.constant dense<0.000000e+00> : vector<16x256xf32>
    %2 = tpu.matmul %0, %1, %cst {dimension_numbers = #tpu.dot_dimension_numbers<[1], [0], [0], [1], [0, 0, 1, 1], [], []>} : vector<16x384xbf16>, vector<384x256xbf16>, vector<16x256xf32> -> vector<16x256xf32>
    %c0_i32 = arith.constant 0 : i32
    %3 = arith.cmpi eq, %arg2, %c0_i32 : i32
    %4 = arith.extui %3 : i1 to i32
    %c0_i32_3 = arith.constant 0 : i32
    %5 = arith.cmpi ne, %4, %c0_i32_3 : i32
    scf.if %5 {
      %c0_7 = arith.constant 0 : index
      %c0_8 = arith.constant 0 : index
      %12 = vector.load %arg7[%c0_7, %c0_8] : memref<16x256xf32, #tpu.memory_space<vmem>>, vector<16x256xf32>
      tpu.vector_store %arg7[%c0_7, %c0_8], %2 {strides = array<i32>} : memref<16x256xf32, #tpu.memory_space<vmem>>, vector<16x256xf32>,
    } else {
    }
    %c0_i32_4 = arith.constant 0 : i32
    %6 = arith.cmpi sgt, %arg2, %c0_i32_4 : i32
    %7 = arith.extui %6 : i1 to i32
    %c0_i32_5 = arith.constant 0 : i32
    %8 = arith.cmpi ne, %7, %c0_i32_5 : i32
    scf.if %8 {
      %c0_7 = arith.constant 0 : index
      %c0_8 = arith.constant 0 : index
      %12 = vector.load %arg7[%c0_7, %c0_8] : memref<16x256xf32, #tpu.memory_space<vmem>>, vector<16x256xf32>
      %13 = arith.addf %12, %2 : vector<16x256xf32>
      %c0_9 = arith.constant 0 : index
      %c0_10 = arith.constant 0 : index
      %14 = vector.load %arg7[%c0_9, %c0_10] : memref<16x256xf32, #tpu.memory_space<vmem>>, vector<16x256xf32>
      tpu.vector_store %arg7[%c0_9, %c0_10], %13 {strides = array<i32>} : memref<16x256xf32, #tpu.memory_space<vmem>>, vector<16x256xf32>,
    } else {
    }
    %c2_i32 = arith.constant 2 : i32
    %9 = arith.cmpi eq, %arg2, %c2_i32 : i32
    %10 = arith.extui %9 : i1 to i32
    %c0_i32_6 = arith.constant 0 : i32
    %11 = arith.cmpi ne, %10, %c0_i32_6 : i32
    scf.if %11 {
      %c0_7 = arith.constant 0 : index
      %c0_8 = arith.constant 0 : index
      %12 = vector.load %arg7[%c0_7, %c0_8] : memref<16x256xf32, #tpu.memory_space<vmem>>, vector<16x256xf32>
      %c0_9 = arith.constant 0 : index
      %c0_10 = arith.constant 0 : index
      %13 = vector.load %arg5[%c0_9, %c0_10] : memref<1x256xf32, #tpu.memory_space<vmem>>, vector<1x256xf32>
      %14 = vector.broadcast %13 : vector<1x256xf32> to vector<16x256xf32>
      %15 = arith.addf %12, %14 : vector<16x256xf32>
      %cst_11 = arith.constant 0.000000e+00 : f32
      %16 = vector.broadcast %cst_11 : f32 to vector<16x256xf32>
      %17 = arith.maximumf %15, %16 : vector<16x256xf32>
      %18 = arith.truncf %17 : vector<16x256xf32> to vector<16x256xbf16>
      %c0_12 = arith.constant 0 : index
      %c0_13 = arith.constant 0 : index
      %19 = vector.load %arg6[%c0_12, %c0_13] : memref<16x256xbf16, #tpu.memory_space<vmem>>, vector<16x256xbf16>
      tpu.vector_store %arg6[%c0_12, %c0_13], %18 {strides = array<i32>} : memref<16x256xbf16, #tpu.memory_space<vmem>>, vector<16x256xbf16>,
    } else {
    }
    return
  }
  func.func @transform_0(%arg0: i32, %arg1: i32, %arg2: i32) -> (i32, i32) {
    %c0_i32 = arith.constant 0 : i32
    return %arg0, %arg2 : i32, i32
  }
  func.func @transform_1(%arg0: i32, %arg1: i32, %arg2: i32) -> (i32, i32) {
    %c0_i32 = arith.constant 0 : i32
    return %arg2, %arg1 : i32, i32
  }
  func.func @transform_2(%arg0: i32, %arg1: i32, %arg2: i32) -> (i32, i32) {
    %c0_i32 = arith.constant 0 : i32
    %c0_i32_0 = arith.constant 0 : i32
    return %c0_i32, %arg1 : i32, i32
  }
  func.func @transform_3(%arg0: i32, %arg1: i32, %arg2: i32) -> (i32, i32) {
    %c0_i32 = arith.constant 0 : i32
    return %arg0, %arg1 : i32, i32
  }
}

module attributes {stable_mosaic.version = 11 : i64} {
  func.func @_fused_matmul_kernel(%arg0: i32, %arg1: i32, %arg2: i32, %arg3: memref<16x768xbf16, #tpu.memory_space<vmem>>, %arg4: memref<768x256xbf16, #tpu.memory_space<vmem>>, %arg5: memref<1x256xf32, #tpu.memory_space<vmem>>, %arg6: memref<16x256xbf16, #tpu.memory_space<vmem>>, %arg7: memref<16x256xbf16, #tpu.memory_space<vmem>>, %arg8: memref<16x256xf32, #tpu.memory_space<vmem>>) attributes {dimension_semantics = [#tpu.dimension_semantics<parallel>, #tpu.dimension_semantics<parallel>, #tpu.dimension_semantics<arbitrary>], iteration_bounds = array<i64: 1, 1, 3>, scalar_prefetch = 0 : i64, scratch_operands = 1 : i64, tpu.core_type = #tpu.core_type<tc>, window_params = [{transform_indices = @transform_0, window_bounds = array<i64: 16, 768>}, {transform_indices = @transform_1, window_bounds = array<i64: 768, 256>}, {transform_indices = @transform_2, window_bounds = array<i64: 1, 256>}, {transform_indices = @transform_3, window_bounds = array<i64: 16, 256>}, {transform_indices = @transform_4, window_bounds = array<i64: 16, 256>}]} {
    %c0 = arith.constant 0 : index
    %c0_0 = arith.constant 0 : index
    %0 = vector.load %arg3[%c0, %c0_0] : memref<16x768xbf16, #tpu.memory_space<vmem>>, vector<16x768xbf16>
    %c0_1 = arith.constant 0 : index
    %c0_2 = arith.constant 0 : index
    %1 = vector.load %arg4[%c0_1, %c0_2] : memref<768x256xbf16, #tpu.memory_space<vmem>>, vector<768x256xbf16>
    %cst = arith.constant dense<0.000000e+00> : vector<16x256xf32>
    %2 = tpu.matmul %0, %1, %cst {dimension_numbers = #tpu.dot_dimension_numbers<[1], [0], [0], [1], [0, 0, 1, 1], [], []>} : vector<16x768xbf16>, vector<768x256xbf16>, vector<16x256xf32> -> vector<16x256xf32>
    %c0_i32 = arith.constant 0 : i32
    %3 = arith.cmpi eq, %arg2, %c0_i32 : i32
    %4 = arith.extui %3 : i1 to i32
    %c0_i32_3 = arith.constant 0 : i32
    %5 = arith.cmpi ne, %4, %c0_i32_3 : i32
    scf.if %5 {
      %c0_7 = arith.constant 0 : index
      %c0_8 = arith.constant 0 : index
      %12 = vector.load %arg8[%c0_7, %c0_8] : memref<16x256xf32, #tpu.memory_space<vmem>>, vector<16x256xf32>
      tpu.vector_store %arg8[%c0_7, %c0_8], %2 {strides = array<i32>} : memref<16x256xf32, #tpu.memory_space<vmem>>, vector<16x256xf32>,
    } else {
    }
    %c0_i32_4 = arith.constant 0 : i32
    %6 = arith.cmpi sgt, %arg2, %c0_i32_4 : i32
    %7 = arith.extui %6 : i1 to i32
    %c0_i32_5 = arith.constant 0 : i32
    %8 = arith.cmpi ne, %7, %c0_i32_5 : i32
    scf.if %8 {
      %c0_7 = arith.constant 0 : index
      %c0_8 = arith.constant 0 : index
      %12 = vector.load %arg8[%c0_7, %c0_8] : memref<16x256xf32, #tpu.memory_space<vmem>>, vector<16x256xf32>
      %13 = arith.addf %12, %2 : vector<16x256xf32>
      %c0_9 = arith.constant 0 : index
      %c0_10 = arith.constant 0 : index
      %14 = vector.load %arg8[%c0_9, %c0_10] : memref<16x256xf32, #tpu.memory_space<vmem>>, vector<16x256xf32>
      tpu.vector_store %arg8[%c0_9, %c0_10], %13 {strides = array<i32>} : memref<16x256xf32, #tpu.memory_space<vmem>>, vector<16x256xf32>,
    } else {
    }
    %c2_i32 = arith.constant 2 : i32
    %9 = arith.cmpi eq, %arg2, %c2_i32 : i32
    %10 = arith.extui %9 : i1 to i32
    %c0_i32_6 = arith.constant 0 : i32
    %11 = arith.cmpi ne, %10, %c0_i32_6 : i32
    scf.if %11 {
      %c0_7 = arith.constant 0 : index
      %c0_8 = arith.constant 0 : index
      %12 = vector.load %arg8[%c0_7, %c0_8] : memref<16x256xf32, #tpu.memory_space<vmem>>, vector<16x256xf32>
      %c0_9 = arith.constant 0 : index
      %c0_10 = arith.constant 0 : index
      %13 = vector.load %arg5[%c0_9, %c0_10] : memref<1x256xf32, #tpu.memory_space<vmem>>, vector<1x256xf32>
      %14 = vector.broadcast %13 : vector<1x256xf32> to vector<16x256xf32>
      %15 = arith.addf %12, %14 : vector<16x256xf32>
      %c0_11 = arith.constant 0 : index
      %c0_12 = arith.constant 0 : index
      %16 = vector.load %arg6[%c0_11, %c0_12] : memref<16x256xbf16, #tpu.memory_space<vmem>>, vector<16x256xbf16>
      %17 = arith.extf %16 : vector<16x256xbf16> to vector<16x256xf32>
      %18 = arith.addf %15, %17 : vector<16x256xf32>
      %cst_13 = arith.constant 0.000000e+00 : f32
      %19 = vector.broadcast %cst_13 : f32 to vector<16x256xf32>
      %20 = arith.maximumf %18, %19 : vector<16x256xf32>
      %21 = arith.truncf %20 : vector<16x256xf32> to vector<16x256xbf16>
      %c0_14 = arith.constant 0 : index
      %c0_15 = arith.constant 0 : index
      %22 = vector.load %arg7[%c0_14, %c0_15] : memref<16x256xbf16, #tpu.memory_space<vmem>>, vector<16x256xbf16>
      tpu.vector_store %arg7[%c0_14, %c0_15], %21 {strides = array<i32>} : memref<16x256xbf16, #tpu.memory_space<vmem>>, vector<16x256xbf16>,
    } else {
    }
    return
  }
  func.func @transform_0(%arg0: i32, %arg1: i32, %arg2: i32) -> (i32, i32) {
    %c0_i32 = arith.constant 0 : i32
    return %arg0, %arg2 : i32, i32
  }
  func.func @transform_1(%arg0: i32, %arg1: i32, %arg2: i32) -> (i32, i32) {
    %c0_i32 = arith.constant 0 : i32
    return %arg2, %arg1 : i32, i32
  }
  func.func @transform_2(%arg0: i32, %arg1: i32, %arg2: i32) -> (i32, i32) {
    %c0_i32 = arith.constant 0 : i32
    %c0_i32_0 = arith.constant 0 : i32
    return %c0_i32, %arg1 : i32, i32
  }
  func.func @transform_3(%arg0: i32, %arg1: i32, %arg2: i32) -> (i32, i32) {
    %c0_i32 = arith.constant 0 : i32
    return %arg0, %arg1 : i32, i32
  }
  func.func @transform_4(%arg0: i32, %arg1: i32, %arg2: i32) -> (i32, i32) {
    %c0_i32 = arith.constant 0 : i32
    return %arg0, %arg1 : i32, i32
  }
}

module attributes {stable_mosaic.version = 11 : i64} {
  func.func @_fused_matmul_kernel(%arg0: i32, %arg1: i32, %arg2: memref<16x128xbf16, #tpu.memory_space<vmem>>, %arg3: memref<128x256xbf16, #tpu.memory_space<vmem>>, %arg4: memref<1x256xf32, #tpu.memory_space<vmem>>, %arg5: memref<16x256xbf16, #tpu.memory_space<vmem>>) attributes {dimension_semantics = [#tpu.dimension_semantics<parallel>, #tpu.dimension_semantics<parallel>], iteration_bounds = array<i64: 1, 1>, scalar_prefetch = 0 : i64, scratch_operands = 0 : i64, tpu.core_type = #tpu.core_type<tc>, window_params = [{transform_indices = @transform_0, window_bounds = array<i64: 16, 128>}, {transform_indices = @transform_1, window_bounds = array<i64: 128, 256>}, {transform_indices = @transform_2, window_bounds = array<i64: 1, 256>}, {transform_indices = @transform_3, window_bounds = array<i64: 16, 256>}]} {
    %c0 = arith.constant 0 : index
    %c0_0 = arith.constant 0 : index
    %0 = vector.load %arg2[%c0, %c0_0] : memref<16x128xbf16, #tpu.memory_space<vmem>>, vector<16x128xbf16>
    %c0_1 = arith.constant 0 : index
    %c0_2 = arith.constant 0 : index
    %1 = vector.load %arg3[%c0_1, %c0_2] : memref<128x256xbf16, #tpu.memory_space<vmem>>, vector<128x256xbf16>
    %cst = arith.constant dense<0.000000e+00> : vector<16x256xf32>
    %2 = tpu.matmul %0, %1, %cst {dimension_numbers = #tpu.dot_dimension_numbers<[1], [0], [0], [1], [0, 0, 1, 1], [], []>} : vector<16x128xbf16>, vector<128x256xbf16>, vector<16x256xf32> -> vector<16x256xf32>
    %c0_3 = arith.constant 0 : index
    %c0_4 = arith.constant 0 : index
    %3 = vector.load %arg4[%c0_3, %c0_4] : memref<1x256xf32, #tpu.memory_space<vmem>>, vector<1x256xf32>
    %4 = vector.broadcast %3 : vector<1x256xf32> to vector<16x256xf32>
    %5 = arith.addf %2, %4 : vector<16x256xf32>
    %6 = arith.truncf %5 : vector<16x256xf32> to vector<16x256xbf16>
    %c0_5 = arith.constant 0 : index
    %c0_6 = arith.constant 0 : index
    %7 = vector.load %arg5[%c0_5, %c0_6] : memref<16x256xbf16, #tpu.memory_space<vmem>>, vector<16x256xbf16>
    tpu.vector_store %arg5[%c0_5, %c0_6], %6 {strides = array<i32>} : memref<16x256xbf16, #tpu.memory_space<vmem>>, vector<16x256xbf16>,
    return
  }
  func.func @transform_0(%arg0: i32, %arg1: i32) -> (i32, i32) {
    %c0_i32 = arith.constant 0 : i32
    %c0_i32_0 = arith.constant 0 : i32
    return %arg0, %c0_i32 : i32, i32
  }
  func.func @transform_1(%arg0: i32, %arg1: i32) -> (i32, i32) {
    %c0_i32 = arith.constant 0 : i32
    %c0_i32_0 = arith.constant 0 : i32
    return %c0_i32, %arg1 : i32, i32
  }
  func.func @transform_2(%arg0: i32, %arg1: i32) -> (i32, i32) {
    %c0_i32 = arith.constant 0 : i32
    %c0_i32_0 = arith.constant 0 : i32
    return %c0_i32, %arg1 : i32, i32
  }
  func.func @transform_3(%arg0: i32, %arg1: i32) -> (i32, i32) {
    %c0_i32 = arith.constant 0 : i32
    return %arg0, %arg1 : i32, i32
  }
}

module attributes {stable_mosaic.version = 11 : i64} {
  func.func @_fused_matmul_kernel(%arg0: i32, %arg1: i32, %arg2: i32, %arg3: memref<16x768xbf16, #tpu.memory_space<vmem>>, %arg4: memref<768x256xbf16, #tpu.memory_space<vmem>>, %arg5: memref<1x256xf32, #tpu.memory_space<vmem>>, %arg6: memref<16x256xbf16, #tpu.memory_space<vmem>>, %arg7: memref<16x256xf32, #tpu.memory_space<vmem>>) attributes {dimension_semantics = [#tpu.dimension_semantics<parallel>, #tpu.dimension_semantics<parallel>, #tpu.dimension_semantics<arbitrary>], iteration_bounds = array<i64: 1, 1, 3>, scalar_prefetch = 0 : i64, scratch_operands = 1 : i64, tpu.core_type = #tpu.core_type<tc>, window_params = [{transform_indices = @transform_0, window_bounds = array<i64: 16, 768>}, {transform_indices = @transform_1, window_bounds = array<i64: 768, 256>}, {transform_indices = @transform_2, window_bounds = array<i64: 1, 256>}, {transform_indices = @transform_3, window_bounds = array<i64: 16, 256>}]} {
    %c0 = arith.constant 0 : index
    %c0_0 = arith.constant 0 : index
    %0 = vector.load %arg3[%c0, %c0_0] : memref<16x768xbf16, #tpu.memory_space<vmem>>, vector<16x768xbf16>
    %c0_1 = arith.constant 0 : index
    %c0_2 = arith.constant 0 : index
    %1 = vector.load %arg4[%c0_1, %c0_2] : memref<768x256xbf16, #tpu.memory_space<vmem>>, vector<768x256xbf16>
    %cst = arith.constant dense<0.000000e+00> : vector<16x256xf32>
    %2 = tpu.matmul %0, %1, %cst {dimension_numbers = #tpu.dot_dimension_numbers<[1], [0], [0], [1], [0, 0, 1, 1], [], []>} : vector<16x768xbf16>, vector<768x256xbf16>, vector<16x256xf32> -> vector<16x256xf32>
    %c0_i32 = arith.constant 0 : i32
    %3 = arith.cmpi eq, %arg2, %c0_i32 : i32
    %4 = arith.extui %3 : i1 to i32
    %c0_i32_3 = arith.constant 0 : i32
    %5 = arith.cmpi ne, %4, %c0_i32_3 : i32
    scf.if %5 {
      %c0_7 = arith.constant 0 : index
      %c0_8 = arith.constant 0 : index
      %12 = vector.load %arg7[%c0_7, %c0_8] : memref<16x256xf32, #tpu.memory_space<vmem>>, vector<16x256xf32>
      tpu.vector_store %arg7[%c0_7, %c0_8], %2 {strides = array<i32>} : memref<16x256xf32, #tpu.memory_space<vmem>>, vector<16x256xf32>,
    } else {
    }
    %c0_i32_4 = arith.constant 0 : i32
    %6 = arith.cmpi sgt, %arg2, %c0_i32_4 : i32
    %7 = arith.extui %6 : i1 to i32
    %c0_i32_5 = arith.constant 0 : i32
    %8 = arith.cmpi ne, %7, %c0_i32_5 : i32
    scf.if %8 {
      %c0_7 = arith.constant 0 : index
      %c0_8 = arith.constant 0 : index
      %12 = vector.load %arg7[%c0_7, %c0_8] : memref<16x256xf32, #tpu.memory_space<vmem>>, vector<16x256xf32>
      %13 = arith.addf %12, %2 : vector<16x256xf32>
      %c0_9 = arith.constant 0 : index
      %c0_10 = arith.constant 0 : index
      %14 = vector.load %arg7[%c0_9, %c0_10] : memref<16x256xf32, #tpu.memory_space<vmem>>, vector<16x256xf32>
      tpu.vector_store %arg7[%c0_9, %c0_10], %13 {strides = array<i32>} : memref<16x256xf32, #tpu.memory_space<vmem>>, vector<16x256xf32>,
    } else {
    }
    %c2_i32 = arith.constant 2 : i32
    %9 = arith.cmpi eq, %arg2, %c2_i32 : i32
    %10 = arith.extui %9 : i1 to i32
    %c0_i32_6 = arith.constant 0 : i32
    %11 = arith.cmpi ne, %10, %c0_i32_6 : i32
    scf.if %11 {
      %c0_7 = arith.constant 0 : index
      %c0_8 = arith.constant 0 : index
      %12 = vector.load %arg7[%c0_7, %c0_8] : memref<16x256xf32, #tpu.memory_space<vmem>>, vector<16x256xf32>
      %c0_9 = arith.constant 0 : index
      %c0_10 = arith.constant 0 : index
      %13 = vector.load %arg5[%c0_9, %c0_10] : memref<1x256xf32, #tpu.memory_space<vmem>>, vector<1x256xf32>
      %14 = vector.broadcast %13 : vector<1x256xf32> to vector<16x256xf32>
      %15 = arith.addf %12, %14 : vector<16x256xf32>
      %cst_11 = arith.constant 0.000000e+00 : f32
      %16 = vector.broadcast %cst_11 : f32 to vector<16x256xf32>
      %17 = arith.maximumf %15, %16 : vector<16x256xf32>
      %18 = arith.truncf %17 : vector<16x256xf32> to vector<16x256xbf16>
      %c0_12 = arith.constant 0 : index
      %c0_13 = arith.constant 0 : index
      %19 = vector.load %arg6[%c0_12, %c0_13] : memref<16x256xbf16, #tpu.memory_space<vmem>>, vector<16x256xbf16>
      tpu.vector_store %arg6[%c0_12, %c0_13], %18 {strides = array<i32>} : memref<16x256xbf16, #tpu.memory_space<vmem>>, vector<16x256xbf16>,
    } else {
    }
    return
  }
  func.func @transform_0(%arg0: i32, %arg1: i32, %arg2: i32) -> (i32, i32) {
    %c0_i32 = arith.constant 0 : i32
    return %arg0, %arg2 : i32, i32
  }
  func.func @transform_1(%arg0: i32, %arg1: i32, %arg2: i32) -> (i32, i32) {
    %c0_i32 = arith.constant 0 : i32
    return %arg2, %arg1 : i32, i32
  }
  func.func @transform_2(%arg0: i32, %arg1: i32, %arg2: i32) -> (i32, i32) {
    %c0_i32 = arith.constant 0 : i32
    %c0_i32_0 = arith.constant 0 : i32
    return %c0_i32, %arg1 : i32, i32
  }
  func.func @transform_3(%arg0: i32, %arg1: i32, %arg2: i32) -> (i32, i32) {
    %c0_i32 = arith.constant 0 : i32
    return %arg0, %arg1 : i32, i32
  }
}

module attributes {stable_mosaic.version = 11 : i64} {
  func.func @_fused_matmul_kernel(%arg0: i32, %arg1: i32, %arg2: i32, %arg3: memref<16x768xbf16, #tpu.memory_space<vmem>>, %arg4: memref<768x256xbf16, #tpu.memory_space<vmem>>, %arg5: memref<1x256xf32, #tpu.memory_space<vmem>>, %arg6: memref<16x256xbf16, #tpu.memory_space<vmem>>, %arg7: memref<16x256xf32, #tpu.memory_space<vmem>>) attributes {dimension_semantics = [#tpu.dimension_semantics<parallel>, #tpu.dimension_semantics<parallel>, #tpu.dimension_semantics<arbitrary>], iteration_bounds = array<i64: 1, 2, 3>, scalar_prefetch = 0 : i64, scratch_operands = 1 : i64, tpu.core_type = #tpu.core_type<tc>, window_params = [{transform_indices = @transform_0, window_bounds = array<i64: 16, 768>}, {transform_indices = @transform_1, window_bounds = array<i64: 768, 256>}, {transform_indices = @transform_2, window_bounds = array<i64: 1, 256>}, {transform_indices = @transform_3, window_bounds = array<i64: 16, 256>}]} {
    %c0 = arith.constant 0 : index
    %c0_0 = arith.constant 0 : index
    %0 = vector.load %arg3[%c0, %c0_0] : memref<16x768xbf16, #tpu.memory_space<vmem>>, vector<16x768xbf16>
    %c0_1 = arith.constant 0 : index
    %c0_2 = arith.constant 0 : index
    %1 = vector.load %arg4[%c0_1, %c0_2] : memref<768x256xbf16, #tpu.memory_space<vmem>>, vector<768x256xbf16>
    %cst = arith.constant dense<0.000000e+00> : vector<16x256xf32>
    %2 = tpu.matmul %0, %1, %cst {dimension_numbers = #tpu.dot_dimension_numbers<[1], [0], [0], [1], [0, 0, 1, 1], [], []>} : vector<16x768xbf16>, vector<768x256xbf16>, vector<16x256xf32> -> vector<16x256xf32>
    %c0_i32 = arith.constant 0 : i32
    %3 = arith.cmpi eq, %arg2, %c0_i32 : i32
    %4 = arith.extui %3 : i1 to i32
    %c0_i32_3 = arith.constant 0 : i32
    %5 = arith.cmpi ne, %4, %c0_i32_3 : i32
    scf.if %5 {
      %c0_7 = arith.constant 0 : index
      %c0_8 = arith.constant 0 : index
      %12 = vector.load %arg7[%c0_7, %c0_8] : memref<16x256xf32, #tpu.memory_space<vmem>>, vector<16x256xf32>
      tpu.vector_store %arg7[%c0_7, %c0_8], %2 {strides = array<i32>} : memref<16x256xf32, #tpu.memory_space<vmem>>, vector<16x256xf32>,
    } else {
    }
    %c0_i32_4 = arith.constant 0 : i32
    %6 = arith.cmpi sgt, %arg2, %c0_i32_4 : i32
    %7 = arith.extui %6 : i1 to i32
    %c0_i32_5 = arith.constant 0 : i32
    %8 = arith.cmpi ne, %7, %c0_i32_5 : i32
    scf.if %8 {
      %c0_7 = arith.constant 0 : index
      %c0_8 = arith.constant 0 : index
      %12 = vector.load %arg7[%c0_7, %c0_8] : memref<16x256xf32, #tpu.memory_space<vmem>>, vector<16x256xf32>
      %13 = arith.addf %12, %2 : vector<16x256xf32>
      %c0_9 = arith.constant 0 : index
      %c0_10 = arith.constant 0 : index
      %14 = vector.load %arg7[%c0_9, %c0_10] : memref<16x256xf32, #tpu.memory_space<vmem>>, vector<16x256xf32>
      tpu.vector_store %arg7[%c0_9, %c0_10], %13 {strides = array<i32>} : memref<16x256xf32, #tpu.memory_space<vmem>>, vector<16x256xf32>,
    } else {
    }
    %c2_i32 = arith.constant 2 : i32
    %9 = arith.cmpi eq, %arg2, %c2_i32 : i32
    %10 = arith.extui %9 : i1 to i32
    %c0_i32_6 = arith.constant 0 : i32
    %11 = arith.cmpi ne, %10, %c0_i32_6 : i32
    scf.if %11 {
      %c0_7 = arith.constant 0 : index
      %c0_8 = arith.constant 0 : index
      %12 = vector.load %arg7[%c0_7, %c0_8] : memref<16x256xf32, #tpu.memory_space<vmem>>, vector<16x256xf32>
      %c0_9 = arith.constant 0 : index
      %c0_10 = arith.constant 0 : index
      %13 = vector.load %arg5[%c0_9, %c0_10] : memref<1x256xf32, #tpu.memory_space<vmem>>, vector<1x256xf32>
      %14 = vector.broadcast %13 : vector<1x256xf32> to vector<16x256xf32>
      %15 = arith.addf %12, %14 : vector<16x256xf32>
      %cst_11 = arith.constant 0.000000e+00 : f32
      %16 = vector.broadcast %cst_11 : f32 to vector<16x256xf32>
      %17 = arith.maximumf %15, %16 : vector<16x256xf32>
      %18 = arith.truncf %17 : vector<16x256xf32> to vector<16x256xbf16>
      %c0_12 = arith.constant 0 : index
      %c0_13 = arith.constant 0 : index
      %19 = vector.load %arg6[%c0_12, %c0_13] : memref<16x256xbf16, #tpu.memory_space<vmem>>, vector<16x256xbf16>
      tpu.vector_store %arg6[%c0_12, %c0_13], %18 {strides = array<i32>} : memref<16x256xbf16, #tpu.memory_space<vmem>>, vector<16x256xbf16>,
    } else {
    }
    return
  }
  func.func @transform_0(%arg0: i32, %arg1: i32, %arg2: i32) -> (i32, i32) {
    %c0_i32 = arith.constant 0 : i32
    return %arg0, %arg2 : i32, i32
  }
  func.func @transform_1(%arg0: i32, %arg1: i32, %arg2: i32) -> (i32, i32) {
    %c0_i32 = arith.constant 0 : i32
    return %arg2, %arg1 : i32, i32
  }
  func.func @transform_2(%arg0: i32, %arg1: i32, %arg2: i32) -> (i32, i32) {
    %c0_i32 = arith.constant 0 : i32
    %c0_i32_0 = arith.constant 0 : i32
    return %c0_i32, %arg1 : i32, i32
  }
  func.func @transform_3(%arg0: i32, %arg1: i32, %arg2: i32) -> (i32, i32) {
    %c0_i32 = arith.constant 0 : i32
    return %arg0, %arg1 : i32, i32
  }
}

module attributes {stable_mosaic.version = 11 : i64} {
  func.func @_fused_matmul_kernel(%arg0: i32, %arg1: i32, %arg2: memref<16x256xbf16, #tpu.memory_space<vmem>>, %arg3: memref<256x256xbf16, #tpu.memory_space<vmem>>, %arg4: memref<1x256xf32, #tpu.memory_space<vmem>>, %arg5: memref<16x256xbf16, #tpu.memory_space<vmem>>) attributes {dimension_semantics = [#tpu.dimension_semantics<parallel>, #tpu.dimension_semantics<parallel>], iteration_bounds = array<i64: 1, 2>, scalar_prefetch = 0 : i64, scratch_operands = 0 : i64, tpu.core_type = #tpu.core_type<tc>, window_params = [{transform_indices = @transform_0, window_bounds = array<i64: 16, 256>}, {transform_indices = @transform_1, window_bounds = array<i64: 256, 256>}, {transform_indices = @transform_2, window_bounds = array<i64: 1, 256>}, {transform_indices = @transform_3, window_bounds = array<i64: 16, 256>}]} {
    %c0 = arith.constant 0 : index
    %c0_0 = arith.constant 0 : index
    %0 = vector.load %arg2[%c0, %c0_0] : memref<16x256xbf16, #tpu.memory_space<vmem>>, vector<16x256xbf16>
    %c0_1 = arith.constant 0 : index
    %c0_2 = arith.constant 0 : index
    %1 = vector.load %arg3[%c0_1, %c0_2] : memref<256x256xbf16, #tpu.memory_space<vmem>>, vector<256x256xbf16>
    %cst = arith.constant dense<0.000000e+00> : vector<16x256xf32>
    %2 = tpu.matmul %0, %1, %cst {dimension_numbers = #tpu.dot_dimension_numbers<[1], [0], [0], [1], [0, 0, 1, 1], [], []>} : vector<16x256xbf16>, vector<256x256xbf16>, vector<16x256xf32> -> vector<16x256xf32>
    %c0_3 = arith.constant 0 : index
    %c0_4 = arith.constant 0 : index
    %3 = vector.load %arg4[%c0_3, %c0_4] : memref<1x256xf32, #tpu.memory_space<vmem>>, vector<1x256xf32>
    %4 = vector.broadcast %3 : vector<1x256xf32> to vector<16x256xf32>
    %5 = arith.addf %2, %4 : vector<16x256xf32>
    %6 = arith.truncf %5 : vector<16x256xf32> to vector<16x256xbf16>
    %c0_5 = arith.constant 0 : index
    %c0_6 = arith.constant 0 : index
    %7 = vector.load %arg5[%c0_5, %c0_6] : memref<16x256xbf16, #tpu.memory_space<vmem>>, vector<16x256xbf16>
    tpu.vector_store %arg5[%c0_5, %c0_6], %6 {strides = array<i32>} : memref<16x256xbf16, #tpu.memory_space<vmem>>, vector<16x256xbf16>,
    return
  }
  func.func @transform_0(%arg0: i32, %arg1: i32) -> (i32, i32) {
    %c0_i32 = arith.constant 0 : i32
    %c0_i32_0 = arith.constant 0 : i32
    return %arg0, %c0_i32 : i32, i32
  }
  func.func @transform_1(%arg0: i32, %arg1: i32) -> (i32, i32) {
    %c0_i32 = arith.constant 0 : i32
    %c0_i32_0 = arith.constant 0 : i32
    return %c0_i32, %arg1 : i32, i32
  }
  func.func @transform_2(%arg0: i32, %arg1: i32) -> (i32, i32) {
    %c0_i32 = arith.constant 0 : i32
    %c0_i32_0 = arith.constant 0 : i32
    return %c0_i32, %arg1 : i32, i32
  }
  func.func @transform_3(%arg0: i32, %arg1: i32) -> (i32, i32) {
    %c0_i32 = arith.constant 0 : i32
    return %arg0, %arg1 : i32, i32
  }
}

module attributes {stable_mosaic.version = 11 : i64} {
  func.func @_fused_matmul_kernel(%arg0: i32, %arg1: i32, %arg2: i32, %arg3: memref<16x768xbf16, #tpu.memory_space<vmem>>, %arg4: memref<768x256xbf16, #tpu.memory_space<vmem>>, %arg5: memref<1x256xf32, #tpu.memory_space<vmem>>, %arg6: memref<16x256xbf16, #tpu.memory_space<vmem>>, %arg7: memref<16x256xbf16, #tpu.memory_space<vmem>>, %arg8: memref<16x256xf32, #tpu.memory_space<vmem>>) attributes {dimension_semantics = [#tpu.dimension_semantics<parallel>, #tpu.dimension_semantics<parallel>, #tpu.dimension_semantics<arbitrary>], iteration_bounds = array<i64: 1, 2, 6>, scalar_prefetch = 0 : i64, scratch_operands = 1 : i64, tpu.core_type = #tpu.core_type<tc>, window_params = [{transform_indices = @transform_0, window_bounds = array<i64: 16, 768>}, {transform_indices = @transform_1, window_bounds = array<i64: 768, 256>}, {transform_indices = @transform_2, window_bounds = array<i64: 1, 256>}, {transform_indices = @transform_3, window_bounds = array<i64: 16, 256>}, {transform_indices = @transform_4, window_bounds = array<i64: 16, 256>}]} {
    %c0 = arith.constant 0 : index
    %c0_0 = arith.constant 0 : index
    %0 = vector.load %arg3[%c0, %c0_0] : memref<16x768xbf16, #tpu.memory_space<vmem>>, vector<16x768xbf16>
    %c0_1 = arith.constant 0 : index
    %c0_2 = arith.constant 0 : index
    %1 = vector.load %arg4[%c0_1, %c0_2] : memref<768x256xbf16, #tpu.memory_space<vmem>>, vector<768x256xbf16>
    %cst = arith.constant dense<0.000000e+00> : vector<16x256xf32>
    %2 = tpu.matmul %0, %1, %cst {dimension_numbers = #tpu.dot_dimension_numbers<[1], [0], [0], [1], [0, 0, 1, 1], [], []>} : vector<16x768xbf16>, vector<768x256xbf16>, vector<16x256xf32> -> vector<16x256xf32>
    %c0_i32 = arith.constant 0 : i32
    %3 = arith.cmpi eq, %arg2, %c0_i32 : i32
    %4 = arith.extui %3 : i1 to i32
    %c0_i32_3 = arith.constant 0 : i32
    %5 = arith.cmpi ne, %4, %c0_i32_3 : i32
    scf.if %5 {
      %c0_7 = arith.constant 0 : index
      %c0_8 = arith.constant 0 : index
      %12 = vector.load %arg8[%c0_7, %c0_8] : memref<16x256xf32, #tpu.memory_space<vmem>>, vector<16x256xf32>
      tpu.vector_store %arg8[%c0_7, %c0_8], %2 {strides = array<i32>} : memref<16x256xf32, #tpu.memory_space<vmem>>, vector<16x256xf32>,
    } else {
    }
    %c0_i32_4 = arith.constant 0 : i32
    %6 = arith.cmpi sgt, %arg2, %c0_i32_4 : i32
    %7 = arith.extui %6 : i1 to i32
    %c0_i32_5 = arith.constant 0 : i32
    %8 = arith.cmpi ne, %7, %c0_i32_5 : i32
    scf.if %8 {
      %c0_7 = arith.constant 0 : index
      %c0_8 = arith.constant 0 : index
      %12 = vector.load %arg8[%c0_7, %c0_8] : memref<16x256xf32, #tpu.memory_space<vmem>>, vector<16x256xf32>
      %13 = arith.addf %12, %2 : vector<16x256xf32>
      %c0_9 = arith.constant 0 : index
      %c0_10 = arith.constant 0 : index
      %14 = vector.load %arg8[%c0_9, %c0_10] : memref<16x256xf32, #tpu.memory_space<vmem>>, vector<16x256xf32>
      tpu.vector_store %arg8[%c0_9, %c0_10], %13 {strides = array<i32>} : memref<16x256xf32, #tpu.memory_space<vmem>>, vector<16x256xf32>,
    } else {
    }
    %c5_i32 = arith.constant 5 : i32
    %9 = arith.cmpi eq, %arg2, %c5_i32 : i32
    %10 = arith.extui %9 : i1 to i32
    %c0_i32_6 = arith.constant 0 : i32
    %11 = arith.cmpi ne, %10, %c0_i32_6 : i32
    scf.if %11 {
      %c0_7 = arith.constant 0 : index
      %c0_8 = arith.constant 0 : index
      %12 = vector.load %arg8[%c0_7, %c0_8] : memref<16x256xf32, #tpu.memory_space<vmem>>, vector<16x256xf32>
      %c0_9 = arith.constant 0 : index
      %c0_10 = arith.constant 0 : index
      %13 = vector.load %arg5[%c0_9, %c0_10] : memref<1x256xf32, #tpu.memory_space<vmem>>, vector<1x256xf32>
      %14 = vector.broadcast %13 : vector<1x256xf32> to vector<16x256xf32>
      %15 = arith.addf %12, %14 : vector<16x256xf32>
      %c0_11 = arith.constant 0 : index
      %c0_12 = arith.constant 0 : index
      %16 = vector.load %arg6[%c0_11, %c0_12] : memref<16x256xbf16, #tpu.memory_space<vmem>>, vector<16x256xbf16>
      %17 = arith.extf %16 : vector<16x256xbf16> to vector<16x256xf32>
      %18 = arith.addf %15, %17 : vector<16x256xf32>
      %cst_13 = arith.constant 0.000000e+00 : f32
      %19 = vector.broadcast %cst_13 : f32 to vector<16x256xf32>
      %20 = arith.maximumf %18, %19 : vector<16x256xf32>
      %21 = arith.truncf %20 : vector<16x256xf32> to vector<16x256xbf16>
      %c0_14 = arith.constant 0 : index
      %c0_15 = arith.constant 0 : index
      %22 = vector.load %arg7[%c0_14, %c0_15] : memref<16x256xbf16, #tpu.memory_space<vmem>>, vector<16x256xbf16>
      tpu.vector_store %arg7[%c0_14, %c0_15], %21 {strides = array<i32>} : memref<16x256xbf16, #tpu.memory_space<vmem>>, vector<16x256xbf16>,
    } else {
    }
    return
  }
  func.func @transform_0(%arg0: i32, %arg1: i32, %arg2: i32) -> (i32, i32) {
    %c0_i32 = arith.constant 0 : i32
    return %arg0, %arg2 : i32, i32
  }
  func.func @transform_1(%arg0: i32, %arg1: i32, %arg2: i32) -> (i32, i32) {
    %c0_i32 = arith.constant 0 : i32
    return %arg2, %arg1 : i32, i32
  }
  func.func @transform_2(%arg0: i32, %arg1: i32, %arg2: i32) -> (i32, i32) {
    %c0_i32 = arith.constant 0 : i32
    %c0_i32_0 = arith.constant 0 : i32
    return %c0_i32, %arg1 : i32, i32
  }
  func.func @transform_3(%arg0: i32, %arg1: i32, %arg2: i32) -> (i32, i32) {
    %c0_i32 = arith.constant 0 : i32
    return %arg0, %arg1 : i32, i32
  }
  func.func @transform_4(%arg0: i32, %arg1: i32, %arg2: i32) -> (i32, i32) {
    %c0_i32 = arith.constant 0 : i32
    return %arg0, %arg1 : i32, i32
  }
}

module attributes {stable_mosaic.version = 11 : i64} {
  func.func @_fused_matmul_kernel(%arg0: i32, %arg1: i32, %arg2: i32, %arg3: memref<16x768xbf16, #tpu.memory_space<vmem>>, %arg4: memref<768x256xbf16, #tpu.memory_space<vmem>>, %arg5: memref<1x256xf32, #tpu.memory_space<vmem>>, %arg6: memref<16x256xbf16, #tpu.memory_space<vmem>>, %arg7: memref<16x256xf32, #tpu.memory_space<vmem>>) attributes {dimension_semantics = [#tpu.dimension_semantics<parallel>, #tpu.dimension_semantics<parallel>, #tpu.dimension_semantics<arbitrary>], iteration_bounds = array<i64: 1, 2, 6>, scalar_prefetch = 0 : i64, scratch_operands = 1 : i64, tpu.core_type = #tpu.core_type<tc>, window_params = [{transform_indices = @transform_0, window_bounds = array<i64: 16, 768>}, {transform_indices = @transform_1, window_bounds = array<i64: 768, 256>}, {transform_indices = @transform_2, window_bounds = array<i64: 1, 256>}, {transform_indices = @transform_3, window_bounds = array<i64: 16, 256>}]} {
    %c0 = arith.constant 0 : index
    %c0_0 = arith.constant 0 : index
    %0 = vector.load %arg3[%c0, %c0_0] : memref<16x768xbf16, #tpu.memory_space<vmem>>, vector<16x768xbf16>
    %c0_1 = arith.constant 0 : index
    %c0_2 = arith.constant 0 : index
    %1 = vector.load %arg4[%c0_1, %c0_2] : memref<768x256xbf16, #tpu.memory_space<vmem>>, vector<768x256xbf16>
    %cst = arith.constant dense<0.000000e+00> : vector<16x256xf32>
    %2 = tpu.matmul %0, %1, %cst {dimension_numbers = #tpu.dot_dimension_numbers<[1], [0], [0], [1], [0, 0, 1, 1], [], []>} : vector<16x768xbf16>, vector<768x256xbf16>, vector<16x256xf32> -> vector<16x256xf32>
    %c0_i32 = arith.constant 0 : i32
    %3 = arith.cmpi eq, %arg2, %c0_i32 : i32
    %4 = arith.extui %3 : i1 to i32
    %c0_i32_3 = arith.constant 0 : i32
    %5 = arith.cmpi ne, %4, %c0_i32_3 : i32
    scf.if %5 {
      %c0_7 = arith.constant 0 : index
      %c0_8 = arith.constant 0 : index
      %12 = vector.load %arg7[%c0_7, %c0_8] : memref<16x256xf32, #tpu.memory_space<vmem>>, vector<16x256xf32>
      tpu.vector_store %arg7[%c0_7, %c0_8], %2 {strides = array<i32>} : memref<16x256xf32, #tpu.memory_space<vmem>>, vector<16x256xf32>,
    } else {
    }
    %c0_i32_4 = arith.constant 0 : i32
    %6 = arith.cmpi sgt, %arg2, %c0_i32_4 : i32
    %7 = arith.extui %6 : i1 to i32
    %c0_i32_5 = arith.constant 0 : i32
    %8 = arith.cmpi ne, %7, %c0_i32_5 : i32
    scf.if %8 {
      %c0_7 = arith.constant 0 : index
      %c0_8 = arith.constant 0 : index
      %12 = vector.load %arg7[%c0_7, %c0_8] : memref<16x256xf32, #tpu.memory_space<vmem>>, vector<16x256xf32>
      %13 = arith.addf %12, %2 : vector<16x256xf32>
      %c0_9 = arith.constant 0 : index
      %c0_10 = arith.constant 0 : index
      %14 = vector.load %arg7[%c0_9, %c0_10] : memref<16x256xf32, #tpu.memory_space<vmem>>, vector<16x256xf32>
      tpu.vector_store %arg7[%c0_9, %c0_10], %13 {strides = array<i32>} : memref<16x256xf32, #tpu.memory_space<vmem>>, vector<16x256xf32>,
    } else {
    }
    %c5_i32 = arith.constant 5 : i32
    %9 = arith.cmpi eq, %arg2, %c5_i32 : i32
    %10 = arith.extui %9 : i1 to i32
    %c0_i32_6 = arith.constant 0 : i32
    %11 = arith.cmpi ne, %10, %c0_i32_6 : i32
    scf.if %11 {
      %c0_7 = arith.constant 0 : index
      %c0_8 = arith.constant 0 : index
      %12 = vector.load %arg7[%c0_7, %c0_8] : memref<16x256xf32, #tpu.memory_space<vmem>>, vector<16x256xf32>
      %c0_9 = arith.constant 0 : index
      %c0_10 = arith.constant 0 : index
      %13 = vector.load %arg5[%c0_9, %c0_10] : memref<1x256xf32, #tpu.memory_space<vmem>>, vector<1x256xf32>
      %14 = vector.broadcast %13 : vector<1x256xf32> to vector<16x256xf32>
      %15 = arith.addf %12, %14 : vector<16x256xf32>
      %cst_11 = arith.constant 0.000000e+00 : f32
      %16 = vector.broadcast %cst_11 : f32 to vector<16x256xf32>
      %17 = arith.maximumf %15, %16 : vector<16x256xf32>
      %18 = arith.truncf %17 : vector<16x256xf32> to vector<16x256xbf16>
      %c0_12 = arith.constant 0 : index
      %c0_13 = arith.constant 0 : index
      %19 = vector.load %arg6[%c0_12, %c0_13] : memref<16x256xbf16, #tpu.memory_space<vmem>>, vector<16x256xbf16>
      tpu.vector_store %arg6[%c0_12, %c0_13], %18 {strides = array<i32>} : memref<16x256xbf16, #tpu.memory_space<vmem>>, vector<16x256xbf16>,
    } else {
    }
    return
  }
  func.func @transform_0(%arg0: i32, %arg1: i32, %arg2: i32) -> (i32, i32) {
    %c0_i32 = arith.constant 0 : i32
    return %arg0, %arg2 : i32, i32
  }
  func.func @transform_1(%arg0: i32, %arg1: i32, %arg2: i32) -> (i32, i32) {
    %c0_i32 = arith.constant 0 : i32
    return %arg2, %arg1 : i32, i32
  }
  func.func @transform_2(%arg0: i32, %arg1: i32, %arg2: i32) -> (i32, i32) {
    %c0_i32 = arith.constant 0 : i32
    %c0_i32_0 = arith.constant 0 : i32
    return %c0_i32, %arg1 : i32, i32
  }
  func.func @transform_3(%arg0: i32, %arg1: i32, %arg2: i32) -> (i32, i32) {
    %c0_i32 = arith.constant 0 : i32
    return %arg0, %arg1 : i32, i32
  }
}

module attributes {stable_mosaic.version = 11 : i64} {
  func.func @_gap_fc_kernel(%arg0: memref<2x1x512xbf16, #tpu.memory_space<vmem>>, %arg1: memref<512x128xf32, #tpu.memory_space<vmem>>, %arg2: memref<1x128xf32, #tpu.memory_space<vmem>>, %arg3: memref<2x128xf32, #tpu.memory_space<vmem>>) attributes {dimension_semantics = [], scalar_prefetch = 0 : i64, scratch_operands = 0 : i64, tpu.core_type = #tpu.core_type<tc>} {
    %c0 = arith.constant 0 : index
    %c0_0 = arith.constant 0 : index
    %c0_1 = arith.constant 0 : index
    %0 = vector.load %arg0[%c0, %c0_0, %c0_1] : memref<2x1x512xbf16, #tpu.memory_space<vmem>>, vector<2x1x512xbf16>
    %1 = arith.extf %0 : vector<2x1x512xbf16> to vector<2x1x512xf32>
    %cst = arith.constant dense<0.000000e+00> : vector<2x512xf32>
    %2 = vector.multi_reduction <add>, %1, %cst [1] : vector<2x1x512xf32> to vector<2x512xf32>
    %cst_2 = arith.constant 1.000000e+00 : f32
    %3 = vector.broadcast %cst_2 : f32 to vector<2x512xf32>
    %4 = arith.divf %2, %3 : vector<2x512xf32>
    %c0_3 = arith.constant 0 : index
    %c0_4 = arith.constant 0 : index
    %5 = vector.load %arg1[%c0_3, %c0_4] : memref<512x128xf32, #tpu.memory_space<vmem>>, vector<512x128xf32>
    %cst_5 = arith.constant dense<0.000000e+00> : vector<2x128xf32>
    %6 = tpu.matmul %4, %5, %cst_5 {dimension_numbers = #tpu.dot_dimension_numbers<[1], [0], [0], [1], [0, 0, 1, 1], [], []>} : vector<2x512xf32>, vector<512x128xf32>, vector<2x128xf32> -> vector<2x128xf32>
    %c0_6 = arith.constant 0 : index
    %c0_7 = arith.constant 0 : index
    %7 = vector.load %arg2[%c0_6, %c0_7] : memref<1x128xf32, #tpu.memory_space<vmem>>, vector<1x128xf32>
    %8 = vector.broadcast %7 : vector<1x128xf32> to vector<2x128xf32>
    %9 = arith.addf %6, %8 : vector<2x128xf32>
    %c0_8 = arith.constant 0 : index
    %c0_9 = arith.constant 0 : index
    %10 = vector.load %arg3[%c0_8, %c0_9] : memref<2x128xf32, #tpu.memory_space<vmem>>, vector<2x128xf32>
    tpu.vector_store %arg3[%c0_8, %c0_9], %9 {strides = array<i32>} : memref<2x128xf32, #tpu.memory_space<vmem>>, vector<2x128xf32>,
    return
  }
}

</mosaic_0001>

<bundles_post_ra>
// kernel: _lambda_.22
= control target key start
LH: loop header
LB: loop body
LE: loop exit
PB: predicated region body
PF: predicated region fallthrough
CT: control target
= control target key end

     0   :  { %s1494_s12 = smov 0   ;;  %s1496_s13 = smov 0   ;;  %s1668_s0 = inlined_call_operand.vmem [shape: bf16[512,256], index: 0, kind: input, shape index: {}]   ;;  %s1669_s1 = inlined_call_operand.vmem [shape: bf16[256,128], index: 1, kind: input, shape index: {}]   ;;  %s1670_s2 = inlined_call_operand.vmem [shape: f32[1,128], index: 2, kind: input, shape index: {}]   ;;  %s1671_s3 = inlined_call_operand.vmem [shape: bf16[512,128], index: 3, kind: output, shape index: {}]  }
   0x1   :  { %s1498_s14 = smov 0  }
   0x2 LB: > { %s25_s15 = sadd.s32 1, %s1468_s13  ;;  %p1017_p0 = scmp.ge.s32.totalorder %s1472_s14, 1  ;;  %s1472_s14 = sphi %s1498_s14, %s13_s14   ;;  %s1468_s13 = sphi %s1496_s13, %s1673_s13   ;;  %s1464_s12 = sphi %s1494_s12, %s1672_s12  }
   0x3   : > { %p27_p1 = scmp.ge.s32.totalorder %s25_s15, 2  ;;  %p170_p2 = scmp.lt.s32.totalorder %s1472_s14, 3 }
   0x5   : > { %s1675_s15 = smov (%p27_p1, %s25_s15), 0  ;;  %p171_p3 = pnand %p1017_p0, %p170_p2 }
   0x6   : > { %v1386_v0 = vld [vmem:[%s1669_s1 + $0x40] sm:$0xff] (!%p171_p3)   ;;  %s1018_s18 = sshll.u32 (!%p171_p3), %s1464_s12, 5  ;;  %v1388_v2 = vld [vmem:[%s1669_s1 + $0x48] sm:$0xff] (!%p171_p3)   ;;  %v1390_v4 = vld [vmem:[%s1669_s1 + $0x50] sm:$0xff] (!%p171_p3)  }
   0x7   : > { %174 = sbr.rel (%p171_p3) target bundleno = 320 (0x140), region = 32  ;;  %v1387_v1 = vld [vmem:[%s1669_s1] sm:$0xff] (!%p171_p3)   ;;  %1234 = vmatprep.subr.bf16.mxu0 (!%p171_p3), %v1386_v0  ;;  %1346 = vmatprep.subr.bf16.mxu1 (!%p171_p3), %v1386_v0  ;;  %v1389_v3 = vld [vmem:[%s1669_s1 + $0x8] sm:$0xff] (!%p171_p3)   ;;  %p206_p4 = scmp.lt.s32.totalorder (!%p171_p3), %s1018_s18, 63  ;;  %v1391_v5 = vld [vmem:[%s1669_s1 + $0x10] sm:$0xff] (!%p171_p3)  }
   0x8   : > { %1235 = vmatpush3.bf16.msra.mxu0 (!%p171_p3), %v1387_v1  ;;  %1354 = vmatpush3.bf16.msra.mxu1 (!%p171_p3), %v1387_v1  ;;  %v1392_v6 = vld [vmem:[%s1669_s1 + $0x58] sm:$0xff] (!%p171_p3)   ;;  %v1394_v8 = vld [vmem:[%s1669_s1 + $0x60] sm:$0xff] (!%p171_p3)   ;;  %v1396_v10 = vld [vmem:[%s1669_s1 + $0x68] sm:$0xff] (!%p171_p3)  }
   0x9   : > { %1236 = vmatprep.subr.bf16.mxu0 (!%p171_p3), %v1388_v2  ;;  %1347 = vmatprep.subr.bf16.mxu1 (!%p171_p3), %v1388_v2  ;;  %v1393_v7 = vld [vmem:[%s1669_s1 + $0x18] sm:$0xff] (!%p171_p3)   ;;  %v1395_v9 = vld [vmem:[%s1669_s1 + $0x20] sm:$0xff] (!%p171_p3)   ;;  %v1397_v13 = vld [vmem:[%s1669_s1 + $0x28] sm:$0xff] (!%p171_p3)  }
   0xa   : > { %v1398_v14 = vld [vmem:[%s1669_s1 + $0x70] sm:$0xff] (!%p171_p3)   ;;  %v1400_v16 = vld [vmem:[%s1669_s1 + $0x78] sm:$0xff] (!%p171_p3)   ;;  %v1603_v50 = vld [vmem:[%s1670_s2] ss:$0 sm:$0xff] (!%p171_p3) }
   0xb   : > { %v1399_v15 = vld [vmem:[%s1669_s1 + $0x30] sm:$0xff] (!%p171_p3)   ;;  %v1401_v17 = vld [vmem:[%s1669_s1 + $0x38] sm:$0xff] (!%p171_p3)  }
   0xc   : > { %1237 = vmatpush3.bf16.msra.mxu0 (!%p171_p3), %v1389_v3  ;;  %1355 = vmatpush3.bf16.msra.mxu1 (!%p171_p3), %v1389_v3 }
   0xd   : > { %1238 = vmatprep.subr.bf16.mxu0 (!%p171_p3), %v1390_v4  ;;  %1348 = vmatprep.subr.bf16.mxu1 (!%p171_p3), %v1390_v4 }
   0xe   : > { %s1677_s18 = smov (!%p206_p4, %s1018_s18), 63 }
   0xf   : > { %s1106_s6 = sshll.u32 %s1677_s18, 3  ;;  %s1022_s5 = sshll.u32 %s1677_s18, 2 }
  0x10   : > { %1239 = vmatpush3.bf16.msra.mxu0 %v1391_v5  ;;  %1356 = vmatpush3.bf16.msra.mxu1 %v1391_v5  ;;  %s1545_s11 = scalar_lea.vmem %s1668_s0, %s1106_s6  ;;  %s1613_s8 = scalar_lea.vmem %s1671_s3, %s1022_s5 }
  0x11   : > { %1240 = vmatprep.subr.bf16.mxu0 %v1392_v6  ;;  %1349 = vmatprep.subr.bf16.mxu1 %v1392_v6  ;;  %v1404_v11 = vld [vmem:[%s1545_s11 + $0x4] ss:$8 sps:$4 sm:$0xff]   ;;  %v1402_v18 = vld [vmem:[%s1545_s11] ss:$8 sps:$4 sm:$0xff]   ;;  %v1408_v20 = vld [vmem:[%s1545_s11 + $0x14] ss:$8 sps:$4 sm:$0xff]  }
  0x12   : > { %v1407_v12 = vld [vmem:[%s1545_s11 + $0x84] ss:$8 sps:$4 sm:$0xff]   ;;  %588 = vmatprep.mubr.bf16.mxu0 %v1404_v11  ;;  %v1405_v19 = vld [vmem:[%s1545_s11 + $0x80] ss:$8 sps:$4 sm:$0xff]   ;;  %v1410_v21 = vld [vmem:[%s1545_s11 + $0x94] ss:$8 sps:$4 sm:$0xff]  }
  0x13   : > { %652 = vmatprep.mubr.bf16.mxu1 %v1407_v12  ;;  %v1412_v22 = vld [vmem:[%s1545_s11 + $0x10] ss:$8 sps:$4 sm:$0xff]   ;;  %v1414_v24 = vld [vmem:[%s1545_s11 + $0x24] ss:$8 sps:$4 sm:$0xff]   ;;  %v1418_v26 = vld [vmem:[%s1545_s11 + $0x20] ss:$8 sps:$4 sm:$0xff]  }
  0x14   : > { %1241 = vmatpush3.bf16.msra.mxu0 %v1393_v7  ;;  %1357 = vmatpush3.bf16.msra.mxu1 %v1393_v7  ;;  %v1413_v23 = vld [vmem:[%s1545_s11 + $0x90] ss:$8 sps:$4 sm:$0xff]   ;;  %v1416_v25 = vld [vmem:[%s1545_s11 + $0xa4] ss:$8 sps:$4 sm:$0xff]   ;;  %v1419_v27 = vld [vmem:[%s1545_s11 + $0xa0] ss:$8 sps:$4 sm:$0xff]  }
  0x15   : > { %1242 = vmatprep.subr.bf16.mxu0 %v1394_v8  ;;  %1350 = vmatprep.subr.bf16.mxu1 %v1394_v8  ;;  %v1420_v28 = vld [vmem:[%s1545_s11 + $0x34] ss:$8 sps:$4 sm:$0xff]   ;;  %v1424_v30 = vld [vmem:[%s1545_s11 + $0x30] ss:$8 sps:$4 sm:$0xff]   ;;  %v1426_v32 = vld [vmem:[%s1545_s11 + $0x44] ss:$8 sps:$4 sm:$0xff]  }
  0x16   : > { %v1422_v29 = vld [vmem:[%s1545_s11 + $0xb4] ss:$8 sps:$4 sm:$0xff]   ;;  %v1425_v31 = vld [vmem:[%s1545_s11 + $0xb0] ss:$8 sps:$4 sm:$0xff]   ;;  %v1428_v33 = vld [vmem:[%s1545_s11 + $0xc4] ss:$8 sps:$4 sm:$0xff]  }
  0x17   : > { %v1430_v34 = vld [vmem:[%s1545_s11 + $0x40] ss:$8 sps:$4 sm:$0xff]   ;;  %v1432_v36 = vld [vmem:[%s1545_s11 + $0x54] ss:$8 sps:$4 sm:$0xff]   ;;  %v1436_v38 = vld [vmem:[%s1545_s11 + $0x50] ss:$8 sps:$4 sm:$0xff]  }
  0x18   : > { %1243 = vmatpush3.bf16.msra.mxu0 %v1395_v9  ;;  %1358 = vmatpush3.bf16.msra.mxu1 %v1395_v9  ;;  %v1431_v35 = vld [vmem:[%s1545_s11 + $0xc0] ss:$8 sps:$4 sm:$0xff]   ;;  %v1434_v37 = vld [vmem:[%s1545_s11 + $0xd4] ss:$8 sps:$4 sm:$0xff]   ;;  %v1437_v39 = vld [vmem:[%s1545_s11 + $0xd0] ss:$8 sps:$4 sm:$0xff]  }
  0x19   : > { %1244 = vmatprep.subr.bf16.mxu0 %v1396_v10  ;;  %1351 = vmatprep.subr.bf16.mxu1 %v1396_v10  ;;  %v1438_v40 = vld [vmem:[%s1545_s11 + $0x64] ss:$8 sps:$4 sm:$0xff]   ;;  %v1442_v42 = vld [vmem:[%s1545_s11 + $0x60] ss:$8 sps:$4 sm:$0xff]   ;;  %v1444_v44 = vld [vmem:[%s1545_s11 + $0x74] ss:$8 sps:$4 sm:$0xff]  }
  0x1a   : > { %v1440_v41 = vld [vmem:[%s1545_s11 + $0xe4] ss:$8 sps:$4 sm:$0xff]   ;;  %v1443_v43 = vld [vmem:[%s1545_s11 + $0xe0] ss:$8 sps:$4 sm:$0xff]   ;;  %v1446_v45 = vld [vmem:[%s1545_s11 + $0xf4] ss:$8 sps:$4 sm:$0xff]  }
  0x1b   : > { %v1448_v46 = vld [vmem:[%s1545_s11 + $0x70] ss:$8 sps:$4 sm:$0xff]  }
  0x1c   : > { %1245 = vmatpush3.bf16.msra.mxu0 %v1397_v13  ;;  %1359 = vmatpush3.bf16.msra.mxu1 %v1397_v13  ;;  %v1449_v47 = vld [vmem:[%s1545_s11 + $0xf0] ss:$8 sps:$4 sm:$0xff]  }
  0x1d   : > { %1246 = vmatprep.subr.bf16.mxu0 %v1398_v14  ;;  %1352 = vmatprep.subr.bf16.mxu1 %v1398_v14 }
  0x20   : > { %1247 = vmatpush3.bf16.msra.mxu0 %v1399_v15  ;;  %1360 = vmatpush3.bf16.msra.mxu1 %v1399_v15 }
  0x21   : > { %1248 = vmatprep.subr.bf16.mxu0 %v1400_v16  ;;  %1353 = vmatprep.subr.bf16.mxu1 %v1400_v16 }
  0x24   : > { %1249 = vmatpush3.bf16.msra.mxu0 %v1401_v17  ;;  %1361 = vmatpush3.bf16.msra.mxu1 %v1401_v17 }
  0x27   : > { %589 = vmatmul.mubr.bf16.vlgmr.msra.gmra.mrb[0].mxu0 %v1402_v18  ;;  %653 = vmatmul.mubr.bf16.vlgmr.msra.gmra.mrb[0].mxu1 %v1405_v19 }
  0x28   : > { %596 = vmatprep.mubr.bf16.mxu0 %v1408_v20  ;;  %660 = vmatprep.mubr.bf16.mxu1 %v1410_v21 }
  0x2f   : > { %597 = vmatmul.mubr.bf16.gmra.mrb[4].mxu0 %v1412_v22  ;;  %661 = vmatmul.mubr.bf16.gmra.mrb[4].mxu1 %v1413_v23 }
  0x30   : > { %604 = vmatprep.mubr.bf16.mxu0 %v1414_v24  ;;  %668 = vmatprep.mubr.bf16.mxu1 %v1416_v25 }
  0x37   : > { %605 = vmatmul.mubr.bf16.gmra.mrb[8].mxu0 %v1418_v26  ;;  %669 = vmatmul.mubr.bf16.gmra.mrb[8].mxu1 %v1419_v27 }
  0x38   : > { %612 = vmatprep.mubr.bf16.mxu0 %v1420_v28  ;;  %676 = vmatprep.mubr.bf16.mxu1 %v1422_v29 }
  0x3f   : > { %613 = vmatmul.mubr.bf16.gmra.mrb[12].mxu0 %v1424_v30  ;;  %677 = vmatmul.mubr.bf16.gmra.mrb[12].mxu1 %v1425_v31 }
  0x40   : > { %620 = vmatprep.mubr.bf16.mxu0 %v1426_v32  ;;  %684 = vmatprep.mubr.bf16.mxu1 %v1428_v33 }
  0x47   : > { %621 = vmatmul.mubr.bf16.gmra.mrb[16].mxu0 %v1430_v34  ;;  %685 = vmatmul.mubr.bf16.gmra.mrb[16].mxu1 %v1431_v35 }
  0x48   : > { %628 = vmatprep.mubr.bf16.mxu0 %v1432_v36  ;;  %692 = vmatprep.mubr.bf16.mxu1 %v1434_v37 }
  0x4f   : > { %629 = vmatmul.mubr.bf16.gmra.mrb[20].mxu0 %v1436_v38  ;;  %693 = vmatmul.mubr.bf16.gmra.mrb[20].mxu1 %v1437_v39 }
  0x50   : > { %636 = vmatprep.mubr.bf16.mxu0 %v1438_v40  ;;  %700 = vmatprep.mubr.bf16.mxu1 %v1440_v41 }
  0x57   : > { %637 = vmatmul.mubr.bf16.gmra.mrb[24].mxu0 %v1442_v42  ;;  %701 = vmatmul.mubr.bf16.gmra.mrb[24].mxu1 %v1443_v43 }
  0x58   : > { %644 = vmatprep.mubr.bf16.mxu0 %v1444_v44  ;;  %708 = vmatprep.mubr.bf16.mxu1 %v1446_v45 }
  0x5f   : > { %645 = vmatmul.mubr.bf16.gmra.mrb[28].mxu0 %v1448_v46  ;;  %709 = vmatmul.mubr.bf16.gmra.mrb[28].mxu1 %v1449_v47 }
  0xfa   : > { %v1250_v48 = vpop.f32.mrb[0].mxu0  ;;  %v1298_v49 = vpop.f32.mrb[0].mxu1 }
  0xfb   : > { %v1251_v51 = vpop.f32.mrb[1].mxu0  ;;  %v1299_v52 = vpop.f32.mrb[1].mxu1 }
  0xfc   : > { %v1252_v53 = vadd.f32 %v1251_v51, %v1250_v48  ;;  %v1300_v54 = vadd.f32 %v1299_v52, %v1298_v49  ;;  %v1253_v55 = vpop.f32.mrb[2].mxu0  ;;  %v1301_v56 = vpop.f32.mrb[2].mxu1 }
  0xfd   : > { %v1254_v57 = vpop.f32.mrb[3].mxu0  ;;  %v1302_v58 = vpop.f32.mrb[3].mxu1 }
  0xfe   : > { %v591_v59 = vadd.f32 %v1252_v53, %v1603_v50  ;;  %v655_v60 = vadd.f32 %v1300_v54, %v1603_v50  ;;  %v1255_v61 = vadd.f32 %v1254_v57, %v1253_v55  ;;  %v1303_v62 = vadd.f32 %v1302_v58, %v1301_v56 }
 0x100   : > { %v594_v63 = vadd.f32 %v1255_v61, %v1603_v50  ;;  %v658_v0 = vadd.f32 %v1303_v62, %v1603_v50  ;;  %v717_v1 = vmax.f32 %v591_v59, 0.0  ;;  %v733_v2 = vmax.f32 %v655_v60, 0.0 }
 0x102   : > { %v718_v3 = vmax.f32 %v594_v63, 0.0  ;;  %v734_v4 = vmax.f32 %v658_v0, 0.0  ;;  %v1256_v5 = vpop.f32.mrb[4].mxu0  ;;  %v1304_v6 = vpop.f32.mrb[4].mxu1 }
 0x103   : > { %v1257_v7 = vpop.f32.mrb[5].mxu0  ;;  %v1305_v8 = vpop.f32.mrb[5].mxu1 }
 0x104   : > { %v1142_v9 = vpack.c.bf16 %v718_v3, %v717_v1  ;;  %v1182_v10 = vpack.c.bf16 %v734_v4, %v733_v2  ;;  %v1258_v11 = vadd.f32 %v1257_v7, %v1256_v5  ;;  %v1306_v12 = vadd.f32 %v1305_v8, %v1304_v6  ;;  %v1259_v13 = vpop.f32.mrb[6].mxu0  ;;  %v1307_v14 = vpop.f32.mrb[6].mxu1 }
 0x105   : > { %v1260_v15 = vpop.f32.mrb[7].mxu0  ;;  %v1308_v16 = vpop.f32.mrb[7].mxu1 }
 0x106   : > { %1143 = vst [vmem:[%s1613_s8] sm:$0xff] %v1142_v9   ;;  %1226 = vst [vmem:[%s1613_s8 + $0x40] sm:$0xff] %v1182_v10   ;;  %v599_v17 = vadd.f32 %v1258_v11, %v1603_v50  ;;  %v663_v18 = vadd.f32 %v1306_v12, %v1603_v50  ;;  %v1261_v19 = vadd.f32 %v1260_v15, %v1259_v13 }
 0x107   : > { %v1309_v20 = vadd.f32 %v1308_v16, %v1307_v14 }
 0x108   : > { %v602_v21 = vadd.f32 %v1261_v19, %v1603_v50  ;;  %v719_v23 = vmax.f32 %v599_v17, 0.0  ;;  %v735_v24 = vmax.f32 %v663_v18, 0.0 }
 0x109   : > { %v666_v22 = vadd.f32 %v1309_v20, %v1603_v50 }
 0x10a   : > { %v720_v25 = vmax.f32 %v602_v21, 0.0  ;;  %v1262_v27 = vpop.f32.mrb[8].mxu0  ;;  %v1310_v28 = vpop.f32.mrb[8].mxu1 }
 0x10b   : > { %v736_v26 = vmax.f32 %v666_v22, 0.0  ;;  %v1263_v29 = vpop.f32.mrb[9].mxu0  ;;  %v1311_v30 = vpop.f32.mrb[9].mxu1 }
 0x10c   : > { %v1147_v31 = vpack.c.bf16 %v720_v25, %v719_v23  ;;  %v1264_v33 = vadd.f32 %v1263_v29, %v1262_v27  ;;  %v1312_v34 = vadd.f32 %v1311_v30, %v1310_v28  ;;  %v1265_v35 = vpop.f32.mrb[10].mxu0  ;;  %v1313_v36 = vpop.f32.mrb[10].mxu1 }
 0x10d   : > { %v1187_v32 = vpack.c.bf16 %v736_v26, %v735_v24  ;;  %v1266_v37 = vpop.f32.mrb[11].mxu0  ;;  %v1314_v38 = vpop.f32.mrb[11].mxu1 }
 0x10e   : > { %1219 = vst [vmem:[%s1613_s8 + $0x8] sm:$0xff] %v1147_v31   ;;  %v607_v39 = vadd.f32 %v1264_v33, %v1603_v50  ;;  %v671_v40 = vadd.f32 %v1312_v34, %v1603_v50  ;;  %v1267_v41 = vadd.f32 %v1266_v37, %v1265_v35  ;;  %v1315_v42 = vadd.f32 %v1314_v38, %v1313_v36 }
 0x10f   : > { %1227 = vst [vmem:[%s1613_s8 + $0x48] sm:$0xff] %v1187_v32  }
 0x110   : > { %v610_v43 = vadd.f32 %v1267_v41, %v1603_v50  ;;  %v674_v44 = vadd.f32 %v1315_v42, %v1603_v50  ;;  %v721_v45 = vmax.f32 %v607_v39, 0.0  ;;  %v737_v46 = vmax.f32 %v671_v40, 0.0 }
 0x112   : > { %v722_v47 = vmax.f32 %v610_v43, 0.0  ;;  %v738_v48 = vmax.f32 %v674_v44, 0.0  ;;  %v1268_v49 = vpop.f32.mrb[12].mxu0  ;;  %v1316_v51 = vpop.f32.mrb[12].mxu1 }
 0x113   : > { %v1269_v52 = vpop.f32.mrb[13].mxu0  ;;  %v1317_v53 = vpop.f32.mrb[13].mxu1 }
 0x114   : > { %v1152_v54 = vpack.c.bf16 %v722_v47, %v721_v45  ;;  %v1192_v55 = vpack.c.bf16 %v738_v48, %v737_v46  ;;  %v1270_v56 = vadd.f32 %v1269_v52, %v1268_v49  ;;  %v1318_v57 = vadd.f32 %v1317_v53, %v1316_v51  ;;  %v1271_v58 = vpop.f32.mrb[14].mxu0  ;;  %v1319_v59 = vpop.f32.mrb[14].mxu1 }
 0x115   : > { %v1272_v60 = vpop.f32.mrb[15].mxu0  ;;  %v1320_v61 = vpop.f32.mrb[15].mxu1 }
 0x116   : > { %1220 = vst [vmem:[%s1613_s8 + $0x10] sm:$0xff] %v1152_v54   ;;  %1228 = vst [vmem:[%s1613_s8 + $0x50] sm:$0xff] %v1192_v55   ;;  %v615_v62 = vadd.f32 %v1270_v56, %v1603_v50  ;;  %v679_v63 = vadd.f32 %v1318_v57, %v1603_v50  ;;  %v1273_v0 = vadd.f32 %v1272_v60, %v1271_v58 }
 0x117   : > { %v1321_v1 = vadd.f32 %v1320_v61, %v1319_v59 }
 0x118   : > { %v618_v2 = vadd.f32 %v1273_v0, %v1603_v50  ;;  %v723_v4 = vmax.f32 %v615_v62, 0.0  ;;  %v739_v5 = vmax.f32 %v679_v63, 0.0 }
 0x119   : > { %v682_v3 = vadd.f32 %v1321_v1, %v1603_v50 }
 0x11a   : > { %v724_v6 = vmax.f32 %v618_v2, 0.0  ;;  %v1274_v8 = vpop.f32.mrb[16].mxu0  ;;  %v1322_v9 = vpop.f32.mrb[16].mxu1 }
 0x11b   : > { %v740_v7 = vmax.f32 %v682_v3, 0.0  ;;  %v1275_v10 = vpop.f32.mrb[17].mxu0  ;;  %v1323_v11 = vpop.f32.mrb[17].mxu1 }
 0x11c   : > { %v1157_v12 = vpack.c.bf16 %v724_v6, %v723_v4  ;;  %v1276_v14 = vadd.f32 %v1275_v10, %v1274_v8  ;;  %v1324_v15 = vadd.f32 %v1323_v11, %v1322_v9  ;;  %v1277_v16 = vpop.f32.mrb[18].mxu0  ;;  %v1325_v17 = vpop.f32.mrb[18].mxu1 }
 0x11d   : > { %v1197_v13 = vpack.c.bf16 %v740_v7, %v739_v5  ;;  %v1278_v18 = vpop.f32.mrb[19].mxu0  ;;  %v1326_v19 = vpop.f32.mrb[19].mxu1 }
 0x11e   : > { %1221 = vst [vmem:[%s1613_s8 + $0x18] sm:$0xff] %v1157_v12   ;;  %v623_v20 = vadd.f32 %v1276_v14, %v1603_v50  ;;  %v687_v21 = vadd.f32 %v1324_v15, %v1603_v50  ;;  %v1279_v22 = vadd.f32 %v1278_v18, %v1277_v16  ;;  %v1327_v23 = vadd.f32 %v1326_v19, %v1325_v17 }
 0x11f   : > { %1229 = vst [vmem:[%s1613_s8 + $0x58] sm:$0xff] %v1197_v13  }
 0x120   : > { %v626_v24 = vadd.f32 %v1279_v22, %v1603_v50  ;;  %v690_v25 = vadd.f32 %v1327_v23, %v1603_v50  ;;  %v725_v26 = vmax.f32 %v623_v20, 0.0  ;;  %v741_v27 = vmax.f32 %v687_v21, 0.0 }
 0x122   : > { %v726_v28 = vmax.f32 %v626_v24, 0.0  ;;  %v742_v29 = vmax.f32 %v690_v25, 0.0  ;;  %v1280_v30 = vpop.f32.mrb[20].mxu0  ;;  %v1328_v31 = vpop.f32.mrb[20].mxu1 }
 0x123   : > { %v1281_v32 = vpop.f32.mrb[21].mxu0  ;;  %v1329_v33 = vpop.f32.mrb[21].mxu1 }
 0x124   : > { %v1162_v34 = vpack.c.bf16 %v726_v28, %v725_v26  ;;  %v1202_v35 = vpack.c.bf16 %v742_v29, %v741_v27  ;;  %v1282_v36 = vadd.f32 %v1281_v32, %v1280_v30  ;;  %v1330_v37 = vadd.f32 %v1329_v33, %v1328_v31  ;;  %v1283_v38 = vpop.f32.mrb[22].mxu0  ;;  %v1331_v39 = vpop.f32.mrb[22].mxu1 }
 0x125   : > { %v1284_v40 = vpop.f32.mrb[23].mxu0  ;;  %v1332_v41 = vpop.f32.mrb[23].mxu1 }
 0x126   : > { %1222 = vst [vmem:[%s1613_s8 + $0x20] sm:$0xff] %v1162_v34   ;;  %1230 = vst [vmem:[%s1613_s8 + $0x60] sm:$0xff] %v1202_v35   ;;  %v631_v42 = vadd.f32 %v1282_v36, %v1603_v50  ;;  %v695_v43 = vadd.f32 %v1330_v37, %v1603_v50  ;;  %v1285_v44 = vadd.f32 %v1284_v40, %v1283_v38 }
 0x127   : > { %v1333_v45 = vadd.f32 %v1332_v41, %v1331_v39 }
 0x128   : > { %v634_v46 = vadd.f32 %v1285_v44, %v1603_v50  ;;  %v727_v48 = vmax.f32 %v631_v42, 0.0  ;;  %v743_v49 = vmax.f32 %v695_v43, 0.0 }
 0x129   : > { %v698_v47 = vadd.f32 %v1333_v45, %v1603_v50 }
 0x12a   : > { %v728_v51 = vmax.f32 %v634_v46, 0.0  ;;  %v1286_v53 = vpop.f32.mrb[24].mxu0  ;;  %v1334_v54 = vpop.f32.mrb[24].mxu1 }
 0x12b   : > { %v744_v52 = vmax.f32 %v698_v47, 0.0  ;;  %v1287_v55 = vpop.f32.mrb[25].mxu0  ;;  %v1335_v56 = vpop.f32.mrb[25].mxu1 }
 0x12c   : > { %v1167_v57 = vpack.c.bf16 %v728_v51, %v727_v48  ;;  %v1288_v59 = vadd.f32 %v1287_v55, %v1286_v53  ;;  %v1336_v60 = vadd.f32 %v1335_v56, %v1334_v54  ;;  %v1289_v61 = vpop.f32.mrb[26].mxu0  ;;  %v1337_v62 = vpop.f32.mrb[26].mxu1 }
 0x12d   : > { %v1207_v58 = vpack.c.bf16 %v744_v52, %v743_v49  ;;  %v1290_v63 = vpop.f32.mrb[27].mxu0  ;;  %v1338_v0 = vpop.f32.mrb[27].mxu1 }
 0x12e   : > { %1223 = vst [vmem:[%s1613_s8 + $0x28] sm:$0xff] %v1167_v57   ;;  %v639_v1 = vadd.f32 %v1288_v59, %v1603_v50  ;;  %v703_v2 = vadd.f32 %v1336_v60, %v1603_v50  ;;  %v1291_v3 = vadd.f32 %v1290_v63, %v1289_v61  ;;  %v1339_v4 = vadd.f32 %v1338_v0, %v1337_v62 }
 0x12f   : > { %1231 = vst [vmem:[%s1613_s8 + $0x68] sm:$0xff] %v1207_v58  }
 0x130   : > { %v642_v5 = vadd.f32 %v1291_v3, %v1603_v50  ;;  %v706_v6 = vadd.f32 %v1339_v4, %v1603_v50  ;;  %v729_v7 = vmax.f32 %v639_v1, 0.0  ;;  %v745_v8 = vmax.f32 %v703_v2, 0.0 }
 0x132   : > { %v730_v9 = vmax.f32 %v642_v5, 0.0  ;;  %v746_v10 = vmax.f32 %v706_v6, 0.0  ;;  %v1292_v11 = vpop.f32.mrb[28].mxu0  ;;  %v1340_v12 = vpop.f32.mrb[28].mxu1 }
 0x133   : > { %v1293_v13 = vpop.f32.mrb[29].mxu0  ;;  %v1341_v14 = vpop.f32.mrb[29].mxu1 }
 0x134   : > { %v1172_v15 = vpack.c.bf16 %v730_v9, %v729_v7  ;;  %v1212_v16 = vpack.c.bf16 %v746_v10, %v745_v8  ;;  %v1294_v17 = vadd.f32 %v1293_v13, %v1292_v11  ;;  %v1342_v18 = vadd.f32 %v1341_v14, %v1340_v12  ;;  %v1295_v19 = vpop.f32.mrb[30].mxu0  ;;  %v1343_v20 = vpop.f32.mrb[30].mxu1 }
 0x135   : > { %v1296_v21 = vpop.f32.mrb[31].mxu0  ;;  %v1344_v22 = vpop.f32.mrb[31].mxu1 }
 0x136   : > { %1224 = vst [vmem:[%s1613_s8 + $0x30] sm:$0xff] %v1172_v15   ;;  %1232 = vst [vmem:[%s1613_s8 + $0x70] sm:$0xff] %v1212_v16   ;;  %v647_v23 = vadd.f32 %v1294_v17, %v1603_v50  ;;  %v711_v24 = vadd.f32 %v1342_v18, %v1603_v50  ;;  %v1297_v25 = vadd.f32 %v1296_v21, %v1295_v19 }
 0x137   : > { %v1345_v26 = vadd.f32 %v1344_v22, %v1343_v20 }
 0x138   : > { %v650_v27 = vadd.f32 %v1297_v25, %v1603_v50  ;;  %v731_v29 = vmax.f32 %v647_v23, 0.0  ;;  %v747_v30 = vmax.f32 %v711_v24, 0.0 }
 0x139   : > { %v714_v28 = vadd.f32 %v1345_v26, %v1603_v50 }
 0x13a   : > { %v732_v31 = vmax.f32 %v650_v27, 0.0 }
 0x13b   : > { %v748_v32 = vmax.f32 %v714_v28, 0.0 }
 0x13c   : > { %v1177_v33 = vpack.c.bf16 %v732_v31, %v731_v29 }
 0x13d   : > { %v1217_v34 = vpack.c.bf16 %v748_v32, %v747_v30 }
 0x13e   : > { %1225 = vst [vmem:[%s1613_s8 + $0x38] sm:$0xff] %v1177_v33  }
 0x13f   : > { %1233 = vst [vmem:[%s1613_s8 + $0x78] sm:$0xff] %v1217_v34  }
 0x140 PF: > { %s13_s14 = sadd.s32 1, %s1472_s14   ;;  %s1672_s12 = smov %s1468_s13 }
 0x141   : > { %p10_p5 = scmp.ge.s32.totalorder %s13_s14, 4   ;;  %s1673_s13 = smov %s1675_s15 }
 0x143   :  { %12 = sbr.rel (!%p10_p5) target bundleno = 2 (0x2), region = 68 }

// kernel: _lambda_.23
= control target key start
LH: loop header
LB: loop body
LE: loop exit
PB: predicated region body
PF: predicated region fallthrough
CT: control target
= control target key end

     0   :  { %s493_s0 = inlined_call_operand.vmem [shape: bf16[9,64,128], index: 0, kind: input, shape index: {}]   ;;  %s494_s1 = inlined_call_operand.vmem [shape: bf16[64,128], index: 1, kind: output, shape index: {}]  }
   0x1   :  { %v8_v0 = vld [vmem:[%s493_s0] sm:$0xf]  ;;  %v9_v1 = vld [vmem:[%s493_s0 + $0x4] sm:$0xf]  ;;  %v10_v18 = vld [vmem:[%s493_s0 + $0x8] sm:$0xf] }
   0x2   :  { %v164_v2 = vld [vmem:[%s493_s0 + $0x20] sm:$0xf]  ;;  %v165_v3 = vld [vmem:[%s493_s0 + $0x24] sm:$0xf]  ;;  %v11_v19 = vld [vmem:[%s493_s0 + $0xc] sm:$0xf] }
   0x3   :  { %v25_v4 = vmax.bf16 %v164_v2, %v8_v0  ;;  %v172_v5 = vld [vmem:[%s493_s0 + $0x40] sm:$0xf]  ;;  %v173_v6 = vld [vmem:[%s493_s0 + $0x44] sm:$0xf]  ;;  %v26_v7 = vmax.bf16 %v165_v3, %v9_v1  ;;  %v166_v20 = vld [vmem:[%s493_s0 + $0x28] sm:$0xf] }
   0x4   :  { %v180_v8 = vld [vmem:[%s493_s0 + $0x60] sm:$0xf]  ;;  %v181_v10 = vld [vmem:[%s493_s0 + $0x64] sm:$0xf]  ;;  %v167_v22 = vld [vmem:[%s493_s0 + $0x2c] sm:$0xf]  ;;  %v27_v23 = vmax.bf16 %v166_v20, %v10_v18 }
   0x5   :  { %v42_v9 = vmax.bf16 %v172_v5, %v25_v4  ;;  %v43_v11 = vmax.bf16 %v173_v6, %v26_v7  ;;  %v188_v12 = vld [vmem:[%s493_s0 + $0x80] sm:$0xf]  ;;  %v189_v14 = vld [vmem:[%s493_s0 + $0x84] sm:$0xf]  ;;  %v174_v24 = vld [vmem:[%s493_s0 + $0x48] sm:$0xf]  ;;  %v28_v28 = vmax.bf16 %v167_v22, %v11_v19 }
   0x6   :  { %v196_v15 = vld [vmem:[%s493_s0 + $0xa0] sm:$0xf]  ;;  %v197_v16 = vld [vmem:[%s493_s0 + $0xa4] sm:$0xf]  ;;  %v175_v25 = vld [vmem:[%s493_s0 + $0x4c] sm:$0xf]  ;;  %v44_v33 = vmax.bf16 %v174_v24, %v27_v23 }
   0x7   :  { %v59_v13 = vmax.bf16 %v180_v8, %v42_v9  ;;  %v60_v17 = vmax.bf16 %v181_v10, %v43_v11  ;;  %v204_v27 = vld [vmem:[%s493_s0 + $0xc0] sm:$0xf]  ;;  %v182_v29 = vld [vmem:[%s493_s0 + $0x68] sm:$0xf]  ;;  %v205_v31 = vld [vmem:[%s493_s0 + $0xc4] sm:$0xf]  ;;  %v45_v38 = vmax.bf16 %v175_v25, %v28_v28 }
   0x8   :  { %v212_v32 = vld [vmem:[%s493_s0 + $0xe0] sm:$0xf]  ;;  %v183_v34 = vld [vmem:[%s493_s0 + $0x6c] sm:$0xf]  ;;  %v213_v36 = vld [vmem:[%s493_s0 + $0xe4] sm:$0xf]  ;;  %v61_v42 = vmax.bf16 %v182_v29, %v44_v33 }
   0x9   :  { %v76_v21 = vmax.bf16 %v188_v12, %v59_v13  ;;  %v77_v26 = vmax.bf16 %v189_v14, %v60_v17  ;;  %v220_v37 = vld [vmem:[%s493_s0 + $0x100] sm:$0xf]  ;;  %v190_v39 = vld [vmem:[%s493_s0 + $0x88] sm:$0xf]  ;;  %v221_v41 = vld [vmem:[%s493_s0 + $0x104] sm:$0xf]  ;;  %v62_v47 = vmax.bf16 %v183_v34, %v45_v38 }
   0xa   :  { %v191_v43 = vld [vmem:[%s493_s0 + $0x8c] sm:$0xf]  ;;  %v198_v44 = vld [vmem:[%s493_s0 + $0xa8] sm:$0xf]  ;;  %v12_v48 = vld [vmem:[%s493_s0 + $0x10] sm:$0xf]  ;;  %v78_v52 = vmax.bf16 %v190_v39, %v61_v42 }
   0xb   :  { %v93_v30 = vmax.bf16 %v196_v15, %v76_v21  ;;  %v94_v35 = vmax.bf16 %v197_v16, %v77_v26  ;;  %v199_v45 = vld [vmem:[%s493_s0 + $0xac] sm:$0xf]  ;;  %v13_v49 = vld [vmem:[%s493_s0 + $0x14] sm:$0xf]  ;;  %v168_v50 = vld [vmem:[%s493_s0 + $0x30] sm:$0xf]  ;;  %v79_v58 = vmax.bf16 %v191_v43, %v62_v47 }
   0xc   :  { %v169_v53 = vld [vmem:[%s493_s0 + $0x34] sm:$0xf]  ;;  %v29_v54 = vmax.bf16 %v168_v50, %v12_v48  ;;  %v176_v55 = vld [vmem:[%s493_s0 + $0x50] sm:$0xf]  ;;  %v206_v59 = vld [vmem:[%s493_s0 + $0xc8] sm:$0xf]  ;;  %v95_v63 = vmax.bf16 %v198_v44, %v78_v52 }
   0xd   :  { %v110_v40 = vmax.bf16 %v204_v27, %v93_v30  ;;  %v111_v46 = vmax.bf16 %v205_v31, %v94_v35  ;;  %v177_v56 = vld [vmem:[%s493_s0 + $0x54] sm:$0xf]  ;;  %v30_v60 = vmax.bf16 %v169_v53, %v13_v49  ;;  %v184_v61 = vld [vmem:[%s493_s0 + $0x70] sm:$0xf]  ;;  %v207_v0 = vld [vmem:[%s493_s0 + $0xcc] sm:$0xf]  ;;  %v96_v5 = vmax.bf16 %v199_v45, %v79_v58 }
   0xe   :  { %v214_v1 = vld [vmem:[%s493_s0 + $0xe8] sm:$0xf]  ;;  %v46_v2 = vmax.bf16 %v176_v55, %v29_v54  ;;  %v185_v3 = vld [vmem:[%s493_s0 + $0x74] sm:$0xf]  ;;  %v215_v6 = vld [vmem:[%s493_s0 + $0xec] sm:$0xf]  ;;  %v112_v10 = vmax.bf16 %v206_v59, %v95_v63 }
   0xf   :  { %v127_v51 = vmax.bf16 %v212_v32, %v110_v40  ;;  %v128_v57 = vmax.bf16 %v213_v36, %v111_v46  ;;  %v222_v7 = vld [vmem:[%s493_s0 + $0x108] sm:$0xf]  ;;  %v47_v8 = vmax.bf16 %v177_v56, %v30_v60  ;;  %v192_v9 = vld [vmem:[%s493_s0 + $0x90] sm:$0xf]  ;;  %v223_v11 = vld [vmem:[%s493_s0 + $0x10c] sm:$0xf]  ;;  %v113_v17 = vmax.bf16 %v207_v0, %v96_v5 }
  0x10   :  { %v63_v12 = vmax.bf16 %v184_v61, %v46_v2  ;;  %v193_v13 = vld [vmem:[%s493_s0 + $0x94] sm:$0xf]  ;;  %v200_v14 = vld [vmem:[%s493_s0 + $0xb0] sm:$0xf]  ;;  %v14_v19 = vld [vmem:[%s493_s0 + $0x18] sm:$0xf]  ;;  %v129_v22 = vmax.bf16 %v214_v1, %v112_v10 }
  0x11   :  { %v144_v62 = vmax.bf16 %v220_v37, %v127_v51  ;;  %v145_v4 = vmax.bf16 %v221_v41, %v128_v57  ;;  %v201_v15 = vld [vmem:[%s493_s0 + $0xb4] sm:$0xf]  ;;  %v64_v18 = vmax.bf16 %v185_v3, %v47_v8  ;;  %v15_v20 = vld [vmem:[%s493_s0 + $0x1c] sm:$0xf]  ;;  %v170_v21 = vld [vmem:[%s493_s0 + $0x38] sm:$0xf]  ;;  %v130_v28 = vmax.bf16 %v215_v6, %v113_v17 }
  0x12   :  { %v80_v23 = vmax.bf16 %v192_v9, %v63_v12  ;;  %v171_v24 = vld [vmem:[%s493_s0 + $0x3c] sm:$0xf]  ;;  %v31_v25 = vmax.bf16 %v170_v21, %v14_v19  ;;  %v178_v26 = vld [vmem:[%s493_s0 + $0x58] sm:$0xf]  ;;  %v208_v30 = vld [vmem:[%s493_s0 + $0xd0] sm:$0xf]  ;;  %v146_v33 = vmax.bf16 %v222_v7, %v129_v22 }
  0x13   :  { %v248_v16 = vcombine.low %v144_v62, %v145_v4  ;;  %v179_v27 = vld [vmem:[%s493_s0 + $0x5c] sm:$0xf]  ;;  %v81_v29 = vmax.bf16 %v193_v13, %v64_v18  ;;  %v32_v31 = vmax.bf16 %v171_v24, %v15_v20  ;;  %v186_v32 = vld [vmem:[%s493_s0 + $0x78] sm:$0xf]  ;;  %v209_v35 = vld [vmem:[%s493_s0 + $0xd4] sm:$0xf]  ;;  %v147_v38 = vmax.bf16 %v223_v11, %v130_v28 }
  0x14   :  { %v97_v34 = vmax.bf16 %v200_v14, %v80_v23  ;;  %v48_v36 = vmax.bf16 %v178_v26, %v31_v25  ;;  %v187_v37 = vld [vmem:[%s493_s0 + $0x7c] sm:$0xf]  ;;  %v216_v40 = vld [vmem:[%s493_s0 + $0xf0] sm:$0xf]  ;;  %v194_v42 = vld [vmem:[%s493_s0 + $0x98] sm:$0xf] }
  0x15   :  { %232 = vst [vmem:[%s494_s1] sm:$0xff] %v248_v16   ;;  %v98_v39 = vmax.bf16 %v201_v15, %v81_v29  ;;  %v49_v41 = vmax.bf16 %v179_v27, %v32_v31  ;;  %v217_v44 = vld [vmem:[%s493_s0 + $0xf4] sm:$0xf]  ;;  %v195_v46 = vld [vmem:[%s493_s0 + $0x9c] sm:$0xf]  ;;  %v249_v47 = vcombine.low %v146_v33, %v147_v38  ;;  %v224_v49 = vld [vmem:[%s493_s0 + $0x110] sm:$0xf] }
  0x16   :  { %v114_v43 = vmax.bf16 %v208_v30, %v97_v34  ;;  %v65_v45 = vmax.bf16 %v186_v32, %v48_v36  ;;  %v202_v51 = vld [vmem:[%s493_s0 + $0xb8] sm:$0xf]  ;;  %v225_v53 = vld [vmem:[%s493_s0 + $0x114] sm:$0xf]  ;;  %v203_v55 = vld [vmem:[%s493_s0 + $0xbc] sm:$0xf] }
  0x17   :  { %v115_v48 = vmax.bf16 %v209_v35, %v98_v39  ;;  %v66_v50 = vmax.bf16 %v187_v37, %v49_v41  ;;  %250 = vst [vmem:[%s494_s1 + $0x8] sm:$0xff] %v249_v47   ;;  %v210_v58 = vld [vmem:[%s493_s0 + $0xd8] sm:$0xf]  ;;  %v211_v61 = vld [vmem:[%s493_s0 + $0xdc] sm:$0xf] }
  0x18   :  { %v131_v52 = vmax.bf16 %v216_v40, %v114_v43  ;;  %v82_v54 = vmax.bf16 %v194_v42, %v65_v45  ;;  %v218_v0 = vld [vmem:[%s493_s0 + $0xf8] sm:$0xf]  ;;  %v219_v2 = vld [vmem:[%s493_s0 + $0xfc] sm:$0xf] }
  0x19   :  { %v132_v56 = vmax.bf16 %v217_v44, %v115_v48  ;;  %v83_v57 = vmax.bf16 %v195_v46, %v66_v50  ;;  %v226_v5 = vld [vmem:[%s493_s0 + $0x118] sm:$0xf]  ;;  %v227_v7 = vld [vmem:[%s493_s0 + $0x11c] sm:$0xf] }
  0x1a   :  { %v148_v59 = vmax.bf16 %v224_v49, %v131_v52  ;;  %v99_v60 = vmax.bf16 %v202_v51, %v82_v54 }
  0x1b   :  { %v149_v62 = vmax.bf16 %v225_v53, %v132_v56  ;;  %v100_v63 = vmax.bf16 %v203_v55, %v83_v57 }
  0x1c   :  { %v116_v1 = vmax.bf16 %v210_v58, %v99_v60 }
  0x1d   :  { %v251_v3 = vcombine.low %v148_v59, %v149_v62  ;;  %v117_v4 = vmax.bf16 %v211_v61, %v100_v63 }
  0x1e   :  { %v133_v6 = vmax.bf16 %v218_v0, %v116_v1 }
  0x1f   :  { %252 = vst [vmem:[%s494_s1 + $0x10] sm:$0xff] %v251_v3   ;;  %v134_v8 = vmax.bf16 %v219_v2, %v117_v4 }
  0x20   :  { %v150_v9 = vmax.bf16 %v226_v5, %v133_v6 }
  0x21   :  { %v151_v10 = vmax.bf16 %v227_v7, %v134_v8 }
  0x23   :  { %v253_v11 = vcombine.low %v150_v9, %v151_v10 }
  0x25   :  { %254 = vst [vmem:[%s494_s1 + $0x18] sm:$0xff] %v253_v11  }

// kernel: _lambda_.24
= control target key start
LH: loop header
LB: loop body
LE: loop exit
PB: predicated region body
PF: predicated region fallthrough
CT: control target
= control target key end

     0   :  { %s1772_s1 = inlined_call_operand.vmem [shape: bf16[640,128], index: 1, kind: input, shape index: {}]   ;;  %s1773_s0 = inlined_call_operand.vmem [shape: bf16[128,640], index: 0, kind: input, shape index: {}]   ;;  %s1774_s2 = inlined_call_operand.vmem [shape: f32[1,128], index: 2, kind: input, shape index: {}]   ;;  %s1775_s3 = inlined_call_operand.vmem [shape: bf16[128,128], index: 3, kind: output, shape index: {}]  }
   0x1   :  { %v1341_v0 = vld [vmem:[%s1772_s1 + $0x40] sm:$0xff]   ;;  %v1345_v4 = vld [vmem:[%s1772_s1 + $0x48] sm:$0xff]   ;;  %v1349_v8 = vld [vmem:[%s1772_s1 + $0x50] sm:$0xff]  }
   0x2   :  { %v1342_v1 = vld [vmem:[%s1772_s1 + $0xc0] sm:$0xff]   ;;  %1149 = vmatprep.subr.bf16.mxu0 %v1341_v0  ;;  %v1346_v5 = vld [vmem:[%s1772_s1 + $0xc8] sm:$0xff]   ;;  %v1350_v9 = vld [vmem:[%s1772_s1 + $0xd0] sm:$0xff]  }
   0x3   :  { %v1343_v2 = vld [vmem:[%s1772_s1] sm:$0xff]   ;;  %1213 = vmatprep.subr.bf16.mxu1 %v1342_v1  ;;  %v1347_v6 = vld [vmem:[%s1772_s1 + $0x8] sm:$0xff]   ;;  %v1351_v10 = vld [vmem:[%s1772_s1 + $0x10] sm:$0xff]  }
   0x4   :  { %v1344_v3 = vld [vmem:[%s1772_s1 + $0x80] sm:$0xff]   ;;  %1150 = vmatpush3.bf16.msra.mxu0 %v1343_v2  ;;  %v1348_v7 = vld [vmem:[%s1772_s1 + $0x88] sm:$0xff]   ;;  %v1352_v11 = vld [vmem:[%s1772_s1 + $0x90] sm:$0xff]  }
   0x5   :  { %1214 = vmatpush3.bf16.msra.mxu1 %v1344_v3  ;;  %1151 = vmatprep.subr.bf16.mxu0 %v1345_v4  ;;  %v1353_v12 = vld [vmem:[%s1772_s1 + $0x58] sm:$0xff]   ;;  %v1357_v16 = vld [vmem:[%s1772_s1 + $0x60] sm:$0xff]   ;;  %v1361_v20 = vld [vmem:[%s1772_s1 + $0x68] sm:$0xff]  }
   0x6   :  { %1215 = vmatprep.subr.bf16.mxu1 %v1346_v5  ;;  %v1354_v13 = vld [vmem:[%s1772_s1 + $0xd8] sm:$0xff]   ;;  %v1358_v17 = vld [vmem:[%s1772_s1 + $0xe0] sm:$0xff]   ;;  %v1362_v21 = vld [vmem:[%s1772_s1 + $0xe8] sm:$0xff]  }
   0x7   :  { %v1355_v14 = vld [vmem:[%s1772_s1 + $0x18] sm:$0xff]   ;;  %v1359_v18 = vld [vmem:[%s1772_s1 + $0x20] sm:$0xff]   ;;  %v1363_v22 = vld [vmem:[%s1772_s1 + $0x28] sm:$0xff]  }
   0x8   :  { %1152 = vmatpush3.bf16.msra.mxu0 %v1347_v6  ;;  %v1356_v15 = vld [vmem:[%s1772_s1 + $0x98] sm:$0xff]   ;;  %v1360_v19 = vld [vmem:[%s1772_s1 + $0xa0] sm:$0xff]   ;;  %v1364_v23 = vld [vmem:[%s1772_s1 + $0xa8] sm:$0xff]  }
   0x9   :  { %1216 = vmatpush3.bf16.msra.mxu1 %v1348_v7  ;;  %1153 = vmatprep.subr.bf16.mxu0 %v1349_v8  ;;  %v1365_v24 = vld [vmem:[%s1772_s1 + $0x70] sm:$0xff]   ;;  %v1369_v28 = vld [vmem:[%s1772_s1 + $0x78] sm:$0xff]   ;;  %v1378_v35 = vld [vmem:[%s1773_s0 + $0xc] ss:$20 sps:$4 sm:$0xff]  }
   0xa   :  { %1217 = vmatprep.subr.bf16.mxu1 %v1350_v9  ;;  %v1366_v25 = vld [vmem:[%s1772_s1 + $0xf0] sm:$0xff]   ;;  %v1370_v29 = vld [vmem:[%s1772_s1 + $0xf8] sm:$0xff]   ;;  %v1379_v36 = vld [vmem:[%s1772_s1 + $0x100] sm:$0xff]   ;;  %727 = vmatprep.mubr.bf16.mxu1 %v1378_v35 }
   0xb   :  { %v1367_v26 = vld [vmem:[%s1772_s1 + $0x30] sm:$0xff]   ;;  %v1371_v30 = vld [vmem:[%s1772_s1 + $0x38] sm:$0xff]   ;;  %v1380_v37 = vld [vmem:[%s1773_s0 + $0x2c] ss:$20 sps:$4 sm:$0xff]  }
   0xc   :  { %1154 = vmatpush3.bf16.msra.mxu0 %v1351_v10  ;;  %v1368_v27 = vld [vmem:[%s1772_s1 + $0xb0] sm:$0xff]   ;;  %v1372_v31 = vld [vmem:[%s1772_s1 + $0xb8] sm:$0xff]   ;;  %v1386_v39 = vld [vmem:[%s1772_s1 + $0x108] sm:$0xff]  }
   0xd   :  { %1218 = vmatpush3.bf16.msra.mxu1 %v1352_v11  ;;  %1155 = vmatprep.subr.bf16.mxu0 %v1353_v12  ;;  %v1373_v32 = vld [vmem:[%s1773_s0] ss:$20 sps:$4 sm:$0xff]   ;;  %v1375_v33 = vld [vmem:[%s1773_s0 + $0x4] ss:$20 sps:$4 sm:$0xff]   ;;  %v1376_v34 = vld [vmem:[%s1773_s0 + $0x8] ss:$20 sps:$4 sm:$0xff]  }
   0xe   :  { %1219 = vmatprep.subr.bf16.mxu1 %v1354_v13  ;;  %630 = vmatprep.mubr.bf16.mxu0 %v1375_v33  ;;  %v1382_v38 = vld [vmem:[%s1773_s0 + $0x34] ss:$20 sps:$4 sm:$0xff]   ;;  %v1385_v41 = vld [vmem:[%s1773_s0 + $0x30] ss:$20 sps:$4 sm:$0xff]   ;;  %v1400_v45 = vld [vmem:[%s1772_s1 + $0x118] sm:$0xff]  }
   0xf   :  { %v1384_v40 = vld [vmem:[%s1773_s0 + $0x28] ss:$20 sps:$4 sm:$0xff]   ;;  %v1393_v44 = vld [vmem:[%s1772_s1 + $0x110] sm:$0xff]   ;;  %v1392_v47 = vld [vmem:[%s1773_s0 + $0x58] ss:$20 sps:$4 sm:$0xff]  }
  0x10   :  { %1156 = vmatpush3.bf16.msra.mxu0 %v1355_v14  ;;  %v1387_v42 = vld [vmem:[%s1773_s0 + $0x54] ss:$20 sps:$4 sm:$0xff]   ;;  %v1389_v43 = vld [vmem:[%s1773_s0 + $0x5c] ss:$20 sps:$4 sm:$0xff]   ;;  %v1396_v49 = vld [vmem:[%s1773_s0 + $0x84] ss:$20 sps:$4 sm:$0xff]  }
  0x11   :  { %1220 = vmatpush3.bf16.msra.mxu1 %v1356_v15  ;;  %1157 = vmatprep.subr.bf16.mxu0 %v1357_v16  ;;  %v1391_v46 = vld [vmem:[%s1773_s0 + $0x50] ss:$20 sps:$4 sm:$0xff]   ;;  %v1414_v51 = vld [vmem:[%s1772_s1 + $0x128] sm:$0xff]   ;;  %v1399_v53 = vld [vmem:[%s1773_s0 + $0x80] ss:$20 sps:$4 sm:$0xff]  }
  0x12   :  { %1221 = vmatprep.subr.bf16.mxu1 %v1358_v17  ;;  %v1394_v48 = vld [vmem:[%s1773_s0 + $0x7c] ss:$20 sps:$4 sm:$0xff]   ;;  %v1407_v50 = vld [vmem:[%s1772_s1 + $0x120] sm:$0xff]   ;;  %v1398_v52 = vld [vmem:[%s1773_s0 + $0x78] ss:$20 sps:$4 sm:$0xff]  }
  0x13   :  { %v1401_v54 = vld [vmem:[%s1773_s0 + $0xa4] ss:$20 sps:$4 sm:$0xff]   ;;  %v1421_v55 = vld [vmem:[%s1772_s1 + $0x130] sm:$0xff]   ;;  %v1403_v56 = vld [vmem:[%s1773_s0 + $0xac] ss:$20 sps:$4 sm:$0xff]  }
  0x14   :  { %1158 = vmatpush3.bf16.msra.mxu0 %v1359_v18  ;;  %v1428_v57 = vld [vmem:[%s1772_s1 + $0x138] sm:$0xff]   ;;  %v1405_v58 = vld [vmem:[%s1773_s0 + $0xa0] ss:$20 sps:$4 sm:$0xff]   ;;  %v1413_v63 = vld [vmem:[%s1773_s0 + $0xd0] ss:$20 sps:$4 sm:$0xff]  }
  0x15   :  { %1222 = vmatpush3.bf16.msra.mxu1 %v1360_v19  ;;  %1159 = vmatprep.subr.bf16.mxu0 %v1361_v20  ;;  %v1406_v59 = vld [vmem:[%s1773_s0 + $0xa8] ss:$20 sps:$4 sm:$0xff]   ;;  %v1408_v60 = vld [vmem:[%s1773_s0 + $0xcc] ss:$20 sps:$4 sm:$0xff]   ;;  %v1419_v2 = vld [vmem:[%s1773_s0 + $0xf0] ss:$20 sps:$4 sm:$0xff]  }
  0x16   :  { %1223 = vmatprep.subr.bf16.mxu1 %v1362_v21  ;;  %v1410_v61 = vld [vmem:[%s1773_s0 + $0xd4] ss:$20 sps:$4 sm:$0xff]   ;;  %v1417_v1 = vld [vmem:[%s1773_s0 + $0xfc] ss:$20 sps:$4 sm:$0xff]   ;;  %v1420_v3 = vld [vmem:[%s1773_s0 + $0xf8] ss:$20 sps:$4 sm:$0xff]  }
  0x17   :  { %v1412_v62 = vld [vmem:[%s1773_s0 + $0xc8] ss:$20 sps:$4 sm:$0xff]   ;;  %v1424_v5 = vld [vmem:[%s1773_s0 + $0x124] ss:$20 sps:$4 sm:$0xff]   ;;  %v1427_v7 = vld [vmem:[%s1773_s0 + $0x120] ss:$20 sps:$4 sm:$0xff]  }
  0x18   :  { %1160 = vmatpush3.bf16.msra.mxu0 %v1363_v22  ;;  %v1415_v0 = vld [vmem:[%s1773_s0 + $0xf4] ss:$20 sps:$4 sm:$0xff]   ;;  %v1422_v4 = vld [vmem:[%s1773_s0 + $0x11c] ss:$20 sps:$4 sm:$0xff]   ;;  %v1426_v6 = vld [vmem:[%s1773_s0 + $0x118] ss:$20 sps:$4 sm:$0xff]  }
  0x19   :  { %1224 = vmatpush3.bf16.msra.mxu1 %v1364_v23  ;;  %1161 = vmatprep.subr.bf16.mxu0 %v1365_v24  ;;  %v1429_v8 = vld [vmem:[%s1773_s0 + $0x10] ss:$20 sps:$4 sm:$0xff]   ;;  %v1431_v10 = vld [vmem:[%s1773_s0 + $0x38] ss:$20 sps:$4 sm:$0xff]   ;;  %v1433_v12 = vld [vmem:[%s1773_s0 + $0x60] ss:$20 sps:$4 sm:$0xff]  }
  0x1a   :  { %1225 = vmatprep.subr.bf16.mxu1 %v1366_v25  ;;  %v1430_v9 = vld [vmem:[%s1773_s0 + $0xb0] ss:$20 sps:$4 sm:$0xff]   ;;  %v1432_v11 = vld [vmem:[%s1773_s0 + $0xd8] ss:$20 sps:$4 sm:$0xff]   ;;  %v1434_v13 = vld [vmem:[%s1773_s0 + $0x100] ss:$20 sps:$4 sm:$0xff]  }
  0x1b   :  { %v1435_v14 = vld [vmem:[%s1773_s0 + $0x88] ss:$20 sps:$4 sm:$0xff]   ;;  %v1700_v18 = vld [vmem:[%s1774_s2] ss:$0 sm:$0xff] }
  0x1c   :  { %1162 = vmatpush3.bf16.msra.mxu0 %v1367_v26  ;;  %v1436_v15 = vld [vmem:[%s1773_s0 + $0x128] ss:$20 sps:$4 sm:$0xff]  }
  0x1d   :  { %1226 = vmatpush3.bf16.msra.mxu1 %v1368_v27  ;;  %1163 = vmatprep.subr.bf16.mxu0 %v1369_v28 }
  0x1e   :  { %1227 = vmatprep.subr.bf16.mxu1 %v1370_v29 }
  0x20   :  { %1164 = vmatpush3.bf16.msra.mxu0 %v1371_v30 }
  0x21   :  { %1228 = vmatpush3.bf16.msra.mxu1 %v1372_v31  ;;  %1293 = vmatprep.subr.bf16.mxu0 %v1379_v36 }
  0x22   :  { %1325 = vmatprep.subr.bf16.mxu1 %v1379_v36 }
  0x23   :  { %631 = vmatmul.mubr.bf16.vlgmr.msra.gmra.mrb[0].mxu0 %v1373_v32 }
  0x24   :  { %728 = vmatmul.mubr.bf16.vlgmr.msra.gmra.mrb[0].mxu1 %v1376_v34  ;;  %1294 = vmatpush3.bf16.msra.mxu0 %v1379_v36 }
  0x25   :  { %1333 = vmatpush3.bf16.msra.mxu1 %v1379_v36  ;;  %638 = vmatprep.mubr.bf16.mxu0 %v1380_v37 }
  0x26   :  { %735 = vmatprep.mubr.bf16.mxu1 %v1382_v38  ;;  %1295 = vmatprep.subr.bf16.mxu0 %v1386_v39 }
  0x27   :  { %1326 = vmatprep.subr.bf16.mxu1 %v1386_v39 }
  0x28   :  { %1296 = vmatpush3.bf16.msra.mxu0 %v1386_v39 }
  0x29   :  { %1334 = vmatpush3.bf16.msra.mxu1 %v1386_v39  ;;  %1297 = vmatprep.subr.bf16.mxu0 %v1393_v44 }
  0x2a   :  { %1327 = vmatprep.subr.bf16.mxu1 %v1393_v44 }
  0x2b   :  { %639 = vmatmul.mubr.bf16.gmra.mrb[4].mxu0 %v1384_v40 }
  0x2c   :  { %736 = vmatmul.mubr.bf16.gmra.mrb[4].mxu1 %v1385_v41  ;;  %646 = vmatprep.mubr.bf16.mxu0 %v1387_v42 }
  0x2d   :  { %743 = vmatprep.mubr.bf16.mxu1 %v1389_v43  ;;  %1298 = vmatpush3.bf16.msra.mxu0 %v1393_v44 }
  0x2e   :  { %1335 = vmatpush3.bf16.msra.mxu1 %v1393_v44  ;;  %1299 = vmatprep.subr.bf16.mxu0 %v1400_v45 }
  0x2f   :  { %1328 = vmatprep.subr.bf16.mxu1 %v1400_v45 }
  0x31   :  { %1300 = vmatpush3.bf16.msra.mxu0 %v1400_v45 }
  0x32   :  { %1336 = vmatpush3.bf16.msra.mxu1 %v1400_v45  ;;  %1301 = vmatprep.subr.bf16.mxu0 %v1407_v50 }
  0x33   :  { %647 = vmatmul.mubr.bf16.gmra.mrb[8].mxu0 %v1391_v46  ;;  %1329 = vmatprep.subr.bf16.mxu1 %v1407_v50 }
  0x34   :  { %744 = vmatmul.mubr.bf16.gmra.mrb[8].mxu1 %v1392_v47  ;;  %654 = vmatprep.mubr.bf16.mxu0 %v1394_v48 }
  0x35   :  { %751 = vmatprep.mubr.bf16.mxu1 %v1396_v49  ;;  %1302 = vmatpush3.bf16.msra.mxu0 %v1407_v50 }
  0x36   :  { %1337 = vmatpush3.bf16.msra.mxu1 %v1407_v50  ;;  %1303 = vmatprep.subr.bf16.mxu0 %v1414_v51 }
  0x37   :  { %1330 = vmatprep.subr.bf16.mxu1 %v1414_v51 }
  0x39   :  { %1304 = vmatpush3.bf16.msra.mxu0 %v1414_v51 }
  0x3a   :  { %1338 = vmatpush3.bf16.msra.mxu1 %v1414_v51  ;;  %1305 = vmatprep.subr.bf16.mxu0 %v1421_v55 }
  0x3b   :  { %655 = vmatmul.mubr.bf16.gmra.mrb[12].mxu0 %v1398_v52  ;;  %1331 = vmatprep.subr.bf16.mxu1 %v1421_v55 }
  0x3c   :  { %752 = vmatmul.mubr.bf16.gmra.mrb[12].mxu1 %v1399_v53  ;;  %662 = vmatprep.mubr.bf16.mxu0 %v1401_v54 }
  0x3d   :  { %759 = vmatprep.mubr.bf16.mxu1 %v1403_v56  ;;  %1306 = vmatpush3.bf16.msra.mxu0 %v1421_v55 }
  0x3e   :  { %1339 = vmatpush3.bf16.msra.mxu1 %v1421_v55  ;;  %1307 = vmatprep.subr.bf16.mxu0 %v1428_v57 }
  0x3f   :  { %1332 = vmatprep.subr.bf16.mxu1 %v1428_v57 }
  0x41   :  { %1308 = vmatpush3.bf16.msra.mxu0 %v1428_v57 }
  0x42   :  { %1340 = vmatpush3.bf16.msra.mxu1 %v1428_v57 }
  0x43   :  { %663 = vmatmul.mubr.bf16.gmra.mrb[16].mxu0 %v1405_v58 }
  0x44   :  { %760 = vmatmul.mubr.bf16.gmra.mrb[16].mxu1 %v1406_v59  ;;  %670 = vmatprep.mubr.bf16.mxu0 %v1408_v60 }
  0x45   :  { %767 = vmatprep.mubr.bf16.mxu1 %v1410_v61 }
  0x4b   :  { %671 = vmatmul.mubr.bf16.gmra.mrb[20].mxu0 %v1412_v62 }
  0x4c   :  { %768 = vmatmul.mubr.bf16.gmra.mrb[20].mxu1 %v1413_v63  ;;  %678 = vmatprep.mubr.bf16.mxu0 %v1415_v0 }
  0x4d   :  { %775 = vmatprep.mubr.bf16.mxu1 %v1417_v1 }
  0x53   :  { %679 = vmatmul.mubr.bf16.gmra.mrb[24].mxu0 %v1419_v2 }
  0x54   :  { %776 = vmatmul.mubr.bf16.gmra.mrb[24].mxu1 %v1420_v3  ;;  %686 = vmatprep.mubr.bf16.mxu0 %v1422_v4 }
  0x55   :  { %783 = vmatprep.mubr.bf16.mxu1 %v1424_v5 }
  0x5b   :  { %687 = vmatmul.mubr.bf16.gmra.mrb[28].mxu0 %v1426_v6 }
  0x5c   :  { %784 = vmatmul.mubr.bf16.gmra.mrb[28].mxu1 %v1427_v7  ;;  %1309 = vmatprep.mubr.bf16.mxu0 %v1429_v8 }
  0x5d   :  { %1317 = vmatprep.mubr.bf16.mxu1 %v1430_v9 }
  0x63   :  { %1310 = vmatmul.mubr.bf16.vlgmr.msra.gmra.mrb[32].mxu0 %v1431_v10 }
  0x64   :  { %1318 = vmatmul.mubr.bf16.vlgmr.msra.gmra.mrb[32].mxu1 %v1432_v11  ;;  %1313 = vmatprep.mubr.bf16.mxu0 %v1433_v12 }
  0x65   :  { %1321 = vmatprep.mubr.bf16.mxu1 %v1434_v13 }
  0x6b   :  { %1314 = vmatmul.mubr.bf16.gmra.mrb[36].mxu0 %v1435_v14 }
  0x6c   :  { %1322 = vmatmul.mubr.bf16.gmra.mrb[36].mxu1 %v1436_v15 }
  0xf6   :  { %v1165_v16 = vpop.f32.mrb[0].mxu0 }
  0xf7   :  { %v1229_v17 = vpop.f32.mrb[0].mxu1  ;;  %v1166_v19 = vpop.f32.mrb[1].mxu0 }
  0xf8   :  { %v1167_v20 = vadd.f32 %v1166_v19, %v1165_v16  ;;  %v1230_v21 = vpop.f32.mrb[1].mxu1  ;;  %v1168_v22 = vpop.f32.mrb[2].mxu0 }
  0xf9   :  { %v1231_v23 = vadd.f32 %v1230_v21, %v1229_v17  ;;  %v1232_v24 = vpop.f32.mrb[2].mxu1  ;;  %v1169_v25 = vpop.f32.mrb[3].mxu0 }
  0xfa   :  { %v633_v26 = vadd.f32 %v1167_v20, %v1700_v18  ;;  %v1170_v27 = vadd.f32 %v1169_v25, %v1168_v22  ;;  %v1233_v28 = vpop.f32.mrb[3].mxu1 }
  0xfb   :  { %v1234_v29 = vadd.f32 %v1233_v28, %v1232_v24 }
  0xfc   :  { %v636_v30 = vadd.f32 %v1170_v27, %v1700_v18  ;;  %v1704_v31 = vadd.f32 %v1231_v23, %v633_v26 }
  0xfe   :  { %v1171_v32 = vpop.f32.mrb[4].mxu0  ;;  %v1706_v33 = vadd.f32 %v1234_v29, %v636_v30 }
  0xff   :  { %v1235_v34 = vpop.f32.mrb[4].mxu1  ;;  %v1172_v35 = vpop.f32.mrb[5].mxu0 }
 0x100   :  { %v1173_v36 = vadd.f32 %v1172_v35, %v1171_v32  ;;  %v1236_v37 = vpop.f32.mrb[5].mxu1  ;;  %v1174_v38 = vpop.f32.mrb[6].mxu0 }
 0x101   :  { %v1237_v39 = vadd.f32 %v1236_v37, %v1235_v34  ;;  %v1238_v40 = vpop.f32.mrb[6].mxu1  ;;  %v1175_v41 = vpop.f32.mrb[7].mxu0 }
 0x102   :  { %v641_v42 = vadd.f32 %v1173_v36, %v1700_v18  ;;  %v1176_v43 = vadd.f32 %v1175_v41, %v1174_v38  ;;  %v1239_v44 = vpop.f32.mrb[7].mxu1 }
 0x103   :  { %v1240_v45 = vadd.f32 %v1239_v44, %v1238_v40 }
 0x104   :  { %v644_v46 = vadd.f32 %v1176_v43, %v1700_v18  ;;  %v1710_v47 = vadd.f32 %v1237_v39, %v641_v42 }
 0x106   :  { %v1177_v48 = vpop.f32.mrb[8].mxu0  ;;  %v1712_v49 = vadd.f32 %v1240_v45, %v644_v46 }
 0x107   :  { %v1241_v50 = vpop.f32.mrb[8].mxu1  ;;  %v1178_v51 = vpop.f32.mrb[9].mxu0 }
 0x108   :  { %v1179_v52 = vadd.f32 %v1178_v51, %v1177_v48  ;;  %v1242_v53 = vpop.f32.mrb[9].mxu1  ;;  %v1180_v54 = vpop.f32.mrb[10].mxu0 }
 0x109   :  { %v1243_v55 = vadd.f32 %v1242_v53, %v1241_v50  ;;  %v1244_v56 = vpop.f32.mrb[10].mxu1  ;;  %v1181_v57 = vpop.f32.mrb[11].mxu0 }
 0x10a   :  { %v649_v58 = vadd.f32 %v1179_v52, %v1700_v18  ;;  %v1182_v59 = vadd.f32 %v1181_v57, %v1180_v54  ;;  %v1245_v60 = vpop.f32.mrb[11].mxu1 }
 0x10b   :  { %v1246_v61 = vadd.f32 %v1245_v60, %v1244_v56 }
 0x10c   :  { %v652_v62 = vadd.f32 %v1182_v59, %v1700_v18  ;;  %v1716_v63 = vadd.f32 %v1243_v55, %v649_v58 }
 0x10e   :  { %v1183_v0 = vpop.f32.mrb[12].mxu0  ;;  %v1718_v1 = vadd.f32 %v1246_v61, %v652_v62 }
 0x10f   :  { %v1247_v2 = vpop.f32.mrb[12].mxu1  ;;  %v1184_v3 = vpop.f32.mrb[13].mxu0 }
 0x110   :  { %v1185_v4 = vadd.f32 %v1184_v3, %v1183_v0  ;;  %v1248_v5 = vpop.f32.mrb[13].mxu1  ;;  %v1186_v6 = vpop.f32.mrb[14].mxu0 }
 0x111   :  { %v1249_v7 = vadd.f32 %v1248_v5, %v1247_v2  ;;  %v1250_v8 = vpop.f32.mrb[14].mxu1  ;;  %v1187_v9 = vpop.f32.mrb[15].mxu0 }
 0x112   :  { %v657_v10 = vadd.f32 %v1185_v4, %v1700_v18  ;;  %v1188_v11 = vadd.f32 %v1187_v9, %v1186_v6  ;;  %v1251_v12 = vpop.f32.mrb[15].mxu1 }
 0x113   :  { %v1252_v13 = vadd.f32 %v1251_v12, %v1250_v8 }
 0x114   :  { %v660_v14 = vadd.f32 %v1188_v11, %v1700_v18  ;;  %v1722_v15 = vadd.f32 %v1249_v7, %v657_v10 }
 0x116   :  { %v1189_v16 = vpop.f32.mrb[16].mxu0  ;;  %v1724_v17 = vadd.f32 %v1252_v13, %v660_v14 }
 0x117   :  { %v1253_v19 = vpop.f32.mrb[16].mxu1  ;;  %v1190_v20 = vpop.f32.mrb[17].mxu0 }
 0x118   :  { %v1191_v21 = vadd.f32 %v1190_v20, %v1189_v16  ;;  %v1254_v22 = vpop.f32.mrb[17].mxu1  ;;  %v1192_v23 = vpop.f32.mrb[18].mxu0 }
 0x119   :  { %v1255_v24 = vadd.f32 %v1254_v22, %v1253_v19  ;;  %v1256_v25 = vpop.f32.mrb[18].mxu1  ;;  %v1193_v26 = vpop.f32.mrb[19].mxu0 }
 0x11a   :  { %v665_v27 = vadd.f32 %v1191_v21, %v1700_v18  ;;  %v1194_v28 = vadd.f32 %v1193_v26, %v1192_v23  ;;  %v1257_v29 = vpop.f32.mrb[19].mxu1 }
 0x11b   :  { %v1258_v30 = vadd.f32 %v1257_v29, %v1256_v25 }
 0x11c   :  { %v668_v32 = vadd.f32 %v1194_v28, %v1700_v18  ;;  %v762_v34 = vadd.f32 %v1255_v24, %v665_v27 }
 0x11e   :  { %v1195_v35 = vpop.f32.mrb[20].mxu0  ;;  %v1728_v36 = vadd.f32 %v1258_v30, %v668_v32 }
 0x11f   :  { %v1259_v37 = vpop.f32.mrb[20].mxu1  ;;  %v1196_v38 = vpop.f32.mrb[21].mxu0 }
 0x120   :  { %v1197_v39 = vadd.f32 %v1196_v38, %v1195_v35  ;;  %v1260_v40 = vpop.f32.mrb[21].mxu1  ;;  %v1198_v41 = vpop.f32.mrb[22].mxu0 }
 0x121   :  { %v1261_v42 = vadd.f32 %v1260_v40, %v1259_v37  ;;  %v1262_v43 = vpop.f32.mrb[22].mxu1  ;;  %v1199_v44 = vpop.f32.mrb[23].mxu0 }
 0x122   :  { %v673_v45 = vadd.f32 %v1197_v39, %v1700_v18  ;;  %v1200_v46 = vadd.f32 %v1199_v44, %v1198_v41  ;;  %v1263_v48 = vpop.f32.mrb[23].mxu1 }
 0x123   :  { %v1264_v50 = vadd.f32 %v1263_v48, %v1262_v43 }
 0x124   :  { %v676_v51 = vadd.f32 %v1200_v46, %v1700_v18  ;;  %v770_v52 = vadd.f32 %v1261_v42, %v673_v45 }
 0x126   :  { %v1201_v53 = vpop.f32.mrb[24].mxu0  ;;  %v773_v54 = vadd.f32 %v1264_v50, %v676_v51 }
 0x127   :  { %v1265_v55 = vpop.f32.mrb[24].mxu1  ;;  %v1202_v56 = vpop.f32.mrb[25].mxu0 }
 0x128   :  { %v1203_v57 = vadd.f32 %v1202_v56, %v1201_v53  ;;  %v1266_v58 = vpop.f32.mrb[25].mxu1  ;;  %v1204_v59 = vpop.f32.mrb[26].mxu0 }
 0x129   :  { %v1267_v60 = vadd.f32 %v1266_v58, %v1265_v55  ;;  %v1268_v61 = vpop.f32.mrb[26].mxu1  ;;  %v1205_v62 = vpop.f32.mrb[27].mxu0 }
 0x12a   :  { %v681_v0 = vadd.f32 %v1203_v57, %v1700_v18  ;;  %v1206_v2 = vadd.f32 %v1205_v62, %v1204_v59  ;;  %v1269_v3 = vpop.f32.mrb[27].mxu1 }
 0x12b   :  { %v1270_v4 = vadd.f32 %v1269_v3, %v1268_v61 }
 0x12c   :  { %v684_v5 = vadd.f32 %v1206_v2, %v1700_v18  ;;  %v778_v6 = vadd.f32 %v1267_v60, %v681_v0 }
 0x12e   :  { %v1207_v7 = vpop.f32.mrb[28].mxu0  ;;  %v1734_v8 = vadd.f32 %v1270_v4, %v684_v5 }
 0x12f   :  { %v1271_v9 = vpop.f32.mrb[28].mxu1  ;;  %v1208_v10 = vpop.f32.mrb[29].mxu0 }
 0x130   :  { %v1209_v11 = vadd.f32 %v1208_v10, %v1207_v7  ;;  %v1272_v12 = vpop.f32.mrb[29].mxu1  ;;  %v1210_v13 = vpop.f32.mrb[30].mxu0 }
 0x131   :  { %v1273_v14 = vadd.f32 %v1272_v12, %v1271_v9  ;;  %v1274_v16 = vpop.f32.mrb[30].mxu1  ;;  %v1211_v19 = vpop.f32.mrb[31].mxu0 }
 0x132   :  { %v689_v20 = vadd.f32 %v1209_v11, %v1700_v18  ;;  %v1212_v21 = vadd.f32 %v1211_v19, %v1210_v13  ;;  %v1275_v22 = vpop.f32.mrb[31].mxu1 }
 0x133   :  { %v1276_v23 = vadd.f32 %v1275_v22, %v1274_v16 }
 0x134   :  { %v692_v24 = vadd.f32 %v1212_v21, %v1700_v18  ;;  %v786_v25 = vadd.f32 %v1273_v14, %v689_v20 }
 0x136   :  { %v1311_v26 = vpop.f32.mrb[32].mxu0  ;;  %v789_v27 = vadd.f32 %v1276_v23, %v692_v24 }
 0x137   :  { %v835_v28 = vadd.f32 %v1311_v26, %v1710_v47  ;;  %v1319_v29 = vpop.f32.mrb[32].mxu1  ;;  %v826_v30 = vpop.f32.mrb[33].mxu0 }
 0x138   :  { %v867_v32 = vadd.f32 %v1319_v29, %v770_v52  ;;  %v827_v35 = vadd.f32 %v826_v30, %v1704_v31  ;;  %v858_v37 = vpop.f32.mrb[33].mxu1  ;;  %v1312_v38 = vpop.f32.mrb[34].mxu0 }
 0x139   :  { %v859_v39 = vadd.f32 %v858_v37, %v762_v34  ;;  %v838_v40 = vadd.f32 %v1312_v38, %v1712_v49  ;;  %v1320_v41 = vpop.f32.mrb[34].mxu1  ;;  %v829_v42 = vpop.f32.mrb[35].mxu0  ;;  %v891_v45 = vmax.f32 %v835_v28, 0.0 }
 0x13a   :  { %v870_v43 = vadd.f32 %v1320_v41, %v773_v54  ;;  %v830_v18 = vadd.f32 %v829_v42, %v1706_v33  ;;  %v861_v44 = vpop.f32.mrb[35].mxu1  ;;  %v899_v48 = vmax.f32 %v867_v32, 0.0  ;;  %v889_v50 = vmax.f32 %v827_v35, 0.0 }
 0x13b   :  { %v892_v46 = vmax.f32 %v838_v40, 0.0  ;;  %v862_v47 = vadd.f32 %v861_v44, %v1728_v36  ;;  %v897_v31 = vmax.f32 %v859_v39, 0.0 }
 0x13c   :  { %v900_v51 = vmax.f32 %v870_v43, 0.0  ;;  %v890_v52 = vmax.f32 %v830_v18, 0.0 }
 0x13d   :  { %v1110_v53 = vpack.c.bf16 %v892_v46, %v891_v45  ;;  %v898_v55 = vmax.f32 %v862_v47, 0.0 }
 0x13e   :  { %v1130_v34 = vpack.c.bf16 %v900_v51, %v899_v48  ;;  %v1105_v56 = vpack.c.bf16 %v890_v52, %v889_v50  ;;  %v1315_v49 = vpop.f32.mrb[36].mxu0 }
 0x13f   :  { %1142 = vst [vmem:[%s1775_s3 + $0x8] sm:$0xff] %v1110_v53   ;;  %v1125_v33 = vpack.c.bf16 %v898_v55, %v897_v31  ;;  %v851_v54 = vadd.f32 %v1315_v49, %v1722_v15  ;;  %v1323_v57 = vpop.f32.mrb[36].mxu1  ;;  %v842_v58 = vpop.f32.mrb[37].mxu0 }
 0x140   :  { %1146 = vst [vmem:[%s1775_s3 + $0x28] sm:$0xff] %v1130_v34   ;;  %1106 = vst [vmem:[%s1775_s3] sm:$0xff] %v1105_v56   ;;  %v883_v36 = vadd.f32 %v1323_v57, %v786_v25  ;;  %v843_v59 = vadd.f32 %v842_v58, %v1716_v63  ;;  %v874_v60 = vpop.f32.mrb[37].mxu1  ;;  %v1316_v61 = vpop.f32.mrb[38].mxu0 }
 0x141   :  { %1145 = vst [vmem:[%s1775_s3 + $0x20] sm:$0xff] %v1125_v33   ;;  %v875_v15 = vadd.f32 %v874_v60, %v778_v6  ;;  %v854_v62 = vadd.f32 %v1316_v61, %v1724_v17  ;;  %v1324_v0 = vpop.f32.mrb[38].mxu1  ;;  %v845_v2 = vpop.f32.mrb[39].mxu0  ;;  %v895_v7 = vmax.f32 %v851_v54, 0.0 }
 0x142   :  { %v886_v3 = vadd.f32 %v1324_v0, %v789_v27  ;;  %v846_v4 = vadd.f32 %v845_v2, %v1718_v1  ;;  %v877_v5 = vpop.f32.mrb[39].mxu1  ;;  %v903_v63 = vmax.f32 %v883_v36, 0.0  ;;  %v893_v11 = vmax.f32 %v843_v59, 0.0 }
 0x143   :  { %v896_v9 = vmax.f32 %v854_v62, 0.0  ;;  %v878_v10 = vadd.f32 %v877_v5, %v1734_v8  ;;  %v901_v14 = vmax.f32 %v875_v15, 0.0 }
 0x144   :  { %v904_v12 = vmax.f32 %v886_v3, 0.0  ;;  %v894_v13 = vmax.f32 %v846_v4, 0.0 }
 0x145   :  { %v1120_v16 = vpack.c.bf16 %v896_v9, %v895_v7  ;;  %v902_v19 = vmax.f32 %v878_v10, 0.0 }
 0x146   :  { %v1140_v6 = vpack.c.bf16 %v904_v12, %v903_v63  ;;  %v1115_v20 = vpack.c.bf16 %v894_v13, %v893_v11 }
 0x147   :  { %1144 = vst [vmem:[%s1775_s3 + $0x18] sm:$0xff] %v1120_v16   ;;  %v1135_v17 = vpack.c.bf16 %v902_v19, %v901_v14 }
 0x148   :  { %1148 = vst [vmem:[%s1775_s3 + $0x38] sm:$0xff] %v1140_v6   ;;  %1143 = vst [vmem:[%s1775_s3 + $0x10] sm:$0xff] %v1115_v20  }
 0x149   :  { %1147 = vst [vmem:[%s1775_s3 + $0x30] sm:$0xff] %v1135_v17  }

// kernel: _lambda_.25
= control target key start
LH: loop header
LB: loop body
LE: loop exit
PB: predicated region body
PF: predicated region fallthrough
CT: control target
= control target key end

     0   :  { %s1919_s1 = inlined_call_operand.vmem [shape: bf16[640,128], index: 1, kind: input, shape index: {}]   ;;  %s1920_s0 = inlined_call_operand.vmem [shape: bf16[128,640], index: 0, kind: input, shape index: {}]   ;;  %s1921_s2 = inlined_call_operand.vmem [shape: f32[1,128], index: 2, kind: input, shape index: {}]   ;;  %s1922_s3 = inlined_call_operand.vmem [shape: bf16[128,128], index: 3, kind: input, shape index: {}]   ;;  %s1923_s4 = inlined_call_operand.vmem [shape: bf16[128,128], index: 4, kind: output, shape index: {}]  }
   0x1   :  { %v1431_v0 = vld [vmem:[%s1919_s1 + $0x40] sm:$0xff]   ;;  %v1435_v4 = vld [vmem:[%s1919_s1 + $0x48] sm:$0xff]   ;;  %v1439_v8 = vld [vmem:[%s1919_s1 + $0x50] sm:$0xff]  }
   0x2   :  { %v1432_v1 = vld [vmem:[%s1919_s1 + $0xc0] sm:$0xff]   ;;  %1239 = vmatprep.subr.bf16.mxu0 %v1431_v0  ;;  %v1436_v5 = vld [vmem:[%s1919_s1 + $0xc8] sm:$0xff]   ;;  %v1440_v9 = vld [vmem:[%s1919_s1 + $0xd0] sm:$0xff]  }
   0x3   :  { %v1433_v2 = vld [vmem:[%s1919_s1] sm:$0xff]   ;;  %1303 = vmatprep.subr.bf16.mxu1 %v1432_v1  ;;  %v1437_v6 = vld [vmem:[%s1919_s1 + $0x8] sm:$0xff]   ;;  %v1441_v10 = vld [vmem:[%s1919_s1 + $0x10] sm:$0xff]  }
   0x4   :  { %v1434_v3 = vld [vmem:[%s1919_s1 + $0x80] sm:$0xff]   ;;  %1240 = vmatpush3.bf16.msra.mxu0 %v1433_v2  ;;  %v1438_v7 = vld [vmem:[%s1919_s1 + $0x88] sm:$0xff]   ;;  %v1442_v11 = vld [vmem:[%s1919_s1 + $0x90] sm:$0xff]  }
   0x5   :  { %1304 = vmatpush3.bf16.msra.mxu1 %v1434_v3  ;;  %1241 = vmatprep.subr.bf16.mxu0 %v1435_v4  ;;  %v1443_v12 = vld [vmem:[%s1919_s1 + $0x58] sm:$0xff]   ;;  %v1447_v16 = vld [vmem:[%s1919_s1 + $0x60] sm:$0xff]   ;;  %v1451_v20 = vld [vmem:[%s1919_s1 + $0x68] sm:$0xff]  }
   0x6   :  { %1305 = vmatprep.subr.bf16.mxu1 %v1436_v5  ;;  %v1444_v13 = vld [vmem:[%s1919_s1 + $0xd8] sm:$0xff]   ;;  %v1448_v17 = vld [vmem:[%s1919_s1 + $0xe0] sm:$0xff]   ;;  %v1452_v21 = vld [vmem:[%s1919_s1 + $0xe8] sm:$0xff]  }
   0x7   :  { %v1445_v14 = vld [vmem:[%s1919_s1 + $0x18] sm:$0xff]   ;;  %v1449_v18 = vld [vmem:[%s1919_s1 + $0x20] sm:$0xff]   ;;  %v1453_v22 = vld [vmem:[%s1919_s1 + $0x28] sm:$0xff]  }
   0x8   :  { %1242 = vmatpush3.bf16.msra.mxu0 %v1437_v6  ;;  %v1446_v15 = vld [vmem:[%s1919_s1 + $0x98] sm:$0xff]   ;;  %v1450_v19 = vld [vmem:[%s1919_s1 + $0xa0] sm:$0xff]   ;;  %v1454_v23 = vld [vmem:[%s1919_s1 + $0xa8] sm:$0xff]  }
   0x9   :  { %1306 = vmatpush3.bf16.msra.mxu1 %v1438_v7  ;;  %1243 = vmatprep.subr.bf16.mxu0 %v1439_v8  ;;  %v1455_v24 = vld [vmem:[%s1919_s1 + $0x70] sm:$0xff]   ;;  %v1459_v28 = vld [vmem:[%s1919_s1 + $0x78] sm:$0xff]   ;;  %v1468_v35 = vld [vmem:[%s1920_s0 + $0xc] ss:$20 sps:$4 sm:$0xff]  }
   0xa   :  { %1307 = vmatprep.subr.bf16.mxu1 %v1440_v9  ;;  %v1456_v25 = vld [vmem:[%s1919_s1 + $0xf0] sm:$0xff]   ;;  %v1460_v29 = vld [vmem:[%s1919_s1 + $0xf8] sm:$0xff]   ;;  %v1469_v36 = vld [vmem:[%s1919_s1 + $0x100] sm:$0xff]   ;;  %730 = vmatprep.mubr.bf16.mxu1 %v1468_v35 }
   0xb   :  { %v1457_v26 = vld [vmem:[%s1919_s1 + $0x30] sm:$0xff]   ;;  %v1461_v30 = vld [vmem:[%s1919_s1 + $0x38] sm:$0xff]   ;;  %v1470_v37 = vld [vmem:[%s1920_s0 + $0x2c] ss:$20 sps:$4 sm:$0xff]  }
   0xc   :  { %1244 = vmatpush3.bf16.msra.mxu0 %v1441_v10  ;;  %v1458_v27 = vld [vmem:[%s1919_s1 + $0xb0] sm:$0xff]   ;;  %v1462_v31 = vld [vmem:[%s1919_s1 + $0xb8] sm:$0xff]   ;;  %v1476_v39 = vld [vmem:[%s1919_s1 + $0x108] sm:$0xff]  }
   0xd   :  { %1308 = vmatpush3.bf16.msra.mxu1 %v1442_v11  ;;  %1245 = vmatprep.subr.bf16.mxu0 %v1443_v12  ;;  %v1463_v32 = vld [vmem:[%s1920_s0] ss:$20 sps:$4 sm:$0xff]   ;;  %v1465_v33 = vld [vmem:[%s1920_s0 + $0x4] ss:$20 sps:$4 sm:$0xff]   ;;  %v1466_v34 = vld [vmem:[%s1920_s0 + $0x8] ss:$20 sps:$4 sm:$0xff]  }
   0xe   :  { %1309 = vmatprep.subr.bf16.mxu1 %v1444_v13  ;;  %633 = vmatprep.mubr.bf16.mxu0 %v1465_v33  ;;  %v1472_v38 = vld [vmem:[%s1920_s0 + $0x34] ss:$20 sps:$4 sm:$0xff]   ;;  %v1475_v41 = vld [vmem:[%s1920_s0 + $0x30] ss:$20 sps:$4 sm:$0xff]   ;;  %v1490_v45 = vld [vmem:[%s1919_s1 + $0x118] sm:$0xff]  }
   0xf   :  { %v1474_v40 = vld [vmem:[%s1920_s0 + $0x28] ss:$20 sps:$4 sm:$0xff]   ;;  %v1483_v44 = vld [vmem:[%s1919_s1 + $0x110] sm:$0xff]   ;;  %v1482_v47 = vld [vmem:[%s1920_s0 + $0x58] ss:$20 sps:$4 sm:$0xff]  }
  0x10   :  { %1246 = vmatpush3.bf16.msra.mxu0 %v1445_v14  ;;  %v1477_v42 = vld [vmem:[%s1920_s0 + $0x54] ss:$20 sps:$4 sm:$0xff]   ;;  %v1479_v43 = vld [vmem:[%s1920_s0 + $0x5c] ss:$20 sps:$4 sm:$0xff]   ;;  %v1486_v49 = vld [vmem:[%s1920_s0 + $0x84] ss:$20 sps:$4 sm:$0xff]  }
  0x11   :  { %1310 = vmatpush3.bf16.msra.mxu1 %v1446_v15  ;;  %1247 = vmatprep.subr.bf16.mxu0 %v1447_v16  ;;  %v1481_v46 = vld [vmem:[%s1920_s0 + $0x50] ss:$20 sps:$4 sm:$0xff]   ;;  %v1504_v51 = vld [vmem:[%s1919_s1 + $0x128] sm:$0xff]   ;;  %v1489_v53 = vld [vmem:[%s1920_s0 + $0x80] ss:$20 sps:$4 sm:$0xff]  }
  0x12   :  { %1311 = vmatprep.subr.bf16.mxu1 %v1448_v17  ;;  %v1484_v48 = vld [vmem:[%s1920_s0 + $0x7c] ss:$20 sps:$4 sm:$0xff]   ;;  %v1497_v50 = vld [vmem:[%s1919_s1 + $0x120] sm:$0xff]   ;;  %v1488_v52 = vld [vmem:[%s1920_s0 + $0x78] ss:$20 sps:$4 sm:$0xff]  }
  0x13   :  { %v1491_v54 = vld [vmem:[%s1920_s0 + $0xa4] ss:$20 sps:$4 sm:$0xff]   ;;  %v1511_v55 = vld [vmem:[%s1919_s1 + $0x130] sm:$0xff]   ;;  %v1493_v56 = vld [vmem:[%s1920_s0 + $0xac] ss:$20 sps:$4 sm:$0xff]  }
  0x14   :  { %1248 = vmatpush3.bf16.msra.mxu0 %v1449_v18  ;;  %v1518_v57 = vld [vmem:[%s1919_s1 + $0x138] sm:$0xff]   ;;  %v1495_v58 = vld [vmem:[%s1920_s0 + $0xa0] ss:$20 sps:$4 sm:$0xff]   ;;  %v1503_v63 = vld [vmem:[%s1920_s0 + $0xd0] ss:$20 sps:$4 sm:$0xff]  }
  0x15   :  { %1312 = vmatpush3.bf16.msra.mxu1 %v1450_v19  ;;  %1249 = vmatprep.subr.bf16.mxu0 %v1451_v20  ;;  %v1496_v59 = vld [vmem:[%s1920_s0 + $0xa8] ss:$20 sps:$4 sm:$0xff]   ;;  %v1498_v60 = vld [vmem:[%s1920_s0 + $0xcc] ss:$20 sps:$4 sm:$0xff]   ;;  %v1509_v2 = vld [vmem:[%s1920_s0 + $0xf0] ss:$20 sps:$4 sm:$0xff]  }
  0x16   :  { %1313 = vmatprep.subr.bf16.mxu1 %v1452_v21  ;;  %v1500_v61 = vld [vmem:[%s1920_s0 + $0xd4] ss:$20 sps:$4 sm:$0xff]   ;;  %v1507_v1 = vld [vmem:[%s1920_s0 + $0xfc] ss:$20 sps:$4 sm:$0xff]   ;;  %v1510_v3 = vld [vmem:[%s1920_s0 + $0xf8] ss:$20 sps:$4 sm:$0xff]  }
  0x17   :  { %v1502_v62 = vld [vmem:[%s1920_s0 + $0xc8] ss:$20 sps:$4 sm:$0xff]   ;;  %v1514_v5 = vld [vmem:[%s1920_s0 + $0x124] ss:$20 sps:$4 sm:$0xff]   ;;  %v1517_v7 = vld [vmem:[%s1920_s0 + $0x120] ss:$20 sps:$4 sm:$0xff]  }
  0x18   :  { %1250 = vmatpush3.bf16.msra.mxu0 %v1453_v22  ;;  %v1505_v0 = vld [vmem:[%s1920_s0 + $0xf4] ss:$20 sps:$4 sm:$0xff]   ;;  %v1512_v4 = vld [vmem:[%s1920_s0 + $0x11c] ss:$20 sps:$4 sm:$0xff]   ;;  %v1516_v6 = vld [vmem:[%s1920_s0 + $0x118] ss:$20 sps:$4 sm:$0xff]  }
  0x19   :  { %1314 = vmatpush3.bf16.msra.mxu1 %v1454_v23  ;;  %1251 = vmatprep.subr.bf16.mxu0 %v1455_v24  ;;  %v1519_v8 = vld [vmem:[%s1920_s0 + $0x10] ss:$20 sps:$4 sm:$0xff]   ;;  %v1521_v10 = vld [vmem:[%s1920_s0 + $0x38] ss:$20 sps:$4 sm:$0xff]   ;;  %v1523_v12 = vld [vmem:[%s1920_s0 + $0x60] ss:$20 sps:$4 sm:$0xff]  }
  0x1a   :  { %1315 = vmatprep.subr.bf16.mxu1 %v1456_v25  ;;  %v1520_v9 = vld [vmem:[%s1920_s0 + $0xb0] ss:$20 sps:$4 sm:$0xff]   ;;  %v1522_v11 = vld [vmem:[%s1920_s0 + $0xd8] ss:$20 sps:$4 sm:$0xff]   ;;  %v1524_v13 = vld [vmem:[%s1920_s0 + $0x100] ss:$20 sps:$4 sm:$0xff]  }
  0x1b   :  { %v1525_v14 = vld [vmem:[%s1920_s0 + $0x88] ss:$20 sps:$4 sm:$0xff]   ;;  %v1795_v18 = vld [vmem:[%s1921_s2] ss:$0 sm:$0xff] }
  0x1c   :  { %1252 = vmatpush3.bf16.msra.mxu0 %v1457_v26  ;;  %v1526_v15 = vld [vmem:[%s1920_s0 + $0x128] ss:$20 sps:$4 sm:$0xff]  }
  0x1d   :  { %1316 = vmatpush3.bf16.msra.mxu1 %v1458_v27  ;;  %1253 = vmatprep.subr.bf16.mxu0 %v1459_v28 }
  0x1e   :  { %1317 = vmatprep.subr.bf16.mxu1 %v1460_v29 }
  0x20   :  { %1254 = vmatpush3.bf16.msra.mxu0 %v1461_v30 }
  0x21   :  { %1318 = vmatpush3.bf16.msra.mxu1 %v1462_v31  ;;  %1383 = vmatprep.subr.bf16.mxu0 %v1469_v36 }
  0x22   :  { %1415 = vmatprep.subr.bf16.mxu1 %v1469_v36 }
  0x23   :  { %634 = vmatmul.mubr.bf16.vlgmr.msra.gmra.mrb[0].mxu0 %v1463_v32 }
  0x24   :  { %731 = vmatmul.mubr.bf16.vlgmr.msra.gmra.mrb[0].mxu1 %v1466_v34  ;;  %1384 = vmatpush3.bf16.msra.mxu0 %v1469_v36 }
  0x25   :  { %1423 = vmatpush3.bf16.msra.mxu1 %v1469_v36  ;;  %641 = vmatprep.mubr.bf16.mxu0 %v1470_v37 }
  0x26   :  { %738 = vmatprep.mubr.bf16.mxu1 %v1472_v38  ;;  %1385 = vmatprep.subr.bf16.mxu0 %v1476_v39 }
  0x27   :  { %1416 = vmatprep.subr.bf16.mxu1 %v1476_v39 }
  0x28   :  { %1386 = vmatpush3.bf16.msra.mxu0 %v1476_v39 }
  0x29   :  { %1424 = vmatpush3.bf16.msra.mxu1 %v1476_v39  ;;  %1387 = vmatprep.subr.bf16.mxu0 %v1483_v44 }
  0x2a   :  { %1417 = vmatprep.subr.bf16.mxu1 %v1483_v44 }
  0x2b   :  { %642 = vmatmul.mubr.bf16.gmra.mrb[4].mxu0 %v1474_v40 }
  0x2c   :  { %739 = vmatmul.mubr.bf16.gmra.mrb[4].mxu1 %v1475_v41  ;;  %649 = vmatprep.mubr.bf16.mxu0 %v1477_v42 }
  0x2d   :  { %746 = vmatprep.mubr.bf16.mxu1 %v1479_v43  ;;  %1388 = vmatpush3.bf16.msra.mxu0 %v1483_v44 }
  0x2e   :  { %1425 = vmatpush3.bf16.msra.mxu1 %v1483_v44  ;;  %1389 = vmatprep.subr.bf16.mxu0 %v1490_v45 }
  0x2f   :  { %1418 = vmatprep.subr.bf16.mxu1 %v1490_v45 }
  0x31   :  { %1390 = vmatpush3.bf16.msra.mxu0 %v1490_v45 }
  0x32   :  { %1426 = vmatpush3.bf16.msra.mxu1 %v1490_v45  ;;  %1391 = vmatprep.subr.bf16.mxu0 %v1497_v50 }
  0x33   :  { %650 = vmatmul.mubr.bf16.gmra.mrb[8].mxu0 %v1481_v46  ;;  %1419 = vmatprep.subr.bf16.mxu1 %v1497_v50 }
  0x34   :  { %747 = vmatmul.mubr.bf16.gmra.mrb[8].mxu1 %v1482_v47  ;;  %657 = vmatprep.mubr.bf16.mxu0 %v1484_v48 }
  0x35   :  { %754 = vmatprep.mubr.bf16.mxu1 %v1486_v49  ;;  %1392 = vmatpush3.bf16.msra.mxu0 %v1497_v50 }
  0x36   :  { %1427 = vmatpush3.bf16.msra.mxu1 %v1497_v50  ;;  %1393 = vmatprep.subr.bf16.mxu0 %v1504_v51 }
  0x37   :  { %1420 = vmatprep.subr.bf16.mxu1 %v1504_v51 }
  0x39   :  { %1394 = vmatpush3.bf16.msra.mxu0 %v1504_v51 }
  0x3a   :  { %1428 = vmatpush3.bf16.msra.mxu1 %v1504_v51  ;;  %1395 = vmatprep.subr.bf16.mxu0 %v1511_v55 }
  0x3b   :  { %658 = vmatmul.mubr.bf16.gmra.mrb[12].mxu0 %v1488_v52  ;;  %1421 = vmatprep.subr.bf16.mxu1 %v1511_v55 }
  0x3c   :  { %755 = vmatmul.mubr.bf16.gmra.mrb[12].mxu1 %v1489_v53  ;;  %665 = vmatprep.mubr.bf16.mxu0 %v1491_v54 }
  0x3d   :  { %762 = vmatprep.mubr.bf16.mxu1 %v1493_v56  ;;  %1396 = vmatpush3.bf16.msra.mxu0 %v1511_v55 }
  0x3e   :  { %1429 = vmatpush3.bf16.msra.mxu1 %v1511_v55  ;;  %1397 = vmatprep.subr.bf16.mxu0 %v1518_v57 }
  0x3f   :  { %1422 = vmatprep.subr.bf16.mxu1 %v1518_v57 }
  0x41   :  { %1398 = vmatpush3.bf16.msra.mxu0 %v1518_v57 }
  0x42   :  { %1430 = vmatpush3.bf16.msra.mxu1 %v1518_v57 }
  0x43   :  { %666 = vmatmul.mubr.bf16.gmra.mrb[16].mxu0 %v1495_v58 }
  0x44   :  { %763 = vmatmul.mubr.bf16.gmra.mrb[16].mxu1 %v1496_v59  ;;  %673 = vmatprep.mubr.bf16.mxu0 %v1498_v60 }
  0x45   :  { %770 = vmatprep.mubr.bf16.mxu1 %v1500_v61 }
  0x4b   :  { %674 = vmatmul.mubr.bf16.gmra.mrb[20].mxu0 %v1502_v62 }
  0x4c   :  { %771 = vmatmul.mubr.bf16.gmra.mrb[20].mxu1 %v1503_v63  ;;  %681 = vmatprep.mubr.bf16.mxu0 %v1505_v0 }
  0x4d   :  { %778 = vmatprep.mubr.bf16.mxu1 %v1507_v1 }
  0x53   :  { %682 = vmatmul.mubr.bf16.gmra.mrb[24].mxu0 %v1509_v2 }
  0x54   :  { %779 = vmatmul.mubr.bf16.gmra.mrb[24].mxu1 %v1510_v3  ;;  %689 = vmatprep.mubr.bf16.mxu0 %v1512_v4 }
  0x55   :  { %786 = vmatprep.mubr.bf16.mxu1 %v1514_v5 }
  0x5b   :  { %690 = vmatmul.mubr.bf16.gmra.mrb[28].mxu0 %v1516_v6 }
  0x5c   :  { %787 = vmatmul.mubr.bf16.gmra.mrb[28].mxu1 %v1517_v7  ;;  %1399 = vmatprep.mubr.bf16.mxu0 %v1519_v8 }
  0x5d   :  { %1407 = vmatprep.mubr.bf16.mxu1 %v1520_v9 }
  0x63   :  { %1400 = vmatmul.mubr.bf16.vlgmr.msra.gmra.mrb[32].mxu0 %v1521_v10 }
  0x64   :  { %1408 = vmatmul.mubr.bf16.vlgmr.msra.gmra.mrb[32].mxu1 %v1522_v11  ;;  %1403 = vmatprep.mubr.bf16.mxu0 %v1523_v12 }
  0x65   :  { %1411 = vmatprep.mubr.bf16.mxu1 %v1524_v13 }
  0x6b   :  { %1404 = vmatmul.mubr.bf16.gmra.mrb[36].mxu0 %v1525_v14 }
  0x6c   :  { %1412 = vmatmul.mubr.bf16.gmra.mrb[36].mxu1 %v1526_v15 }
  0xf6   :  { %v1255_v16 = vpop.f32.mrb[0].mxu0 }
  0xf7   :  { %v1319_v17 = vpop.f32.mrb[0].mxu1  ;;  %v1256_v19 = vpop.f32.mrb[1].mxu0 }
  0xf8   :  { %v1257_v20 = vadd.f32 %v1256_v19, %v1255_v16  ;;  %v1320_v21 = vpop.f32.mrb[1].mxu1  ;;  %v1258_v22 = vpop.f32.mrb[2].mxu0 }
  0xf9   :  { %v1321_v23 = vadd.f32 %v1320_v21, %v1319_v17  ;;  %v1322_v24 = vpop.f32.mrb[2].mxu1  ;;  %v1259_v25 = vpop.f32.mrb[3].mxu0 }
  0xfa   :  { %v636_v26 = vadd.f32 %v1257_v20, %v1795_v18  ;;  %v1260_v27 = vadd.f32 %v1259_v25, %v1258_v22  ;;  %v1323_v28 = vpop.f32.mrb[3].mxu1 }
  0xfb   :  { %v1324_v29 = vadd.f32 %v1323_v28, %v1322_v24 }
  0xfc   :  { %v639_v30 = vadd.f32 %v1260_v27, %v1795_v18  ;;  %v1799_v31 = vadd.f32 %v1321_v23, %v636_v26 }
  0xfe   :  { %v1261_v32 = vpop.f32.mrb[4].mxu0  ;;  %v1801_v33 = vadd.f32 %v1324_v29, %v639_v30 }
  0xff   :  { %v1325_v34 = vpop.f32.mrb[4].mxu1  ;;  %v1262_v35 = vpop.f32.mrb[5].mxu0 }
 0x100   :  { %v1263_v36 = vadd.f32 %v1262_v35, %v1261_v32  ;;  %v1326_v37 = vpop.f32.mrb[5].mxu1  ;;  %v1264_v38 = vpop.f32.mrb[6].mxu0 }
 0x101   :  { %v1327_v39 = vadd.f32 %v1326_v37, %v1325_v34  ;;  %v1328_v40 = vpop.f32.mrb[6].mxu1  ;;  %v1265_v41 = vpop.f32.mrb[7].mxu0 }
 0x102   :  { %v644_v42 = vadd.f32 %v1263_v36, %v1795_v18  ;;  %v1266_v43 = vadd.f32 %v1265_v41, %v1264_v38  ;;  %v1329_v44 = vpop.f32.mrb[7].mxu1 }
 0x103   :  { %v1330_v45 = vadd.f32 %v1329_v44, %v1328_v40 }
 0x104   :  { %v647_v46 = vadd.f32 %v1266_v43, %v1795_v18  ;;  %v1805_v47 = vadd.f32 %v1327_v39, %v644_v42 }
 0x106   :  { %v1267_v48 = vpop.f32.mrb[8].mxu0  ;;  %v1807_v49 = vadd.f32 %v1330_v45, %v647_v46 }
 0x107   :  { %v1331_v50 = vpop.f32.mrb[8].mxu1  ;;  %v1268_v51 = vpop.f32.mrb[9].mxu0 }
 0x108   :  { %v1269_v52 = vadd.f32 %v1268_v51, %v1267_v48  ;;  %v1332_v53 = vpop.f32.mrb[9].mxu1  ;;  %v1270_v54 = vpop.f32.mrb[10].mxu0 }
 0x109   :  { %v1333_v55 = vadd.f32 %v1332_v53, %v1331_v50  ;;  %v1334_v56 = vpop.f32.mrb[10].mxu1  ;;  %v1271_v57 = vpop.f32.mrb[11].mxu0 }
 0x10a   :  { %v652_v58 = vadd.f32 %v1269_v52, %v1795_v18  ;;  %v1272_v59 = vadd.f32 %v1271_v57, %v1270_v54  ;;  %v1335_v60 = vpop.f32.mrb[11].mxu1 }
 0x10b   :  { %v1336_v61 = vadd.f32 %v1335_v60, %v1334_v56 }
 0x10c   :  { %v655_v62 = vadd.f32 %v1272_v59, %v1795_v18  ;;  %v1811_v63 = vadd.f32 %v1333_v55, %v652_v58 }
 0x10e   :  { %v1273_v0 = vpop.f32.mrb[12].mxu0  ;;  %v1813_v1 = vadd.f32 %v1336_v61, %v655_v62 }
 0x10f   :  { %v1337_v2 = vpop.f32.mrb[12].mxu1  ;;  %v1274_v3 = vpop.f32.mrb[13].mxu0 }
 0x110   :  { %v1275_v4 = vadd.f32 %v1274_v3, %v1273_v0  ;;  %v1338_v5 = vpop.f32.mrb[13].mxu1  ;;  %v1276_v6 = vpop.f32.mrb[14].mxu0 }
 0x111   :  { %v1339_v7 = vadd.f32 %v1338_v5, %v1337_v2  ;;  %v1340_v8 = vpop.f32.mrb[14].mxu1  ;;  %v1277_v9 = vpop.f32.mrb[15].mxu0 }
 0x112   :  { %v660_v10 = vadd.f32 %v1275_v4, %v1795_v18  ;;  %v1278_v11 = vadd.f32 %v1277_v9, %v1276_v6  ;;  %v1341_v12 = vpop.f32.mrb[15].mxu1 }
 0x113   :  { %v1342_v13 = vadd.f32 %v1341_v12, %v1340_v8 }
 0x114   :  { %v663_v14 = vadd.f32 %v1278_v11, %v1795_v18  ;;  %v1817_v15 = vadd.f32 %v1339_v7, %v660_v10 }
 0x116   :  { %v1279_v16 = vpop.f32.mrb[16].mxu0  ;;  %v1819_v17 = vadd.f32 %v1342_v13, %v663_v14 }
 0x117   :  { %v1343_v19 = vpop.f32.mrb[16].mxu1  ;;  %v1280_v20 = vpop.f32.mrb[17].mxu0 }
 0x118   :  { %v1281_v21 = vadd.f32 %v1280_v20, %v1279_v16  ;;  %v1344_v22 = vpop.f32.mrb[17].mxu1  ;;  %v1282_v23 = vpop.f32.mrb[18].mxu0 }
 0x119   :  { %v1345_v24 = vadd.f32 %v1344_v22, %v1343_v19  ;;  %v1346_v25 = vpop.f32.mrb[18].mxu1  ;;  %v1283_v26 = vpop.f32.mrb[19].mxu0 }
 0x11a   :  { %v668_v27 = vadd.f32 %v1281_v21, %v1795_v18  ;;  %v1284_v28 = vadd.f32 %v1283_v26, %v1282_v23  ;;  %v1347_v29 = vpop.f32.mrb[19].mxu1  ;;  %v1225_v23 = vld [vmem:[%s1922_s3 + $0x8] sm:$0xff]  }
 0x11b   :  { %v1348_v30 = vadd.f32 %v1347_v29, %v1346_v25  ;;  %v1154_v25 = vld [vmem:[%s1922_s3] sm:$0xff]   ;;  %v1854_v29 = vld [vmem:[%s1922_s3 + $0x18] sm:$0xff]  }
 0x11c   :  { %v671_v32 = vadd.f32 %v1284_v28, %v1795_v18  ;;  %v1823_v34 = vadd.f32 %v1345_v24, %v668_v27  ;;  %v1229_v24 = vld [vmem:[%s1922_s3 + $0x28] sm:$0xff]   ;;  %v1228_v27 = vld [vmem:[%s1922_s3 + $0x20] sm:$0xff]  }
 0x11e   :  { %v1285_v35 = vpop.f32.mrb[20].mxu0  ;;  %v1825_v36 = vadd.f32 %v1348_v30, %v671_v32  ;;  %v1159_v32 = vunpack.c.l.bf16 %v1225_v23 }
 0x11f   :  { %v1349_v37 = vpop.f32.mrb[20].mxu1  ;;  %v1286_v38 = vpop.f32.mrb[21].mxu0 }
 0x120   :  { %v1287_v39 = vadd.f32 %v1286_v38, %v1285_v35  ;;  %v1350_v40 = vpop.f32.mrb[21].mxu1  ;;  %v1288_v41 = vpop.f32.mrb[22].mxu0  ;;  %v1175_v35 = vunpack.c.l.bf16 %v1229_v24  ;;  %v1859_v38 = vld [vmem:[%s1922_s3 + $0x38] sm:$0xff]  }
 0x121   :  { %v1351_v42 = vadd.f32 %v1350_v40, %v1349_v37  ;;  %v1352_v43 = vpop.f32.mrb[22].mxu1  ;;  %v1289_v44 = vpop.f32.mrb[23].mxu0  ;;  %v1155_v37 = vunpack.c.l.bf16 %v1154_v25  ;;  %v1171_v40 = vunpack.c.l.bf16 %v1228_v27 }
 0x122   :  { %v676_v45 = vadd.f32 %v1287_v39, %v1795_v18  ;;  %v1290_v46 = vadd.f32 %v1289_v44, %v1288_v41  ;;  %v1353_v48 = vpop.f32.mrb[23].mxu1  ;;  %v1864_v39 = vld [vmem:[%s1922_s3 + $0x10] sm:$0xff]   ;;  %v1160_v41 = vunpack.c.h.bf16 %v1225_v23 }
 0x123   :  { %v1354_v50 = vadd.f32 %v1353_v48, %v1352_v43  ;;  %v1869_v43 = vld [vmem:[%s1922_s3 + $0x30] sm:$0xff]  }
 0x124   :  { %v679_v51 = vadd.f32 %v1290_v46, %v1795_v18  ;;  %v773_v52 = vadd.f32 %v1351_v42, %v676_v45  ;;  %v1176_v42 = vunpack.c.h.bf16 %v1229_v24 }
 0x126   :  { %v1291_v53 = vpop.f32.mrb[24].mxu0  ;;  %v1829_v54 = vadd.f32 %v1354_v50, %v679_v51  ;;  %v1156_v50 = vunpack.c.h.bf16 %v1154_v25  ;;  %v1172_v51 = vunpack.c.h.bf16 %v1228_v27 }
 0x127   :  { %v1355_v55 = vpop.f32.mrb[24].mxu1  ;;  %v1292_v56 = vpop.f32.mrb[25].mxu0 }
 0x128   :  { %v1293_v57 = vadd.f32 %v1292_v56, %v1291_v53  ;;  %v1356_v58 = vpop.f32.mrb[25].mxu1  ;;  %v1294_v59 = vpop.f32.mrb[26].mxu0  ;;  %v1167_v53 = vunpack.c.l.bf16 %v1854_v29 }
 0x129   :  { %v1357_v60 = vadd.f32 %v1356_v58, %v1355_v55  ;;  %v1358_v61 = vpop.f32.mrb[26].mxu1  ;;  %v1295_v62 = vpop.f32.mrb[27].mxu0 }
 0x12a   :  { %v684_v0 = vadd.f32 %v1293_v57, %v1795_v18  ;;  %v1296_v2 = vadd.f32 %v1295_v62, %v1294_v59  ;;  %v1359_v3 = vpop.f32.mrb[27].mxu1  ;;  %v1183_v59 = vunpack.c.l.bf16 %v1859_v38 }
 0x12b   :  { %v1360_v4 = vadd.f32 %v1359_v3, %v1358_v61  ;;  %v1179_v3 = vunpack.c.l.bf16 %v1869_v43 }
 0x12c   :  { %v687_v5 = vadd.f32 %v1296_v2, %v1795_v18  ;;  %v1833_v6 = vadd.f32 %v1357_v60, %v684_v0  ;;  %v1163_v60 = vunpack.c.l.bf16 %v1864_v39 }
 0x12e   :  { %v1297_v7 = vpop.f32.mrb[28].mxu0  ;;  %v1835_v8 = vadd.f32 %v1360_v4, %v687_v5 }
 0x12f   :  { %v1361_v9 = vpop.f32.mrb[28].mxu1  ;;  %v1298_v10 = vpop.f32.mrb[29].mxu0 }
 0x130   :  { %v1299_v11 = vadd.f32 %v1298_v10, %v1297_v7  ;;  %v1362_v12 = vpop.f32.mrb[29].mxu1  ;;  %v1300_v13 = vpop.f32.mrb[30].mxu0 }
 0x131   :  { %v1363_v14 = vadd.f32 %v1362_v12, %v1361_v9  ;;  %v1364_v16 = vpop.f32.mrb[30].mxu1  ;;  %v1301_v19 = vpop.f32.mrb[31].mxu0  ;;  %v1168_v12 = vunpack.c.h.bf16 %v1854_v29 }
 0x132   :  { %v692_v20 = vadd.f32 %v1299_v11, %v1795_v18  ;;  %v1302_v21 = vadd.f32 %v1301_v19, %v1300_v13  ;;  %v1365_v22 = vpop.f32.mrb[31].mxu1 }
 0x133   :  { %v1366_v26 = vadd.f32 %v1365_v22, %v1364_v16 }
 0x134   :  { %v695_v28 = vadd.f32 %v1302_v21, %v1795_v18  ;;  %v789_v30 = vadd.f32 %v1363_v14, %v692_v20  ;;  %v1164_v14 = vunpack.c.h.bf16 %v1864_v39 }
 0x136   :  { %v1401_v18 = vpop.f32.mrb[32].mxu0  ;;  %v1871_v44 = vadd.f32 %v1366_v26, %v695_v28 }
 0x137   :  { %v838_v45 = vadd.f32 %v1401_v18, %v1805_v47  ;;  %v1409_v46 = vpop.f32.mrb[32].mxu1  ;;  %v829_v48 = vpop.f32.mrb[33].mxu0 }
 0x138   :  { %v870_v55 = vadd.f32 %v1409_v46, %v773_v52  ;;  %v830_v56 = vadd.f32 %v829_v48, %v1799_v31  ;;  %v861_v57 = vpop.f32.mrb[33].mxu1  ;;  %v1402_v58 = vpop.f32.mrb[34].mxu0 }
 0x139   :  { %v926_v61 = vadd.f32 %v1159_v32, %v838_v45  ;;  %v862_v62 = vadd.f32 %v861_v57, %v1823_v34  ;;  %v841_v47 = vadd.f32 %v1402_v58, %v1807_v49  ;;  %v1410_v0 = vpop.f32.mrb[34].mxu1  ;;  %v832_v2 = vpop.f32.mrb[35].mxu0  ;;  %v1184_v49 = vunpack.c.h.bf16 %v1859_v38 }
 0x13a   :  { %v934_v4 = vadd.f32 %v1175_v35, %v870_v55  ;;  %v924_v5 = vadd.f32 %v1155_v37, %v830_v56  ;;  %v873_v52 = vadd.f32 %v1410_v0, %v1829_v54  ;;  %v833_v31 = vadd.f32 %v832_v2, %v1801_v33  ;;  %v864_v7 = vpop.f32.mrb[35].mxu1 }
 0x13b   :  { %v932_v9 = vadd.f32 %v1171_v40, %v862_v62  ;;  %v927_v10 = vadd.f32 %v1160_v41, %v841_v47  ;;  %v865_v11 = vadd.f32 %v864_v7, %v1825_v36  ;;  %v942_v16 = vmax.f32 %v926_v61, 0.0 }
 0x13c   :  { %v935_v34 = vadd.f32 %v1176_v42, %v873_v52  ;;  %v925_v13 = vadd.f32 %v1156_v50, %v833_v31  ;;  %v1180_v54 = vunpack.c.h.bf16 %v1869_v43  ;;  %v950_v21 = vmax.f32 %v934_v4, 0.0 }
 0x13d   :  { %v943_v19 = vmax.f32 %v927_v10, 0.0  ;;  %v933_v20 = vadd.f32 %v1172_v51, %v865_v11  ;;  %v940_v33 = vmax.f32 %v924_v5, 0.0  ;;  %v948_v25 = vmax.f32 %v932_v9, 0.0 }
 0x13e   :  { %v951_v22 = vmax.f32 %v935_v34, 0.0  ;;  %v941_v23 = vmax.f32 %v925_v13, 0.0  ;;  %v1405_v24 = vpop.f32.mrb[36].mxu0 }
 0x13f   :  { %v1193_v36 = vpack.c.bf16 %v943_v19, %v942_v16  ;;  %v949_v26 = vmax.f32 %v933_v20, 0.0  ;;  %v854_v27 = vadd.f32 %v1405_v24, %v1817_v15  ;;  %v1413_v28 = vpop.f32.mrb[36].mxu1  ;;  %v845_v29 = vpop.f32.mrb[37].mxu0 }
 0x140   :  { %v1213_v32 = vpack.c.bf16 %v951_v22, %v950_v21  ;;  %v1188_v35 = vpack.c.bf16 %v941_v23, %v940_v33  ;;  %v886_v37 = vadd.f32 %v1413_v28, %v789_v30  ;;  %v846_v38 = vadd.f32 %v845_v29, %v1811_v63  ;;  %v877_v39 = vpop.f32.mrb[37].mxu1  ;;  %v1406_v18 = vpop.f32.mrb[38].mxu0 }
 0x141   :  { %1232 = vst [vmem:[%s1923_s4 + $0x8] sm:$0xff] %v1193_v36   ;;  %v1208_v40 = vpack.c.bf16 %v949_v26, %v948_v25  ;;  %v930_v41 = vadd.f32 %v1167_v53, %v854_v27  ;;  %v878_v42 = vadd.f32 %v877_v39, %v1833_v6  ;;  %v857_v43 = vadd.f32 %v1406_v18, %v1819_v17  ;;  %v1414_v15 = vpop.f32.mrb[38].mxu1  ;;  %v848_v45 = vpop.f32.mrb[39].mxu0 }
 0x142   :  { %1236 = vst [vmem:[%s1923_s4 + $0x28] sm:$0xff] %v1213_v32   ;;  %1189 = vst [vmem:[%s1923_s4] sm:$0xff] %v1188_v35   ;;  %v938_v63 = vadd.f32 %v1183_v59, %v886_v37  ;;  %v928_v30 = vadd.f32 %v1163_v60, %v846_v38  ;;  %v889_v46 = vadd.f32 %v1414_v15, %v1871_v44  ;;  %v880_v50 = vpop.f32.mrb[39].mxu1 }
 0x143   :  { %v849_v48 = vadd.f32 %v848_v45, %v1813_v1  ;;  %1235 = vst [vmem:[%s1923_s4 + $0x20] sm:$0xff] %v1208_v40   ;;  %v936_v17 = vadd.f32 %v1179_v3, %v878_v42  ;;  %v931_v6 = vadd.f32 %v1168_v12, %v857_v43  ;;  %v881_v51 = vadd.f32 %v880_v50, %v1835_v8 }
 0x144   :  { %v939_v53 = vadd.f32 %v1184_v49, %v889_v46  ;;  %v946_v56 = vmax.f32 %v930_v41, 0.0  ;;  %v954_v59 = vmax.f32 %v938_v63, 0.0  ;;  %v944_v60 = vmax.f32 %v928_v30, 0.0 }
 0x145   :  { %v929_v55 = vadd.f32 %v1164_v14, %v849_v48  ;;  %v947_v57 = vmax.f32 %v931_v6, 0.0  ;;  %v937_v58 = vadd.f32 %v1180_v54, %v881_v51  ;;  %v952_v62 = vmax.f32 %v936_v17, 0.0 }
 0x146   :  { %v955_v61 = vmax.f32 %v939_v53, 0.0 }
 0x147   :  { %v945_v44 = vmax.f32 %v929_v55, 0.0  ;;  %v1203_v1 = vpack.c.bf16 %v947_v57, %v946_v56  ;;  %v953_v47 = vmax.f32 %v937_v58, 0.0 }
 0x148   :  { %v1223_v0 = vpack.c.bf16 %v955_v61, %v954_v59 }
 0x149   :  { %v1198_v2 = vpack.c.bf16 %v945_v44, %v944_v60  ;;  %1234 = vst [vmem:[%s1923_s4 + $0x18] sm:$0xff] %v1203_v1   ;;  %v1218_v3 = vpack.c.bf16 %v953_v47, %v952_v62 }
 0x14a   :  { %1238 = vst [vmem:[%s1923_s4 + $0x38] sm:$0xff] %v1223_v0  }
 0x14b   :  { %1233 = vst [vmem:[%s1923_s4 + $0x10] sm:$0xff] %v1198_v2   ;;  %1237 = vst [vmem:[%s1923_s4 + $0x30] sm:$0xff] %v1218_v3  }

// kernel: _lambda_.28
= control target key start
LH: loop header
LB: loop body
LE: loop exit
PB: predicated region body
PF: predicated region fallthrough
CT: control target
= control target key end

     0   :  { %s970_s1 = inlined_call_operand.vmem [shape: bf16[640,128], index: 1, kind: input, shape index: {}]   ;;  %s971_s0 = inlined_call_operand.vmem [shape: bf16[32,640], index: 0, kind: input, shape index: {}]   ;;  %s972_s2 = inlined_call_operand.vmem [shape: f32[1,128], index: 2, kind: input, shape index: {}]   ;;  %s973_s3 = inlined_call_operand.vmem [shape: bf16[32,128], index: 3, kind: output, shape index: {}]  }
   0x1   :  { %v737_v0 = vld [vmem:[%s970_s1 + $0x40] sm:$0xff]   ;;  %v741_v4 = vld [vmem:[%s970_s1 + $0x48] sm:$0xff]   ;;  %v745_v8 = vld [vmem:[%s970_s1 + $0x50] sm:$0xff]  }
   0x2   :  { %v738_v1 = vld [vmem:[%s970_s1] sm:$0xff]   ;;  %651 = vmatprep.subr.bf16.mxu0 %v737_v0  ;;  %v742_v5 = vld [vmem:[%s970_s1 + $0x8] sm:$0xff]   ;;  %v746_v9 = vld [vmem:[%s970_s1 + $0x10] sm:$0xff]  }
   0x3   :  { %v739_v2 = vld [vmem:[%s970_s1 + $0xc0] sm:$0xff]   ;;  %652 = vmatpush3.bf16.msra.mxu0 %v738_v1  ;;  %v743_v6 = vld [vmem:[%s970_s1 + $0xc8] sm:$0xff]   ;;  %v747_v10 = vld [vmem:[%s970_s1 + $0xd0] sm:$0xff]  }
   0x4   :  { %v740_v3 = vld [vmem:[%s970_s1 + $0x80] sm:$0xff]   ;;  %679 = vmatprep.subr.bf16.mxu1 %v739_v2  ;;  %653 = vmatprep.subr.bf16.mxu0 %v741_v4  ;;  %v744_v7 = vld [vmem:[%s970_s1 + $0x88] sm:$0xff]   ;;  %v748_v11 = vld [vmem:[%s970_s1 + $0x90] sm:$0xff]  }
   0x5   :  { %680 = vmatpush3.bf16.msra.mxu1 %v740_v3  ;;  %v749_v12 = vld [vmem:[%s970_s1 + $0x58] sm:$0xff]   ;;  %v753_v16 = vld [vmem:[%s970_s1 + $0x60] sm:$0xff]   ;;  %v757_v20 = vld [vmem:[%s970_s1 + $0x68] sm:$0xff]  }
   0x6   :  { %681 = vmatprep.subr.bf16.mxu1 %v743_v6  ;;  %v750_v13 = vld [vmem:[%s970_s1 + $0x18] sm:$0xff]   ;;  %v754_v17 = vld [vmem:[%s970_s1 + $0x20] sm:$0xff]   ;;  %v758_v21 = vld [vmem:[%s970_s1 + $0x28] sm:$0xff]  }
   0x7   :  { %654 = vmatpush3.bf16.msra.mxu0 %v742_v5  ;;  %v751_v14 = vld [vmem:[%s970_s1 + $0xd8] sm:$0xff]   ;;  %v755_v18 = vld [vmem:[%s970_s1 + $0xe0] sm:$0xff]   ;;  %v759_v22 = vld [vmem:[%s970_s1 + $0xe8] sm:$0xff]  }
   0x8   :  { %655 = vmatprep.subr.bf16.mxu0 %v745_v8  ;;  %v752_v15 = vld [vmem:[%s970_s1 + $0x98] sm:$0xff]   ;;  %v756_v19 = vld [vmem:[%s970_s1 + $0xa0] sm:$0xff]   ;;  %v760_v23 = vld [vmem:[%s970_s1 + $0xa8] sm:$0xff]  }
   0x9   :  { %682 = vmatpush3.bf16.msra.mxu1 %v744_v7  ;;  %v761_v24 = vld [vmem:[%s970_s1 + $0x70] sm:$0xff]   ;;  %v765_v28 = vld [vmem:[%s970_s1 + $0x78] sm:$0xff]   ;;  %v772_v34 = vld [vmem:[%s970_s1 + $0x100] sm:$0xff]  }
   0xa   :  { %683 = vmatprep.subr.bf16.mxu1 %v747_v10  ;;  %v762_v25 = vld [vmem:[%s970_s1 + $0x30] sm:$0xff]   ;;  %v766_v29 = vld [vmem:[%s970_s1 + $0x38] sm:$0xff]   ;;  %v775_v36 = vld [vmem:[%s971_s0 + $0xc] ss:$20 sps:$4 sm:$0xff]  }
   0xb   :  { %656 = vmatpush3.bf16.msra.mxu0 %v746_v9  ;;  %v763_v26 = vld [vmem:[%s970_s1 + $0xf0] sm:$0xff]   ;;  %v767_v30 = vld [vmem:[%s970_s1 + $0xf8] sm:$0xff]   ;;  %v776_v37 = vld [vmem:[%s970_s1 + $0x108] sm:$0xff]   ;;  %487 = vmatprep.mubr.bf16.mxu1 %v775_v36 }
   0xc   :  { %657 = vmatprep.subr.bf16.mxu0 %v749_v12  ;;  %v764_v27 = vld [vmem:[%s970_s1 + $0xb0] sm:$0xff]   ;;  %v770_v32 = vld [vmem:[%s971_s0 + $0x4] ss:$20 sps:$4 sm:$0xff]   ;;  %v773_v35 = vld [vmem:[%s971_s0 + $0x8] ss:$20 sps:$4 sm:$0xff]  }
   0xd   :  { %684 = vmatpush3.bf16.msra.mxu1 %v748_v11  ;;  %v768_v31 = vld [vmem:[%s971_s0] ss:$20 sps:$4 sm:$0xff]   ;;  %v771_v33 = vld [vmem:[%s970_s1 + $0xb8] sm:$0xff]   ;;  %438 = vmatprep.mubr.bf16.mxu0 %v770_v32  ;;  %v786_v43 = vld [vmem:[%s971_s0 + $0x30] ss:$20 sps:$4 sm:$0xff]  }
   0xe   :  { %685 = vmatprep.subr.bf16.mxu1 %v751_v14  ;;  %v777_v38 = vld [vmem:[%s970_s1 + $0x110] sm:$0xff]   ;;  %v780_v39 = vld [vmem:[%s971_s0 + $0x2c] ss:$20 sps:$4 sm:$0xff]   ;;  %v778_v40 = vld [vmem:[%s970_s1 + $0x118] sm:$0xff]  }
   0xf   :  { %658 = vmatpush3.bf16.msra.mxu0 %v750_v13  ;;  %v783_v41 = vld [vmem:[%s971_s0 + $0x28] ss:$20 sps:$4 sm:$0xff]   ;;  %v779_v44 = vld [vmem:[%s970_s1 + $0x120] sm:$0xff]   ;;  %v787_v47 = vld [vmem:[%s970_s1 + $0x130] sm:$0xff]  }
  0x10   :  { %659 = vmatprep.subr.bf16.mxu0 %v753_v16  ;;  %v784_v42 = vld [vmem:[%s971_s0 + $0x34] ss:$20 sps:$4 sm:$0xff]   ;;  %v789_v45 = vld [vmem:[%s971_s0 + $0x10] ss:$20 sps:$4 sm:$0xff]   ;;  %v788_v48 = vld [vmem:[%s970_s1 + $0x138] sm:$0xff]  }
  0x11   :  { %686 = vmatpush3.bf16.msra.mxu1 %v752_v15  ;;  %v782_v46 = vld [vmem:[%s970_s1 + $0x128] sm:$0xff]   ;;  %v581_v51 = vld [vmem:[%s972_s2] ss:$0 sm:$0xff] }
  0x12   :  { %687 = vmatprep.subr.bf16.mxu1 %v755_v18  ;;  %v790_v49 = vld [vmem:[%s971_s0 + $0x38] ss:$20 sps:$4 sm:$0xff]  }
  0x13   :  { %660 = vmatpush3.bf16.msra.mxu0 %v754_v17 }
  0x14   :  { %661 = vmatprep.subr.bf16.mxu0 %v757_v20 }
  0x15   :  { %688 = vmatpush3.bf16.msra.mxu1 %v756_v19 }
  0x16   :  { %689 = vmatprep.subr.bf16.mxu1 %v759_v22 }
  0x17   :  { %662 = vmatpush3.bf16.msra.mxu0 %v758_v21 }
  0x18   :  { %663 = vmatprep.subr.bf16.mxu0 %v761_v24 }
  0x19   :  { %690 = vmatpush3.bf16.msra.mxu1 %v760_v23 }
  0x1a   :  { %691 = vmatprep.subr.bf16.mxu1 %v763_v26 }
  0x1b   :  { %664 = vmatpush3.bf16.msra.mxu0 %v762_v25 }
  0x1c   :  { %665 = vmatprep.subr.bf16.mxu0 %v765_v28 }
  0x1d   :  { %692 = vmatpush3.bf16.msra.mxu1 %v764_v27 }
  0x1e   :  { %693 = vmatprep.subr.bf16.mxu1 %v767_v30 }
  0x1f   :  { %666 = vmatpush3.bf16.msra.mxu0 %v766_v29 }
  0x20   :  { %717 = vmatprep.subr.bf16.mxu0 %v772_v34 }
  0x21   :  { %694 = vmatpush3.bf16.msra.mxu1 %v771_v33 }
  0x22   :  { %439 = vmatmul.mubr.bf16.vlgmr.msra.gmra.mrb[0].mxu0 %v768_v31 }
  0x23   :  { %718 = vmatpush3.bf16.msra.mxu0 %v772_v34  ;;  %446 = vmatprep.mubr.bf16.mxu0 %v780_v39 }
  0x24   :  { %488 = vmatmul.mubr.bf16.vlgmr.msra.gmra.mrb[0].mxu1 %v773_v35  ;;  %719 = vmatprep.subr.bf16.mxu0 %v776_v37 }
  0x25   :  { %495 = vmatprep.mubr.bf16.mxu1 %v784_v42 }
  0x27   :  { %720 = vmatpush3.bf16.msra.mxu0 %v776_v37 }
  0x28   :  { %721 = vmatprep.subr.bf16.mxu0 %v777_v38 }
  0x2a   :  { %447 = vmatmul.mubr.bf16.gmra.mrb[4].mxu0 %v783_v41 }
  0x2b   :  { %722 = vmatpush3.bf16.msra.mxu0 %v777_v38  ;;  %733 = vmatprep.mubr.bf16.mxu0 %v789_v45 }
  0x2c   :  { %723 = vmatprep.subr.bf16.mxu0 %v778_v40  ;;  %496 = vmatmul.mubr.bf16.gmra.mrb[4].mxu1 %v786_v43 }
  0x2f   :  { %724 = vmatpush3.bf16.msra.mxu0 %v778_v40 }
  0x30   :  { %725 = vmatprep.subr.bf16.mxu0 %v779_v44 }
  0x33   :  { %726 = vmatpush3.bf16.msra.mxu0 %v779_v44 }
  0x34   :  { %727 = vmatprep.subr.bf16.mxu0 %v782_v46 }
  0x37   :  { %728 = vmatpush3.bf16.msra.mxu0 %v782_v46 }
  0x38   :  { %729 = vmatprep.subr.bf16.mxu0 %v787_v47 }
  0x3b   :  { %730 = vmatpush3.bf16.msra.mxu0 %v787_v47 }
  0x3c   :  { %731 = vmatprep.subr.bf16.mxu0 %v788_v48 }
  0x3f   :  { %732 = vmatpush3.bf16.msra.mxu0 %v788_v48 }
  0x42   :  { %734 = vmatmul.mubr.bf16.vlgmr.msra.gmra.mrb[8].mxu0 %v790_v49 }
  0xf5   :  { %v667_v50 = vpop.f32.mrb[0].mxu0 }
  0xf6   :  { %v668_v52 = vpop.f32.mrb[1].mxu0 }
  0xf7   :  { %v669_v53 = vadd.f32 %v668_v52, %v667_v50  ;;  %v670_v54 = vpop.f32.mrb[2].mxu0  ;;  %v695_v55 = vpop.f32.mrb[0].mxu1 }
  0xf8   :  { %v671_v56 = vpop.f32.mrb[3].mxu0  ;;  %v696_v59 = vpop.f32.mrb[1].mxu1 }
  0xf9   :  { %v441_v57 = vadd.f32 %v669_v53, %v581_v51  ;;  %v672_v58 = vadd.f32 %v671_v56, %v670_v54  ;;  %v697_v60 = vadd.f32 %v696_v59, %v695_v55  ;;  %v698_v61 = vpop.f32.mrb[2].mxu1 }
  0xfa   :  { %v699_v63 = vpop.f32.mrb[3].mxu1 }
  0xfb   :  { %v444_v62 = vadd.f32 %v672_v58, %v581_v51  ;;  %v700_v0 = vadd.f32 %v699_v63, %v698_v61  ;;  %v490_v1 = vadd.f32 %v697_v60, %v441_v57 }
  0xfd   :  { %v673_v2 = vpop.f32.mrb[4].mxu0  ;;  %v493_v4 = vadd.f32 %v700_v0, %v444_v62 }
  0xfe   :  { %v674_v3 = vpop.f32.mrb[5].mxu0 }
  0xff   :  { %v675_v5 = vadd.f32 %v674_v3, %v673_v2  ;;  %v676_v6 = vpop.f32.mrb[6].mxu0  ;;  %v701_v7 = vpop.f32.mrb[4].mxu1 }
 0x100   :  { %v677_v8 = vpop.f32.mrb[7].mxu0  ;;  %v702_v11 = vpop.f32.mrb[5].mxu1 }
 0x101   :  { %v449_v9 = vadd.f32 %v675_v5, %v581_v51  ;;  %v678_v10 = vadd.f32 %v677_v8, %v676_v6  ;;  %v703_v12 = vadd.f32 %v702_v11, %v701_v7  ;;  %v704_v13 = vpop.f32.mrb[6].mxu1 }
 0x102   :  { %v705_v15 = vpop.f32.mrb[7].mxu1 }
 0x103   :  { %v452_v14 = vadd.f32 %v678_v10, %v581_v51  ;;  %v706_v16 = vadd.f32 %v705_v15, %v704_v13  ;;  %v498_v17 = vadd.f32 %v703_v12, %v449_v9 }
 0x105   :  { %v501_v18 = vadd.f32 %v706_v16, %v452_v14 }
 0x115   :  { %v735_v19 = vpop.f32.mrb[8].mxu0 }
 0x116   :  { %v547_v20 = vadd.f32 %v735_v19, %v498_v17  ;;  %v538_v21 = vpop.f32.mrb[9].mxu0 }
 0x117   :  { %v539_v22 = vadd.f32 %v538_v21, %v490_v1  ;;  %v736_v23 = vpop.f32.mrb[10].mxu0 }
 0x118   :  { %v550_v24 = vadd.f32 %v736_v23, %v501_v18  ;;  %v541_v25 = vpop.f32.mrb[11].mxu0  ;;  %v555_v27 = vmax.f32 %v547_v20, 0.0 }
 0x119   :  { %v542_v26 = vadd.f32 %v541_v25, %v493_v4  ;;  %v553_v29 = vmax.f32 %v539_v22, 0.0 }
 0x11a   :  { %v556_v28 = vmax.f32 %v550_v24, 0.0 }
 0x11b   :  { %v554_v30 = vmax.f32 %v542_v26, 0.0 }
 0x11c   :  { %v648_v31 = vpack.c.bf16 %v556_v28, %v555_v27 }
 0x11d   :  { %v643_v32 = vpack.c.bf16 %v554_v30, %v553_v29 }
 0x11e   :  { %650 = vst [vmem:[%s973_s3 + $0x8] sm:$0xff] %v648_v31  }
 0x11f   :  { %644 = vst [vmem:[%s973_s3] sm:$0xff] %v643_v32  }

// kernel: _lambda_.29
= control target key start
LH: loop header
LB: loop body
LE: loop exit
PB: predicated region body
PF: predicated region fallthrough
CT: control target
= control target key end

     0   :  { %s304_s1 = inlined_call_operand.vmem [shape: bf16[128,128], index: 1, kind: input, shape index: {}]   ;;  %s305_s0 = inlined_call_operand.vmem [shape: bf16[32,128], index: 0, kind: input, shape index: {}]   ;;  %s306_s2 = inlined_call_operand.vmem [shape: f32[1,128], index: 2, kind: input, shape index: {}]   ;;  %s307_s3 = inlined_call_operand.vmem [shape: bf16[32,128], index: 3, kind: output, shape index: {}]  }
   0x1   :  { %v235_v0 = vld [vmem:[%s304_s1] sm:$0xff]   ;;  %v236_v1 = vld [vmem:[%s304_s1 + $0x8] sm:$0xff]   ;;  %v237_v2 = vld [vmem:[%s304_s1 + $0x10] sm:$0xff]  }
   0x2   :  { %215 = vmatprep.subr.bf16.mxu0 %v235_v0  ;;  %v238_v3 = vld [vmem:[%s304_s1 + $0x18] sm:$0xff]   ;;  %v243_v4 = vld [vmem:[%s305_s0] sm:$0xff]   ;;  %v240_v6 = vld [vmem:[%s304_s1 + $0x28] sm:$0xff]  }
   0x3   :  { %216 = vmatpush3.bf16.msra.mxu0 %v235_v0  ;;  %231 = vmatprep.mubr.bf16.mxu0 %v243_v4  ;;  %v239_v5 = vld [vmem:[%s304_s1 + $0x20] sm:$0xff]   ;;  %v241_v7 = vld [vmem:[%s304_s1 + $0x30] sm:$0xff]   ;;  %v242_v8 = vld [vmem:[%s304_s1 + $0x38] sm:$0xff]  }
   0x4   :  { %217 = vmatprep.subr.bf16.mxu0 %v236_v1  ;;  %v244_v9 = vld [vmem:[%s305_s0 + $0x8] sm:$0xff]   ;;  %v175_v11 = vld [vmem:[%s306_s2] ss:$0 sm:$0xff] }
   0x7   :  { %218 = vmatpush3.bf16.msra.mxu0 %v236_v1 }
   0x8   :  { %219 = vmatprep.subr.bf16.mxu0 %v237_v2 }
   0xb   :  { %220 = vmatpush3.bf16.msra.mxu0 %v237_v2 }
   0xc   :  { %221 = vmatprep.subr.bf16.mxu0 %v238_v3 }
   0xf   :  { %222 = vmatpush3.bf16.msra.mxu0 %v238_v3 }
  0x10   :  { %223 = vmatprep.subr.bf16.mxu0 %v239_v5 }
  0x13   :  { %224 = vmatpush3.bf16.msra.mxu0 %v239_v5 }
  0x14   :  { %225 = vmatprep.subr.bf16.mxu0 %v240_v6 }
  0x17   :  { %226 = vmatpush3.bf16.msra.mxu0 %v240_v6 }
  0x18   :  { %227 = vmatprep.subr.bf16.mxu0 %v241_v7 }
  0x1b   :  { %228 = vmatpush3.bf16.msra.mxu0 %v241_v7 }
  0x1c   :  { %229 = vmatprep.subr.bf16.mxu0 %v242_v8 }
  0x1f   :  { %230 = vmatpush3.bf16.msra.mxu0 %v242_v8 }
  0x22   :  { %232 = vmatmul.mubr.bf16.vlgmr.msra.gmra.mrb[0].mxu0 %v244_v9 }
  0xf5   :  { %v233_v10 = vpop.f32.mrb[0].mxu0 }
  0xf6   :  { %v136_v12 = vpop.f32.mrb[1].mxu0  ;;  %v145_v14 = vadd.f32 %v233_v10, %v175_v11 }
  0xf7   :  { %v234_v13 = vpop.f32.mrb[2].mxu0  ;;  %v137_v17 = vadd.f32 %v175_v11, %v136_v12 }
  0xf8   :  { %v148_v15 = vadd.f32 %v234_v13, %v175_v11  ;;  %v139_v16 = vpop.f32.mrb[3].mxu0 }
  0xf9   :  { %v140_v18 = vadd.f32 %v175_v11, %v139_v16 }
  0xfa   :  { %v202_v19 = vpack.c.bf16 %v148_v15, %v145_v14 }
  0xfb   :  { %v197_v20 = vpack.c.bf16 %v140_v18, %v137_v17 }
  0xfc   :  { %204 = vst [vmem:[%s307_s3 + $0x8] sm:$0xff] %v202_v19  }
  0xfd   :  { %198 = vst [vmem:[%s307_s3] sm:$0xff] %v197_v20  }

// kernel: _lambda_.30
= control target key start
LH: loop header
LB: loop body
LE: loop exit
PB: predicated region body
PF: predicated region fallthrough
CT: control target
= control target key end

     0   :  { %s1179_s15 = smov 0   ;;  %s1181_s16 = smov 0   ;;  %s1296_s0 = inlined_call_operand.vmem [shape: bf16[32,1152], index: 0, kind: input, shape index: {}]   ;;  %s1297_s1 = inlined_call_operand.vmem [shape: bf16[1152,128], index: 1, kind: input, shape index: {}]   ;;  %s1298_s2 = inlined_call_operand.vmem [shape: f32[1,128], index: 2, kind: input, shape index: {}]   ;;  %s1299_s3 = inlined_call_operand.vmem [shape: bf16[32,128], index: 3, kind: input, shape index: {}]   ;;  %s1300_s4 = inlined_call_operand.vmem [shape: bf16[32,128], index: 4, kind: output, shape index: {}]  }
   0x1   :  { %s1183_s17 = smov 0   ;;  %s1185_s18 = smov 0  }
   0x2   :  { %s1187_s19 = smov 0  }
   0x3 LB: > { %s26_s20 = sadd.s32 1, %s1148_s18  ;;  %p49_p1 = scmp.ne.s32.totalorder %s1140_s16, %s1136_s15  ;;  %s1152_s19 = sphi %s1187_s19, %s14_s19   ;;  %s1148_s18 = sphi %s1185_s18, %s1304_s18   ;;  %s1144_s17 = sphi %s1183_s17, %s1303_s17   ;;  %s1140_s16 = sphi %s1181_s16, %s1302_s16   ;;  %s1136_s15 = sphi %s1179_s15, %s1301_s15  }
   0x4   : > { %p27_p0 = scmp.ge.s32.totalorder %s26_s20, 3  ;;  %p50_p2 = scmp.eq.s32.totalorder %s1152_s19, 0 }
   0x5   : > { %s42_s22 = sadd.s32 1, %s1140_s16  ;;  %p903_p5 = scmp.ge.s32.totalorder %s1152_s19, 3 }
   0x6   : > { %s1306_s20 = smov (%p27_p0, %s26_s20), 0  ;;  %p51_p3 = por %p50_p2, %p49_p1 }
   0x7   : > { %s38_s21 = ssub.s32 %s1148_s18, %s1306_s20  ;;  %203 = sbr.rel (%p903_p5) target bundleno = 23 (0x17), region = 24 }
   0x8   : > { %p40_p4 = scmp.eq.s32.totalorder %s38_s21, 0 }
   0xa   : > { %s1214_s23 = scalar_select %p40_p4, %s1140_s16, %s42_s22  }
   0xe   : > { %206 = sbr.rel (!%p51_p3) target bundleno = 23 (0x17), region = 28  ;;  %s208_s24 = sand.u32 (%p51_p3), 1, %s1140_s16  }
   0xf   : > { %s957_s25 = smul.u32 (%p51_p3), 12, %s1148_s18 }
  0x10   : > { %s1040_s26 = smul.u32 (%p51_p3), 48, %s208_s24 }
  0x11   : > { %s216_s29 = scalar_lea.vmem (%p51_p3), %s1296_s0, %s957_s25 }
  0x12   : > { %v231_v0 = vld [vmem:[%s216_s29] sm:$0xff] (%p51_p3)  ;;  %v235_v2 = vld [vmem:[%s216_s29 + $0x48] sm:$0xff] (%p51_p3)  ;;  %s210_s30 = scalar_lea.vmem (%p51_p3), [#allocation3], %s1040_s26  ;;  %v909_v6 = vld [vmem:[%s216_s29 + $0x50] sm:$0xf] (%p51_p3) }
  0x13   : > { %v233_v1 = vld [vmem:[%s216_s29 + $0x24] sm:$0xff] (%p51_p3)  ;;  %232 = vst [vmem:[%s210_s30] sm:$0xff] (%p51_p3), %v231_v0  ;;  %236 = vst [vmem:[%s210_s30 + $0x18] sm:$0xff] (%p51_p3), %v235_v2  ;;  %v237_v3 = vld [vmem:[%s216_s29 + $0x6c] sm:$0xff] (%p51_p3) }
  0x14   : > { %234 = vst [vmem:[%s210_s30 + $0xc] sm:$0xff] (%p51_p3), %v233_v1  ;;  %v905_v4 = vld [vmem:[%s216_s29 + $0x8] sm:$0xf] (%p51_p3)  ;;  %v907_v5 = vld [vmem:[%s216_s29 + $0x2c] sm:$0xf] (%p51_p3)  ;;  %238 = vst [vmem:[%s210_s30 + $0x24] sm:$0xff] (%p51_p3), %v237_v3 }
  0x15   : > { %906 = vst [vmem:[%s210_s30 + $0x8] sm:$0xf] %v905_v4  ;;  %908 = vst [vmem:[%s210_s30 + $0x14] sm:$0xf] %v907_v5  ;;  %v911_v7 = vld [vmem:[%s216_s29 + $0x74] sm:$0xf] }
  0x16   : > { %910 = vst [vmem:[%s210_s30 + $0x20] sm:$0xf] %v909_v6  ;;  %912 = vst [vmem:[%s210_s30 + $0x2c] sm:$0xf] %v911_v7 }
  0x17 PF: > { %p913_p6 = scmp.ge.s32.totalorder %s1152_s19, 1  ;;  %p270_p7 = scmp.lt.s32.totalorder %s1152_s19, 4 }
  0x19   : > { %p271_p8 = pnand %p913_p6, %p270_p7 }
  0x1a   : > { %s326_s5 = smul.u32 (!%p271_p8), 48, %s1144_s17  ;;  %s277_s6 = sand.u32 (!%p271_p8), 1, %s1136_s15  }
  0x1b   : > { %274 = sbr.rel (%p271_p8) target bundleno = 324 (0x144), region = 58  ;;  %p945_p10 = scmp.ne.s32.totalorder (!%p271_p8), %s1144_s17, 0 }
  0x1c   : > { %s1041_s7 = smul.u32 (!%p271_p8), 48, %s277_s6  ;;  %p327_p9 = scmp.lt.s32.totalorder (!%p271_p8), %s326_s5, 143 }
  0x1e   : > { %s1226_s8 = scalar_lea.vmem (!%p271_p8), [#allocation3], %s1041_s7 }
  0x1f   : > { %v1108_v8 = vld [vmem:[%s1226_s8 + $0x4] ss:$12 sps:$4 sm:$0xff] (!%p271_p8)   ;;  %v1109_v9 = vld [vmem:[%s1226_s8 + $0x8] ss:$12 sps:$4 sm:$0xff] (!%p271_p8)   ;;  %v1106_v34 = vld [vmem:[%s1226_s8] ss:$12 sps:$4 sm:$0xff] (!%p271_p8)  }
  0x20   : > { %621 = vmatprep.mubr.bf16.mxu0 (!%p271_p8), %v1108_v8  ;;  %1036 = vmatprep.mubr.bf16.mxu1 (!%p271_p8), %v1109_v9  ;;  %v1111_v35 = vld [vmem:[%s1226_s8 + $0x1c] ss:$12 sps:$4 sm:$0xff] (!%p271_p8)   ;;  %v1110_v36 = vld [vmem:[%s1226_s8 + $0x20] ss:$12 sps:$4 sm:$0xff] (!%p271_p8)   ;;  %v1113_v37 = vld [vmem:[%s1226_s8 + $0x18] ss:$12 sps:$4 sm:$0xff] (!%p271_p8)  }
  0x22   : > { %s1308_s5 = smov (!%p327_p9, %s326_s5), 143 }
  0x23   : > { %s914_s9 = sshll.u32 %s1308_s5, 2 }
  0x24   : > { %s1233_s12 = scalar_lea.vmem %s1297_s1, %s914_s9 }
  0x25   : > { %v1082_v10 = vld [vmem:[%s1233_s12 + $0x40] sm:$0xff]   ;;  %v1085_v13 = vld [vmem:[%s1233_s12 + $0x48] sm:$0xff]   ;;  %v1088_v16 = vld [vmem:[%s1233_s12 + $0x50] sm:$0xff]  }
  0x26   : > { %v1083_v11 = vld [vmem:[%s1233_s12] sm:$0xff]   ;;  %982 = vmatprep.subr.bf16.mxu0 %v1082_v10  ;;  %v1086_v14 = vld [vmem:[%s1233_s12 + $0x8] sm:$0xff]   ;;  %v1089_v17 = vld [vmem:[%s1233_s12 + $0x10] sm:$0xff]  }
  0x27   : > { %v1084_v12 = vld [vmem:[%s1233_s12 + $0x80] sm:$0xff]   ;;  %983 = vmatpush3.bf16.msra.mxu0 %v1083_v11  ;;  %v1087_v15 = vld [vmem:[%s1233_s12 + $0x88] sm:$0xff]   ;;  %v1090_v18 = vld [vmem:[%s1233_s12 + $0x90] sm:$0xff]  }
  0x28   : > { %1020 = vmatprep.subr.bf16.mxu1 %v1084_v12  ;;  %984 = vmatprep.subr.bf16.mxu0 %v1085_v13  ;;  %v1091_v19 = vld [vmem:[%s1233_s12 + $0x58] sm:$0xff]   ;;  %v1094_v22 = vld [vmem:[%s1233_s12 + $0x60] sm:$0xff]   ;;  %v1097_v25 = vld [vmem:[%s1233_s12 + $0x68] sm:$0xff]  }
  0x29   : > { %1021 = vmatpush3.bf16.msra.mxu1 %v1084_v12  ;;  %v1092_v20 = vld [vmem:[%s1233_s12 + $0x18] sm:$0xff]   ;;  %v1096_v23 = vld [vmem:[%s1233_s12 + $0xa0] sm:$0xff]   ;;  %v1099_v26 = vld [vmem:[%s1233_s12 + $0xa8] sm:$0xff]  }
  0x2a   : > { %1022 = vmatprep.subr.bf16.mxu1 %v1087_v15  ;;  %v1093_v21 = vld [vmem:[%s1233_s12 + $0x98] sm:$0xff]   ;;  %v1095_v24 = vld [vmem:[%s1233_s12 + $0x20] sm:$0xff]   ;;  %v1098_v27 = vld [vmem:[%s1233_s12 + $0x28] sm:$0xff]  }
  0x2b   : > { %985 = vmatpush3.bf16.msra.mxu0 %v1086_v14  ;;  %v1100_v28 = vld [vmem:[%s1233_s12 + $0x70] sm:$0xff]   ;;  %v1103_v31 = vld [vmem:[%s1233_s12 + $0x78] sm:$0xff]  }
  0x2c   : > { %986 = vmatprep.subr.bf16.mxu0 %v1088_v16  ;;  %v1102_v29 = vld [vmem:[%s1233_s12 + $0xb0] sm:$0xff]   ;;  %v1105_v32 = vld [vmem:[%s1233_s12 + $0xb8] sm:$0xff]  }
  0x2d   : > { %1023 = vmatpush3.bf16.msra.mxu1 %v1087_v15  ;;  %v1101_v30 = vld [vmem:[%s1233_s12 + $0x30] sm:$0xff]   ;;  %v1104_v33 = vld [vmem:[%s1233_s12 + $0x38] sm:$0xff]  }
  0x2e   : > { %1024 = vmatprep.subr.bf16.mxu1 %v1090_v18 }
  0x2f   : > { %987 = vmatpush3.bf16.msra.mxu0 %v1089_v17 }
  0x30   : > { %988 = vmatprep.subr.bf16.mxu0 %v1091_v19 }
  0x31   : > { %1025 = vmatpush3.bf16.msra.mxu1 %v1090_v18 }
  0x32   : > { %1026 = vmatprep.subr.bf16.mxu1 %v1093_v21 }
  0x33   : > { %989 = vmatpush3.bf16.msra.mxu0 %v1092_v20 }
  0x34   : > { %990 = vmatprep.subr.bf16.mxu0 %v1094_v22 }
  0x35   : > { %1027 = vmatpush3.bf16.msra.mxu1 %v1093_v21 }
  0x36   : > { %1028 = vmatprep.subr.bf16.mxu1 %v1096_v23 }
  0x37   : > { %991 = vmatpush3.bf16.msra.mxu0 %v1095_v24 }
  0x38   : > { %992 = vmatprep.subr.bf16.mxu0 %v1097_v25 }
  0x39   : > { %1029 = vmatpush3.bf16.msra.mxu1 %v1096_v23 }
  0x3a   : > { %1030 = vmatprep.subr.bf16.mxu1 %v1099_v26 }
  0x3b   : > { %993 = vmatpush3.bf16.msra.mxu0 %v1098_v27 }
  0x3c   : > { %994 = vmatprep.subr.bf16.mxu0 %v1100_v28 }
  0x3d   : > { %1031 = vmatpush3.bf16.msra.mxu1 %v1099_v26 }
  0x3e   : > { %1032 = vmatprep.subr.bf16.mxu1 %v1102_v29 }
  0x3f   : > { %995 = vmatpush3.bf16.msra.mxu0 %v1101_v30 }
  0x40   : > { %996 = vmatprep.subr.bf16.mxu0 %v1103_v31 }
  0x41   : > { %1033 = vmatpush3.bf16.msra.mxu1 %v1102_v29 }
  0x42   : > { %1034 = vmatprep.subr.bf16.mxu1 %v1105_v32 }
  0x43   : > { %997 = vmatpush3.bf16.msra.mxu0 %v1104_v33 }
  0x45   : > { %1035 = vmatpush3.bf16.msra.mxu1 %v1105_v32 }
  0x46   : > { %622 = vmatmul.mubr.bf16.vlgmr.msra.gmra.mrb[0].mxu0 %v1106_v34 }
  0x47   : > { %629 = vmatprep.mubr.bf16.mxu0 %v1111_v35 }
  0x48   : > { %1037 = vmatmul.mubr.bf16.vlgmr.msra.gmra.mrb[0].mxu1 %v1110_v36 }
  0x4e   : > { %630 = vmatmul.mubr.bf16.gmra.mrb[4].mxu0 %v1113_v37 }
 0x119   : > { %v998_v38 = vpop.f32.mrb[0].mxu0 }
 0x11a   : > { %v999_v39 = vpop.f32.mrb[1].mxu0 }
 0x11b   : > { %v1000_v40 = vadd.f32 %v999_v39, %v998_v38  ;;  %v1001_v41 = vpop.f32.mrb[2].mxu0  ;;  %v1038_v42 = vpop.f32.mrb[0].mxu1 }
 0x11c   : > { %v1002_v43 = vpop.f32.mrb[3].mxu0  ;;  %v672_v44 = vpop.f32.mrb[1].mxu1 }
 0x11d   : > { %v1003_v45 = vadd.f32 %v1002_v43, %v1001_v41  ;;  %v673_v46 = vadd.f32 %v1000_v40, %v672_v44  ;;  %v1039_v47 = vpop.f32.mrb[2].mxu1 }
 0x11e   : > { %v675_v48 = vpop.f32.mrb[3].mxu1 }
 0x11f   : > { %v676_v49 = vadd.f32 %v1003_v45, %v675_v48  ;;  %691 = vst [vmem:[#allocation2] sm:$0xff] (!%p945_p10), %v673_v46 }
 0x121   : > { %v1004_v50 = vpop.f32.mrb[4].mxu0  ;;  %690 = sbr.rel (%p945_p10) target bundleno = 298 (0x12a), region = 66  ;;  %692 = vst [vmem:[#allocation2 + $0x8] sm:$0xff] (!%p945_p10), %v676_v49 }
 0x122   : > { %v1005_v51 = vpop.f32.mrb[5].mxu0 }
 0x123   : > { %v1006_v52 = vadd.f32 %v1005_v51, %v1004_v50  ;;  %v1007_v53 = vpop.f32.mrb[6].mxu0 }
 0x124   : > { %v1008_v54 = vpop.f32.mrb[7].mxu0 }
 0x125   : > { %v681_v55 = vadd.f32 %v1038_v42, %v1006_v52  ;;  %v1009_v56 = vadd.f32 %v1008_v54, %v1007_v53 }
 0x127   : > { %v684_v57 = vadd.f32 %v1039_v47, %v1009_v56  ;;  %693 = vst [vmem:[#allocation2 + $0x10] sm:$0xff] (!%p945_p10), %v681_v55 }
 0x129   : > { %694 = vst [vmem:[#allocation2 + $0x18] sm:$0xff] %v684_v57 }
 0x12a PF: > { %p946_p11 = scmp.le.s32.totalorder %s1144_s17, 0 }
 0x12b   : > { %v699_v58 = vld [vmem:[#allocation2] sm:$0xff] (!%p946_p11)  ;;  %v700_v59 = vld [vmem:[#allocation2 + $0x8] sm:$0xff] (!%p946_p11) }
 0x12c   : > { %698 = sbr.rel (%p946_p11) target bundleno = 308 (0x134), region = 70  ;;  %v703_v61 = vadd.f32 (!%p946_p11), %v699_v58, %v673_v46  ;;  %v704_v62 = vadd.f32 (!%p946_p11), %v700_v59, %v676_v49 }
 0x12e   : > { %707 = vst [vmem:[#allocation2] sm:$0xff] (!%p946_p11), %v703_v61  ;;  %708 = vst [vmem:[#allocation2 + $0x8] sm:$0xff] (!%p946_p11), %v704_v62 }
 0x130   : > { %v701_v60 = vld [vmem:[#allocation2 + $0x10] sm:$0xff] (!%p946_p11)  ;;  %v702_v0 = vld [vmem:[#allocation2 + $0x18] sm:$0xff] (!%p946_p11) }
 0x131   : > { %v705_v63 = vadd.f32 (!%p946_p11), %v701_v60, %v681_v55  ;;  %v706_v1 = vadd.f32 (!%p946_p11), %v702_v0, %v684_v57 }
 0x133   : > { %709 = vst [vmem:[#allocation2 + $0x10] sm:$0xff] %v705_v63  ;;  %710 = vst [vmem:[#allocation2 + $0x18] sm:$0xff] %v706_v1 }
 0x134 PF: > { %p947_p12 = scmp.ne.s32.totalorder %s1144_s17, 2 }
 0x135   : > { %v948_v4 = vld [vmem:[%s1298_s2] ss:$0 sm:$0xff] (!%p947_p12)  ;;  %v980_v14 = vld [vmem:[%s1299_s3 + $0x8] sm:$0xff] (!%p947_p12)  }
 0x136   : > { %714 = sbr.rel (%p947_p12) target bundleno = 324 (0x144), region = 74  ;;  %v715_v2 = vld [vmem:[#allocation2] sm:$0xff] (!%p947_p12)  ;;  %v716_v3 = vld [vmem:[#allocation2 + $0x8] sm:$0xff] (!%p947_p12)  ;;  %v968_v15 = vunpack.c.l.bf16 (!%p947_p12), %v980_v14  ;;  %v969_v16 = vunpack.c.h.bf16 (!%p947_p12), %v980_v14 }
 0x137   : > { %v726_v5 = vadd.f32 (!%p947_p12), %v948_v4, %v715_v2  ;;  %v727_v6 = vadd.f32 (!%p947_p12), %v948_v4, %v716_v3  ;;  %v963_v7 = vld [vmem:[%s1299_s3] sm:$0xff] (!%p947_p12)  }
 0x138   : > { %v964_v10 = vunpack.c.l.bf16 (!%p947_p12), %v963_v7  ;;  %v965_v11 = vunpack.c.h.bf16 (!%p947_p12), %v963_v7 }
 0x13a   : > { %v717_v8 = vld [vmem:[#allocation2 + $0x10] sm:$0xff] (!%p947_p12)  ;;  %v718_v9 = vld [vmem:[#allocation2 + $0x18] sm:$0xff] (!%p947_p12)  ;;  %v738_v17 = vadd.f32 (!%p947_p12), %v964_v10, %v726_v5  ;;  %v739_v18 = vadd.f32 (!%p947_p12), %v965_v11, %v727_v6 }
 0x13b   : > { %v728_v12 = vadd.f32 (!%p947_p12), %v948_v4, %v717_v8  ;;  %v729_v13 = vadd.f32 (!%p947_p12), %v948_v4, %v718_v9 }
 0x13c   : > { %v742_v21 = vmax.f32 (!%p947_p12), %v738_v17, 0.0  ;;  %v743_v22 = vmax.f32 (!%p947_p12), %v739_v18, 0.0 }
 0x13d   : > { %v740_v19 = vadd.f32 %v968_v15, %v728_v12  ;;  %v741_v20 = vadd.f32 %v969_v16, %v729_v13 }
 0x13e   : > { %v973_v25 = vpack.c.bf16 %v743_v22, %v742_v21 }
 0x13f   : > { %v744_v23 = vmax.f32 %v740_v19, 0.0  ;;  %v745_v24 = vmax.f32 %v741_v20, 0.0 }
 0x140   : > { %974 = vst [vmem:[%s1300_s4] sm:$0xff] %v973_v25  }
 0x141   : > { %v978_v26 = vpack.c.bf16 %v745_v24, %v744_v23 }
 0x143   : > { %981 = vst [vmem:[%s1300_s4 + $0x8] sm:$0xff] %v978_v26  }
 0x144 PF: > { %s14_s19 = sadd.s32 1, %s1152_s19   ;;  %s1301_s15 = smov %s1140_s16 }
 0x145   : > { %p11_p13 = scmp.ge.s32.totalorder %s14_s19, 5   ;;  %s1302_s16 = smov %s1214_s23 }
 0x146   : > { %s1303_s17 = smov %s1148_s18  ;;  %s1304_s18 = smov %s1306_s20 }
 0x147   :  { %13 = sbr.rel (!%p11_p13) target bundleno = 3 (0x3), region = 124 }

// kernel: _lambda_.31
= control target key start
LH: loop header
LB: loop body
LE: loop exit
PB: predicated region body
PF: predicated region fallthrough
CT: control target
= control target key end

     0   :  { %s1074_s12 = smov 0   ;;  %s1076_s13 = smov 0   ;;  %s1185_s0 = inlined_call_operand.vmem [shape: bf16[32,1152], index: 0, kind: input, shape index: {}]   ;;  %s1186_s1 = inlined_call_operand.vmem [shape: bf16[1152,128], index: 1, kind: input, shape index: {}]   ;;  %s1187_s2 = inlined_call_operand.vmem [shape: f32[1,128], index: 2, kind: input, shape index: {}]   ;;  %s1188_s3 = inlined_call_operand.vmem [shape: bf16[32,128], index: 3, kind: output, shape index: {}]  }
   0x1   :  { %s1078_s14 = smov 0   ;;  %s1080_s15 = smov 0  }
   0x2   :  { %s1082_s16 = smov 0  }
   0x3 LB: > { %s25_s17 = sadd.s32 1, %s1048_s15  ;;  %p48_p1 = scmp.ne.s32.totalorder %s1040_s13, %s1036_s12  ;;  %s1052_s16 = sphi %s1082_s16, %s13_s16   ;;  %s1048_s15 = sphi %s1080_s15, %s1192_s15   ;;  %s1044_s14 = sphi %s1078_s14, %s1191_s14   ;;  %s1040_s13 = sphi %s1076_s13, %s1190_s13   ;;  %s1036_s12 = sphi %s1074_s12, %s1189_s12  }
   0x4   : > { %p26_p0 = scmp.ge.s32.totalorder %s25_s17, 3  ;;  %p49_p2 = scmp.eq.s32.totalorder %s1052_s16, 0 }
   0x5   : > { %s41_s19 = sadd.s32 1, %s1040_s13  ;;  %p812_p5 = scmp.ge.s32.totalorder %s1052_s16, 3 }
   0x6   : > { %s1194_s17 = smov (%p26_p0, %s25_s17), 0  ;;  %p50_p3 = por %p49_p2, %p48_p1 }
   0x7   : > { %s37_s18 = ssub.s32 %s1048_s15, %s1194_s17  ;;  %162 = sbr.rel (%p812_p5) target bundleno = 23 (0x17), region = 20 }
   0x8   : > { %p39_p4 = scmp.eq.s32.totalorder %s37_s18, 0 }
   0xa   : > { %s1109_s20 = scalar_select %p39_p4, %s1040_s13, %s41_s19  }
   0xe   : > { %165 = sbr.rel (!%p50_p3) target bundleno = 23 (0x17), region = 24  ;;  %s167_s21 = sand.u32 (%p50_p3), 1, %s1040_s13  }
   0xf   : > { %s866_s22 = smul.u32 (%p50_p3), 12, %s1048_s15 }
  0x10   : > { %s940_s23 = smul.u32 (%p50_p3), 48, %s167_s21 }
  0x11   : > { %s175_s26 = scalar_lea.vmem (%p50_p3), %s1185_s0, %s866_s22 }
  0x12   : > { %v190_v0 = vld [vmem:[%s175_s26] sm:$0xff] (%p50_p3)  ;;  %v194_v2 = vld [vmem:[%s175_s26 + $0x48] sm:$0xff] (%p50_p3)  ;;  %s169_s27 = scalar_lea.vmem (%p50_p3), [#allocation3], %s940_s23  ;;  %v818_v6 = vld [vmem:[%s175_s26 + $0x50] sm:$0xf] (%p50_p3) }
  0x13   : > { %v192_v1 = vld [vmem:[%s175_s26 + $0x24] sm:$0xff] (%p50_p3)  ;;  %191 = vst [vmem:[%s169_s27] sm:$0xff] (%p50_p3), %v190_v0  ;;  %195 = vst [vmem:[%s169_s27 + $0x18] sm:$0xff] (%p50_p3), %v194_v2  ;;  %v196_v3 = vld [vmem:[%s175_s26 + $0x6c] sm:$0xff] (%p50_p3) }
  0x14   : > { %193 = vst [vmem:[%s169_s27 + $0xc] sm:$0xff] (%p50_p3), %v192_v1  ;;  %v814_v4 = vld [vmem:[%s175_s26 + $0x8] sm:$0xf] (%p50_p3)  ;;  %v816_v5 = vld [vmem:[%s175_s26 + $0x2c] sm:$0xf] (%p50_p3)  ;;  %197 = vst [vmem:[%s169_s27 + $0x24] sm:$0xff] (%p50_p3), %v196_v3 }
  0x15   : > { %815 = vst [vmem:[%s169_s27 + $0x8] sm:$0xf] %v814_v4  ;;  %817 = vst [vmem:[%s169_s27 + $0x14] sm:$0xf] %v816_v5  ;;  %v820_v7 = vld [vmem:[%s175_s26 + $0x74] sm:$0xf] }
  0x16   : > { %819 = vst [vmem:[%s169_s27 + $0x20] sm:$0xf] %v818_v6  ;;  %821 = vst [vmem:[%s169_s27 + $0x2c] sm:$0xf] %v820_v7 }
  0x17 PF: > { %p822_p6 = scmp.ge.s32.totalorder %s1052_s16, 1  ;;  %p229_p7 = scmp.lt.s32.totalorder %s1052_s16, 4 }
  0x19   : > { %p230_p8 = pnand %p822_p6, %p229_p7 }
  0x1a   : > { %s275_s28 = smul.u32 (!%p230_p8), 48, %s1044_s14  ;;  %s236_s29 = sand.u32 (!%p230_p8), 1, %s1036_s12  }
  0x1b   : > { %233 = sbr.rel (%p230_p8) target bundleno = 322 (0x142), region = 54  ;;  %p854_p10 = scmp.ne.s32.totalorder (!%p230_p8), %s1044_s14, 0 }
  0x1c   : > { %s941_s30 = smul.u32 (!%p230_p8), 48, %s236_s29  ;;  %p276_p9 = scmp.lt.s32.totalorder (!%p230_p8), %s275_s28, 143 }
  0x1e   : > { %s1121_s4 = scalar_lea.vmem (!%p230_p8), [#allocation3], %s941_s30 }
  0x1f   : > { %v1008_v8 = vld [vmem:[%s1121_s4 + $0x4] ss:$12 sps:$4 sm:$0xff] (!%p230_p8)   ;;  %v1009_v9 = vld [vmem:[%s1121_s4 + $0x8] ss:$12 sps:$4 sm:$0xff] (!%p230_p8)   ;;  %v1006_v34 = vld [vmem:[%s1121_s4] ss:$12 sps:$4 sm:$0xff] (!%p230_p8)  }
  0x20   : > { %561 = vmatprep.mubr.bf16.mxu0 (!%p230_p8), %v1008_v8  ;;  %936 = vmatprep.mubr.bf16.mxu1 (!%p230_p8), %v1009_v9  ;;  %v1011_v35 = vld [vmem:[%s1121_s4 + $0x1c] ss:$12 sps:$4 sm:$0xff] (!%p230_p8)   ;;  %v1010_v36 = vld [vmem:[%s1121_s4 + $0x20] ss:$12 sps:$4 sm:$0xff] (!%p230_p8)   ;;  %v1013_v37 = vld [vmem:[%s1121_s4 + $0x18] ss:$12 sps:$4 sm:$0xff] (!%p230_p8)  }
  0x22   : > { %s1196_s28 = smov (!%p276_p9, %s275_s28), 143 }
  0x23   : > { %s823_s5 = sshll.u32 %s1196_s28, 2 }
  0x24   : > { %s1128_s8 = scalar_lea.vmem %s1186_s1, %s823_s5 }
  0x25   : > { %v982_v10 = vld [vmem:[%s1128_s8 + $0x40] sm:$0xff]   ;;  %v985_v13 = vld [vmem:[%s1128_s8 + $0x48] sm:$0xff]   ;;  %v988_v16 = vld [vmem:[%s1128_s8 + $0x50] sm:$0xff]  }
  0x26   : > { %v983_v11 = vld [vmem:[%s1128_s8] sm:$0xff]   ;;  %882 = vmatprep.subr.bf16.mxu0 %v982_v10  ;;  %v986_v14 = vld [vmem:[%s1128_s8 + $0x8] sm:$0xff]   ;;  %v989_v17 = vld [vmem:[%s1128_s8 + $0x10] sm:$0xff]  }
  0x27   : > { %v984_v12 = vld [vmem:[%s1128_s8 + $0x80] sm:$0xff]   ;;  %883 = vmatpush3.bf16.msra.mxu0 %v983_v11  ;;  %v987_v15 = vld [vmem:[%s1128_s8 + $0x88] sm:$0xff]   ;;  %v990_v18 = vld [vmem:[%s1128_s8 + $0x90] sm:$0xff]  }
  0x28   : > { %920 = vmatprep.subr.bf16.mxu1 %v984_v12  ;;  %884 = vmatprep.subr.bf16.mxu0 %v985_v13  ;;  %v991_v19 = vld [vmem:[%s1128_s8 + $0x58] sm:$0xff]   ;;  %v994_v22 = vld [vmem:[%s1128_s8 + $0x60] sm:$0xff]   ;;  %v997_v25 = vld [vmem:[%s1128_s8 + $0x68] sm:$0xff]  }
  0x29   : > { %921 = vmatpush3.bf16.msra.mxu1 %v984_v12  ;;  %v992_v20 = vld [vmem:[%s1128_s8 + $0x18] sm:$0xff]   ;;  %v996_v23 = vld [vmem:[%s1128_s8 + $0xa0] sm:$0xff]   ;;  %v999_v26 = vld [vmem:[%s1128_s8 + $0xa8] sm:$0xff]  }
  0x2a   : > { %922 = vmatprep.subr.bf16.mxu1 %v987_v15  ;;  %v993_v21 = vld [vmem:[%s1128_s8 + $0x98] sm:$0xff]   ;;  %v995_v24 = vld [vmem:[%s1128_s8 + $0x20] sm:$0xff]   ;;  %v998_v27 = vld [vmem:[%s1128_s8 + $0x28] sm:$0xff]  }
  0x2b   : > { %885 = vmatpush3.bf16.msra.mxu0 %v986_v14  ;;  %v1000_v28 = vld [vmem:[%s1128_s8 + $0x70] sm:$0xff]   ;;  %v1003_v31 = vld [vmem:[%s1128_s8 + $0x78] sm:$0xff]  }
  0x2c   : > { %886 = vmatprep.subr.bf16.mxu0 %v988_v16  ;;  %v1002_v29 = vld [vmem:[%s1128_s8 + $0xb0] sm:$0xff]   ;;  %v1005_v32 = vld [vmem:[%s1128_s8 + $0xb8] sm:$0xff]  }
  0x2d   : > { %923 = vmatpush3.bf16.msra.mxu1 %v987_v15  ;;  %v1001_v30 = vld [vmem:[%s1128_s8 + $0x30] sm:$0xff]   ;;  %v1004_v33 = vld [vmem:[%s1128_s8 + $0x38] sm:$0xff]  }
  0x2e   : > { %924 = vmatprep.subr.bf16.mxu1 %v990_v18 }
  0x2f   : > { %887 = vmatpush3.bf16.msra.mxu0 %v989_v17 }
  0x30   : > { %888 = vmatprep.subr.bf16.mxu0 %v991_v19 }
  0x31   : > { %925 = vmatpush3.bf16.msra.mxu1 %v990_v18 }
  0x32   : > { %926 = vmatprep.subr.bf16.mxu1 %v993_v21 }
  0x33   : > { %889 = vmatpush3.bf16.msra.mxu0 %v992_v20 }
  0x34   : > { %890 = vmatprep.subr.bf16.mxu0 %v994_v22 }
  0x35   : > { %927 = vmatpush3.bf16.msra.mxu1 %v993_v21 }
  0x36   : > { %928 = vmatprep.subr.bf16.mxu1 %v996_v23 }
  0x37   : > { %891 = vmatpush3.bf16.msra.mxu0 %v995_v24 }
  0x38   : > { %892 = vmatprep.subr.bf16.mxu0 %v997_v25 }
  0x39   : > { %929 = vmatpush3.bf16.msra.mxu1 %v996_v23 }
  0x3a   : > { %930 = vmatprep.subr.bf16.mxu1 %v999_v26 }
  0x3b   : > { %893 = vmatpush3.bf16.msra.mxu0 %v998_v27 }
  0x3c   : > { %894 = vmatprep.subr.bf16.mxu0 %v1000_v28 }
  0x3d   : > { %931 = vmatpush3.bf16.msra.mxu1 %v999_v26 }
  0x3e   : > { %932 = vmatprep.subr.bf16.mxu1 %v1002_v29 }
  0x3f   : > { %895 = vmatpush3.bf16.msra.mxu0 %v1001_v30 }
  0x40   : > { %896 = vmatprep.subr.bf16.mxu0 %v1003_v31 }
  0x41   : > { %933 = vmatpush3.bf16.msra.mxu1 %v1002_v29 }
  0x42   : > { %934 = vmatprep.subr.bf16.mxu1 %v1005_v32 }
  0x43   : > { %897 = vmatpush3.bf16.msra.mxu0 %v1004_v33 }
  0x45   : > { %935 = vmatpush3.bf16.msra.mxu1 %v1005_v32 }
  0x46   : > { %562 = vmatmul.mubr.bf16.vlgmr.msra.gmra.mrb[0].mxu0 %v1006_v34 }
  0x47   : > { %569 = vmatprep.mubr.bf16.mxu0 %v1011_v35 }
  0x48   : > { %937 = vmatmul.mubr.bf16.vlgmr.msra.gmra.mrb[0].mxu1 %v1010_v36 }
  0x4e   : > { %570 = vmatmul.mubr.bf16.gmra.mrb[4].mxu0 %v1013_v37 }
 0x119   : > { %v898_v38 = vpop.f32.mrb[0].mxu0 }
 0x11a   : > { %v899_v39 = vpop.f32.mrb[1].mxu0 }
 0x11b   : > { %v900_v40 = vadd.f32 %v899_v39, %v898_v38  ;;  %v901_v41 = vpop.f32.mrb[2].mxu0  ;;  %v938_v42 = vpop.f32.mrb[0].mxu1 }
 0x11c   : > { %v902_v43 = vpop.f32.mrb[3].mxu0  ;;  %v612_v44 = vpop.f32.mrb[1].mxu1 }
 0x11d   : > { %v903_v45 = vadd.f32 %v902_v43, %v901_v41  ;;  %v613_v46 = vadd.f32 %v900_v40, %v612_v44  ;;  %v939_v47 = vpop.f32.mrb[2].mxu1 }
 0x11e   : > { %v615_v48 = vpop.f32.mrb[3].mxu1 }
 0x11f   : > { %v616_v49 = vadd.f32 %v903_v45, %v615_v48  ;;  %631 = vst [vmem:[#allocation2] sm:$0xff] (!%p854_p10), %v613_v46 }
 0x121   : > { %v904_v50 = vpop.f32.mrb[4].mxu0  ;;  %630 = sbr.rel (%p854_p10) target bundleno = 298 (0x12a), region = 62  ;;  %632 = vst [vmem:[#allocation2 + $0x8] sm:$0xff] (!%p854_p10), %v616_v49 }
 0x122   : > { %v905_v51 = vpop.f32.mrb[5].mxu0 }
 0x123   : > { %v906_v52 = vadd.f32 %v905_v51, %v904_v50  ;;  %v907_v53 = vpop.f32.mrb[6].mxu0 }
 0x124   : > { %v908_v54 = vpop.f32.mrb[7].mxu0 }
 0x125   : > { %v621_v55 = vadd.f32 %v938_v42, %v906_v52  ;;  %v909_v56 = vadd.f32 %v908_v54, %v907_v53 }
 0x127   : > { %v624_v57 = vadd.f32 %v939_v47, %v909_v56  ;;  %633 = vst [vmem:[#allocation2 + $0x10] sm:$0xff] (!%p854_p10), %v621_v55 }
 0x129   : > { %634 = vst [vmem:[#allocation2 + $0x18] sm:$0xff] %v624_v57 }
 0x12a PF: > { %p855_p11 = scmp.le.s32.totalorder %s1044_s14, 0 }
 0x12b   : > { %v639_v58 = vld [vmem:[#allocation2] sm:$0xff] (!%p855_p11)  ;;  %v640_v59 = vld [vmem:[#allocation2 + $0x8] sm:$0xff] (!%p855_p11) }
 0x12c   : > { %638 = sbr.rel (%p855_p11) target bundleno = 308 (0x134), region = 66  ;;  %v643_v61 = vadd.f32 (!%p855_p11), %v639_v58, %v613_v46  ;;  %v644_v62 = vadd.f32 (!%p855_p11), %v640_v59, %v616_v49 }
 0x12e   : > { %647 = vst [vmem:[#allocation2] sm:$0xff] (!%p855_p11), %v643_v61  ;;  %648 = vst [vmem:[#allocation2 + $0x8] sm:$0xff] (!%p855_p11), %v644_v62 }
 0x130   : > { %v641_v60 = vld [vmem:[#allocation2 + $0x10] sm:$0xff] (!%p855_p11)  ;;  %v642_v0 = vld [vmem:[#allocation2 + $0x18] sm:$0xff] (!%p855_p11) }
 0x131   : > { %v645_v63 = vadd.f32 (!%p855_p11), %v641_v60, %v621_v55  ;;  %v646_v1 = vadd.f32 (!%p855_p11), %v642_v0, %v624_v57 }
 0x133   : > { %649 = vst [vmem:[#allocation2 + $0x10] sm:$0xff] %v645_v63  ;;  %650 = vst [vmem:[#allocation2 + $0x18] sm:$0xff] %v646_v1 }
 0x134 PF: > { %p856_p12 = scmp.ne.s32.totalorder %s1044_s14, 2 }
 0x135   : > { %v857_v4 = vld [vmem:[%s1187_s2] ss:$0 sm:$0xff] (!%p856_p12) }
 0x136   : > { %654 = sbr.rel (%p856_p12) target bundleno = 322 (0x142), region = 70  ;;  %v655_v2 = vld [vmem:[#allocation2] sm:$0xff] (!%p856_p12)  ;;  %v656_v3 = vld [vmem:[#allocation2 + $0x8] sm:$0xff] (!%p856_p12) }
 0x137   : > { %v666_v5 = vadd.f32 (!%p856_p12), %v857_v4, %v655_v2  ;;  %v667_v6 = vadd.f32 (!%p856_p12), %v857_v4, %v656_v3 }
 0x139   : > { %v670_v11 = vmax.f32 (!%p856_p12), %v666_v5, 0.0  ;;  %v671_v12 = vmax.f32 (!%p856_p12), %v667_v6, 0.0 }
 0x13a   : > { %v657_v7 = vld [vmem:[#allocation2 + $0x10] sm:$0xff] (!%p856_p12)  ;;  %v658_v8 = vld [vmem:[#allocation2 + $0x18] sm:$0xff] (!%p856_p12) }
 0x13b   : > { %v668_v9 = vadd.f32 (!%p856_p12), %v857_v4, %v657_v7  ;;  %v669_v10 = vadd.f32 (!%p856_p12), %v857_v4, %v658_v8  ;;  %v874_v15 = vpack.c.bf16 (!%p856_p12), %v671_v12, %v670_v11 }
 0x13d   : > { %v672_v13 = vmax.f32 %v668_v9, 0.0  ;;  %v673_v14 = vmax.f32 %v669_v10, 0.0  ;;  %875 = vst [vmem:[%s1188_s3] sm:$0xff] %v874_v15  }
 0x13f   : > { %v879_v16 = vpack.c.bf16 %v673_v14, %v672_v13 }
 0x141   : > { %881 = vst [vmem:[%s1188_s3 + $0x8] sm:$0xff] %v879_v16  }
 0x142 PF: > { %s13_s16 = sadd.s32 1, %s1052_s16   ;;  %s1189_s12 = smov %s1040_s13 }
 0x143   : > { %p10_p13 = scmp.ge.s32.totalorder %s13_s16, 5   ;;  %s1190_s13 = smov %s1109_s20 }
 0x144   : > { %s1191_s14 = smov %s1048_s15  ;;  %s1192_s15 = smov %s1194_s17 }
 0x145   :  { %12 = sbr.rel (!%p10_p13) target bundleno = 3 (0x3), region = 117 }

// kernel: _lambda_.33
= control target key start
LH: loop header
LB: loop body
LE: loop exit
PB: predicated region body
PF: predicated region fallthrough
CT: control target
= control target key end

     0   :  { %s1154_s12 = smov 0   ;;  %s1156_s13 = smov 0   ;;  %s1286_s0 = inlined_call_operand.vmem [shape: bf16[16,1152], index: 0, kind: input, shape index: {}]   ;;  %s1287_s1 = inlined_call_operand.vmem [shape: bf16[1152,256], index: 1, kind: input, shape index: {}]   ;;  %s1288_s2 = inlined_call_operand.vmem [shape: f32[1,256], index: 2, kind: input, shape index: {}]   ;;  %s1289_s3 = inlined_call_operand.vmem [shape: bf16[16,256], index: 3, kind: output, shape index: {}]  }
   0x1   :  { %s1158_s14 = smov 0   ;;  %s1160_s15 = smov 0  }
   0x2   :  { %s1162_s16 = smov 0  }
   0x3 LB: > { %s25_s17 = sadd.s32 1, %s1127_s15  ;;  %p48_p1 = scmp.ne.s32.totalorder %s1119_s13, %s1115_s12  ;;  %s1131_s16 = sphi %s1162_s16, %s13_s16   ;;  %s1127_s15 = sphi %s1160_s15, %s1293_s15   ;;  %s1123_s14 = sphi %s1158_s14, %s1292_s14   ;;  %s1119_s13 = sphi %s1156_s13, %s1291_s13   ;;  %s1115_s12 = sphi %s1154_s12, %s1290_s12  }
   0x4   : > { %p26_p0 = scmp.ge.s32.totalorder %s25_s17, 3  ;;  %p49_p2 = scmp.eq.s32.totalorder %s1131_s16, 0 }
   0x5   : > { %s41_s19 = sadd.s32 1, %s1119_s13  ;;  %p897_p5 = scmp.ge.s32.totalorder %s1131_s16, 3 }
   0x6   : > { %s1295_s17 = smov (%p26_p0, %s25_s17), 0  ;;  %p50_p3 = por %p49_p2, %p48_p1 }
   0x7   : > { %s37_s18 = ssub.s32 %s1127_s15, %s1295_s17  ;;  %164 = sbr.rel (%p897_p5) target bundleno = 21 (0x15), region = 20 }
   0x8   : > { %p39_p4 = scmp.eq.s32.totalorder %s37_s18, 0 }
   0xa   : > { %s1189_s20 = scalar_select %p39_p4, %s1119_s13, %s41_s19  }
   0xe   : > { %167 = sbr.rel (!%p50_p3) target bundleno = 21 (0x15), region = 24  ;;  %s169_s21 = sand.u32 (%p50_p3), 1, %s1119_s13  }
   0xf   : > { %s966_s22 = smul.u32 (%p50_p3), 12, %s1127_s15 }
  0x10   : > { %s974_s23 = smul.u32 (%p50_p3), 24, %s169_s21 }
  0x11   : > { %s177_s26 = scalar_lea.vmem (%p50_p3), %s1286_s0, %s966_s22 }
  0x12   : > { %v192_v0 = vld [vmem:[%s177_s26] sm:$0xff] (%p50_p3)  ;;  %v899_v2 = vld [vmem:[%s177_s26 + $0x8] sm:$0xf] (%p50_p3)  ;;  %s171_s27 = scalar_lea.vmem (%p50_p3), [#allocation3], %s974_s23  ;;  %v901_v3 = vld [vmem:[%s177_s26 + $0x2c] sm:$0xf] (%p50_p3) }
  0x13   : > { %v194_v1 = vld [vmem:[%s177_s26 + $0x24] sm:$0xff] (%p50_p3)  ;;  %193 = vst [vmem:[%s171_s27] sm:$0xff] (%p50_p3), %v192_v0  ;;  %900 = vst [vmem:[%s171_s27 + $0x8] sm:$0xf] (%p50_p3), %v899_v2 }
  0x14   : > { %195 = vst [vmem:[%s171_s27 + $0xc] sm:$0xff] (%p50_p3), %v194_v1  ;;  %902 = vst [vmem:[%s171_s27 + $0x14] sm:$0xf] (%p50_p3), %v901_v3 }
  0x15 PF: > { %p903_p6 = scmp.ge.s32.totalorder %s1131_s16, 1  ;;  %p226_p7 = scmp.lt.s32.totalorder %s1131_s16, 4 }
  0x17   : > { %p227_p8 = pnand %p903_p6, %p226_p7 }
  0x18   : > { %s277_s28 = smul.u32 (!%p227_p8), 48, %s1123_s14  ;;  %s233_s29 = sand.u32 (!%p227_p8), 1, %s1115_s12   ;;  %v1133_v4 = vmov (!%p227_p8), 0  }
  0x19   : > { %230 = sbr.rel (%p227_p8) target bundleno = 345 (0x159), region = 54  ;;  %690 = vmatprep.mubr.bf16.mxu0 (!%p227_p8), %v1133_v4  ;;  %p957_p10 = scmp.ne.s32.totalorder (!%p227_p8), %s1123_s14, 0 }
  0x1a   : > { %s975_s30 = smul.u32 (!%p227_p8), 24, %s233_s29  ;;  %p279_p9 = scmp.lt.s32.totalorder (!%p227_p8), %s277_s28, 143 }
  0x1c   : > { %s1201_s4 = scalar_lea.vmem (!%p227_p8), [#allocation3], %s975_s30 }
  0x1d   : > { %v1092_v5 = vld [vmem:[%s1201_s4 + $0x4] ss:$12 sps:$4 sm:$0xff] (!%p227_p8)   ;;  %v1089_v45 = vld [vmem:[%s1201_s4 + $0x8] ss:$12 sps:$4 sm:$0xff] (!%p227_p8)   ;;  %v1090_v55 = vld [vmem:[%s1201_s4] ss:$12 sps:$4 sm:$0xff] (!%p227_p8)  }
  0x1e   : > { %647 = vmatprep.mubr.bf16.mxu1 (!%p227_p8), %v1092_v5 }
  0x20   : > { %s1297_s28 = smov (!%p279_p9, %s277_s28), 143 }
  0x21   : > { %s967_s5 = sshll.u32 %s1297_s28, 3 }
  0x22   : > { %s1207_s8 = scalar_lea.vmem %s1287_s1, %s967_s5 }
  0x23   : > { %v1017_v6 = vld [vmem:[%s1207_s8 + $0x4] ss:$8 sps:$4 sm:$0xff]   ;;  %v1019_v7 = vld [vmem:[%s1207_s8] ss:$8 sps:$4 sm:$0xff]   ;;  %v1020_v8 = vld [vmem:[%s1207_s8 + $0x14] ss:$8 sps:$4 sm:$0xff]  }
  0x24   : > { %615 = vmatprep.subr.bf16.mxu1 %v1017_v6  ;;  %v1022_v9 = vld [vmem:[%s1207_s8 + $0x10] ss:$8 sps:$4 sm:$0xff]   ;;  %v1023_v10 = vld [vmem:[%s1207_s8 + $0x24] ss:$8 sps:$4 sm:$0xff]   ;;  %v1025_v11 = vld [vmem:[%s1207_s8 + $0x20] ss:$8 sps:$4 sm:$0xff]  }
  0x25   : > { %616 = vmatpush1.bf16.msra.mxu1 %v1019_v7  ;;  %v1026_v12 = vld [vmem:[%s1207_s8 + $0x34] ss:$8 sps:$4 sm:$0xff]   ;;  %v1028_v13 = vld [vmem:[%s1207_s8 + $0x30] ss:$8 sps:$4 sm:$0xff]   ;;  %v1041_v14 = vld [vmem:[%s1207_s8 + $0x104] ss:$8 sps:$4 sm:$0xff]  }
  0x26   : > { %617 = vmatprep.subr.bf16.mxu1 %v1020_v8  ;;  %v1043_v15 = vld [vmem:[%s1207_s8 + $0x100] ss:$8 sps:$4 sm:$0xff]   ;;  %v1029_v16 = vld [vmem:[%s1207_s8 + $0x44] ss:$8 sps:$4 sm:$0xff]   ;;  %658 = vmatprep.subr.bf16.mxu0 %v1041_v14  ;;  %v1047_v17 = vld [vmem:[%s1207_s8 + $0x114] ss:$8 sps:$4 sm:$0xff]  }
  0x27   : > { %659 = vmatpush1.bf16.msra.mxu0 %v1043_v15  ;;  %v1049_v18 = vld [vmem:[%s1207_s8 + $0x110] ss:$8 sps:$4 sm:$0xff]   ;;  %v1031_v19 = vld [vmem:[%s1207_s8 + $0x40] ss:$8 sps:$4 sm:$0xff]   ;;  %v1032_v20 = vld [vmem:[%s1207_s8 + $0x54] ss:$8 sps:$4 sm:$0xff]  }
  0x28   : > { %660 = vmatprep.subr.bf16.mxu0 %v1047_v17  ;;  %v1053_v21 = vld [vmem:[%s1207_s8 + $0x124] ss:$8 sps:$4 sm:$0xff]   ;;  %v1055_v22 = vld [vmem:[%s1207_s8 + $0x120] ss:$8 sps:$4 sm:$0xff]   ;;  %v1034_v23 = vld [vmem:[%s1207_s8 + $0x50] ss:$8 sps:$4 sm:$0xff]  }
  0x29   : > { %618 = vmatpush1.bf16.msra.mxu1 %v1022_v9  ;;  %v1059_v24 = vld [vmem:[%s1207_s8 + $0x134] ss:$8 sps:$4 sm:$0xff]   ;;  %v1035_v25 = vld [vmem:[%s1207_s8 + $0x64] ss:$8 sps:$4 sm:$0xff]   ;;  %v1061_v26 = vld [vmem:[%s1207_s8 + $0x130] ss:$8 sps:$4 sm:$0xff]  }
  0x2a   : > { %619 = vmatprep.subr.bf16.mxu1 %v1023_v10  ;;  %v1037_v27 = vld [vmem:[%s1207_s8 + $0x60] ss:$8 sps:$4 sm:$0xff]   ;;  %v1065_v28 = vld [vmem:[%s1207_s8 + $0x144] ss:$8 sps:$4 sm:$0xff]   ;;  %v1038_v29 = vld [vmem:[%s1207_s8 + $0x74] ss:$8 sps:$4 sm:$0xff]  }
  0x2b   : > { %661 = vmatpush1.bf16.msra.mxu0 %v1049_v18  ;;  %v1067_v30 = vld [vmem:[%s1207_s8 + $0x140] ss:$8 sps:$4 sm:$0xff]   ;;  %v1040_v31 = vld [vmem:[%s1207_s8 + $0x70] ss:$8 sps:$4 sm:$0xff]   ;;  %v1071_v32 = vld [vmem:[%s1207_s8 + $0x154] ss:$8 sps:$4 sm:$0xff]  }
  0x2c   : > { %662 = vmatprep.subr.bf16.mxu0 %v1053_v21  ;;  %v1044_v33 = vld [vmem:[%s1207_s8 + $0x84] ss:$8 sps:$4 sm:$0xff]   ;;  %v1073_v34 = vld [vmem:[%s1207_s8 + $0x150] ss:$8 sps:$4 sm:$0xff]   ;;  %v1046_v35 = vld [vmem:[%s1207_s8 + $0x80] ss:$8 sps:$4 sm:$0xff]  }
  0x2d   : > { %620 = vmatpush1.bf16.msra.mxu1 %v1025_v11  ;;  %v1077_v36 = vld [vmem:[%s1207_s8 + $0x164] ss:$8 sps:$4 sm:$0xff]   ;;  %v1050_v37 = vld [vmem:[%s1207_s8 + $0x94] ss:$8 sps:$4 sm:$0xff]   ;;  %v1079_v38 = vld [vmem:[%s1207_s8 + $0x160] ss:$8 sps:$4 sm:$0xff]  }
  0x2e   : > { %621 = vmatprep.subr.bf16.mxu1 %v1026_v12  ;;  %v1052_v39 = vld [vmem:[%s1207_s8 + $0x90] ss:$8 sps:$4 sm:$0xff]   ;;  %v1083_v40 = vld [vmem:[%s1207_s8 + $0x174] ss:$8 sps:$4 sm:$0xff]   ;;  %v1056_v41 = vld [vmem:[%s1207_s8 + $0xa4] ss:$8 sps:$4 sm:$0xff]  }
  0x2f   : > { %663 = vmatpush1.bf16.msra.mxu0 %v1055_v22  ;;  %v1085_v42 = vld [vmem:[%s1207_s8 + $0x170] ss:$8 sps:$4 sm:$0xff]   ;;  %v1058_v43 = vld [vmem:[%s1207_s8 + $0xa0] ss:$8 sps:$4 sm:$0xff]   ;;  %v1062_v44 = vld [vmem:[%s1207_s8 + $0xb4] ss:$8 sps:$4 sm:$0xff]  }
  0x30   : > { %664 = vmatprep.subr.bf16.mxu0 %v1059_v24  ;;  %v1064_v46 = vld [vmem:[%s1207_s8 + $0xb0] ss:$8 sps:$4 sm:$0xff]   ;;  %v1068_v47 = vld [vmem:[%s1207_s8 + $0xc4] ss:$8 sps:$4 sm:$0xff]   ;;  %v1070_v48 = vld [vmem:[%s1207_s8 + $0xc0] ss:$8 sps:$4 sm:$0xff]  }
  0x31   : > { %622 = vmatpush1.bf16.msra.mxu1 %v1028_v13  ;;  %v1074_v49 = vld [vmem:[%s1207_s8 + $0xd4] ss:$8 sps:$4 sm:$0xff]   ;;  %v1076_v50 = vld [vmem:[%s1207_s8 + $0xd0] ss:$8 sps:$4 sm:$0xff]   ;;  %v1080_v51 = vld [vmem:[%s1207_s8 + $0xe4] ss:$8 sps:$4 sm:$0xff]  }
  0x32   : > { %623 = vmatprep.subr.bf16.mxu1 %v1029_v16  ;;  %v1082_v52 = vld [vmem:[%s1207_s8 + $0xe0] ss:$8 sps:$4 sm:$0xff]   ;;  %v1086_v53 = vld [vmem:[%s1207_s8 + $0xf4] ss:$8 sps:$4 sm:$0xff]   ;;  %v1088_v54 = vld [vmem:[%s1207_s8 + $0xf0] ss:$8 sps:$4 sm:$0xff]  }
  0x33   : > { %665 = vmatpush1.bf16.msra.mxu0 %v1061_v26 }
  0x34   : > { %666 = vmatprep.subr.bf16.mxu0 %v1065_v28 }
  0x35   : > { %624 = vmatpush1.bf16.msra.mxu1 %v1031_v19 }
  0x36   : > { %625 = vmatprep.subr.bf16.mxu1 %v1032_v20 }
  0x37   : > { %667 = vmatpush1.bf16.msra.mxu0 %v1067_v30 }
  0x38   : > { %668 = vmatprep.subr.bf16.mxu0 %v1071_v32 }
  0x39   : > { %626 = vmatpush1.bf16.msra.mxu1 %v1034_v23 }
  0x3a   : > { %627 = vmatprep.subr.bf16.mxu1 %v1035_v25 }
  0x3b   : > { %669 = vmatpush1.bf16.msra.mxu0 %v1073_v34 }
  0x3c   : > { %670 = vmatprep.subr.bf16.mxu0 %v1077_v36 }
  0x3d   : > { %628 = vmatpush1.bf16.msra.mxu1 %v1037_v27 }
  0x3e   : > { %629 = vmatprep.subr.bf16.mxu1 %v1038_v29 }
  0x3f   : > { %671 = vmatpush1.bf16.msra.mxu0 %v1079_v38 }
  0x40   : > { %672 = vmatprep.subr.bf16.mxu0 %v1083_v40 }
  0x41   : > { %630 = vmatpush1.bf16.msra.mxu1 %v1040_v31 }
  0x42   : > { %631 = vmatprep.subr.bf16.mxu1 %v1044_v33 }
  0x43   : > { %673 = vmatpush1.bf16.msra.mxu0 %v1085_v42 }
  0x45   : > { %632 = vmatpush1.bf16.msra.mxu1 %v1046_v35 }
  0x46   : > { %633 = vmatprep.subr.bf16.mxu1 %v1050_v37  ;;  %691 = vmatmul.mubr.bf16.vlgmr.msra.gmra.mrb[0].mxu0 %v1089_v45 }
  0x49   : > { %634 = vmatpush1.bf16.msra.mxu1 %v1052_v39 }
  0x4a   : > { %635 = vmatprep.subr.bf16.mxu1 %v1056_v41 }
  0x4d   : > { %636 = vmatpush1.bf16.msra.mxu1 %v1058_v43 }
  0x4e   : > { %637 = vmatprep.subr.bf16.mxu1 %v1062_v44 }
  0x51   : > { %638 = vmatpush1.bf16.msra.mxu1 %v1064_v46 }
  0x52   : > { %639 = vmatprep.subr.bf16.mxu1 %v1068_v47 }
  0x55   : > { %640 = vmatpush1.bf16.msra.mxu1 %v1070_v48 }
  0x56   : > { %641 = vmatprep.subr.bf16.mxu1 %v1074_v49 }
  0x59   : > { %642 = vmatpush1.bf16.msra.mxu1 %v1076_v50 }
  0x5a   : > { %643 = vmatprep.subr.bf16.mxu1 %v1080_v51 }
  0x5d   : > { %644 = vmatpush1.bf16.msra.mxu1 %v1082_v52 }
  0x5e   : > { %645 = vmatprep.subr.bf16.mxu1 %v1086_v53 }
  0x61   : > { %646 = vmatpush1.bf16.msra.mxu1 %v1088_v54 }
  0x64   : > { %648 = vmatmul.mubr.bf16.vlgmr.msra.gmra.mrb[0].mxu1 %v1090_v55 }
 0x119   : > { %v692_v56 = vpop.f32.mrb[0].mxu0 }
 0x11a   : > { %v694_v57 = vpop.f32.mrb[1].mxu0 }
 0x11b   : > { %v696_v58 = vpop.f32.mrb[2].mxu0 }
 0x11c   : > { %v698_v59 = vpop.f32.mrb[3].mxu0 }
 0x135   : > { %704 = sbr.rel (%p957_p10) target bundleno = 318 (0x13e), region = 62 }
 0x137   : > { %v649_v60 = vpop.f32.mrb[0].mxu1 }
 0x138   : > { %v693_v61 = vadd.f32 %v692_v56, %v649_v60  ;;  %v651_v62 = vpop.f32.mrb[1].mxu1 }
 0x139   : > { %v695_v63 = vadd.f32 %v694_v57, %v651_v62  ;;  %v653_v0 = vpop.f32.mrb[2].mxu1 }
 0x13a   : > { %v697_v1 = vadd.f32 %v696_v58, %v653_v0  ;;  %v655_v2 = vpop.f32.mrb[3].mxu1  ;;  %705 = vst [vmem:[#allocation2] sm:$0xff] (!%p957_p10), %v693_v61 }
 0x13b   : > { %v699_v3 = vadd.f32 %v698_v59, %v655_v2  ;;  %706 = vst [vmem:[#allocation2 + $0x8] sm:$0xff] (!%p957_p10), %v695_v63 }
 0x13c   : > { %707 = vst [vmem:[#allocation2 + $0x10] sm:$0xff] %v697_v1 }
 0x13d   : > { %708 = vst [vmem:[#allocation2 + $0x18] sm:$0xff] %v699_v3 }
 0x13e PF: > { %p958_p11 = scmp.le.s32.totalorder %s1123_s14, 0 }
 0x140   : > { %712 = sbr.rel (%p958_p11) target bundleno = 329 (0x149), region = 66 }
 0x143   : > { %v713_v4 = vld [vmem:[#allocation2] sm:$0xff] (!%p958_p11) }
 0x144   : > { %v714_v5 = vld [vmem:[#allocation2 + $0x8] sm:$0xff] (!%p958_p11)  ;;  %v717_v7 = vadd.f32 (!%p958_p11), %v713_v4, %v693_v61  ;;  %v716_v10 = vld [vmem:[#allocation2 + $0x18] sm:$0xff] (!%p958_p11) }
 0x145   : > { %v715_v6 = vld [vmem:[#allocation2 + $0x10] sm:$0xff] (!%p958_p11)  ;;  %v718_v8 = vadd.f32 (!%p958_p11), %v714_v5, %v695_v63  ;;  %v720_v11 = vadd.f32 (!%p958_p11), %v716_v10, %v699_v3 }
 0x146   : > { %v719_v9 = vadd.f32 (!%p958_p11), %v715_v6, %v697_v1  ;;  %721 = vst [vmem:[#allocation2] sm:$0xff] (!%p958_p11), %v717_v7 }
 0x147   : > { %722 = vst [vmem:[#allocation2 + $0x8] sm:$0xff] %v718_v8  ;;  %724 = vst [vmem:[#allocation2 + $0x18] sm:$0xff] %v720_v11 }
 0x148   : > { %723 = vst [vmem:[#allocation2 + $0x10] sm:$0xff] %v719_v9 }
 0x149 PF: > { %p959_p12 = scmp.ne.s32.totalorder %s1123_s14, 2 }
 0x14a   : > { %v735_v12 = vlaneseq (!%p959_p12)  ;;  %v733_v14 = vld [vmem:[%s1288_s2] sm:$0x3] (!%p959_p12) }
 0x14b   : > { %728 = sbr.rel (%p959_p12) target bundleno = 345 (0x159), region = 70 }
 0x14c   : > { %v736_v13 = vshrl.u32 (!%p959_p12), %v735_v12, 7 }
 0x14e   : > { %v737_v16 = vsub.s32 (!%p959_p12), 0, %v736_v13  ;;  %v741_v17 = vsub.s32 (!%p959_p12), 1, %v736_v13 }
 0x14f   : > { %v729_v15 = vld [vmem:[#allocation2] sm:$0xff] (!%p959_p12)  ;;  %v731_v19 = vld [vmem:[#allocation2 + $0x10] sm:$0xff] (!%p959_p12) }
 0x150   : > { %v730_v18 = vld [vmem:[#allocation2 + $0x8] sm:$0xff] (!%p959_p12)  ;;  %v732_v20 = vld [vmem:[#allocation2 + $0x18] sm:$0xff] (!%p959_p12)  ;;  %v738_v21 = vrot.slane (!%p959_p12), %v733_v14, %v737_v16  ;;  %v742_v22 = vrot.slane (!%p959_p12), %v733_v14, %v741_v17 }
 0x152   : > { %v745_v23 = vadd.f32 %v738_v21, %v729_v15  ;;  %v746_v24 = vadd.f32 %v742_v22, %v730_v18  ;;  %v747_v25 = vadd.f32 %v738_v21, %v731_v19  ;;  %v748_v26 = vadd.f32 %v742_v22, %v732_v20 }
 0x154   : > { %v749_v27 = vmax.f32 %v745_v23, 0.0  ;;  %v750_v28 = vmax.f32 %v746_v24, 0.0  ;;  %v751_v29 = vmax.f32 %v747_v25, 0.0  ;;  %v752_v30 = vmax.f32 %v748_v26, 0.0 }
 0x156   : > { %v968_v31 = vpack.c.bf16 %v750_v28, %v749_v27  ;;  %v969_v32 = vpack.c.bf16 %v752_v30, %v751_v29 }
 0x158   : > { %765 = vst [vmem:[%s1289_s3] sm:$0xff] %v968_v31  ;;  %766 = vst [vmem:[%s1289_s3 + $0x8] sm:$0xff] %v969_v32 }
 0x159 PF: > { %s13_s16 = sadd.s32 1, %s1131_s16   ;;  %s1290_s12 = smov %s1119_s13 }
 0x15a   : > { %p10_p13 = scmp.ge.s32.totalorder %s13_s16, 5   ;;  %s1291_s13 = smov %s1189_s20 }
 0x15b   : > { %s1292_s14 = smov %s1127_s15  ;;  %s1293_s15 = smov %s1295_s17 }
 0x15c   :  { %12 = sbr.rel (!%p10_p13) target bundleno = 3 (0x3), region = 117 }

// kernel: _lambda_.34
= control target key start
LH: loop header
LB: loop body
LE: loop exit
PB: predicated region body
PF: predicated region fallthrough
CT: control target
= control target key end

     0   :  { %v239_v1 = vmov 0   ;;  %v35_v18 = vlaneseq  ;;  %s320_s1 = inlined_call_operand.vmem [shape: bf16[128,256], index: 1, kind: input, shape index: {}]   ;;  %s321_s0 = inlined_call_operand.vmem [shape: bf16[16,128], index: 0, kind: input, shape index: {}]   ;;  %s322_s2 = inlined_call_operand.vmem [shape: f32[1,256], index: 2, kind: input, shape index: {}]   ;;  %s323_s3 = inlined_call_operand.vmem [shape: bf16[16,256], index: 3, kind: output, shape index: {}]  }
   0x1   :  { %v214_v0 = vld [vmem:[%s320_s1 + $0x4] ss:$8 sps:$4 sm:$0xff]   ;;  %163 = vmatprep.mubr.bf16.mxu0 %v239_v1  ;;  %v216_v2 = vld [vmem:[%s320_s1] ss:$8 sps:$4 sm:$0xff]   ;;  %v217_v3 = vld [vmem:[%s320_s1 + $0x14] ss:$8 sps:$4 sm:$0xff]  }
   0x2   :  { %131 = vmatprep.subr.bf16.mxu0 %v214_v0  ;;  %v219_v4 = vld [vmem:[%s320_s1 + $0x10] ss:$8 sps:$4 sm:$0xff]   ;;  %v220_v5 = vld [vmem:[%s320_s1 + $0x24] ss:$8 sps:$4 sm:$0xff]   ;;  %v222_v6 = vld [vmem:[%s320_s1 + $0x20] ss:$8 sps:$4 sm:$0xff]  }
   0x3   :  { %132 = vmatpush1.bf16.msra.mxu0 %v216_v2  ;;  %v223_v7 = vld [vmem:[%s320_s1 + $0x34] ss:$8 sps:$4 sm:$0xff]   ;;  %v225_v8 = vld [vmem:[%s320_s1 + $0x30] ss:$8 sps:$4 sm:$0xff]   ;;  %v226_v9 = vld [vmem:[%s320_s1 + $0x44] ss:$8 sps:$4 sm:$0xff]  }
   0x4   :  { %133 = vmatprep.subr.bf16.mxu0 %v217_v3  ;;  %v228_v10 = vld [vmem:[%s320_s1 + $0x40] ss:$8 sps:$4 sm:$0xff]   ;;  %v229_v11 = vld [vmem:[%s320_s1 + $0x54] ss:$8 sps:$4 sm:$0xff]   ;;  %v231_v12 = vld [vmem:[%s320_s1 + $0x50] ss:$8 sps:$4 sm:$0xff]  }
   0x5   :  { %v232_v13 = vld [vmem:[%s320_s1 + $0x64] ss:$8 sps:$4 sm:$0xff]   ;;  %v234_v14 = vld [vmem:[%s320_s1 + $0x60] ss:$8 sps:$4 sm:$0xff]   ;;  %v235_v15 = vld [vmem:[%s320_s1 + $0x74] ss:$8 sps:$4 sm:$0xff]  }
   0x6   :  { %v237_v16 = vld [vmem:[%s320_s1 + $0x70] ss:$8 sps:$4 sm:$0xff]   ;;  %v238_v17 = vld [vmem:[%s321_s0] sm:$0xff]   ;;  %v36_v19 = vshrl.u32 %v35_v18, 7 }
   0x7   :  { %134 = vmatpush1.bf16.msra.mxu0 %v219_v4  ;;  %v33_v21 = vld [vmem:[%s322_s2] sm:$0x3] }
   0x8   :  { %135 = vmatprep.subr.bf16.mxu0 %v220_v5  ;;  %v37_v20 = vsub.s32 0, %v36_v19  ;;  %v41_v22 = vsub.s32 1, %v36_v19 }
   0xa   :  { %v38_v23 = vrot.slane %v33_v21, %v37_v20  ;;  %v42_v24 = vrot.slane %v33_v21, %v41_v22 }
   0xb   :  { %136 = vmatpush1.bf16.msra.mxu0 %v222_v6 }
   0xc   :  { %137 = vmatprep.subr.bf16.mxu0 %v223_v7 }
   0xf   :  { %138 = vmatpush1.bf16.msra.mxu0 %v225_v8 }
  0x10   :  { %139 = vmatprep.subr.bf16.mxu0 %v226_v9 }
  0x13   :  { %140 = vmatpush1.bf16.msra.mxu0 %v228_v10 }
  0x14   :  { %141 = vmatprep.subr.bf16.mxu0 %v229_v11 }
  0x17   :  { %142 = vmatpush1.bf16.msra.mxu0 %v231_v12 }
  0x18   :  { %143 = vmatprep.subr.bf16.mxu0 %v232_v13 }
  0x1b   :  { %144 = vmatpush1.bf16.msra.mxu0 %v234_v14 }
  0x1c   :  { %145 = vmatprep.subr.bf16.mxu0 %v235_v15 }
  0x1f   :  { %146 = vmatpush1.bf16.msra.mxu0 %v237_v16 }
  0x22   :  { %164 = vmatmul.mubr.bf16.vlgmr.msra.gmra.mrb[0].mxu0 %v238_v17 }
  0xf5   :  { %v165_v25 = vpop.f32.mrb[0].mxu0 }
  0xf6   :  { %v166_v26 = vadd.f32 %v165_v25, %v38_v23  ;;  %v167_v27 = vpop.f32.mrb[1].mxu0 }
  0xf7   :  { %v168_v28 = vadd.f32 %v167_v27, %v42_v24  ;;  %v169_v29 = vpop.f32.mrb[2].mxu0 }
  0xf8   :  { %v170_v30 = vadd.f32 %v169_v29, %v38_v23  ;;  %v171_v31 = vpop.f32.mrb[3].mxu0 }
  0xf9   :  { %v211_v32 = vpack.c.bf16 %v168_v28, %v166_v26  ;;  %v172_v33 = vadd.f32 %v171_v31, %v42_v24 }
  0xfb   :  { %186 = vst [vmem:[%s323_s3] sm:$0xff] %v211_v32  ;;  %v212_v34 = vpack.c.bf16 %v172_v33, %v170_v30 }
  0xfd   :  { %187 = vst [vmem:[%s323_s3 + $0x8] sm:$0xff] %v212_v34 }

// kernel: _lambda_.35
= control target key start
LH: loop header
LB: loop body
LE: loop exit
PB: predicated region body
PF: predicated region fallthrough
CT: control target
= control target key end

     0   :  { %s1722_s15 = smov 0   ;;  %s1724_s16 = smov 0   ;;  %s1911_s0 = inlined_call_operand.vmem [shape: bf16[16,2304], index: 0, kind: input, shape index: {}]   ;;  %s1912_s1 = inlined_call_operand.vmem [shape: bf16[2304,256], index: 1, kind: input, shape index: {}]   ;;  %s1913_s2 = inlined_call_operand.vmem [shape: f32[1,256], index: 2, kind: input, shape index: {}]   ;;  %s1914_s3 = inlined_call_operand.vmem [shape: bf16[16,256], index: 3, kind: input, shape index: {}]   ;;  %s1915_s4 = inlined_call_operand.vmem [shape: bf16[16,256], index: 4, kind: output, shape index: {}]  }
   0x1   :  { %s1726_s17 = smov 0   ;;  %s1728_s18 = smov 0  }
   0x2   :  { %s1730_s19 = smov 0  }
   0x3 LB: > { %s26_s20 = sadd.s32 1, %s1691_s18  ;;  %p49_p1 = scmp.ne.s32.totalorder %s1683_s16, %s1679_s15  ;;  %s1695_s19 = sphi %s1730_s19, %s14_s19   ;;  %s1691_s18 = sphi %s1728_s18, %s1919_s18   ;;  %s1687_s17 = sphi %s1726_s17, %s1918_s17   ;;  %s1683_s16 = sphi %s1724_s16, %s1917_s16   ;;  %s1679_s15 = sphi %s1722_s15, %s1916_s15  }
   0x4   : > { %p27_p0 = scmp.ge.s32.totalorder %s26_s20, 3  ;;  %p50_p2 = scmp.eq.s32.totalorder %s1695_s19, 0 }
   0x5   : > { %s42_s22 = sadd.s32 1, %s1683_s16  ;;  %p1334_p5 = scmp.ge.s32.totalorder %s1695_s19, 3 }
   0x6   : > { %s1921_s20 = smov (%p27_p0, %s26_s20), 0  ;;  %p51_p3 = por %p50_p2, %p49_p1 }
   0x7   : > { %s38_s21 = ssub.s32 %s1691_s18, %s1921_s20  ;;  %208 = sbr.rel (%p1334_p5) target bundleno = 22 (0x16), region = 24 }
   0x8   : > { %p40_p4 = scmp.eq.s32.totalorder %s38_s21, 0 }
   0xa   : > { %s1757_s23 = scalar_select %p40_p4, %s1683_s16, %s42_s22  }
   0xe   : > { %211 = sbr.rel (!%p51_p3) target bundleno = 22 (0x16), region = 28  ;;  %s213_s24 = sand.u32 (%p51_p3), 1, %s1683_s16  }
   0xf   : > { %s1450_s25 = smul.u32 (%p51_p3), 24, %s1691_s18 }
  0x10   : > { %s1462_s26 = smul.u32 (%p51_p3), 48, %s213_s24 }
  0x11   : > { %s221_s29 = scalar_lea.vmem (%p51_p3), %s1911_s0, %s1450_s25 }
  0x12   : > { %v234_v0 = vld [vmem:[%s221_s29] sm:$0xff] (%p51_p3)  ;;  %v236_v1 = vld [vmem:[%s221_s29 + $0x8] sm:$0xff] (%p51_p3)  ;;  %v238_v2 = vld [vmem:[%s221_s29 + $0x10] sm:$0xff] (%p51_p3)  ;;  %s215_s30 = scalar_lea.vmem (%p51_p3), [#allocation3], %s1462_s26 }
  0x13   : > { %235 = vst [vmem:[%s215_s30] sm:$0xff] (%p51_p3), %v234_v0  ;;  %237 = vst [vmem:[%s215_s30 + $0x8] sm:$0xff] (%p51_p3), %v236_v1  ;;  %v240_v3 = vld [vmem:[%s221_s29 + $0x48] sm:$0xff] (%p51_p3)  ;;  %v242_v4 = vld [vmem:[%s221_s29 + $0x50] sm:$0xff] (%p51_p3) }
  0x14   : > { %239 = vst [vmem:[%s215_s30 + $0x10] sm:$0xff] (%p51_p3), %v238_v2  ;;  %v244_v5 = vld [vmem:[%s221_s29 + $0x58] sm:$0xff] (%p51_p3)  ;;  %241 = vst [vmem:[%s215_s30 + $0x18] sm:$0xff] (%p51_p3), %v240_v3 }
  0x15   : > { %243 = vst [vmem:[%s215_s30 + $0x20] sm:$0xff] %v242_v4  ;;  %245 = vst [vmem:[%s215_s30 + $0x28] sm:$0xff] %v244_v5 }
  0x16 PF: > { %p1336_p6 = scmp.ge.s32.totalorder %s1695_s19, 1  ;;  %p265_p7 = scmp.lt.s32.totalorder %s1695_s19, 4 }
  0x18   : > { %p266_p8 = pnand %p1336_p6, %p265_p7 }
  0x19   : > { %s328_s5 = smul.u32 (!%p266_p8), 96, %s1687_s17  ;;  %s272_s6 = sand.u32 (!%p266_p8), 1, %s1679_s15  }
  0x1a   : > { %269 = sbr.rel (%p266_p8) target bundleno = 412 (0x19c), region = 55  ;;  %p1441_p10 = scmp.ne.s32.totalorder (!%p266_p8), %s1687_s17, 0 }
  0x1b   : > { %s1463_s7 = smul.u32 (!%p266_p8), 48, %s272_s6  ;;  %p330_p9 = scmp.lt.s32.totalorder (!%p266_p8), %s328_s5, 287 }
  0x1d   : > { %s1769_s8 = scalar_lea.vmem (!%p266_p8), [#allocation3], %s1463_s7 }
  0x1e   : > { %v1557_v6 = vld [vmem:[%s1769_s8 + $0xc] ss:$24 sps:$4 sm:$0xff] (!%p266_p8)   ;;  %v1555_v0 = vld [vmem:[%s1769_s8 + $0x8] ss:$24 sps:$4 sm:$0xff] (!%p266_p8)  }
  0x1f   : > { %v1650_v7 = vld [vmem:[%s1769_s8 + $0x4] ss:$24 sps:$4 sm:$0xff] (!%p266_p8)   ;;  %1056 = vmatprep.mubr.bf16.mxu0 (!%p266_p8), %v1557_v6  ;;  %v1656_v2 = vld [vmem:[%s1769_s8 + $0x14] ss:$24 sps:$4 sm:$0xff] (!%p266_p8)  }
  0x20   : > { %1013 = vmatprep.mubr.bf16.mxu1 (!%p266_p8), %v1650_v7 }
  0x21   : > { %s1923_s5 = smov (!%p330_p9, %s328_s5), 287 }
  0x22   : > { %s1451_s9 = sshll.u32 %s1923_s5, 3 }
  0x23   : > { %s1776_s12 = scalar_lea.vmem %s1912_s1, %s1451_s9 }
  0x24   : > { %v1504_v8 = vld [vmem:[%s1776_s12 + $0x104] ss:$8 sps:$4 sm:$0xff]   ;;  %v1506_v9 = vld [vmem:[%s1776_s12 + $0x100] ss:$8 sps:$4 sm:$0xff]   ;;  %v1507_v10 = vld [vmem:[%s1776_s12 + $0x114] ss:$8 sps:$4 sm:$0xff]  }
  0x25   : > { %1024 = vmatprep.subr.bf16.mxu0 %v1504_v8  ;;  %v1509_v11 = vld [vmem:[%s1776_s12 + $0x110] ss:$8 sps:$4 sm:$0xff]   ;;  %v1510_v12 = vld [vmem:[%s1776_s12 + $0x124] ss:$8 sps:$4 sm:$0xff]   ;;  %v1512_v13 = vld [vmem:[%s1776_s12 + $0x120] ss:$8 sps:$4 sm:$0xff]  }
  0x26   : > { %1025 = vmatpush1.bf16.msra.mxu0 %v1506_v9  ;;  %v1513_v14 = vld [vmem:[%s1776_s12 + $0x134] ss:$8 sps:$4 sm:$0xff]   ;;  %v1515_v15 = vld [vmem:[%s1776_s12 + $0x130] ss:$8 sps:$4 sm:$0xff]   ;;  %v1516_v16 = vld [vmem:[%s1776_s12 + $0x144] ss:$8 sps:$4 sm:$0xff]  }
  0x27   : > { %1026 = vmatprep.subr.bf16.mxu0 %v1507_v10  ;;  %v1518_v17 = vld [vmem:[%s1776_s12 + $0x140] ss:$8 sps:$4 sm:$0xff]   ;;  %v1519_v18 = vld [vmem:[%s1776_s12 + $0x154] ss:$8 sps:$4 sm:$0xff]   ;;  %v1521_v19 = vld [vmem:[%s1776_s12 + $0x150] ss:$8 sps:$4 sm:$0xff]  }
  0x28   : > { %v1522_v20 = vld [vmem:[%s1776_s12 + $0x164] ss:$8 sps:$4 sm:$0xff]   ;;  %v1554_v22 = vld [vmem:[%s1776_s12] ss:$8 sps:$4 sm:$0xff]   ;;  %v1525_v24 = vld [vmem:[%s1776_s12 + $0x174] ss:$8 sps:$4 sm:$0xff]  }
  0x29   : > { %v1551_v21 = vld [vmem:[%s1776_s12 + $0x4] ss:$8 sps:$4 sm:$0xff]   ;;  %v1524_v23 = vld [vmem:[%s1776_s12 + $0x160] ss:$8 sps:$4 sm:$0xff]   ;;  %v1561_v25 = vld [vmem:[%s1776_s12 + $0x14] ss:$8 sps:$4 sm:$0xff]  }
  0x2a   : > { %1027 = vmatpush1.bf16.msra.mxu0 %v1509_v11  ;;  %981 = vmatprep.subr.bf16.mxu1 %v1551_v21  ;;  %v1563_v26 = vld [vmem:[%s1776_s12 + $0x10] ss:$8 sps:$4 sm:$0xff]   ;;  %v1528_v28 = vld [vmem:[%s1776_s12 + $0x184] ss:$8 sps:$4 sm:$0xff]   ;;  %v1569_v30 = vld [vmem:[%s1776_s12 + $0x20] ss:$8 sps:$4 sm:$0xff]  }
  0x2b   : > { %1028 = vmatprep.subr.bf16.mxu0 %v1510_v12  ;;  %982 = vmatpush1.bf16.msra.mxu1 %v1554_v22  ;;  %v1527_v27 = vld [vmem:[%s1776_s12 + $0x170] ss:$8 sps:$4 sm:$0xff]   ;;  %v1567_v29 = vld [vmem:[%s1776_s12 + $0x24] ss:$8 sps:$4 sm:$0xff]   ;;  %v1573_v31 = vld [vmem:[%s1776_s12 + $0x34] ss:$8 sps:$4 sm:$0xff]  }
  0x2c   : > { %983 = vmatprep.subr.bf16.mxu1 %v1561_v25  ;;  %v1530_v32 = vld [vmem:[%s1776_s12 + $0x180] ss:$8 sps:$4 sm:$0xff]   ;;  %v1531_v33 = vld [vmem:[%s1776_s12 + $0x194] ss:$8 sps:$4 sm:$0xff]   ;;  %v1575_v34 = vld [vmem:[%s1776_s12 + $0x30] ss:$8 sps:$4 sm:$0xff]  }
  0x2d   : > { %v1579_v35 = vld [vmem:[%s1776_s12 + $0x44] ss:$8 sps:$4 sm:$0xff]   ;;  %v1533_v36 = vld [vmem:[%s1776_s12 + $0x190] ss:$8 sps:$4 sm:$0xff]   ;;  %v1581_v38 = vld [vmem:[%s1776_s12 + $0x40] ss:$8 sps:$4 sm:$0xff]  }
  0x2e   : > { %1029 = vmatpush1.bf16.msra.mxu0 %v1512_v13  ;;  %v1534_v37 = vld [vmem:[%s1776_s12 + $0x1a4] ss:$8 sps:$4 sm:$0xff]   ;;  %v1585_v39 = vld [vmem:[%s1776_s12 + $0x54] ss:$8 sps:$4 sm:$0xff]   ;;  %v1536_v40 = vld [vmem:[%s1776_s12 + $0x1a0] ss:$8 sps:$4 sm:$0xff]  }
  0x2f   : > { %1030 = vmatprep.subr.bf16.mxu0 %v1513_v14  ;;  %984 = vmatpush1.bf16.msra.mxu1 %v1563_v26  ;;  %v1537_v41 = vld [vmem:[%s1776_s12 + $0x1b4] ss:$8 sps:$4 sm:$0xff]   ;;  %v1587_v42 = vld [vmem:[%s1776_s12 + $0x50] ss:$8 sps:$4 sm:$0xff]   ;;  %v1591_v43 = vld [vmem:[%s1776_s12 + $0x64] ss:$8 sps:$4 sm:$0xff]  }
  0x30   : > { %985 = vmatprep.subr.bf16.mxu1 %v1567_v29  ;;  %v1539_v44 = vld [vmem:[%s1776_s12 + $0x1b0] ss:$8 sps:$4 sm:$0xff]   ;;  %v1540_v45 = vld [vmem:[%s1776_s12 + $0x1c4] ss:$8 sps:$4 sm:$0xff]   ;;  %v1593_v46 = vld [vmem:[%s1776_s12 + $0x60] ss:$8 sps:$4 sm:$0xff]  }
  0x31   : > { %v1597_v47 = vld [vmem:[%s1776_s12 + $0x74] ss:$8 sps:$4 sm:$0xff]   ;;  %v1542_v48 = vld [vmem:[%s1776_s12 + $0x1c0] ss:$8 sps:$4 sm:$0xff]   ;;  %v1599_v50 = vld [vmem:[%s1776_s12 + $0x70] ss:$8 sps:$4 sm:$0xff]  }
  0x32   : > { %1031 = vmatpush1.bf16.msra.mxu0 %v1515_v15  ;;  %v1543_v49 = vld [vmem:[%s1776_s12 + $0x1d4] ss:$8 sps:$4 sm:$0xff]   ;;  %v1603_v51 = vld [vmem:[%s1776_s12 + $0x84] ss:$8 sps:$4 sm:$0xff]   ;;  %v1545_v52 = vld [vmem:[%s1776_s12 + $0x1d0] ss:$8 sps:$4 sm:$0xff]  }
  0x33   : > { %1032 = vmatprep.subr.bf16.mxu0 %v1516_v16  ;;  %986 = vmatpush1.bf16.msra.mxu1 %v1569_v30  ;;  %v1546_v53 = vld [vmem:[%s1776_s12 + $0x1e4] ss:$8 sps:$4 sm:$0xff]   ;;  %v1605_v54 = vld [vmem:[%s1776_s12 + $0x80] ss:$8 sps:$4 sm:$0xff]   ;;  %v1609_v55 = vld [vmem:[%s1776_s12 + $0x94] ss:$8 sps:$4 sm:$0xff]  }
  0x34   : > { %987 = vmatprep.subr.bf16.mxu1 %v1573_v31  ;;  %v1548_v56 = vld [vmem:[%s1776_s12 + $0x1e0] ss:$8 sps:$4 sm:$0xff]   ;;  %v1549_v57 = vld [vmem:[%s1776_s12 + $0x1f4] ss:$8 sps:$4 sm:$0xff]   ;;  %v1611_v58 = vld [vmem:[%s1776_s12 + $0x90] ss:$8 sps:$4 sm:$0xff]  }
  0x35   : > { %v1615_v59 = vld [vmem:[%s1776_s12 + $0xa4] ss:$8 sps:$4 sm:$0xff]   ;;  %v1553_v60 = vld [vmem:[%s1776_s12 + $0x1f0] ss:$8 sps:$4 sm:$0xff]   ;;  %v1617_v62 = vld [vmem:[%s1776_s12 + $0xa0] ss:$8 sps:$4 sm:$0xff]  }
  0x36   : > { %1033 = vmatpush1.bf16.msra.mxu0 %v1518_v17  ;;  %v1560_v61 = vld [vmem:[%s1776_s12 + $0x204] ss:$8 sps:$4 sm:$0xff]   ;;  %v1621_v63 = vld [vmem:[%s1776_s12 + $0xb4] ss:$8 sps:$4 sm:$0xff]   ;;  %v1558_v1 = vld [vmem:[%s1776_s12 + $0x200] ss:$8 sps:$4 sm:$0xff]  }
  0x37   : > { %1034 = vmatprep.subr.bf16.mxu0 %v1519_v18  ;;  %988 = vmatpush1.bf16.msra.mxu1 %v1575_v34  ;;  %v1566_v3 = vld [vmem:[%s1776_s12 + $0x214] ss:$8 sps:$4 sm:$0xff]   ;;  %v1623_v4 = vld [vmem:[%s1776_s12 + $0xb0] ss:$8 sps:$4 sm:$0xff]   ;;  %v1627_v5 = vld [vmem:[%s1776_s12 + $0xc4] ss:$8 sps:$4 sm:$0xff]  }
  0x38   : > { %989 = vmatprep.subr.bf16.mxu1 %v1579_v35  ;;  %v1564_v6 = vld [vmem:[%s1776_s12 + $0x210] ss:$8 sps:$4 sm:$0xff]   ;;  %v1572_v7 = vld [vmem:[%s1776_s12 + $0x224] ss:$8 sps:$4 sm:$0xff]   ;;  %v1629_v8 = vld [vmem:[%s1776_s12 + $0xc0] ss:$8 sps:$4 sm:$0xff]  }
  0x39   : > { %v1633_v9 = vld [vmem:[%s1776_s12 + $0xd4] ss:$8 sps:$4 sm:$0xff]   ;;  %v1570_v10 = vld [vmem:[%s1776_s12 + $0x220] ss:$8 sps:$4 sm:$0xff]   ;;  %v1635_v12 = vld [vmem:[%s1776_s12 + $0xd0] ss:$8 sps:$4 sm:$0xff]  }
  0x3a   : > { %1035 = vmatpush1.bf16.msra.mxu0 %v1521_v19  ;;  %v1578_v11 = vld [vmem:[%s1776_s12 + $0x234] ss:$8 sps:$4 sm:$0xff]   ;;  %v1639_v13 = vld [vmem:[%s1776_s12 + $0xe4] ss:$8 sps:$4 sm:$0xff]   ;;  %v1576_v14 = vld [vmem:[%s1776_s12 + $0x230] ss:$8 sps:$4 sm:$0xff]  }
  0x3b   : > { %1036 = vmatprep.subr.bf16.mxu0 %v1522_v20  ;;  %990 = vmatpush1.bf16.msra.mxu1 %v1581_v38  ;;  %v1584_v15 = vld [vmem:[%s1776_s12 + $0x244] ss:$8 sps:$4 sm:$0xff]   ;;  %v1641_v16 = vld [vmem:[%s1776_s12 + $0xe0] ss:$8 sps:$4 sm:$0xff]   ;;  %v1645_v17 = vld [vmem:[%s1776_s12 + $0xf4] ss:$8 sps:$4 sm:$0xff]  }
  0x3c   : > { %991 = vmatprep.subr.bf16.mxu1 %v1585_v39  ;;  %v1582_v18 = vld [vmem:[%s1776_s12 + $0x240] ss:$8 sps:$4 sm:$0xff]   ;;  %v1590_v19 = vld [vmem:[%s1776_s12 + $0x254] ss:$8 sps:$4 sm:$0xff]   ;;  %v1647_v20 = vld [vmem:[%s1776_s12 + $0xf0] ss:$8 sps:$4 sm:$0xff]  }
  0x3d   : > { %v1588_v21 = vld [vmem:[%s1776_s12 + $0x250] ss:$8 sps:$4 sm:$0xff]   ;;  %v1602_v25 = vld [vmem:[%s1776_s12 + $0x274] ss:$8 sps:$4 sm:$0xff]   ;;  %v1620_v31 = vld [vmem:[%s1776_s12 + $0x2a4] ss:$8 sps:$4 sm:$0xff]  }
  0x3e   : > { %1037 = vmatpush1.bf16.msra.mxu0 %v1524_v23  ;;  %v1648_v22 = vld [vmem:[%s1769_s8] ss:$24 sps:$4 sm:$0xff]   ;;  %v1596_v23 = vld [vmem:[%s1776_s12 + $0x264] ss:$8 sps:$4 sm:$0xff]   ;;  %v1614_v29 = vld [vmem:[%s1776_s12 + $0x294] ss:$8 sps:$4 sm:$0xff]  }
  0x3f   : > { %1038 = vmatprep.subr.bf16.mxu0 %v1525_v24  ;;  %992 = vmatpush1.bf16.msra.mxu1 %v1587_v42  ;;  %v1594_v24 = vld [vmem:[%s1776_s12 + $0x260] ss:$8 sps:$4 sm:$0xff]   ;;  %v1600_v26 = vld [vmem:[%s1776_s12 + $0x270] ss:$8 sps:$4 sm:$0xff]   ;;  %v1632_v35 = vld [vmem:[%s1776_s12 + $0x2c4] ss:$8 sps:$4 sm:$0xff]  }
  0x40   : > { %993 = vmatprep.subr.bf16.mxu1 %v1591_v43  ;;  %v1612_v30 = vld [vmem:[%s1776_s12 + $0x290] ss:$8 sps:$4 sm:$0xff]   ;;  %v1644_v39 = vld [vmem:[%s1776_s12 + $0x2e4] ss:$8 sps:$4 sm:$0xff]  }
  0x41   : > { %v1624_v34 = vld [vmem:[%s1776_s12 + $0x2b0] ss:$8 sps:$4 sm:$0xff]  }
  0x42   : > { %1039 = vmatpush1.bf16.msra.mxu0 %v1527_v27  ;;  %v1608_v27 = vld [vmem:[%s1776_s12 + $0x284] ss:$8 sps:$4 sm:$0xff]   ;;  %v1636_v38 = vld [vmem:[%s1776_s12 + $0x2d0] ss:$8 sps:$4 sm:$0xff]  }
  0x43   : > { %1040 = vmatprep.subr.bf16.mxu0 %v1528_v28  ;;  %994 = vmatpush1.bf16.msra.mxu1 %v1593_v46  ;;  %v1606_v28 = vld [vmem:[%s1776_s12 + $0x280] ss:$8 sps:$4 sm:$0xff]   ;;  %v1651_v42 = vld [vmem:[%s1776_s12 + $0x2f0] ss:$8 sps:$4 sm:$0xff]  }
  0x44   : > { %995 = vmatprep.subr.bf16.mxu1 %v1597_v47  ;;  %v1654_v43 = vld [vmem:[%s1769_s8 + $0x10] ss:$24 sps:$4 sm:$0xff]  }
  0x46   : > { %1041 = vmatpush1.bf16.msra.mxu0 %v1530_v32  ;;  %v1618_v32 = vld [vmem:[%s1776_s12 + $0x2a0] ss:$8 sps:$4 sm:$0xff]  }
  0x47   : > { %1042 = vmatprep.subr.bf16.mxu0 %v1531_v33  ;;  %996 = vmatpush1.bf16.msra.mxu1 %v1599_v50  ;;  %v1626_v33 = vld [vmem:[%s1776_s12 + $0x2b4] ss:$8 sps:$4 sm:$0xff]  }
  0x48   : > { %997 = vmatprep.subr.bf16.mxu1 %v1603_v51 }
  0x4a   : > { %1043 = vmatpush1.bf16.msra.mxu0 %v1533_v36  ;;  %v1630_v36 = vld [vmem:[%s1776_s12 + $0x2c0] ss:$8 sps:$4 sm:$0xff]  }
  0x4b   : > { %1044 = vmatprep.subr.bf16.mxu0 %v1534_v37  ;;  %998 = vmatpush1.bf16.msra.mxu1 %v1605_v54  ;;  %v1638_v37 = vld [vmem:[%s1776_s12 + $0x2d4] ss:$8 sps:$4 sm:$0xff]  }
  0x4c   : > { %999 = vmatprep.subr.bf16.mxu1 %v1609_v55 }
  0x4e   : > { %1045 = vmatpush1.bf16.msra.mxu0 %v1536_v40  ;;  %v1642_v40 = vld [vmem:[%s1776_s12 + $0x2e0] ss:$8 sps:$4 sm:$0xff]  }
  0x4f   : > { %1046 = vmatprep.subr.bf16.mxu0 %v1537_v41  ;;  %1000 = vmatpush1.bf16.msra.mxu1 %v1611_v58  ;;  %v1653_v41 = vld [vmem:[%s1776_s12 + $0x2f4] ss:$8 sps:$4 sm:$0xff]  }
  0x50   : > { %1001 = vmatprep.subr.bf16.mxu1 %v1615_v59 }
  0x52   : > { %1047 = vmatpush1.bf16.msra.mxu0 %v1539_v44 }
  0x53   : > { %1048 = vmatprep.subr.bf16.mxu0 %v1540_v45  ;;  %1002 = vmatpush1.bf16.msra.mxu1 %v1617_v62 }
  0x54   : > { %1003 = vmatprep.subr.bf16.mxu1 %v1621_v63 }
  0x56   : > { %1049 = vmatpush1.bf16.msra.mxu0 %v1542_v48 }
  0x57   : > { %1050 = vmatprep.subr.bf16.mxu0 %v1543_v49  ;;  %1004 = vmatpush1.bf16.msra.mxu1 %v1623_v4 }
  0x58   : > { %1005 = vmatprep.subr.bf16.mxu1 %v1627_v5 }
  0x5a   : > { %1051 = vmatpush1.bf16.msra.mxu0 %v1545_v52 }
  0x5b   : > { %1052 = vmatprep.subr.bf16.mxu0 %v1546_v53  ;;  %1006 = vmatpush1.bf16.msra.mxu1 %v1629_v8 }
  0x5c   : > { %1007 = vmatprep.subr.bf16.mxu1 %v1633_v9 }
  0x5e   : > { %1053 = vmatpush1.bf16.msra.mxu0 %v1548_v56 }
  0x5f   : > { %1054 = vmatprep.subr.bf16.mxu0 %v1549_v57  ;;  %1008 = vmatpush1.bf16.msra.mxu1 %v1635_v12 }
  0x60   : > { %1009 = vmatprep.subr.bf16.mxu1 %v1639_v13 }
  0x62   : > { %1055 = vmatpush1.bf16.msra.mxu0 %v1553_v60 }
  0x63   : > { %1067 = vmatprep.subr.bf16.mxu0 %v1560_v61  ;;  %1010 = vmatpush1.bf16.msra.mxu1 %v1641_v16 }
  0x64   : > { %1011 = vmatprep.subr.bf16.mxu1 %v1645_v17 }
  0x65   : > { %1057 = vmatmul.mubr.bf16.vlgmr.msra.gmra.mrb[0].mxu0 %v1555_v0 }
  0x66   : > { %1068 = vmatpush1.bf16.msra.mxu0 %v1558_v1  ;;  %1099 = vmatprep.mubr.bf16.mxu0 %v1656_v2 }
  0x67   : > { %1069 = vmatprep.subr.bf16.mxu0 %v1566_v3  ;;  %1012 = vmatpush1.bf16.msra.mxu1 %v1647_v20 }
  0x6a   : > { %1070 = vmatpush1.bf16.msra.mxu0 %v1564_v6  ;;  %1014 = vmatmul.mubr.bf16.vlgmr.msra.gmra.mrb[0].mxu1 %v1648_v22 }
  0x6b   : > { %1071 = vmatprep.subr.bf16.mxu0 %v1572_v7 }
  0x6e   : > { %1072 = vmatpush1.bf16.msra.mxu0 %v1570_v10 }
  0x6f   : > { %1073 = vmatprep.subr.bf16.mxu0 %v1578_v11 }
  0x72   : > { %1074 = vmatpush1.bf16.msra.mxu0 %v1576_v14 }
  0x73   : > { %1075 = vmatprep.subr.bf16.mxu0 %v1584_v15 }
  0x76   : > { %1076 = vmatpush1.bf16.msra.mxu0 %v1582_v18 }
  0x77   : > { %1077 = vmatprep.subr.bf16.mxu0 %v1590_v19 }
  0x7a   : > { %1078 = vmatpush1.bf16.msra.mxu0 %v1588_v21 }
  0x7b   : > { %1079 = vmatprep.subr.bf16.mxu0 %v1596_v23 }
  0x7e   : > { %1080 = vmatpush1.bf16.msra.mxu0 %v1594_v24 }
  0x7f   : > { %1081 = vmatprep.subr.bf16.mxu0 %v1602_v25 }
  0x82   : > { %1082 = vmatpush1.bf16.msra.mxu0 %v1600_v26 }
  0x83   : > { %1083 = vmatprep.subr.bf16.mxu0 %v1608_v27 }
  0x86   : > { %1084 = vmatpush1.bf16.msra.mxu0 %v1606_v28 }
  0x87   : > { %1085 = vmatprep.subr.bf16.mxu0 %v1614_v29 }
  0x8a   : > { %1086 = vmatpush1.bf16.msra.mxu0 %v1612_v30 }
  0x8b   : > { %1087 = vmatprep.subr.bf16.mxu0 %v1620_v31 }
  0x8e   : > { %1088 = vmatpush1.bf16.msra.mxu0 %v1618_v32 }
  0x8f   : > { %1089 = vmatprep.subr.bf16.mxu0 %v1626_v33 }
  0x92   : > { %1090 = vmatpush1.bf16.msra.mxu0 %v1624_v34 }
  0x93   : > { %1091 = vmatprep.subr.bf16.mxu0 %v1632_v35 }
  0x96   : > { %1092 = vmatpush1.bf16.msra.mxu0 %v1630_v36 }
  0x97   : > { %1093 = vmatprep.subr.bf16.mxu0 %v1638_v37 }
  0x9a   : > { %1094 = vmatpush1.bf16.msra.mxu0 %v1636_v38 }
  0x9b   : > { %1095 = vmatprep.subr.bf16.mxu0 %v1644_v39 }
  0x9e   : > { %1096 = vmatpush1.bf16.msra.mxu0 %v1642_v40 }
  0x9f   : > { %1097 = vmatprep.subr.bf16.mxu0 %v1653_v41 }
  0xa2   : > { %1098 = vmatpush1.bf16.msra.mxu0 %v1651_v42 }
  0xa5   : > { %1100 = vmatmul.mubr.bf16.vlgmr.msra.gmra.mrb[0].mxu0 %v1654_v43 }
 0x13d   : > { %v1015_v44 = vpop.f32.mrb[0].mxu1 }
 0x13e   : > { %v1017_v45 = vpop.f32.mrb[1].mxu1 }
 0x13f   : > { %v1019_v46 = vpop.f32.mrb[2].mxu1 }
 0x140   : > { %v1021_v47 = vpop.f32.mrb[3].mxu1 }
 0x176   : > { %1113 = sbr.rel (%p1441_p10) target bundleno = 383 (0x17f), region = 63 }
 0x178   : > { %v1101_v48 = vpop.f32.mrb[0].mxu0 }
 0x179   : > { %v1454_v49 = vadd.f32 %v1101_v48, %v1015_v44  ;;  %v1103_v50 = vpop.f32.mrb[1].mxu0 }
 0x17a   : > { %v1455_v51 = vadd.f32 %v1103_v50, %v1017_v45  ;;  %v1105_v52 = vpop.f32.mrb[2].mxu0 }
 0x17b   : > { %v1456_v53 = vadd.f32 %v1105_v52, %v1019_v46  ;;  %v1107_v54 = vpop.f32.mrb[3].mxu0  ;;  %1114 = vst [vmem:[#allocation2] sm:$0xff] (!%p1441_p10), %v1454_v49 }
 0x17c   : > { %v1457_v55 = vadd.f32 %v1107_v54, %v1021_v47  ;;  %1115 = vst [vmem:[#allocation2 + $0x8] sm:$0xff] (!%p1441_p10), %v1455_v51 }
 0x17d   : > { %1116 = vst [vmem:[#allocation2 + $0x10] sm:$0xff] %v1456_v53 }
 0x17e   : > { %1117 = vst [vmem:[#allocation2 + $0x18] sm:$0xff] %v1457_v55 }
 0x17f PF: > { %p1442_p11 = scmp.le.s32.totalorder %s1687_s17, 0 }
 0x181   : > { %1121 = sbr.rel (%p1442_p11) target bundleno = 394 (0x18a), region = 67 }
 0x184   : > { %v1122_v56 = vld [vmem:[#allocation2] sm:$0xff] (!%p1442_p11) }
 0x185   : > { %v1123_v57 = vld [vmem:[#allocation2 + $0x8] sm:$0xff] (!%p1442_p11)  ;;  %v1126_v59 = vadd.f32 (!%p1442_p11), %v1454_v49, %v1122_v56  ;;  %v1125_v62 = vld [vmem:[#allocation2 + $0x18] sm:$0xff] (!%p1442_p11) }
 0x186   : > { %v1124_v58 = vld [vmem:[#allocation2 + $0x10] sm:$0xff] (!%p1442_p11)  ;;  %v1127_v60 = vadd.f32 (!%p1442_p11), %v1455_v51, %v1123_v57  ;;  %v1129_v63 = vadd.f32 (!%p1442_p11), %v1457_v55, %v1125_v62 }
 0x187   : > { %v1128_v61 = vadd.f32 (!%p1442_p11), %v1456_v53, %v1124_v58  ;;  %1130 = vst [vmem:[#allocation2] sm:$0xff] (!%p1442_p11), %v1126_v59 }
 0x188   : > { %1131 = vst [vmem:[#allocation2 + $0x8] sm:$0xff] %v1127_v60  ;;  %1133 = vst [vmem:[#allocation2 + $0x18] sm:$0xff] %v1129_v63 }
 0x189   : > { %1132 = vst [vmem:[#allocation2 + $0x10] sm:$0xff] %v1128_v61 }
 0x18a PF: > { %p1443_p12 = scmp.ne.s32.totalorder %s1687_s17, 2 }
 0x18b   : > { %v1144_v0 = vlaneseq (!%p1443_p12)  ;;  %v1158_v2 = vld [vmem:[%s1914_s3] sm:$0xff] (!%p1443_p12)  ;;  %v1159_v4 = vld [vmem:[%s1914_s3 + $0x8] sm:$0xff] (!%p1443_p12) }
 0x18c   : > { %1137 = sbr.rel (%p1443_p12) target bundleno = 412 (0x19c), region = 71  ;;  %v1142_v3 = vld [vmem:[%s1913_s2] sm:$0x3] (!%p1443_p12)  ;;  %v1160_v9 = vunpack.c.l.bf16 (!%p1443_p12), %v1158_v2  ;;  %v1161_v10 = vunpack.c.h.bf16 (!%p1443_p12), %v1158_v2  ;;  %v1162_v15 = vunpack.c.l.bf16 (!%p1443_p12), %v1159_v4  ;;  %v1163_v16 = vunpack.c.h.bf16 (!%p1443_p12), %v1159_v4 }
 0x18d   : > { %v1145_v1 = vshrl.u32 (!%p1443_p12), %v1144_v0, 7 }
 0x18f   : > { %v1146_v6 = vsub.s32 (!%p1443_p12), 0, %v1145_v1  ;;  %v1150_v7 = vsub.s32 (!%p1443_p12), 1, %v1145_v1 }
 0x190   : > { %v1138_v5 = vld [vmem:[#allocation2] sm:$0xff] (!%p1443_p12)  ;;  %v1140_v11 = vld [vmem:[#allocation2 + $0x10] sm:$0xff] (!%p1443_p12) }
 0x191   : > { %v1139_v8 = vld [vmem:[#allocation2 + $0x8] sm:$0xff] (!%p1443_p12)  ;;  %v1141_v12 = vld [vmem:[#allocation2 + $0x18] sm:$0xff] (!%p1443_p12)  ;;  %v1147_v13 = vrot.slane (!%p1443_p12), %v1142_v3, %v1146_v6  ;;  %v1151_v14 = vrot.slane (!%p1443_p12), %v1142_v3, %v1150_v7 }
 0x193   : > { %v1154_v17 = vadd.f32 %v1147_v13, %v1138_v5  ;;  %v1155_v18 = vadd.f32 %v1151_v14, %v1139_v8  ;;  %v1156_v19 = vadd.f32 %v1147_v13, %v1140_v11  ;;  %v1157_v20 = vadd.f32 %v1151_v14, %v1141_v12 }
 0x195   : > { %v1164_v21 = vadd.f32 %v1160_v9, %v1154_v17  ;;  %v1165_v22 = vadd.f32 %v1161_v10, %v1155_v18  ;;  %v1166_v23 = vadd.f32 %v1162_v15, %v1156_v19  ;;  %v1167_v24 = vadd.f32 %v1163_v16, %v1157_v20 }
 0x197   : > { %v1168_v25 = vmax.f32 %v1164_v21, 0.0  ;;  %v1169_v26 = vmax.f32 %v1165_v22, 0.0  ;;  %v1170_v27 = vmax.f32 %v1166_v23, 0.0  ;;  %v1171_v28 = vmax.f32 %v1167_v24, 0.0 }
 0x199   : > { %v1452_v29 = vpack.c.bf16 %v1169_v26, %v1168_v25  ;;  %v1453_v30 = vpack.c.bf16 %v1171_v28, %v1170_v27 }
 0x19b   : > { %1184 = vst [vmem:[%s1915_s4] sm:$0xff] %v1452_v29  ;;  %1185 = vst [vmem:[%s1915_s4 + $0x8] sm:$0xff] %v1453_v30 }
 0x19c PF: > { %s14_s19 = sadd.s32 1, %s1695_s19   ;;  %s1916_s15 = smov %s1683_s16 }
 0x19d   : > { %p11_p13 = scmp.ge.s32.totalorder %s14_s19, 5   ;;  %s1917_s16 = smov %s1757_s23 }
 0x19e   : > { %s1918_s17 = smov %s1691_s18  ;;  %s1919_s18 = smov %s1921_s20 }
 0x19f   :  { %13 = sbr.rel (!%p11_p13) target bundleno = 3 (0x3), region = 115 }

// kernel: _lambda_.36
= control target key start
LH: loop header
LB: loop body
LE: loop exit
PB: predicated region body
PF: predicated region fallthrough
CT: control target
= control target key end

     0   :  { %s1617_s12 = smov 0   ;;  %s1619_s13 = smov 0   ;;  %s1800_s0 = inlined_call_operand.vmem [shape: bf16[16,2304], index: 0, kind: input, shape index: {}]   ;;  %s1801_s1 = inlined_call_operand.vmem [shape: bf16[2304,256], index: 1, kind: input, shape index: {}]   ;;  %s1802_s2 = inlined_call_operand.vmem [shape: f32[1,256], index: 2, kind: input, shape index: {}]   ;;  %s1803_s3 = inlined_call_operand.vmem [shape: bf16[16,256], index: 3, kind: output, shape index: {}]  }
   0x1   :  { %s1621_s14 = smov 0   ;;  %s1623_s15 = smov 0  }
   0x2   :  { %s1625_s16 = smov 0  }
   0x3 LB: > { %s25_s17 = sadd.s32 1, %s1591_s15  ;;  %p48_p1 = scmp.ne.s32.totalorder %s1583_s13, %s1579_s12  ;;  %s1595_s16 = sphi %s1625_s16, %s13_s16   ;;  %s1591_s15 = sphi %s1623_s15, %s1807_s15   ;;  %s1587_s14 = sphi %s1621_s14, %s1806_s14   ;;  %s1583_s13 = sphi %s1619_s13, %s1805_s13   ;;  %s1579_s12 = sphi %s1617_s12, %s1804_s12  }
   0x4   : > { %p26_p0 = scmp.ge.s32.totalorder %s25_s17, 3  ;;  %p49_p2 = scmp.eq.s32.totalorder %s1595_s16, 0 }
   0x5   : > { %s41_s19 = sadd.s32 1, %s1583_s13  ;;  %p1234_p5 = scmp.ge.s32.totalorder %s1595_s16, 3 }
   0x6   : > { %s1809_s17 = smov (%p26_p0, %s25_s17), 0  ;;  %p50_p3 = por %p49_p2, %p48_p1 }
   0x7   : > { %s37_s18 = ssub.s32 %s1591_s15, %s1809_s17  ;;  %164 = sbr.rel (%p1234_p5) target bundleno = 22 (0x16), region = 20 }
   0x8   : > { %p39_p4 = scmp.eq.s32.totalorder %s37_s18, 0 }
   0xa   : > { %s1652_s20 = scalar_select %p39_p4, %s1583_s13, %s41_s19  }
   0xe   : > { %167 = sbr.rel (!%p50_p3) target bundleno = 22 (0x16), region = 24  ;;  %s169_s21 = sand.u32 (%p50_p3), 1, %s1583_s13  }
   0xf   : > { %s1350_s22 = smul.u32 (%p50_p3), 24, %s1591_s15 }
  0x10   : > { %s1362_s23 = smul.u32 (%p50_p3), 48, %s169_s21 }
  0x11   : > { %s177_s26 = scalar_lea.vmem (%p50_p3), %s1800_s0, %s1350_s22 }
  0x12   : > { %v190_v0 = vld [vmem:[%s177_s26] sm:$0xff] (%p50_p3)  ;;  %v192_v1 = vld [vmem:[%s177_s26 + $0x8] sm:$0xff] (%p50_p3)  ;;  %v194_v2 = vld [vmem:[%s177_s26 + $0x10] sm:$0xff] (%p50_p3)  ;;  %s171_s27 = scalar_lea.vmem (%p50_p3), [#allocation3], %s1362_s23 }
  0x13   : > { %191 = vst [vmem:[%s171_s27] sm:$0xff] (%p50_p3), %v190_v0  ;;  %193 = vst [vmem:[%s171_s27 + $0x8] sm:$0xff] (%p50_p3), %v192_v1  ;;  %v196_v3 = vld [vmem:[%s177_s26 + $0x48] sm:$0xff] (%p50_p3)  ;;  %v198_v4 = vld [vmem:[%s177_s26 + $0x50] sm:$0xff] (%p50_p3) }
  0x14   : > { %195 = vst [vmem:[%s171_s27 + $0x10] sm:$0xff] (%p50_p3), %v194_v2  ;;  %v200_v5 = vld [vmem:[%s177_s26 + $0x58] sm:$0xff] (%p50_p3)  ;;  %197 = vst [vmem:[%s171_s27 + $0x18] sm:$0xff] (%p50_p3), %v196_v3 }
  0x15   : > { %199 = vst [vmem:[%s171_s27 + $0x20] sm:$0xff] %v198_v4  ;;  %201 = vst [vmem:[%s171_s27 + $0x28] sm:$0xff] %v200_v5 }
  0x16 PF: > { %p1236_p6 = scmp.ge.s32.totalorder %s1595_s16, 1  ;;  %p221_p7 = scmp.lt.s32.totalorder %s1595_s16, 4 }
  0x18   : > { %p222_p8 = pnand %p1236_p6, %p221_p7 }
  0x19   : > { %s272_s28 = smul.u32 (!%p222_p8), 96, %s1587_s14  ;;  %s228_s29 = sand.u32 (!%p222_p8), 1, %s1579_s12  }
  0x1a   : > { %225 = sbr.rel (%p222_p8) target bundleno = 410 (0x19a), region = 51  ;;  %p1341_p10 = scmp.ne.s32.totalorder (!%p222_p8), %s1587_s14, 0 }
  0x1b   : > { %s1363_s30 = smul.u32 (!%p222_p8), 48, %s228_s29  ;;  %p274_p9 = scmp.lt.s32.totalorder (!%p222_p8), %s272_s28, 287 }
  0x1d   : > { %s1664_s4 = scalar_lea.vmem (!%p222_p8), [#allocation3], %s1363_s30 }
  0x1e   : > { %v1457_v6 = vld [vmem:[%s1664_s4 + $0xc] ss:$24 sps:$4 sm:$0xff] (!%p222_p8)   ;;  %v1455_v0 = vld [vmem:[%s1664_s4 + $0x8] ss:$24 sps:$4 sm:$0xff] (!%p222_p8)  }
  0x1f   : > { %v1550_v7 = vld [vmem:[%s1664_s4 + $0x4] ss:$24 sps:$4 sm:$0xff] (!%p222_p8)   ;;  %988 = vmatprep.mubr.bf16.mxu0 (!%p222_p8), %v1457_v6  ;;  %v1556_v2 = vld [vmem:[%s1664_s4 + $0x14] ss:$24 sps:$4 sm:$0xff] (!%p222_p8)  }
  0x20   : > { %945 = vmatprep.mubr.bf16.mxu1 (!%p222_p8), %v1550_v7 }
  0x21   : > { %s1811_s28 = smov (!%p274_p9, %s272_s28), 287 }
  0x22   : > { %s1351_s5 = sshll.u32 %s1811_s28, 3 }
  0x23   : > { %s1671_s8 = scalar_lea.vmem %s1801_s1, %s1351_s5 }
  0x24   : > { %v1404_v8 = vld [vmem:[%s1671_s8 + $0x104] ss:$8 sps:$4 sm:$0xff]   ;;  %v1406_v9 = vld [vmem:[%s1671_s8 + $0x100] ss:$8 sps:$4 sm:$0xff]   ;;  %v1407_v10 = vld [vmem:[%s1671_s8 + $0x114] ss:$8 sps:$4 sm:$0xff]  }
  0x25   : > { %956 = vmatprep.subr.bf16.mxu0 %v1404_v8  ;;  %v1409_v11 = vld [vmem:[%s1671_s8 + $0x110] ss:$8 sps:$4 sm:$0xff]   ;;  %v1410_v12 = vld [vmem:[%s1671_s8 + $0x124] ss:$8 sps:$4 sm:$0xff]   ;;  %v1412_v13 = vld [vmem:[%s1671_s8 + $0x120] ss:$8 sps:$4 sm:$0xff]  }
  0x26   : > { %957 = vmatpush1.bf16.msra.mxu0 %v1406_v9  ;;  %v1413_v14 = vld [vmem:[%s1671_s8 + $0x134] ss:$8 sps:$4 sm:$0xff]   ;;  %v1415_v15 = vld [vmem:[%s1671_s8 + $0x130] ss:$8 sps:$4 sm:$0xff]   ;;  %v1416_v16 = vld [vmem:[%s1671_s8 + $0x144] ss:$8 sps:$4 sm:$0xff]  }
  0x27   : > { %958 = vmatprep.subr.bf16.mxu0 %v1407_v10  ;;  %v1418_v17 = vld [vmem:[%s1671_s8 + $0x140] ss:$8 sps:$4 sm:$0xff]   ;;  %v1419_v18 = vld [vmem:[%s1671_s8 + $0x154] ss:$8 sps:$4 sm:$0xff]   ;;  %v1421_v19 = vld [vmem:[%s1671_s8 + $0x150] ss:$8 sps:$4 sm:$0xff]  }
  0x28   : > { %v1422_v20 = vld [vmem:[%s1671_s8 + $0x164] ss:$8 sps:$4 sm:$0xff]   ;;  %v1454_v22 = vld [vmem:[%s1671_s8] ss:$8 sps:$4 sm:$0xff]   ;;  %v1425_v24 = vld [vmem:[%s1671_s8 + $0x174] ss:$8 sps:$4 sm:$0xff]  }
  0x29   : > { %v1451_v21 = vld [vmem:[%s1671_s8 + $0x4] ss:$8 sps:$4 sm:$0xff]   ;;  %v1424_v23 = vld [vmem:[%s1671_s8 + $0x160] ss:$8 sps:$4 sm:$0xff]   ;;  %v1461_v25 = vld [vmem:[%s1671_s8 + $0x14] ss:$8 sps:$4 sm:$0xff]  }
  0x2a   : > { %959 = vmatpush1.bf16.msra.mxu0 %v1409_v11  ;;  %913 = vmatprep.subr.bf16.mxu1 %v1451_v21  ;;  %v1463_v26 = vld [vmem:[%s1671_s8 + $0x10] ss:$8 sps:$4 sm:$0xff]   ;;  %v1428_v28 = vld [vmem:[%s1671_s8 + $0x184] ss:$8 sps:$4 sm:$0xff]   ;;  %v1469_v30 = vld [vmem:[%s1671_s8 + $0x20] ss:$8 sps:$4 sm:$0xff]  }
  0x2b   : > { %960 = vmatprep.subr.bf16.mxu0 %v1410_v12  ;;  %914 = vmatpush1.bf16.msra.mxu1 %v1454_v22  ;;  %v1427_v27 = vld [vmem:[%s1671_s8 + $0x170] ss:$8 sps:$4 sm:$0xff]   ;;  %v1467_v29 = vld [vmem:[%s1671_s8 + $0x24] ss:$8 sps:$4 sm:$0xff]   ;;  %v1473_v31 = vld [vmem:[%s1671_s8 + $0x34] ss:$8 sps:$4 sm:$0xff]  }
  0x2c   : > { %915 = vmatprep.subr.bf16.mxu1 %v1461_v25  ;;  %v1430_v32 = vld [vmem:[%s1671_s8 + $0x180] ss:$8 sps:$4 sm:$0xff]   ;;  %v1431_v33 = vld [vmem:[%s1671_s8 + $0x194] ss:$8 sps:$4 sm:$0xff]   ;;  %v1475_v34 = vld [vmem:[%s1671_s8 + $0x30] ss:$8 sps:$4 sm:$0xff]  }
  0x2d   : > { %v1479_v35 = vld [vmem:[%s1671_s8 + $0x44] ss:$8 sps:$4 sm:$0xff]   ;;  %v1433_v36 = vld [vmem:[%s1671_s8 + $0x190] ss:$8 sps:$4 sm:$0xff]   ;;  %v1481_v38 = vld [vmem:[%s1671_s8 + $0x40] ss:$8 sps:$4 sm:$0xff]  }
  0x2e   : > { %961 = vmatpush1.bf16.msra.mxu0 %v1412_v13  ;;  %v1434_v37 = vld [vmem:[%s1671_s8 + $0x1a4] ss:$8 sps:$4 sm:$0xff]   ;;  %v1485_v39 = vld [vmem:[%s1671_s8 + $0x54] ss:$8 sps:$4 sm:$0xff]   ;;  %v1436_v40 = vld [vmem:[%s1671_s8 + $0x1a0] ss:$8 sps:$4 sm:$0xff]  }
  0x2f   : > { %962 = vmatprep.subr.bf16.mxu0 %v1413_v14  ;;  %916 = vmatpush1.bf16.msra.mxu1 %v1463_v26  ;;  %v1437_v41 = vld [vmem:[%s1671_s8 + $0x1b4] ss:$8 sps:$4 sm:$0xff]   ;;  %v1487_v42 = vld [vmem:[%s1671_s8 + $0x50] ss:$8 sps:$4 sm:$0xff]   ;;  %v1491_v43 = vld [vmem:[%s1671_s8 + $0x64] ss:$8 sps:$4 sm:$0xff]  }
  0x30   : > { %917 = vmatprep.subr.bf16.mxu1 %v1467_v29  ;;  %v1439_v44 = vld [vmem:[%s1671_s8 + $0x1b0] ss:$8 sps:$4 sm:$0xff]   ;;  %v1440_v45 = vld [vmem:[%s1671_s8 + $0x1c4] ss:$8 sps:$4 sm:$0xff]   ;;  %v1493_v46 = vld [vmem:[%s1671_s8 + $0x60] ss:$8 sps:$4 sm:$0xff]  }
  0x31   : > { %v1497_v47 = vld [vmem:[%s1671_s8 + $0x74] ss:$8 sps:$4 sm:$0xff]   ;;  %v1442_v48 = vld [vmem:[%s1671_s8 + $0x1c0] ss:$8 sps:$4 sm:$0xff]   ;;  %v1499_v50 = vld [vmem:[%s1671_s8 + $0x70] ss:$8 sps:$4 sm:$0xff]  }
  0x32   : > { %963 = vmatpush1.bf16.msra.mxu0 %v1415_v15  ;;  %v1443_v49 = vld [vmem:[%s1671_s8 + $0x1d4] ss:$8 sps:$4 sm:$0xff]   ;;  %v1503_v51 = vld [vmem:[%s1671_s8 + $0x84] ss:$8 sps:$4 sm:$0xff]   ;;  %v1445_v52 = vld [vmem:[%s1671_s8 + $0x1d0] ss:$8 sps:$4 sm:$0xff]  }
  0x33   : > { %964 = vmatprep.subr.bf16.mxu0 %v1416_v16  ;;  %918 = vmatpush1.bf16.msra.mxu1 %v1469_v30  ;;  %v1446_v53 = vld [vmem:[%s1671_s8 + $0x1e4] ss:$8 sps:$4 sm:$0xff]   ;;  %v1505_v54 = vld [vmem:[%s1671_s8 + $0x80] ss:$8 sps:$4 sm:$0xff]   ;;  %v1509_v55 = vld [vmem:[%s1671_s8 + $0x94] ss:$8 sps:$4 sm:$0xff]  }
  0x34   : > { %919 = vmatprep.subr.bf16.mxu1 %v1473_v31  ;;  %v1448_v56 = vld [vmem:[%s1671_s8 + $0x1e0] ss:$8 sps:$4 sm:$0xff]   ;;  %v1449_v57 = vld [vmem:[%s1671_s8 + $0x1f4] ss:$8 sps:$4 sm:$0xff]   ;;  %v1511_v58 = vld [vmem:[%s1671_s8 + $0x90] ss:$8 sps:$4 sm:$0xff]  }
  0x35   : > { %v1515_v59 = vld [vmem:[%s1671_s8 + $0xa4] ss:$8 sps:$4 sm:$0xff]   ;;  %v1453_v60 = vld [vmem:[%s1671_s8 + $0x1f0] ss:$8 sps:$4 sm:$0xff]   ;;  %v1517_v62 = vld [vmem:[%s1671_s8 + $0xa0] ss:$8 sps:$4 sm:$0xff]  }
  0x36   : > { %965 = vmatpush1.bf16.msra.mxu0 %v1418_v17  ;;  %v1460_v61 = vld [vmem:[%s1671_s8 + $0x204] ss:$8 sps:$4 sm:$0xff]   ;;  %v1521_v63 = vld [vmem:[%s1671_s8 + $0xb4] ss:$8 sps:$4 sm:$0xff]   ;;  %v1458_v1 = vld [vmem:[%s1671_s8 + $0x200] ss:$8 sps:$4 sm:$0xff]  }
  0x37   : > { %966 = vmatprep.subr.bf16.mxu0 %v1419_v18  ;;  %920 = vmatpush1.bf16.msra.mxu1 %v1475_v34  ;;  %v1466_v3 = vld [vmem:[%s1671_s8 + $0x214] ss:$8 sps:$4 sm:$0xff]   ;;  %v1523_v4 = vld [vmem:[%s1671_s8 + $0xb0] ss:$8 sps:$4 sm:$0xff]   ;;  %v1527_v5 = vld [vmem:[%s1671_s8 + $0xc4] ss:$8 sps:$4 sm:$0xff]  }
  0x38   : > { %921 = vmatprep.subr.bf16.mxu1 %v1479_v35  ;;  %v1464_v6 = vld [vmem:[%s1671_s8 + $0x210] ss:$8 sps:$4 sm:$0xff]   ;;  %v1472_v7 = vld [vmem:[%s1671_s8 + $0x224] ss:$8 sps:$4 sm:$0xff]   ;;  %v1529_v8 = vld [vmem:[%s1671_s8 + $0xc0] ss:$8 sps:$4 sm:$0xff]  }
  0x39   : > { %v1533_v9 = vld [vmem:[%s1671_s8 + $0xd4] ss:$8 sps:$4 sm:$0xff]   ;;  %v1470_v10 = vld [vmem:[%s1671_s8 + $0x220] ss:$8 sps:$4 sm:$0xff]   ;;  %v1535_v12 = vld [vmem:[%s1671_s8 + $0xd0] ss:$8 sps:$4 sm:$0xff]  }
  0x3a   : > { %967 = vmatpush1.bf16.msra.mxu0 %v1421_v19  ;;  %v1478_v11 = vld [vmem:[%s1671_s8 + $0x234] ss:$8 sps:$4 sm:$0xff]   ;;  %v1539_v13 = vld [vmem:[%s1671_s8 + $0xe4] ss:$8 sps:$4 sm:$0xff]   ;;  %v1476_v14 = vld [vmem:[%s1671_s8 + $0x230] ss:$8 sps:$4 sm:$0xff]  }
  0x3b   : > { %968 = vmatprep.subr.bf16.mxu0 %v1422_v20  ;;  %922 = vmatpush1.bf16.msra.mxu1 %v1481_v38  ;;  %v1484_v15 = vld [vmem:[%s1671_s8 + $0x244] ss:$8 sps:$4 sm:$0xff]   ;;  %v1541_v16 = vld [vmem:[%s1671_s8 + $0xe0] ss:$8 sps:$4 sm:$0xff]   ;;  %v1545_v17 = vld [vmem:[%s1671_s8 + $0xf4] ss:$8 sps:$4 sm:$0xff]  }
  0x3c   : > { %923 = vmatprep.subr.bf16.mxu1 %v1485_v39  ;;  %v1482_v18 = vld [vmem:[%s1671_s8 + $0x240] ss:$8 sps:$4 sm:$0xff]   ;;  %v1490_v19 = vld [vmem:[%s1671_s8 + $0x254] ss:$8 sps:$4 sm:$0xff]   ;;  %v1547_v20 = vld [vmem:[%s1671_s8 + $0xf0] ss:$8 sps:$4 sm:$0xff]  }
  0x3d   : > { %v1488_v21 = vld [vmem:[%s1671_s8 + $0x250] ss:$8 sps:$4 sm:$0xff]   ;;  %v1502_v25 = vld [vmem:[%s1671_s8 + $0x274] ss:$8 sps:$4 sm:$0xff]   ;;  %v1520_v31 = vld [vmem:[%s1671_s8 + $0x2a4] ss:$8 sps:$4 sm:$0xff]  }
  0x3e   : > { %969 = vmatpush1.bf16.msra.mxu0 %v1424_v23  ;;  %v1548_v22 = vld [vmem:[%s1664_s4] ss:$24 sps:$4 sm:$0xff]   ;;  %v1496_v23 = vld [vmem:[%s1671_s8 + $0x264] ss:$8 sps:$4 sm:$0xff]   ;;  %v1514_v29 = vld [vmem:[%s1671_s8 + $0x294] ss:$8 sps:$4 sm:$0xff]  }
  0x3f   : > { %970 = vmatprep.subr.bf16.mxu0 %v1425_v24  ;;  %924 = vmatpush1.bf16.msra.mxu1 %v1487_v42  ;;  %v1494_v24 = vld [vmem:[%s1671_s8 + $0x260] ss:$8 sps:$4 sm:$0xff]   ;;  %v1500_v26 = vld [vmem:[%s1671_s8 + $0x270] ss:$8 sps:$4 sm:$0xff]   ;;  %v1532_v35 = vld [vmem:[%s1671_s8 + $0x2c4] ss:$8 sps:$4 sm:$0xff]  }
  0x40   : > { %925 = vmatprep.subr.bf16.mxu1 %v1491_v43  ;;  %v1512_v30 = vld [vmem:[%s1671_s8 + $0x290] ss:$8 sps:$4 sm:$0xff]   ;;  %v1544_v39 = vld [vmem:[%s1671_s8 + $0x2e4] ss:$8 sps:$4 sm:$0xff]  }
  0x41   : > { %v1524_v34 = vld [vmem:[%s1671_s8 + $0x2b0] ss:$8 sps:$4 sm:$0xff]  }
  0x42   : > { %971 = vmatpush1.bf16.msra.mxu0 %v1427_v27  ;;  %v1508_v27 = vld [vmem:[%s1671_s8 + $0x284] ss:$8 sps:$4 sm:$0xff]   ;;  %v1536_v38 = vld [vmem:[%s1671_s8 + $0x2d0] ss:$8 sps:$4 sm:$0xff]  }
  0x43   : > { %972 = vmatprep.subr.bf16.mxu0 %v1428_v28  ;;  %926 = vmatpush1.bf16.msra.mxu1 %v1493_v46  ;;  %v1506_v28 = vld [vmem:[%s1671_s8 + $0x280] ss:$8 sps:$4 sm:$0xff]   ;;  %v1551_v42 = vld [vmem:[%s1671_s8 + $0x2f0] ss:$8 sps:$4 sm:$0xff]  }
  0x44   : > { %927 = vmatprep.subr.bf16.mxu1 %v1497_v47  ;;  %v1554_v43 = vld [vmem:[%s1664_s4 + $0x10] ss:$24 sps:$4 sm:$0xff]  }
  0x46   : > { %973 = vmatpush1.bf16.msra.mxu0 %v1430_v32  ;;  %v1518_v32 = vld [vmem:[%s1671_s8 + $0x2a0] ss:$8 sps:$4 sm:$0xff]  }
  0x47   : > { %974 = vmatprep.subr.bf16.mxu0 %v1431_v33  ;;  %928 = vmatpush1.bf16.msra.mxu1 %v1499_v50  ;;  %v1526_v33 = vld [vmem:[%s1671_s8 + $0x2b4] ss:$8 sps:$4 sm:$0xff]  }
  0x48   : > { %929 = vmatprep.subr.bf16.mxu1 %v1503_v51 }
  0x4a   : > { %975 = vmatpush1.bf16.msra.mxu0 %v1433_v36  ;;  %v1530_v36 = vld [vmem:[%s1671_s8 + $0x2c0] ss:$8 sps:$4 sm:$0xff]  }
  0x4b   : > { %976 = vmatprep.subr.bf16.mxu0 %v1434_v37  ;;  %930 = vmatpush1.bf16.msra.mxu1 %v1505_v54  ;;  %v1538_v37 = vld [vmem:[%s1671_s8 + $0x2d4] ss:$8 sps:$4 sm:$0xff]  }
  0x4c   : > { %931 = vmatprep.subr.bf16.mxu1 %v1509_v55 }
  0x4e   : > { %977 = vmatpush1.bf16.msra.mxu0 %v1436_v40  ;;  %v1542_v40 = vld [vmem:[%s1671_s8 + $0x2e0] ss:$8 sps:$4 sm:$0xff]  }
  0x4f   : > { %978 = vmatprep.subr.bf16.mxu0 %v1437_v41  ;;  %932 = vmatpush1.bf16.msra.mxu1 %v1511_v58  ;;  %v1553_v41 = vld [vmem:[%s1671_s8 + $0x2f4] ss:$8 sps:$4 sm:$0xff]  }
  0x50   : > { %933 = vmatprep.subr.bf16.mxu1 %v1515_v59 }
  0x52   : > { %979 = vmatpush1.bf16.msra.mxu0 %v1439_v44 }
  0x53   : > { %980 = vmatprep.subr.bf16.mxu0 %v1440_v45  ;;  %934 = vmatpush1.bf16.msra.mxu1 %v1517_v62 }
  0x54   : > { %935 = vmatprep.subr.bf16.mxu1 %v1521_v63 }
  0x56   : > { %981 = vmatpush1.bf16.msra.mxu0 %v1442_v48 }
  0x57   : > { %982 = vmatprep.subr.bf16.mxu0 %v1443_v49  ;;  %936 = vmatpush1.bf16.msra.mxu1 %v1523_v4 }
  0x58   : > { %937 = vmatprep.subr.bf16.mxu1 %v1527_v5 }
  0x5a   : > { %983 = vmatpush1.bf16.msra.mxu0 %v1445_v52 }
  0x5b   : > { %984 = vmatprep.subr.bf16.mxu0 %v1446_v53  ;;  %938 = vmatpush1.bf16.msra.mxu1 %v1529_v8 }
  0x5c   : > { %939 = vmatprep.subr.bf16.mxu1 %v1533_v9 }
  0x5e   : > { %985 = vmatpush1.bf16.msra.mxu0 %v1448_v56 }
  0x5f   : > { %986 = vmatprep.subr.bf16.mxu0 %v1449_v57  ;;  %940 = vmatpush1.bf16.msra.mxu1 %v1535_v12 }
  0x60   : > { %941 = vmatprep.subr.bf16.mxu1 %v1539_v13 }
  0x62   : > { %987 = vmatpush1.bf16.msra.mxu0 %v1453_v60 }
  0x63   : > { %999 = vmatprep.subr.bf16.mxu0 %v1460_v61  ;;  %942 = vmatpush1.bf16.msra.mxu1 %v1541_v16 }
  0x64   : > { %943 = vmatprep.subr.bf16.mxu1 %v1545_v17 }
  0x65   : > { %989 = vmatmul.mubr.bf16.vlgmr.msra.gmra.mrb[0].mxu0 %v1455_v0 }
  0x66   : > { %1000 = vmatpush1.bf16.msra.mxu0 %v1458_v1  ;;  %1031 = vmatprep.mubr.bf16.mxu0 %v1556_v2 }
  0x67   : > { %1001 = vmatprep.subr.bf16.mxu0 %v1466_v3  ;;  %944 = vmatpush1.bf16.msra.mxu1 %v1547_v20 }
  0x6a   : > { %1002 = vmatpush1.bf16.msra.mxu0 %v1464_v6  ;;  %946 = vmatmul.mubr.bf16.vlgmr.msra.gmra.mrb[0].mxu1 %v1548_v22 }
  0x6b   : > { %1003 = vmatprep.subr.bf16.mxu0 %v1472_v7 }
  0x6e   : > { %1004 = vmatpush1.bf16.msra.mxu0 %v1470_v10 }
  0x6f   : > { %1005 = vmatprep.subr.bf16.mxu0 %v1478_v11 }
  0x72   : > { %1006 = vmatpush1.bf16.msra.mxu0 %v1476_v14 }
  0x73   : > { %1007 = vmatprep.subr.bf16.mxu0 %v1484_v15 }
  0x76   : > { %1008 = vmatpush1.bf16.msra.mxu0 %v1482_v18 }
  0x77   : > { %1009 = vmatprep.subr.bf16.mxu0 %v1490_v19 }
  0x7a   : > { %1010 = vmatpush1.bf16.msra.mxu0 %v1488_v21 }
  0x7b   : > { %1011 = vmatprep.subr.bf16.mxu0 %v1496_v23 }
  0x7e   : > { %1012 = vmatpush1.bf16.msra.mxu0 %v1494_v24 }
  0x7f   : > { %1013 = vmatprep.subr.bf16.mxu0 %v1502_v25 }
  0x82   : > { %1014 = vmatpush1.bf16.msra.mxu0 %v1500_v26 }
  0x83   : > { %1015 = vmatprep.subr.bf16.mxu0 %v1508_v27 }
  0x86   : > { %1016 = vmatpush1.bf16.msra.mxu0 %v1506_v28 }
  0x87   : > { %1017 = vmatprep.subr.bf16.mxu0 %v1514_v29 }
  0x8a   : > { %1018 = vmatpush1.bf16.msra.mxu0 %v1512_v30 }
  0x8b   : > { %1019 = vmatprep.subr.bf16.mxu0 %v1520_v31 }
  0x8e   : > { %1020 = vmatpush1.bf16.msra.mxu0 %v1518_v32 }
  0x8f   : > { %1021 = vmatprep.subr.bf16.mxu0 %v1526_v33 }
  0x92   : > { %1022 = vmatpush1.bf16.msra.mxu0 %v1524_v34 }
  0x93   : > { %1023 = vmatprep.subr.bf16.mxu0 %v1532_v35 }
  0x96   : > { %1024 = vmatpush1.bf16.msra.mxu0 %v1530_v36 }
  0x97   : > { %1025 = vmatprep.subr.bf16.mxu0 %v1538_v37 }
  0x9a   : > { %1026 = vmatpush1.bf16.msra.mxu0 %v1536_v38 }
  0x9b   : > { %1027 = vmatprep.subr.bf16.mxu0 %v1544_v39 }
  0x9e   : > { %1028 = vmatpush1.bf16.msra.mxu0 %v1542_v40 }
  0x9f   : > { %1029 = vmatprep.subr.bf16.mxu0 %v1553_v41 }
  0xa2   : > { %1030 = vmatpush1.bf16.msra.mxu0 %v1551_v42 }
  0xa5   : > { %1032 = vmatmul.mubr.bf16.vlgmr.msra.gmra.mrb[0].mxu0 %v1554_v43 }
 0x13d   : > { %v947_v44 = vpop.f32.mrb[0].mxu1 }
 0x13e   : > { %v949_v45 = vpop.f32.mrb[1].mxu1 }
 0x13f   : > { %v951_v46 = vpop.f32.mrb[2].mxu1 }
 0x140   : > { %v953_v47 = vpop.f32.mrb[3].mxu1 }
 0x176   : > { %1045 = sbr.rel (%p1341_p10) target bundleno = 383 (0x17f), region = 59 }
 0x178   : > { %v1033_v48 = vpop.f32.mrb[0].mxu0 }
 0x179   : > { %v1354_v49 = vadd.f32 %v1033_v48, %v947_v44  ;;  %v1035_v50 = vpop.f32.mrb[1].mxu0 }
 0x17a   : > { %v1355_v51 = vadd.f32 %v1035_v50, %v949_v45  ;;  %v1037_v52 = vpop.f32.mrb[2].mxu0 }
 0x17b   : > { %v1356_v53 = vadd.f32 %v1037_v52, %v951_v46  ;;  %v1039_v54 = vpop.f32.mrb[3].mxu0  ;;  %1046 = vst [vmem:[#allocation2] sm:$0xff] (!%p1341_p10), %v1354_v49 }
 0x17c   : > { %v1357_v55 = vadd.f32 %v1039_v54, %v953_v47  ;;  %1047 = vst [vmem:[#allocation2 + $0x8] sm:$0xff] (!%p1341_p10), %v1355_v51 }
 0x17d   : > { %1048 = vst [vmem:[#allocation2 + $0x10] sm:$0xff] %v1356_v53 }
 0x17e   : > { %1049 = vst [vmem:[#allocation2 + $0x18] sm:$0xff] %v1357_v55 }
 0x17f PF: > { %p1342_p11 = scmp.le.s32.totalorder %s1587_s14, 0 }
 0x181   : > { %1053 = sbr.rel (%p1342_p11) target bundleno = 394 (0x18a), region = 63 }
 0x184   : > { %v1054_v56 = vld [vmem:[#allocation2] sm:$0xff] (!%p1342_p11) }
 0x185   : > { %v1055_v57 = vld [vmem:[#allocation2 + $0x8] sm:$0xff] (!%p1342_p11)  ;;  %v1058_v59 = vadd.f32 (!%p1342_p11), %v1354_v49, %v1054_v56  ;;  %v1057_v62 = vld [vmem:[#allocation2 + $0x18] sm:$0xff] (!%p1342_p11) }
 0x186   : > { %v1056_v58 = vld [vmem:[#allocation2 + $0x10] sm:$0xff] (!%p1342_p11)  ;;  %v1059_v60 = vadd.f32 (!%p1342_p11), %v1355_v51, %v1055_v57  ;;  %v1061_v63 = vadd.f32 (!%p1342_p11), %v1357_v55, %v1057_v62 }
 0x187   : > { %v1060_v61 = vadd.f32 (!%p1342_p11), %v1356_v53, %v1056_v58  ;;  %1062 = vst [vmem:[#allocation2] sm:$0xff] (!%p1342_p11), %v1058_v59 }
 0x188   : > { %1063 = vst [vmem:[#allocation2 + $0x8] sm:$0xff] %v1059_v60  ;;  %1065 = vst [vmem:[#allocation2 + $0x18] sm:$0xff] %v1061_v63 }
 0x189   : > { %1064 = vst [vmem:[#allocation2 + $0x10] sm:$0xff] %v1060_v61 }
 0x18a PF: > { %p1343_p12 = scmp.ne.s32.totalorder %s1587_s14, 2 }
 0x18b   : > { %v1076_v0 = vlaneseq (!%p1343_p12)  ;;  %v1074_v2 = vld [vmem:[%s1802_s2] sm:$0x3] (!%p1343_p12) }
 0x18c   : > { %1069 = sbr.rel (%p1343_p12) target bundleno = 410 (0x19a), region = 67 }
 0x18d   : > { %v1077_v1 = vshrl.u32 (!%p1343_p12), %v1076_v0, 7 }
 0x18f   : > { %v1078_v4 = vsub.s32 (!%p1343_p12), 0, %v1077_v1  ;;  %v1082_v5 = vsub.s32 (!%p1343_p12), 1, %v1077_v1 }
 0x190   : > { %v1070_v3 = vld [vmem:[#allocation2] sm:$0xff] (!%p1343_p12)  ;;  %v1072_v7 = vld [vmem:[#allocation2 + $0x10] sm:$0xff] (!%p1343_p12) }
 0x191   : > { %v1071_v6 = vld [vmem:[#allocation2 + $0x8] sm:$0xff] (!%p1343_p12)  ;;  %v1073_v8 = vld [vmem:[#allocation2 + $0x18] sm:$0xff] (!%p1343_p12)  ;;  %v1079_v9 = vrot.slane (!%p1343_p12), %v1074_v2, %v1078_v4  ;;  %v1083_v10 = vrot.slane (!%p1343_p12), %v1074_v2, %v1082_v5 }
 0x193   : > { %v1086_v11 = vadd.f32 %v1079_v9, %v1070_v3  ;;  %v1087_v12 = vadd.f32 %v1083_v10, %v1071_v6  ;;  %v1088_v13 = vadd.f32 %v1079_v9, %v1072_v7  ;;  %v1089_v14 = vadd.f32 %v1083_v10, %v1073_v8 }
 0x195   : > { %v1090_v15 = vmax.f32 %v1086_v11, 0.0  ;;  %v1091_v16 = vmax.f32 %v1087_v12, 0.0  ;;  %v1092_v17 = vmax.f32 %v1088_v13, 0.0  ;;  %v1093_v18 = vmax.f32 %v1089_v14, 0.0 }
 0x197   : > { %v1352_v19 = vpack.c.bf16 %v1091_v16, %v1090_v15  ;;  %v1353_v20 = vpack.c.bf16 %v1093_v18, %v1092_v17 }
 0x199   : > { %1106 = vst [vmem:[%s1803_s3] sm:$0xff] %v1352_v19  ;;  %1107 = vst [vmem:[%s1803_s3 + $0x8] sm:$0xff] %v1353_v20 }
 0x19a PF: > { %s13_s16 = sadd.s32 1, %s1595_s16   ;;  %s1804_s12 = smov %s1583_s13 }
 0x19b   : > { %p10_p13 = scmp.ge.s32.totalorder %s13_s16, 5   ;;  %s1805_s13 = smov %s1652_s20 }
 0x19c   : > { %s1806_s14 = smov %s1591_s15  ;;  %s1807_s15 = smov %s1809_s17 }
 0x19d   :  { %12 = sbr.rel (!%p10_p13) target bundleno = 3 (0x3), region = 108 }

// kernel: _lambda_.38
= control target key start
LH: loop header
LB: loop body
LE: loop exit
PB: predicated region body
PF: predicated region fallthrough
CT: control target
= control target key end

     0   :  { %s2622_s0 = inlined_call_operand.vmem [shape: bf16[16,2304], index: 0, kind: input, shape index: {}]   ;;  %s2623_s1 = inlined_call_operand.vmem [shape: bf16[2304,512], index: 1, kind: input, shape index: {}]   ;;  %s2624_s2 = inlined_call_operand.vmem [shape: f32[1,512], index: 2, kind: input, shape index: {}]   ;;  %s2625_s3 = inlined_call_operand.vmem [shape: bf16[16,512], index: 3, kind: output, shape index: {}]  }
   0x1   :  { %2626 = sst [smem:[#allocation6_spill]] %s2622_s0 }
   0x2   :  { %s2138_s12 = smov 0   ;;  %s2140_s13 = smov 0  }
   0x3   :  { %s2142_s14 = smov 0   ;;  %s2144_s15 = smov 0  }
   0x4   :  { %s2146_s16 = smov 0   ;;  %s2148_s17 = smov 0  }
   0x5   :  { %s2150_s18 = smov 0   ;;  %s2152_s19 = smov 0  }
   0x6   :  { %s2154_s20 = smov 0   ;;  %s2156_s21 = smov 0  }
   0x7   :  { %s2158_s22 = smov 0  }
   0x8 LB: > { %s1649_s23 = sadd.s32 4294967295, %s2116_s22   ;;  %s25_s24 = sadd.s32 1, %s2108_s20  ;;  %s2116_s22 = sphi %s2158_s22, %s13_s22   ;;  %s2112_s21 = sphi %s2156_s21, %s2640_s21   ;;  %s2108_s20 = sphi %s2154_s20, %s2639_s20   ;;  %s2104_s19 = sphi %s2152_s19, %s2638_s19   ;;  %s2100_s18 = sphi %s2150_s18, %s2637_s18   ;;  %s2096_s17 = sphi %s2148_s17, %s2636_s17   ;;  %s2092_s16 = sphi %s2146_s16, %s2635_s16   ;;  %s2088_s15 = sphi %s2144_s15, %s2634_s15   ;;  %s2084_s14 = sphi %s2142_s14, %s2633_s14   ;;  %s2080_s13 = sphi %s2140_s13, %s2632_s13   ;;  %s2076_s12 = sphi %s2138_s12, %s2631_s12  }
   0x9   : > { %p26_p0 = scmp.ge.s32.totalorder %s25_s24, 3  ;;  %s28_s25 = sadd.s32 1, %s2112_s21 }
   0xa   : > { %s41_s26 = sadd.s32 1, %s2096_s17  ;;  %p48_p1 = scmp.ne.s32.totalorder %s2096_s17, %s2092_s16 }
   0xb   : > { %s2642_s24 = smov (%p26_p0, %s25_s24), 0  ;;  %s2644_s25 = smov (!%p26_p0, %s28_s25), %s2112_s21 }
   0xc   : > { %s37_s27 = ssub.s32 %s2108_s20, %s2642_s24  ;;  %p49_p2 = scmp.eq.s32.totalorder %s2116_s22, 0 }
   0xd   : > { %p30_p3 = scmp.ge.s32.totalorder %s2644_s25, 2  ;;  %p39_p4 = scmp.eq.s32.totalorder %s37_s27, 0 }
   0xe   : > { %p2205_p5 = por %p49_p2, %p48_p1  ;;  %s69_s29 = sadd.s32 1, %s2088_s15 }
   0xf   : > { %s2646_s25 = smov (%p30_p3, %s2644_s25), 0  ;;  %p76_p6 = scmp.ne.s32.totalorder %s2088_s15, %s2084_s14 }
  0x10   : > { %s2213_s30 = scalar_select %p39_p4, %s2096_s17, %s41_s26  }
  0x11   : > { %s65_s4 = ssub.s32 %s2112_s21, %s2646_s25  ;;  %p2219_p9 = por %p76_p6, %p49_p2 }
  0x12   : > { %s66_s5 = sor.u32 %s65_s4, %s37_s27  ;;  %p121_p7 = scmp.eq.s32.totalorder %s65_s4, 0 }
  0x13   : > { %p67_p8 = scmp.eq.s32.totalorder %s66_s5, 0  ;;  %s123_s7 = sadd.s32 1, %s2080_s13 }
  0x14   : > { %p133_p10 = scmp.ne.s32.totalorder %s2080_s13, %s2076_s12  ;;  %p134_p11 = scmp.eq.s32.totalorder %s1649_s23, 5 }
  0x15   : > { %s2227_s8 = scalar_select %p67_p8, %s2088_s15, %s69_s29  }
  0x16   : > { %s2230_s9 = scalar_select %p121_p7, %s2080_s13, %s123_s7  }
  0x17   : > { %p2232_p12 = por %p134_p11, %p133_p10  ;;  %p1652_p13 = scmp.ge.s32.totalorder %s2116_s22, 6 }
  0x19   : > { %156 = sbr.rel (%p1652_p13) target bundleno = 100 (0x64), region = 16 }
  0x20   : > { %159 = sbr.rel (!%p2205_p5) target bundleno = 44 (0x2c), region = 20  ;;  %s161_s11 = sand.u32 (%p2205_p5), 1, %s2096_s17  }
  0x21   : > { %s1772_s26 = smul.u32 (%p2205_p5), 24, %s2108_s20  ;;  %s2630_s0 = sld [smem:[#allocation6_spill]] (%p2205_p5) }
  0x22   : > { %s1785_s27 = smul.u32 (%p2205_p5), 48, %s161_s11 }
  0x24   : > { %s163_s23 = scalar_lea.vmem (%p2205_p5), [#allocation3], %s1785_s27 }
  0x27   : > { %s169_s5 = scalar_lea.vmem %s2630_s0, %s1772_s26 }
  0x28   : > { %v182_v0 = vld [vmem:[%s169_s5] sm:$0xff]  ;;  %v184_v1 = vld [vmem:[%s169_s5 + $0x8] sm:$0xff]  ;;  %v186_v2 = vld [vmem:[%s169_s5 + $0x10] sm:$0xff] }
  0x29   : > { %183 = vst [vmem:[%s163_s23] sm:$0xff] %v182_v0  ;;  %185 = vst [vmem:[%s163_s23 + $0x8] sm:$0xff] %v184_v1  ;;  %v188_v3 = vld [vmem:[%s169_s5 + $0x48] sm:$0xff]  ;;  %v190_v4 = vld [vmem:[%s169_s5 + $0x50] sm:$0xff] }
  0x2a   : > { %187 = vst [vmem:[%s163_s23 + $0x10] sm:$0xff] %v186_v2  ;;  %v192_v5 = vld [vmem:[%s169_s5 + $0x58] sm:$0xff]  ;;  %189 = vst [vmem:[%s163_s23 + $0x18] sm:$0xff] %v188_v3 }
  0x2b   : > { %191 = vst [vmem:[%s163_s23 + $0x20] sm:$0xff] %v190_v4  ;;  %193 = vst [vmem:[%s163_s23 + $0x28] sm:$0xff] %v192_v5 }
  0x2c PF: > { %199 = sbr.rel (!%p2219_p9) target bundleno = 100 (0x64), region = 43  ;;  %s201_s28 = sand.u32 (%p2219_p9), 1, %s2088_s15  }
  0x2d   : > { %s1786_s7 = smul.u32 (%p2219_p9), 768, %s201_s28  ;;  %s1654_s11 = sshll.u32 (%p2219_p9), %s2112_s21, 1 }
  0x2e   : > { %s1773_s26 = smul.u32 (%p2219_p9), 384, %s2108_s20 }
  0x2f   : > { %s2257_s6 = scalar_lea.vmem (%p2219_p9), [#allocation4], %s1786_s7 }
  0x30   : > { %s207_s27 = sadd.s32 (%p2219_p9), %s1773_s26, %s1654_s11 }
  0x31   : > { %s1656_s29 = sshll.u32 (%p2219_p9), %s207_s27, 2 }
  0x32   : > { %s2252_s5 = scalar_lea.vmem (%p2219_p9), %s2623_s1, %s1656_s29 }
  0x33   : > { %v427_v6 = vld [vmem:[%s2252_s5] sm:$0xff]  ;;  %v429_v7 = vld [vmem:[%s2252_s5 + $0x10] sm:$0xff] }
  0x34   : > { %v431_v8 = vld [vmem:[%s2252_s5 + $0x20] sm:$0xff]  ;;  %428 = vst [vmem:[%s2257_s6] sm:$0xff] %v427_v6  ;;  %430 = vst [vmem:[%s2257_s6 + $0x8] sm:$0xff] %v429_v7  ;;  %v433_v9 = vld [vmem:[%s2252_s5 + $0x30] sm:$0xff] }
  0x35   : > { %432 = vst [vmem:[%s2257_s6 + $0x10] sm:$0xff] %v431_v8  ;;  %v435_v10 = vld [vmem:[%s2252_s5 + $0x40] sm:$0xff]  ;;  %v437_v11 = vld [vmem:[%s2252_s5 + $0x50] sm:$0xff]  ;;  %434 = vst [vmem:[%s2257_s6 + $0x18] sm:$0xff] %v433_v9 }
  0x36   : > { %436 = vst [vmem:[%s2257_s6 + $0x20] sm:$0xff] %v435_v10  ;;  %438 = vst [vmem:[%s2257_s6 + $0x28] sm:$0xff] %v437_v11  ;;  %v439_v12 = vld [vmem:[%s2252_s5 + $0x60] sm:$0xff]  ;;  %v441_v13 = vld [vmem:[%s2252_s5 + $0x70] sm:$0xff] }
  0x37   : > { %v443_v14 = vld [vmem:[%s2252_s5 + $0x80] sm:$0xff]  ;;  %440 = vst [vmem:[%s2257_s6 + $0x30] sm:$0xff] %v439_v12  ;;  %442 = vst [vmem:[%s2257_s6 + $0x38] sm:$0xff] %v441_v13  ;;  %v445_v15 = vld [vmem:[%s2252_s5 + $0x90] sm:$0xff] }
  0x38   : > { %444 = vst [vmem:[%s2257_s6 + $0x40] sm:$0xff] %v443_v14  ;;  %v447_v16 = vld [vmem:[%s2252_s5 + $0xa0] sm:$0xff]  ;;  %v449_v17 = vld [vmem:[%s2252_s5 + $0xb0] sm:$0xff]  ;;  %446 = vst [vmem:[%s2257_s6 + $0x48] sm:$0xff] %v445_v15 }
  0x39   : > { %448 = vst [vmem:[%s2257_s6 + $0x50] sm:$0xff] %v447_v16  ;;  %450 = vst [vmem:[%s2257_s6 + $0x58] sm:$0xff] %v449_v17  ;;  %v451_v18 = vld [vmem:[%s2252_s5 + $0xc0] sm:$0xff]  ;;  %v453_v19 = vld [vmem:[%s2252_s5 + $0xd0] sm:$0xff] }
  0x3a   : > { %v455_v20 = vld [vmem:[%s2252_s5 + $0xe0] sm:$0xff]  ;;  %452 = vst [vmem:[%s2257_s6 + $0x60] sm:$0xff] %v451_v18  ;;  %454 = vst [vmem:[%s2257_s6 + $0x68] sm:$0xff] %v453_v19  ;;  %v457_v21 = vld [vmem:[%s2252_s5 + $0xf0] sm:$0xff] }
  0x3b   : > { %456 = vst [vmem:[%s2257_s6 + $0x70] sm:$0xff] %v455_v20  ;;  %v459_v22 = vld [vmem:[%s2252_s5 + $0x100] sm:$0xff]  ;;  %v461_v23 = vld [vmem:[%s2252_s5 + $0x110] sm:$0xff]  ;;  %458 = vst [vmem:[%s2257_s6 + $0x78] sm:$0xff] %v457_v21 }
  0x3c   : > { %460 = vst [vmem:[%s2257_s6 + $0x80] sm:$0xff] %v459_v22  ;;  %462 = vst [vmem:[%s2257_s6 + $0x88] sm:$0xff] %v461_v23  ;;  %v463_v24 = vld [vmem:[%s2252_s5 + $0x120] sm:$0xff]  ;;  %v465_v25 = vld [vmem:[%s2252_s5 + $0x130] sm:$0xff] }
  0x3d   : > { %v467_v26 = vld [vmem:[%s2252_s5 + $0x140] sm:$0xff]  ;;  %464 = vst [vmem:[%s2257_s6 + $0x90] sm:$0xff] %v463_v24  ;;  %466 = vst [vmem:[%s2257_s6 + $0x98] sm:$0xff] %v465_v25  ;;  %v469_v27 = vld [vmem:[%s2252_s5 + $0x150] sm:$0xff] }
  0x3e   : > { %468 = vst [vmem:[%s2257_s6 + $0xa0] sm:$0xff] %v467_v26  ;;  %v471_v28 = vld [vmem:[%s2252_s5 + $0x160] sm:$0xff]  ;;  %v473_v29 = vld [vmem:[%s2252_s5 + $0x170] sm:$0xff]  ;;  %470 = vst [vmem:[%s2257_s6 + $0xa8] sm:$0xff] %v469_v27 }
  0x3f   : > { %472 = vst [vmem:[%s2257_s6 + $0xb0] sm:$0xff] %v471_v28  ;;  %474 = vst [vmem:[%s2257_s6 + $0xb8] sm:$0xff] %v473_v29  ;;  %v475_v30 = vld [vmem:[%s2252_s5 + $0x180] sm:$0xff]  ;;  %v477_v31 = vld [vmem:[%s2252_s5 + $0x190] sm:$0xff] }
  0x40   : > { %v479_v32 = vld [vmem:[%s2252_s5 + $0x1a0] sm:$0xff]  ;;  %476 = vst [vmem:[%s2257_s6 + $0xc0] sm:$0xff] %v475_v30  ;;  %478 = vst [vmem:[%s2257_s6 + $0xc8] sm:$0xff] %v477_v31  ;;  %v481_v33 = vld [vmem:[%s2252_s5 + $0x1b0] sm:$0xff] }
  0x41   : > { %480 = vst [vmem:[%s2257_s6 + $0xd0] sm:$0xff] %v479_v32  ;;  %v483_v34 = vld [vmem:[%s2252_s5 + $0x1c0] sm:$0xff]  ;;  %v485_v35 = vld [vmem:[%s2252_s5 + $0x1d0] sm:$0xff]  ;;  %482 = vst [vmem:[%s2257_s6 + $0xd8] sm:$0xff] %v481_v33 }
  0x42   : > { %484 = vst [vmem:[%s2257_s6 + $0xe0] sm:$0xff] %v483_v34  ;;  %486 = vst [vmem:[%s2257_s6 + $0xe8] sm:$0xff] %v485_v35  ;;  %v487_v36 = vld [vmem:[%s2252_s5 + $0x1e0] sm:$0xff]  ;;  %v489_v37 = vld [vmem:[%s2252_s5 + $0x1f0] sm:$0xff] }
  0x43   : > { %v491_v38 = vld [vmem:[%s2252_s5 + $0x200] sm:$0xff]  ;;  %488 = vst [vmem:[%s2257_s6 + $0xf0] sm:$0xff] %v487_v36  ;;  %490 = vst [vmem:[%s2257_s6 + $0xf8] sm:$0xff] %v489_v37  ;;  %v493_v39 = vld [vmem:[%s2252_s5 + $0x210] sm:$0xff] }
  0x44   : > { %492 = vst [vmem:[%s2257_s6 + $0x100] sm:$0xff] %v491_v38  ;;  %v495_v40 = vld [vmem:[%s2252_s5 + $0x220] sm:$0xff]  ;;  %v497_v41 = vld [vmem:[%s2252_s5 + $0x230] sm:$0xff]  ;;  %494 = vst [vmem:[%s2257_s6 + $0x108] sm:$0xff] %v493_v39 }
  0x45   : > { %496 = vst [vmem:[%s2257_s6 + $0x110] sm:$0xff] %v495_v40  ;;  %498 = vst [vmem:[%s2257_s6 + $0x118] sm:$0xff] %v497_v41  ;;  %v499_v42 = vld [vmem:[%s2252_s5 + $0x240] sm:$0xff]  ;;  %v501_v43 = vld [vmem:[%s2252_s5 + $0x250] sm:$0xff] }
  0x46   : > { %v503_v44 = vld [vmem:[%s2252_s5 + $0x260] sm:$0xff]  ;;  %500 = vst [vmem:[%s2257_s6 + $0x120] sm:$0xff] %v499_v42  ;;  %502 = vst [vmem:[%s2257_s6 + $0x128] sm:$0xff] %v501_v43  ;;  %v505_v45 = vld [vmem:[%s2252_s5 + $0x270] sm:$0xff] }
  0x47   : > { %504 = vst [vmem:[%s2257_s6 + $0x130] sm:$0xff] %v503_v44  ;;  %v507_v46 = vld [vmem:[%s2252_s5 + $0x280] sm:$0xff]  ;;  %v509_v47 = vld [vmem:[%s2252_s5 + $0x290] sm:$0xff]  ;;  %506 = vst [vmem:[%s2257_s6 + $0x138] sm:$0xff] %v505_v45 }
  0x48   : > { %508 = vst [vmem:[%s2257_s6 + $0x140] sm:$0xff] %v507_v46  ;;  %510 = vst [vmem:[%s2257_s6 + $0x148] sm:$0xff] %v509_v47  ;;  %v511_v48 = vld [vmem:[%s2252_s5 + $0x2a0] sm:$0xff]  ;;  %v513_v49 = vld [vmem:[%s2252_s5 + $0x2b0] sm:$0xff] }
  0x49   : > { %v515_v50 = vld [vmem:[%s2252_s5 + $0x2c0] sm:$0xff]  ;;  %512 = vst [vmem:[%s2257_s6 + $0x150] sm:$0xff] %v511_v48  ;;  %514 = vst [vmem:[%s2257_s6 + $0x158] sm:$0xff] %v513_v49  ;;  %v517_v51 = vld [vmem:[%s2252_s5 + $0x2d0] sm:$0xff] }
  0x4a   : > { %516 = vst [vmem:[%s2257_s6 + $0x160] sm:$0xff] %v515_v50  ;;  %v519_v52 = vld [vmem:[%s2252_s5 + $0x2e0] sm:$0xff]  ;;  %v521_v53 = vld [vmem:[%s2252_s5 + $0x2f0] sm:$0xff]  ;;  %518 = vst [vmem:[%s2257_s6 + $0x168] sm:$0xff] %v517_v51 }
  0x4b   : > { %520 = vst [vmem:[%s2257_s6 + $0x170] sm:$0xff] %v519_v52  ;;  %522 = vst [vmem:[%s2257_s6 + $0x178] sm:$0xff] %v521_v53  ;;  %v523_v54 = vld [vmem:[%s2252_s5 + $0x300] sm:$0xff]  ;;  %v525_v55 = vld [vmem:[%s2252_s5 + $0x310] sm:$0xff] }
  0x4c   : > { %v527_v56 = vld [vmem:[%s2252_s5 + $0x320] sm:$0xff]  ;;  %524 = vst [vmem:[%s2257_s6 + $0x180] sm:$0xff] %v523_v54  ;;  %526 = vst [vmem:[%s2257_s6 + $0x188] sm:$0xff] %v525_v55  ;;  %v529_v57 = vld [vmem:[%s2252_s5 + $0x330] sm:$0xff] }
  0x4d   : > { %528 = vst [vmem:[%s2257_s6 + $0x190] sm:$0xff] %v527_v56  ;;  %v531_v58 = vld [vmem:[%s2252_s5 + $0x340] sm:$0xff]  ;;  %v533_v59 = vld [vmem:[%s2252_s5 + $0x350] sm:$0xff]  ;;  %530 = vst [vmem:[%s2257_s6 + $0x198] sm:$0xff] %v529_v57 }
  0x4e   : > { %532 = vst [vmem:[%s2257_s6 + $0x1a0] sm:$0xff] %v531_v58  ;;  %534 = vst [vmem:[%s2257_s6 + $0x1a8] sm:$0xff] %v533_v59  ;;  %v535_v60 = vld [vmem:[%s2252_s5 + $0x360] sm:$0xff]  ;;  %v537_v61 = vld [vmem:[%s2252_s5 + $0x370] sm:$0xff] }
  0x4f   : > { %v539_v62 = vld [vmem:[%s2252_s5 + $0x380] sm:$0xff]  ;;  %536 = vst [vmem:[%s2257_s6 + $0x1b0] sm:$0xff] %v535_v60  ;;  %538 = vst [vmem:[%s2257_s6 + $0x1b8] sm:$0xff] %v537_v61  ;;  %v541_v63 = vld [vmem:[%s2252_s5 + $0x390] sm:$0xff] }
  0x50   : > { %540 = vst [vmem:[%s2257_s6 + $0x1c0] sm:$0xff] %v539_v62  ;;  %v543_v0 = vld [vmem:[%s2252_s5 + $0x3a0] sm:$0xff]  ;;  %v545_v1 = vld [vmem:[%s2252_s5 + $0x3b0] sm:$0xff]  ;;  %542 = vst [vmem:[%s2257_s6 + $0x1c8] sm:$0xff] %v541_v63 }
  0x51   : > { %544 = vst [vmem:[%s2257_s6 + $0x1d0] sm:$0xff] %v543_v0  ;;  %546 = vst [vmem:[%s2257_s6 + $0x1d8] sm:$0xff] %v545_v1  ;;  %v547_v2 = vld [vmem:[%s2252_s5 + $0x3c0] sm:$0xff]  ;;  %v549_v3 = vld [vmem:[%s2252_s5 + $0x3d0] sm:$0xff] }
  0x52   : > { %v551_v4 = vld [vmem:[%s2252_s5 + $0x3e0] sm:$0xff]  ;;  %548 = vst [vmem:[%s2257_s6 + $0x1e0] sm:$0xff] %v547_v2  ;;  %550 = vst [vmem:[%s2257_s6 + $0x1e8] sm:$0xff] %v549_v3  ;;  %v553_v5 = vld [vmem:[%s2252_s5 + $0x3f0] sm:$0xff] }
  0x53   : > { %552 = vst [vmem:[%s2257_s6 + $0x1f0] sm:$0xff] %v551_v4  ;;  %v555_v6 = vld [vmem:[%s2252_s5 + $0x400] sm:$0xff]  ;;  %v557_v7 = vld [vmem:[%s2252_s5 + $0x410] sm:$0xff]  ;;  %554 = vst [vmem:[%s2257_s6 + $0x1f8] sm:$0xff] %v553_v5 }
  0x54   : > { %556 = vst [vmem:[%s2257_s6 + $0x200] sm:$0xff] %v555_v6  ;;  %558 = vst [vmem:[%s2257_s6 + $0x208] sm:$0xff] %v557_v7  ;;  %v559_v8 = vld [vmem:[%s2252_s5 + $0x420] sm:$0xff]  ;;  %v561_v9 = vld [vmem:[%s2252_s5 + $0x430] sm:$0xff] }
  0x55   : > { %v563_v10 = vld [vmem:[%s2252_s5 + $0x440] sm:$0xff]  ;;  %560 = vst [vmem:[%s2257_s6 + $0x210] sm:$0xff] %v559_v8  ;;  %562 = vst [vmem:[%s2257_s6 + $0x218] sm:$0xff] %v561_v9  ;;  %v565_v11 = vld [vmem:[%s2252_s5 + $0x450] sm:$0xff] }
  0x56   : > { %564 = vst [vmem:[%s2257_s6 + $0x220] sm:$0xff] %v563_v10  ;;  %v567_v12 = vld [vmem:[%s2252_s5 + $0x460] sm:$0xff]  ;;  %v569_v13 = vld [vmem:[%s2252_s5 + $0x470] sm:$0xff]  ;;  %566 = vst [vmem:[%s2257_s6 + $0x228] sm:$0xff] %v565_v11 }
  0x57   : > { %568 = vst [vmem:[%s2257_s6 + $0x230] sm:$0xff] %v567_v12  ;;  %570 = vst [vmem:[%s2257_s6 + $0x238] sm:$0xff] %v569_v13  ;;  %v571_v14 = vld [vmem:[%s2252_s5 + $0x480] sm:$0xff]  ;;  %v573_v15 = vld [vmem:[%s2252_s5 + $0x490] sm:$0xff] }
  0x58   : > { %v575_v16 = vld [vmem:[%s2252_s5 + $0x4a0] sm:$0xff]  ;;  %572 = vst [vmem:[%s2257_s6 + $0x240] sm:$0xff] %v571_v14  ;;  %574 = vst [vmem:[%s2257_s6 + $0x248] sm:$0xff] %v573_v15  ;;  %v577_v17 = vld [vmem:[%s2252_s5 + $0x4b0] sm:$0xff] }
  0x59   : > { %576 = vst [vmem:[%s2257_s6 + $0x250] sm:$0xff] %v575_v16  ;;  %v579_v18 = vld [vmem:[%s2252_s5 + $0x4c0] sm:$0xff]  ;;  %v581_v19 = vld [vmem:[%s2252_s5 + $0x4d0] sm:$0xff]  ;;  %578 = vst [vmem:[%s2257_s6 + $0x258] sm:$0xff] %v577_v17 }
  0x5a   : > { %580 = vst [vmem:[%s2257_s6 + $0x260] sm:$0xff] %v579_v18  ;;  %582 = vst [vmem:[%s2257_s6 + $0x268] sm:$0xff] %v581_v19  ;;  %v583_v20 = vld [vmem:[%s2252_s5 + $0x4e0] sm:$0xff]  ;;  %v585_v21 = vld [vmem:[%s2252_s5 + $0x4f0] sm:$0xff] }
  0x5b   : > { %v587_v22 = vld [vmem:[%s2252_s5 + $0x500] sm:$0xff]  ;;  %584 = vst [vmem:[%s2257_s6 + $0x270] sm:$0xff] %v583_v20  ;;  %586 = vst [vmem:[%s2257_s6 + $0x278] sm:$0xff] %v585_v21  ;;  %v589_v23 = vld [vmem:[%s2252_s5 + $0x510] sm:$0xff] }
  0x5c   : > { %588 = vst [vmem:[%s2257_s6 + $0x280] sm:$0xff] %v587_v22  ;;  %v591_v24 = vld [vmem:[%s2252_s5 + $0x520] sm:$0xff]  ;;  %v593_v25 = vld [vmem:[%s2252_s5 + $0x530] sm:$0xff]  ;;  %590 = vst [vmem:[%s2257_s6 + $0x288] sm:$0xff] %v589_v23 }
  0x5d   : > { %592 = vst [vmem:[%s2257_s6 + $0x290] sm:$0xff] %v591_v24  ;;  %594 = vst [vmem:[%s2257_s6 + $0x298] sm:$0xff] %v593_v25  ;;  %v595_v26 = vld [vmem:[%s2252_s5 + $0x540] sm:$0xff]  ;;  %v597_v27 = vld [vmem:[%s2252_s5 + $0x550] sm:$0xff] }
  0x5e   : > { %v599_v28 = vld [vmem:[%s2252_s5 + $0x560] sm:$0xff]  ;;  %596 = vst [vmem:[%s2257_s6 + $0x2a0] sm:$0xff] %v595_v26  ;;  %598 = vst [vmem:[%s2257_s6 + $0x2a8] sm:$0xff] %v597_v27  ;;  %v601_v29 = vld [vmem:[%s2252_s5 + $0x570] sm:$0xff] }
  0x5f   : > { %600 = vst [vmem:[%s2257_s6 + $0x2b0] sm:$0xff] %v599_v28  ;;  %v603_v30 = vld [vmem:[%s2252_s5 + $0x580] sm:$0xff]  ;;  %v605_v31 = vld [vmem:[%s2252_s5 + $0x590] sm:$0xff]  ;;  %602 = vst [vmem:[%s2257_s6 + $0x2b8] sm:$0xff] %v601_v29 }
  0x60   : > { %604 = vst [vmem:[%s2257_s6 + $0x2c0] sm:$0xff] %v603_v30  ;;  %606 = vst [vmem:[%s2257_s6 + $0x2c8] sm:$0xff] %v605_v31  ;;  %v607_v32 = vld [vmem:[%s2252_s5 + $0x5a0] sm:$0xff]  ;;  %v609_v33 = vld [vmem:[%s2252_s5 + $0x5b0] sm:$0xff] }
  0x61   : > { %v611_v34 = vld [vmem:[%s2252_s5 + $0x5c0] sm:$0xff]  ;;  %608 = vst [vmem:[%s2257_s6 + $0x2d0] sm:$0xff] %v607_v32  ;;  %610 = vst [vmem:[%s2257_s6 + $0x2d8] sm:$0xff] %v609_v33  ;;  %v613_v35 = vld [vmem:[%s2252_s5 + $0x5d0] sm:$0xff] }
  0x62   : > { %612 = vst [vmem:[%s2257_s6 + $0x2e0] sm:$0xff] %v611_v34  ;;  %v615_v36 = vld [vmem:[%s2252_s5 + $0x5e0] sm:$0xff]  ;;  %v617_v37 = vld [vmem:[%s2252_s5 + $0x5f0] sm:$0xff]  ;;  %614 = vst [vmem:[%s2257_s6 + $0x2e8] sm:$0xff] %v613_v35 }
  0x63   : > { %616 = vst [vmem:[%s2257_s6 + $0x2f0] sm:$0xff] %v615_v36  ;;  %618 = vst [vmem:[%s2257_s6 + $0x2f8] sm:$0xff] %v617_v37 }
  0x64 PF: > { %p1657_p0 = scmp.ge.s32.totalorder %s2116_s22, 1  ;;  %p631_p1 = scmp.lt.s32.totalorder %s2116_s22, 7 }
  0x66   : > { %p632_p2 = pnand %p1657_p0, %p631_p1 }
  0x67   : > { %s645_s0 = sand.u32 (!%p632_p2), 1, %s2084_s14   ;;  %s672_s23 = sand.u32 (!%p632_p2), 1, %s2076_s12  }
  0x68   : > { %635 = sbr.rel (%p632_p2) target bundleno = 490 (0x1ea), region = 85  ;;  %s2452_s7 = sshll.u32 (!%p632_p2), %s672_s23, 4 }
  0x69   : > { %s1788_s28 = smul.u32 (!%p632_p2), 768, %s645_s0  ;;  %s1659_s11 = sshll.u32 (!%p632_p2), %s2104_s19, 1 }
  0x6a   : > { %p680_p3 = scmp.lt.s32.totalorder (!%p632_p2), %s1659_s11, 3  ;;  %s638_s29 = sand.u32 (!%p632_p2), 1, %s2092_s16  }
  0x6b   : > { %s2455_s26 = scalar_lea.vmem (!%p632_p2), [#allocation4], %s1788_s28  ;;  %s1787_s4 = smul.u32 (!%p632_p2), 48, %s638_s29 }
  0x6c   : > { %v1877_v38 = vld [vmem:[%s2455_s26 + $0x104] ss:$8 sps:$4 sm:$0xff] (!%p632_p2)   ;;  %v1879_v39 = vld [vmem:[%s2455_s26 + $0x100] ss:$8 sps:$4 sm:$0xff] (!%p632_p2)   ;;  %v1880_v40 = vld [vmem:[%s2455_s26 + $0x114] ss:$8 sps:$4 sm:$0xff] (!%p632_p2)  }
  0x6d   : > { %1341 = vmatprep.subr.bf16.mxu0 (!%p632_p2), %v1877_v38  ;;  %v1882_v41 = vld [vmem:[%s2455_s26 + $0x110] ss:$8 sps:$4 sm:$0xff] (!%p632_p2)   ;;  %v1883_v42 = vld [vmem:[%s2455_s26 + $0x124] ss:$8 sps:$4 sm:$0xff] (!%p632_p2)   ;;  %v1885_v43 = vld [vmem:[%s2455_s26 + $0x120] ss:$8 sps:$4 sm:$0xff] (!%p632_p2)  }
  0x6e   : > { %1342 = vmatpush1.bf16.msra.mxu0 (!%p632_p2), %v1879_v39  ;;  %v1886_v44 = vld [vmem:[%s2455_s26 + $0x134] ss:$8 sps:$4 sm:$0xff] (!%p632_p2)   ;;  %v1888_v45 = vld [vmem:[%s2455_s26 + $0x130] ss:$8 sps:$4 sm:$0xff] (!%p632_p2)   ;;  %v1889_v46 = vld [vmem:[%s2455_s26 + $0x144] ss:$8 sps:$4 sm:$0xff] (!%p632_p2)  }
  0x6f   : > { %s2648_s11 = smov (!%p680_p3, %s1659_s11), 3  ;;  %1343 = vmatprep.subr.bf16.mxu0 %v1880_v40  ;;  %v1891_v47 = vld [vmem:[%s2455_s26 + $0x140] ss:$8 sps:$4 sm:$0xff]   ;;  %v1892_v48 = vld [vmem:[%s2455_s26 + $0x154] ss:$8 sps:$4 sm:$0xff]   ;;  %s2479_s5 = scalar_lea.vmem [#allocation3], %s1787_s4 }
  0x70   : > { %s682_s27 = scalar_lea.vmem %s2624_s2, %s2648_s11  ;;  %v1894_v49 = vld [vmem:[%s2455_s26 + $0x150] ss:$8 sps:$4 sm:$0xff]   ;;  %v1895_v50 = vld [vmem:[%s2455_s26 + $0x164] ss:$8 sps:$4 sm:$0xff]   ;;  %v1927_v52 = vld [vmem:[%s2455_s26] ss:$8 sps:$4 sm:$0xff]  }
  0x71   : > { %v1924_v51 = vld [vmem:[%s2455_s26 + $0x4] ss:$8 sps:$4 sm:$0xff]   ;;  %v1897_v53 = vld [vmem:[%s2455_s26 + $0x160] ss:$8 sps:$4 sm:$0xff]   ;;  %v1898_v55 = vld [vmem:[%s2455_s26 + $0x174] ss:$8 sps:$4 sm:$0xff]  }
  0x72   : > { %1344 = vmatpush1.bf16.msra.mxu0 %v1882_v41  ;;  %1298 = vmatprep.subr.bf16.mxu1 %v1924_v51  ;;  %v1930_v54 = vld [vmem:[%s2479_s5 + $0xc] ss:$24 sps:$4 sm:$0xff]   ;;  %v1936_v57 = vld [vmem:[%s2455_s26 + $0x10] ss:$8 sps:$4 sm:$0xff]   ;;  %v1942_v61 = vld [vmem:[%s2455_s26 + $0x20] ss:$8 sps:$4 sm:$0xff]  }
  0x73   : > { %1345 = vmatprep.subr.bf16.mxu0 %v1883_v42  ;;  %1299 = vmatpush1.bf16.msra.mxu1 %v1927_v52  ;;  %v1934_v56 = vld [vmem:[%s2455_s26 + $0x14] ss:$8 sps:$4 sm:$0xff]   ;;  %v1900_v58 = vld [vmem:[%s2455_s26 + $0x170] ss:$8 sps:$4 sm:$0xff]   ;;  %v1901_v59 = vld [vmem:[%s2455_s26 + $0x184] ss:$8 sps:$4 sm:$0xff]  }
  0x74   : > { %1373 = vmatprep.mubr.bf16.mxu0 %v1930_v54  ;;  %1300 = vmatprep.subr.bf16.mxu1 %v1934_v56  ;;  %v1940_v60 = vld [vmem:[%s2455_s26 + $0x24] ss:$8 sps:$4 sm:$0xff]   ;;  %v1903_v62 = vld [vmem:[%s2455_s26 + $0x180] ss:$8 sps:$4 sm:$0xff]   ;;  %v1946_v63 = vld [vmem:[%s2455_s26 + $0x34] ss:$8 sps:$4 sm:$0xff]  }
  0x75   : > { %v1904_v0 = vld [vmem:[%s2455_s26 + $0x194] ss:$8 sps:$4 sm:$0xff]   ;;  %v1948_v1 = vld [vmem:[%s2455_s26 + $0x30] ss:$8 sps:$4 sm:$0xff]   ;;  %v1952_v2 = vld [vmem:[%s2455_s26 + $0x44] ss:$8 sps:$4 sm:$0xff]  }
  0x76   : > { %1346 = vmatpush1.bf16.msra.mxu0 %v1885_v43  ;;  %v1906_v3 = vld [vmem:[%s2455_s26 + $0x190] ss:$8 sps:$4 sm:$0xff]   ;;  %v1907_v4 = vld [vmem:[%s2455_s26 + $0x1a4] ss:$8 sps:$4 sm:$0xff]   ;;  %v1954_v5 = vld [vmem:[%s2455_s26 + $0x40] ss:$8 sps:$4 sm:$0xff]  }
  0x77   : > { %1347 = vmatprep.subr.bf16.mxu0 %v1886_v44  ;;  %1301 = vmatpush1.bf16.msra.mxu1 %v1936_v57  ;;  %v1958_v6 = vld [vmem:[%s2455_s26 + $0x54] ss:$8 sps:$4 sm:$0xff]   ;;  %v1909_v7 = vld [vmem:[%s2455_s26 + $0x1a0] ss:$8 sps:$4 sm:$0xff]   ;;  %v1960_v9 = vld [vmem:[%s2455_s26 + $0x50] ss:$8 sps:$4 sm:$0xff]  }
  0x78   : > { %1302 = vmatprep.subr.bf16.mxu1 %v1940_v60  ;;  %v1910_v8 = vld [vmem:[%s2455_s26 + $0x1b4] ss:$8 sps:$4 sm:$0xff]   ;;  %v1964_v10 = vld [vmem:[%s2455_s26 + $0x64] ss:$8 sps:$4 sm:$0xff]   ;;  %v1912_v11 = vld [vmem:[%s2455_s26 + $0x1b0] ss:$8 sps:$4 sm:$0xff]  }
  0x79   : > { %v1913_v12 = vld [vmem:[%s2455_s26 + $0x1c4] ss:$8 sps:$4 sm:$0xff]   ;;  %v1966_v13 = vld [vmem:[%s2455_s26 + $0x60] ss:$8 sps:$4 sm:$0xff]   ;;  %v1970_v14 = vld [vmem:[%s2455_s26 + $0x74] ss:$8 sps:$4 sm:$0xff]  }
  0x7a   : > { %1348 = vmatpush1.bf16.msra.mxu0 %v1888_v45  ;;  %v1915_v15 = vld [vmem:[%s2455_s26 + $0x1c0] ss:$8 sps:$4 sm:$0xff]   ;;  %v1916_v16 = vld [vmem:[%s2455_s26 + $0x1d4] ss:$8 sps:$4 sm:$0xff]   ;;  %v1972_v17 = vld [vmem:[%s2455_s26 + $0x70] ss:$8 sps:$4 sm:$0xff]  }
  0x7b   : > { %1349 = vmatprep.subr.bf16.mxu0 %v1889_v46  ;;  %1303 = vmatpush1.bf16.msra.mxu1 %v1942_v61  ;;  %v1976_v18 = vld [vmem:[%s2455_s26 + $0x84] ss:$8 sps:$4 sm:$0xff]   ;;  %v1918_v19 = vld [vmem:[%s2455_s26 + $0x1d0] ss:$8 sps:$4 sm:$0xff]   ;;  %v1978_v21 = vld [vmem:[%s2455_s26 + $0x80] ss:$8 sps:$4 sm:$0xff]  }
  0x7c   : > { %1304 = vmatprep.subr.bf16.mxu1 %v1946_v63  ;;  %v1919_v20 = vld [vmem:[%s2455_s26 + $0x1e4] ss:$8 sps:$4 sm:$0xff]   ;;  %v1982_v22 = vld [vmem:[%s2455_s26 + $0x94] ss:$8 sps:$4 sm:$0xff]   ;;  %v1921_v23 = vld [vmem:[%s2455_s26 + $0x1e0] ss:$8 sps:$4 sm:$0xff]  }
  0x7d   : > { %v1922_v24 = vld [vmem:[%s2455_s26 + $0x1f4] ss:$8 sps:$4 sm:$0xff]   ;;  %v1984_v25 = vld [vmem:[%s2455_s26 + $0x90] ss:$8 sps:$4 sm:$0xff]   ;;  %v1988_v26 = vld [vmem:[%s2455_s26 + $0xa4] ss:$8 sps:$4 sm:$0xff]  }
  0x7e   : > { %1350 = vmatpush1.bf16.msra.mxu0 %v1891_v47  ;;  %v1926_v27 = vld [vmem:[%s2455_s26 + $0x1f0] ss:$8 sps:$4 sm:$0xff]   ;;  %v1933_v28 = vld [vmem:[%s2455_s26 + $0x204] ss:$8 sps:$4 sm:$0xff]   ;;  %v1990_v29 = vld [vmem:[%s2455_s26 + $0xa0] ss:$8 sps:$4 sm:$0xff]  }
  0x7f   : > { %1351 = vmatprep.subr.bf16.mxu0 %v1892_v48  ;;  %1305 = vmatpush1.bf16.msra.mxu1 %v1948_v1  ;;  %v1928_v30 = vld [vmem:[%s2479_s5 + $0x8] ss:$24 sps:$4 sm:$0xff]   ;;  %v1994_v31 = vld [vmem:[%s2455_s26 + $0xb4] ss:$8 sps:$4 sm:$0xff]   ;;  %v2000_v36 = vld [vmem:[%s2455_s26 + $0xc4] ss:$8 sps:$4 sm:$0xff]  }
  0x80   : > { %1306 = vmatprep.subr.bf16.mxu1 %v1952_v2  ;;  %v1931_v32 = vld [vmem:[%s2455_s26 + $0x200] ss:$8 sps:$4 sm:$0xff]   ;;  %v1939_v33 = vld [vmem:[%s2455_s26 + $0x214] ss:$8 sps:$4 sm:$0xff]   ;;  %v1996_v34 = vld [vmem:[%s2455_s26 + $0xb0] ss:$8 sps:$4 sm:$0xff]  }
  0x81   : > { %v2023_v35 = vld [vmem:[%s2479_s5 + $0x4] ss:$24 sps:$4 sm:$0xff]   ;;  %v1937_v37 = vld [vmem:[%s2455_s26 + $0x210] ss:$8 sps:$4 sm:$0xff]   ;;  %v2029_v38 = vld [vmem:[%s2479_s5 + $0x14] ss:$24 sps:$4 sm:$0xff]  }
  0x82   : > { %1352 = vmatpush1.bf16.msra.mxu0 %v1894_v49  ;;  %1330 = vmatprep.mubr.bf16.mxu1 %v2023_v35  ;;  %v1945_v39 = vld [vmem:[%s2455_s26 + $0x224] ss:$8 sps:$4 sm:$0xff]   ;;  %v2002_v40 = vld [vmem:[%s2455_s26 + $0xc0] ss:$8 sps:$4 sm:$0xff]   ;;  %v2006_v41 = vld [vmem:[%s2455_s26 + $0xd4] ss:$8 sps:$4 sm:$0xff]  }
  0x83   : > { %1353 = vmatprep.subr.bf16.mxu0 %v1895_v50  ;;  %1307 = vmatpush1.bf16.msra.mxu1 %v1954_v5  ;;  %v1943_v42 = vld [vmem:[%s2455_s26 + $0x220] ss:$8 sps:$4 sm:$0xff]   ;;  %v1951_v43 = vld [vmem:[%s2455_s26 + $0x234] ss:$8 sps:$4 sm:$0xff]   ;;  %v2008_v44 = vld [vmem:[%s2455_s26 + $0xd0] ss:$8 sps:$4 sm:$0xff]  }
  0x84   : > { %1308 = vmatprep.subr.bf16.mxu1 %v1958_v6  ;;  %v2012_v45 = vld [vmem:[%s2455_s26 + $0xe4] ss:$8 sps:$4 sm:$0xff]   ;;  %v1949_v46 = vld [vmem:[%s2455_s26 + $0x230] ss:$8 sps:$4 sm:$0xff]   ;;  %v2014_v48 = vld [vmem:[%s2455_s26 + $0xe0] ss:$8 sps:$4 sm:$0xff]  }
  0x85   : > { %v1957_v47 = vld [vmem:[%s2455_s26 + $0x244] ss:$8 sps:$4 sm:$0xff]   ;;  %v2018_v49 = vld [vmem:[%s2455_s26 + $0xf4] ss:$8 sps:$4 sm:$0xff]   ;;  %v1955_v50 = vld [vmem:[%s2455_s26 + $0x240] ss:$8 sps:$4 sm:$0xff]  }
  0x86   : > { %1354 = vmatpush1.bf16.msra.mxu0 %v1897_v53  ;;  %v1963_v51 = vld [vmem:[%s2455_s26 + $0x254] ss:$8 sps:$4 sm:$0xff]   ;;  %v2020_v52 = vld [vmem:[%s2455_s26 + $0xf0] ss:$8 sps:$4 sm:$0xff]   ;;  %v1969_v54 = vld [vmem:[%s2455_s26 + $0x264] ss:$8 sps:$4 sm:$0xff]  }
  0x87   : > { %1355 = vmatprep.subr.bf16.mxu0 %v1898_v55  ;;  %1309 = vmatpush1.bf16.msra.mxu1 %v1960_v9  ;;  %v1961_v53 = vld [vmem:[%s2455_s26 + $0x250] ss:$8 sps:$4 sm:$0xff]   ;;  %v1967_v56 = vld [vmem:[%s2455_s26 + $0x260] ss:$8 sps:$4 sm:$0xff]   ;;  %v1975_v57 = vld [vmem:[%s2455_s26 + $0x274] ss:$8 sps:$4 sm:$0xff]  }
  0x88   : > { %1310 = vmatprep.subr.bf16.mxu1 %v1964_v10  ;;  %v2021_v55 = vld [vmem:[%s2479_s5] ss:$24 sps:$4 sm:$0xff]   ;;  %v1987_v61 = vld [vmem:[%s2455_s26 + $0x294] ss:$8 sps:$4 sm:$0xff]   ;;  %v1993_v63 = vld [vmem:[%s2455_s26 + $0x2a4] ss:$8 sps:$4 sm:$0xff]  }
  0x89   : > { %v1979_v60 = vld [vmem:[%s2455_s26 + $0x280] ss:$8 sps:$4 sm:$0xff]   ;;  %v1999_v1 = vld [vmem:[%s2455_s26 + $0x2b4] ss:$8 sps:$4 sm:$0xff]   ;;  %v1997_v2 = vld [vmem:[%s2455_s26 + $0x2b0] ss:$8 sps:$4 sm:$0xff]  }
  0x8a   : > { %1356 = vmatpush1.bf16.msra.mxu0 %v1900_v58  ;;  %v1973_v58 = vld [vmem:[%s2455_s26 + $0x270] ss:$8 sps:$4 sm:$0xff]   ;;  %v2011_v5 = vld [vmem:[%s2455_s26 + $0x2d4] ss:$8 sps:$4 sm:$0xff]   ;;  %s2569_s16 = scalar_lea.vmem [#allocation5], %s2452_s7  ;;  %p1762_p4 = scmp.ne.s32.totalorder %s2100_s18, 0 }
  0x8b   : > { %1357 = vmatprep.subr.bf16.mxu0 %v1901_v59  ;;  %1311 = vmatpush1.bf16.msra.mxu1 %v1966_v13  ;;  %v1981_v59 = vld [vmem:[%s2455_s26 + $0x284] ss:$8 sps:$4 sm:$0xff]   ;;  %v2009_v6 = vld [vmem:[%s2455_s26 + $0x2d0] ss:$8 sps:$4 sm:$0xff]   ;;  %v2026_v9 = vld [vmem:[%s2455_s26 + $0x2f4] ss:$8 sps:$4 sm:$0xff]  }
  0x8c   : > { %1312 = vmatprep.subr.bf16.mxu1 %v1970_v14  ;;  %v2024_v10 = vld [vmem:[%s2455_s26 + $0x2f0] ss:$8 sps:$4 sm:$0xff]  }
  0x8e   : > { %1358 = vmatpush1.bf16.msra.mxu0 %v1903_v62  ;;  %v1985_v62 = vld [vmem:[%s2455_s26 + $0x290] ss:$8 sps:$4 sm:$0xff]  }
  0x8f   : > { %1359 = vmatprep.subr.bf16.mxu0 %v1904_v0  ;;  %1313 = vmatpush1.bf16.msra.mxu1 %v1972_v17  ;;  %v1991_v0 = vld [vmem:[%s2455_s26 + $0x2a0] ss:$8 sps:$4 sm:$0xff]  }
  0x90   : > { %1314 = vmatprep.subr.bf16.mxu1 %v1976_v18 }
  0x92   : > { %1360 = vmatpush1.bf16.msra.mxu0 %v1906_v3  ;;  %v2005_v3 = vld [vmem:[%s2455_s26 + $0x2c4] ss:$8 sps:$4 sm:$0xff]  }
  0x93   : > { %1361 = vmatprep.subr.bf16.mxu0 %v1907_v4  ;;  %1315 = vmatpush1.bf16.msra.mxu1 %v1978_v21  ;;  %v2003_v4 = vld [vmem:[%s2455_s26 + $0x2c0] ss:$8 sps:$4 sm:$0xff]  }
  0x94   : > { %1316 = vmatprep.subr.bf16.mxu1 %v1982_v22 }
  0x96   : > { %1362 = vmatpush1.bf16.msra.mxu0 %v1909_v7  ;;  %v2017_v7 = vld [vmem:[%s2455_s26 + $0x2e4] ss:$8 sps:$4 sm:$0xff]  }
  0x97   : > { %1363 = vmatprep.subr.bf16.mxu0 %v1910_v8  ;;  %1317 = vmatpush1.bf16.msra.mxu1 %v1984_v25  ;;  %v2015_v8 = vld [vmem:[%s2455_s26 + $0x2e0] ss:$8 sps:$4 sm:$0xff]  }
  0x98   : > { %1318 = vmatprep.subr.bf16.mxu1 %v1988_v26 }
  0x9a   : > { %1364 = vmatpush1.bf16.msra.mxu0 %v1912_v11  ;;  %v2027_v11 = vld [vmem:[%s2479_s5 + $0x10] ss:$24 sps:$4 sm:$0xff]  }
  0x9b   : > { %1365 = vmatprep.subr.bf16.mxu0 %v1913_v12  ;;  %1319 = vmatpush1.bf16.msra.mxu1 %v1990_v29 }
  0x9c   : > { %1320 = vmatprep.subr.bf16.mxu1 %v1994_v31 }
  0x9e   : > { %1366 = vmatpush1.bf16.msra.mxu0 %v1915_v15 }
  0x9f   : > { %1367 = vmatprep.subr.bf16.mxu0 %v1916_v16  ;;  %1321 = vmatpush1.bf16.msra.mxu1 %v1996_v34 }
  0xa0   : > { %1322 = vmatprep.subr.bf16.mxu1 %v2000_v36 }
  0xa2   : > { %1368 = vmatpush1.bf16.msra.mxu0 %v1918_v19 }
  0xa3   : > { %1369 = vmatprep.subr.bf16.mxu0 %v1919_v20  ;;  %1323 = vmatpush1.bf16.msra.mxu1 %v2002_v40 }
  0xa4   : > { %1324 = vmatprep.subr.bf16.mxu1 %v2006_v41 }
  0xa6   : > { %1370 = vmatpush1.bf16.msra.mxu0 %v1921_v23 }
  0xa7   : > { %1371 = vmatprep.subr.bf16.mxu0 %v1922_v24  ;;  %1325 = vmatpush1.bf16.msra.mxu1 %v2008_v44 }
  0xa8   : > { %1326 = vmatprep.subr.bf16.mxu1 %v2012_v45 }
  0xaa   : > { %1372 = vmatpush1.bf16.msra.mxu0 %v1926_v27 }
  0xab   : > { %1384 = vmatprep.subr.bf16.mxu0 %v1933_v28  ;;  %1327 = vmatpush1.bf16.msra.mxu1 %v2014_v48 }
  0xac   : > { %1328 = vmatprep.subr.bf16.mxu1 %v2018_v49 }
  0xad   : > { %1374 = vmatmul.mubr.bf16.vlgmr.msra.gmra.mrb[0].mxu0 %v1928_v30 }
  0xae   : > { %1385 = vmatpush1.bf16.msra.mxu0 %v1931_v32  ;;  %1416 = vmatprep.mubr.bf16.mxu0 %v2029_v38 }
  0xaf   : > { %1386 = vmatprep.subr.bf16.mxu0 %v1939_v33  ;;  %1329 = vmatpush1.bf16.msra.mxu1 %v2020_v52 }
  0xb2   : > { %1387 = vmatpush1.bf16.msra.mxu0 %v1937_v37  ;;  %1331 = vmatmul.mubr.bf16.vlgmr.msra.gmra.mrb[0].mxu1 %v2021_v55 }
  0xb3   : > { %1388 = vmatprep.subr.bf16.mxu0 %v1945_v39 }
  0xb6   : > { %1389 = vmatpush1.bf16.msra.mxu0 %v1943_v42 }
  0xb7   : > { %1390 = vmatprep.subr.bf16.mxu0 %v1951_v43 }
  0xba   : > { %1391 = vmatpush1.bf16.msra.mxu0 %v1949_v46 }
  0xbb   : > { %1392 = vmatprep.subr.bf16.mxu0 %v1957_v47 }
  0xbe   : > { %1393 = vmatpush1.bf16.msra.mxu0 %v1955_v50 }
  0xbf   : > { %1394 = vmatprep.subr.bf16.mxu0 %v1963_v51 }
  0xc2   : > { %1395 = vmatpush1.bf16.msra.mxu0 %v1961_v53 }
  0xc3   : > { %1396 = vmatprep.subr.bf16.mxu0 %v1969_v54 }
  0xc6   : > { %1397 = vmatpush1.bf16.msra.mxu0 %v1967_v56 }
  0xc7   : > { %1398 = vmatprep.subr.bf16.mxu0 %v1975_v57 }
  0xca   : > { %1399 = vmatpush1.bf16.msra.mxu0 %v1973_v58 }
  0xcb   : > { %1400 = vmatprep.subr.bf16.mxu0 %v1981_v59 }
  0xce   : > { %1401 = vmatpush1.bf16.msra.mxu0 %v1979_v60 }
  0xcf   : > { %1402 = vmatprep.subr.bf16.mxu0 %v1987_v61 }
  0xd2   : > { %1403 = vmatpush1.bf16.msra.mxu0 %v1985_v62 }
  0xd3   : > { %1404 = vmatprep.subr.bf16.mxu0 %v1993_v63 }
  0xd6   : > { %1405 = vmatpush1.bf16.msra.mxu0 %v1991_v0 }
  0xd7   : > { %1406 = vmatprep.subr.bf16.mxu0 %v1999_v1 }
  0xda   : > { %1407 = vmatpush1.bf16.msra.mxu0 %v1997_v2 }
  0xdb   : > { %1408 = vmatprep.subr.bf16.mxu0 %v2005_v3 }
  0xde   : > { %1409 = vmatpush1.bf16.msra.mxu0 %v2003_v4 }
  0xdf   : > { %1410 = vmatprep.subr.bf16.mxu0 %v2011_v5 }
  0xe2   : > { %1411 = vmatpush1.bf16.msra.mxu0 %v2009_v6 }
  0xe3   : > { %1412 = vmatprep.subr.bf16.mxu0 %v2017_v7 }
  0xe6   : > { %1413 = vmatpush1.bf16.msra.mxu0 %v2015_v8 }
  0xe7   : > { %1414 = vmatprep.subr.bf16.mxu0 %v2026_v9 }
  0xea   : > { %1415 = vmatpush1.bf16.msra.mxu0 %v2024_v10 }
  0xed   : > { %1417 = vmatmul.mubr.bf16.vlgmr.msra.gmra.mrb[0].mxu0 %v2027_v11 }
 0x185   : > { %v1332_v12 = vpop.f32.mrb[0].mxu1 }
 0x186   : > { %v1334_v13 = vpop.f32.mrb[1].mxu1 }
 0x187   : > { %v1336_v14 = vpop.f32.mrb[2].mxu1 }
 0x188   : > { %v1338_v15 = vpop.f32.mrb[3].mxu1 }
 0x1be   : > { %1430 = sbr.rel (%p1762_p4) target bundleno = 455 (0x1c7), region = 97 }
 0x1c0   : > { %v1418_v16 = vpop.f32.mrb[0].mxu0 }
 0x1c1   : > { %v1777_v17 = vadd.f32 %v1418_v16, %v1332_v12  ;;  %v1420_v18 = vpop.f32.mrb[1].mxu0 }
 0x1c2   : > { %v1778_v19 = vadd.f32 %v1420_v18, %v1334_v13  ;;  %v1422_v20 = vpop.f32.mrb[2].mxu0 }
 0x1c3   : > { %v1779_v21 = vadd.f32 %v1422_v20, %v1336_v14  ;;  %v1424_v22 = vpop.f32.mrb[3].mxu0  ;;  %1431 = vst [vmem:[#allocation2] sm:$0xff] (!%p1762_p4), %v1777_v17 }
 0x1c4   : > { %v1780_v23 = vadd.f32 %v1424_v22, %v1338_v15  ;;  %1432 = vst [vmem:[#allocation2 + $0x8] sm:$0xff] (!%p1762_p4), %v1778_v19 }
 0x1c5   : > { %1433 = vst [vmem:[#allocation2 + $0x10] sm:$0xff] %v1779_v21 }
 0x1c6   : > { %1434 = vst [vmem:[#allocation2 + $0x18] sm:$0xff] %v1780_v23 }
 0x1c7 PF: > { %p1763_p5 = scmp.le.s32.totalorder %s2100_s18, 0 }
 0x1c9   : > { %1438 = sbr.rel (%p1763_p5) target bundleno = 466 (0x1d2), region = 101 }
 0x1cc   : > { %v1439_v24 = vld [vmem:[#allocation2] sm:$0xff] (!%p1763_p5) }
 0x1cd   : > { %v1440_v25 = vld [vmem:[#allocation2 + $0x8] sm:$0xff] (!%p1763_p5)  ;;  %v1443_v27 = vadd.f32 (!%p1763_p5), %v1777_v17, %v1439_v24  ;;  %v1442_v30 = vld [vmem:[#allocation2 + $0x18] sm:$0xff] (!%p1763_p5) }
 0x1ce   : > { %v1441_v26 = vld [vmem:[#allocation2 + $0x10] sm:$0xff] (!%p1763_p5)  ;;  %v1444_v28 = vadd.f32 (!%p1763_p5), %v1778_v19, %v1440_v25  ;;  %v1446_v31 = vadd.f32 (!%p1763_p5), %v1780_v23, %v1442_v30 }
 0x1cf   : > { %v1445_v29 = vadd.f32 (!%p1763_p5), %v1779_v21, %v1441_v26  ;;  %1447 = vst [vmem:[#allocation2] sm:$0xff] (!%p1763_p5), %v1443_v27 }
 0x1d0   : > { %1448 = vst [vmem:[#allocation2 + $0x8] sm:$0xff] %v1444_v28  ;;  %1450 = vst [vmem:[#allocation2 + $0x18] sm:$0xff] %v1446_v31 }
 0x1d1   : > { %1449 = vst [vmem:[#allocation2 + $0x10] sm:$0xff] %v1445_v29 }
 0x1d2 PF: > { %p1764_p6 = scmp.ne.s32.totalorder %s2100_s18, 2 }
 0x1d3   : > { %v1461_v32 = vlaneseq (!%p1764_p6)  ;;  %v1459_v34 = vld [vmem:[%s682_s27] sm:$0x3] (!%p1764_p6) }
 0x1d4   : > { %1454 = sbr.rel (%p1764_p6) target bundleno = 482 (0x1e2), region = 105 }
 0x1d5   : > { %v1462_v33 = vshrl.u32 (!%p1764_p6), %v1461_v32, 7 }
 0x1d7   : > { %v1463_v36 = vsub.s32 (!%p1764_p6), 0, %v1462_v33  ;;  %v1467_v37 = vsub.s32 (!%p1764_p6), 1, %v1462_v33 }
 0x1d8   : > { %v1455_v35 = vld [vmem:[#allocation2] sm:$0xff] (!%p1764_p6)  ;;  %v1457_v39 = vld [vmem:[#allocation2 + $0x10] sm:$0xff] (!%p1764_p6) }
 0x1d9   : > { %v1456_v38 = vld [vmem:[#allocation2 + $0x8] sm:$0xff] (!%p1764_p6)  ;;  %v1458_v40 = vld [vmem:[#allocation2 + $0x18] sm:$0xff] (!%p1764_p6)  ;;  %v1464_v41 = vrot.slane (!%p1764_p6), %v1459_v34, %v1463_v36  ;;  %v1468_v42 = vrot.slane (!%p1764_p6), %v1459_v34, %v1467_v37 }
 0x1db   : > { %v1471_v43 = vadd.f32 %v1464_v41, %v1455_v35  ;;  %v1472_v44 = vadd.f32 %v1468_v42, %v1456_v38  ;;  %v1473_v45 = vadd.f32 %v1464_v41, %v1457_v39  ;;  %v1474_v46 = vadd.f32 %v1468_v42, %v1458_v40 }
 0x1dd   : > { %v1475_v47 = vmax.f32 %v1471_v43, 0.0  ;;  %v1476_v48 = vmax.f32 %v1472_v44, 0.0  ;;  %v1477_v49 = vmax.f32 %v1473_v45, 0.0  ;;  %v1478_v50 = vmax.f32 %v1474_v46, 0.0 }
 0x1df   : > { %v1774_v51 = vpack.c.bf16 %v1476_v48, %v1475_v47  ;;  %v1775_v52 = vpack.c.bf16 %v1478_v50, %v1477_v49 }
 0x1e1   : > { %1491 = vst [vmem:[%s2569_s16] sm:$0xff] %v1774_v51  ;;  %1492 = vst [vmem:[%s2569_s16 + $0x8] sm:$0xff] %v1775_v52 }
 0x1e2 PF: > { %1499 = sbr.rel (!%p2232_p12) target bundleno = 490 (0x1ea), region = 109  ;;  %s1776_s18 = sshll.u32 (%p2232_p12), %s2104_s19, 3 }
 0x1e3   : > { %s1505_s7 = scalar_lea.vmem (%p2232_p12), %s2625_s3, %s1776_s18 }
 0x1e8   : > { %v1535_v53 = vld [vmem:[%s2569_s16] sm:$0xff] (%p2232_p12)  ;;  %v1537_v54 = vld [vmem:[%s2569_s16 + $0x8] sm:$0xff] (%p2232_p12) }
 0x1e9   : > { %1536 = vst [vmem:[%s1505_s7] sm:$0xff] %v1535_v53  ;;  %1538 = vst [vmem:[%s1505_s7 + $0x10] sm:$0xff] %v1537_v54 }
 0x1ea PF: > { %s13_s22 = sadd.s32 1, %s2116_s22   ;;  %s2631_s12 = smov %s2080_s13 }
 0x1eb   : > { %p10_p7 = scmp.ge.s32.totalorder %s13_s22, 8   ;;  %s2632_s13 = smov %s2230_s9 }
 0x1ec   : > { %s2633_s14 = smov %s2088_s15  ;;  %s2634_s15 = smov %s2227_s8 }
 0x1ed   : > { %s2635_s16 = smov %s2096_s17  ;;  %s2636_s17 = smov %s2213_s30 }
 0x1ee   : > { %s2637_s18 = smov %s2108_s20  ;;  %s2638_s19 = smov %s2112_s21 }
 0x1ef   : > { %s2639_s20 = smov %s2642_s24  ;;  %s2640_s21 = smov %s2646_s25 }
 0x1f0   :  { %12 = sbr.rel (!%p10_p7) target bundleno = 8 (0x8), region = 189 }

// kernel: _lambda_.39
= control target key start
LH: loop header
LB: loop body
LE: loop exit
PB: predicated region body
PF: predicated region fallthrough
CT: control target
= control target key end

     0   :  { %s1007_s12 = smov 0   ;;  %s1009_s13 = smov 0   ;;  %s1195_s0 = inlined_call_operand.vmem [shape: bf16[16,256], index: 0, kind: input, shape index: {}]   ;;  %s1196_s1 = inlined_call_operand.vmem [shape: bf16[256,512], index: 1, kind: input, shape index: {}]   ;;  %s1197_s2 = inlined_call_operand.vmem [shape: f32[1,512], index: 2, kind: input, shape index: {}]   ;;  %s1198_s3 = inlined_call_operand.vmem [shape: bf16[16,512], index: 3, kind: output, shape index: {}]  }
   0x1   :  { %s1011_s14 = smov 0   ;;  %s1013_s15 = smov 0  }
   0x2   :  { %s1015_s16 = smov 0  }
   0x3 LB: > { %s22_s17 = sadd.s32 1, %s981_s15  ;;  %s799_s18 = sadd.s32 4294967295, %s985_s16   ;;  %s985_s16 = sphi %s1015_s16, %s13_s16   ;;  %s981_s15 = sphi %s1013_s15, %s1203_s15   ;;  %s977_s14 = sphi %s1011_s14, %s1202_s14   ;;  %s973_s13 = sphi %s1009_s13, %s1201_s13   ;;  %s969_s12 = sphi %s1007_s12, %s1200_s12  }
   0x4   : > { %p23_p0 = scmp.ge.s32.totalorder %s22_s17, 2  ;;  %p65_p1 = scmp.ne.s32.totalorder %s973_s13, %s969_s12 }
   0x5   : > { %p66_p2 = scmp.eq.s32.totalorder %s985_s16, 0  ;;  %p123_p4 = scmp.eq.s32.totalorder %s799_s18, 1 }
   0x6   : > { %s1205_s17 = smov (%p23_p0, %s22_s17), 0  ;;  %s58_s20 = sadd.s32 1, %s973_s13 }
   0x7   : > { %p67_p3 = por %p66_p2, %p65_p1  ;;  %s55_s19 = ssub.s32 %s981_s15, %s1205_s17 }
   0x8   : > { %p56_p5 = scmp.eq.s32.totalorder %s55_s19, 0  ;;  %p1042_p6 = por %p123_p4, %p65_p1 }
   0x9   : > { %p803_p7 = scmp.ge.s32.totalorder %s985_s16, 2 }
   0xa   : > { %s1047_s22 = scalar_select %p56_p5, %s973_s13, %s58_s20  }
   0xb   : > { %155 = sbr.rel (%p803_p7) target bundleno = 38 (0x26), region = 20 }
  0x12   : > { %158 = sbr.rel (!%p67_p3) target bundleno = 38 (0x26), region = 24  ;;  %s160_s23 = sand.u32 (%p67_p3), 1, %s973_s13  }
  0x13   : > { %s852_s24 = sshll.u32 (%p67_p3), %s981_s15, 3  ;;  %s804_s25 = sshll.u32 (%p67_p3), %s160_s23, 8 }
  0x14   : > { %s1055_s28 = scalar_lea.vmem (%p67_p3), %s1196_s1, %s852_s24  ;;  %s1060_s29 = scalar_lea.vmem (%p67_p3), [#allocation2], %s804_s25 }
  0x15   : > { %v255_v0 = vld [vmem:[%s1055_s28] sm:$0xff] (%p67_p3)  ;;  %v257_v1 = vld [vmem:[%s1055_s28 + $0x10] sm:$0xff] (%p67_p3) }
  0x16   : > { %v259_v2 = vld [vmem:[%s1055_s28 + $0x20] sm:$0xff] (%p67_p3)  ;;  %256 = vst [vmem:[%s1060_s29] sm:$0xff] (%p67_p3), %v255_v0  ;;  %258 = vst [vmem:[%s1060_s29 + $0x8] sm:$0xff] (%p67_p3), %v257_v1  ;;  %v261_v3 = vld [vmem:[%s1055_s28 + $0x30] sm:$0xff] (%p67_p3) }
  0x17   : > { %260 = vst [vmem:[%s1060_s29 + $0x10] sm:$0xff] (%p67_p3), %v259_v2  ;;  %v263_v4 = vld [vmem:[%s1055_s28 + $0x40] sm:$0xff] (%p67_p3)  ;;  %v265_v5 = vld [vmem:[%s1055_s28 + $0x50] sm:$0xff] (%p67_p3)  ;;  %262 = vst [vmem:[%s1060_s29 + $0x18] sm:$0xff] (%p67_p3), %v261_v3 }
  0x18   : > { %264 = vst [vmem:[%s1060_s29 + $0x20] sm:$0xff] (%p67_p3), %v263_v4  ;;  %266 = vst [vmem:[%s1060_s29 + $0x28] sm:$0xff] (%p67_p3), %v265_v5  ;;  %v267_v6 = vld [vmem:[%s1055_s28 + $0x60] sm:$0xff] (%p67_p3)  ;;  %v269_v7 = vld [vmem:[%s1055_s28 + $0x70] sm:$0xff] (%p67_p3) }
  0x19   : > { %v271_v8 = vld [vmem:[%s1055_s28 + $0x80] sm:$0xff]  ;;  %268 = vst [vmem:[%s1060_s29 + $0x30] sm:$0xff] %v267_v6  ;;  %270 = vst [vmem:[%s1060_s29 + $0x38] sm:$0xff] %v269_v7  ;;  %v273_v9 = vld [vmem:[%s1055_s28 + $0x90] sm:$0xff] }
  0x1a   : > { %272 = vst [vmem:[%s1060_s29 + $0x40] sm:$0xff] %v271_v8  ;;  %v275_v10 = vld [vmem:[%s1055_s28 + $0xa0] sm:$0xff]  ;;  %v277_v11 = vld [vmem:[%s1055_s28 + $0xb0] sm:$0xff]  ;;  %274 = vst [vmem:[%s1060_s29 + $0x48] sm:$0xff] %v273_v9 }
  0x1b   : > { %276 = vst [vmem:[%s1060_s29 + $0x50] sm:$0xff] %v275_v10  ;;  %278 = vst [vmem:[%s1060_s29 + $0x58] sm:$0xff] %v277_v11  ;;  %v279_v12 = vld [vmem:[%s1055_s28 + $0xc0] sm:$0xff]  ;;  %v281_v13 = vld [vmem:[%s1055_s28 + $0xd0] sm:$0xff] }
  0x1c   : > { %v283_v14 = vld [vmem:[%s1055_s28 + $0xe0] sm:$0xff]  ;;  %280 = vst [vmem:[%s1060_s29 + $0x60] sm:$0xff] %v279_v12  ;;  %282 = vst [vmem:[%s1060_s29 + $0x68] sm:$0xff] %v281_v13  ;;  %v285_v15 = vld [vmem:[%s1055_s28 + $0xf0] sm:$0xff] }
  0x1d   : > { %284 = vst [vmem:[%s1060_s29 + $0x70] sm:$0xff] %v283_v14  ;;  %v287_v16 = vld [vmem:[%s1055_s28 + $0x100] sm:$0xff]  ;;  %v289_v17 = vld [vmem:[%s1055_s28 + $0x110] sm:$0xff]  ;;  %286 = vst [vmem:[%s1060_s29 + $0x78] sm:$0xff] %v285_v15 }
  0x1e   : > { %288 = vst [vmem:[%s1060_s29 + $0x80] sm:$0xff] %v287_v16  ;;  %290 = vst [vmem:[%s1060_s29 + $0x88] sm:$0xff] %v289_v17  ;;  %v291_v18 = vld [vmem:[%s1055_s28 + $0x120] sm:$0xff]  ;;  %v293_v19 = vld [vmem:[%s1055_s28 + $0x130] sm:$0xff] }
  0x1f   : > { %v295_v20 = vld [vmem:[%s1055_s28 + $0x140] sm:$0xff]  ;;  %292 = vst [vmem:[%s1060_s29 + $0x90] sm:$0xff] %v291_v18  ;;  %294 = vst [vmem:[%s1060_s29 + $0x98] sm:$0xff] %v293_v19  ;;  %v297_v21 = vld [vmem:[%s1055_s28 + $0x150] sm:$0xff] }
  0x20   : > { %296 = vst [vmem:[%s1060_s29 + $0xa0] sm:$0xff] %v295_v20  ;;  %v299_v22 = vld [vmem:[%s1055_s28 + $0x160] sm:$0xff]  ;;  %v301_v23 = vld [vmem:[%s1055_s28 + $0x170] sm:$0xff]  ;;  %298 = vst [vmem:[%s1060_s29 + $0xa8] sm:$0xff] %v297_v21 }
  0x21   : > { %300 = vst [vmem:[%s1060_s29 + $0xb0] sm:$0xff] %v299_v22  ;;  %302 = vst [vmem:[%s1060_s29 + $0xb8] sm:$0xff] %v301_v23  ;;  %v303_v24 = vld [vmem:[%s1055_s28 + $0x180] sm:$0xff]  ;;  %v305_v25 = vld [vmem:[%s1055_s28 + $0x190] sm:$0xff] }
  0x22   : > { %v307_v26 = vld [vmem:[%s1055_s28 + $0x1a0] sm:$0xff]  ;;  %304 = vst [vmem:[%s1060_s29 + $0xc0] sm:$0xff] %v303_v24  ;;  %306 = vst [vmem:[%s1060_s29 + $0xc8] sm:$0xff] %v305_v25  ;;  %v309_v27 = vld [vmem:[%s1055_s28 + $0x1b0] sm:$0xff] }
  0x23   : > { %308 = vst [vmem:[%s1060_s29 + $0xd0] sm:$0xff] %v307_v26  ;;  %v311_v28 = vld [vmem:[%s1055_s28 + $0x1c0] sm:$0xff]  ;;  %v313_v29 = vld [vmem:[%s1055_s28 + $0x1d0] sm:$0xff]  ;;  %310 = vst [vmem:[%s1060_s29 + $0xd8] sm:$0xff] %v309_v27 }
  0x24   : > { %312 = vst [vmem:[%s1060_s29 + $0xe0] sm:$0xff] %v311_v28  ;;  %314 = vst [vmem:[%s1060_s29 + $0xe8] sm:$0xff] %v313_v29  ;;  %v315_v30 = vld [vmem:[%s1055_s28 + $0x1e0] sm:$0xff]  ;;  %v317_v31 = vld [vmem:[%s1055_s28 + $0x1f0] sm:$0xff] }
  0x25   : > { %316 = vst [vmem:[%s1060_s29 + $0xf0] sm:$0xff] %v315_v30  ;;  %318 = vst [vmem:[%s1060_s29 + $0xf8] sm:$0xff] %v317_v31 }
  0x26 PF: > { %p807_p8 = scmp.ge.s32.totalorder %s985_s16, 1  ;;  %p331_p9 = scmp.lt.s32.totalorder %s985_s16, 3 }
  0x28   : > { %p332_p10 = pnand %p807_p8, %p331_p9 }
  0x29   : > { %s338_s30 = sand.u32 (!%p332_p10), 1, %s969_s12   ;;  %v946_v32 = vld [vmem:[%s1195_s0 + $0x4] ss:$8 sps:$4 sm:$0xff] (!%p332_p10)   ;;  %v944_v1 = vld [vmem:[%s1195_s0] ss:$8 sps:$4 sm:$0xff] (!%p332_p10)   ;;  %s810_s10 = sshll.u32 (!%p332_p10), %s977_s14, 1  ;;  %v421_v2 = vlaneseq (!%p332_p10) }
  0x2a   : > { %335 = sbr.rel (%p332_p10) target bundleno = 337 (0x151), region = 66  ;;  %s808_s4 = sshll.u32 (!%p332_p10), %s338_s30, 8  ;;  %633 = vmatprep.mubr.bf16.mxu0 (!%p332_p10), %v946_v32 }
  0x2b   : > { %s1131_s7 = scalar_lea.vmem (!%p332_p10), [#allocation2], %s808_s4  ;;  %p379_p11 = scmp.lt.s32.totalorder (!%p332_p10), %s810_s10, 3  ;;  %v422_v3 = vshrl.u32 (!%p332_p10), %v421_v2, 7 }
  0x2c   : > { %v896_v33 = vld [vmem:[%s1131_s7 + $0x4] ss:$8 sps:$4 sm:$0xff] (!%p332_p10)   ;;  %v898_v34 = vld [vmem:[%s1131_s7] ss:$8 sps:$4 sm:$0xff] (!%p332_p10)   ;;  %v899_v35 = vld [vmem:[%s1131_s7 + $0x14] ss:$8 sps:$4 sm:$0xff] (!%p332_p10)  }
  0x2d   : > { %601 = vmatprep.subr.bf16.mxu0 (!%p332_p10), %v896_v33  ;;  %v901_v36 = vld [vmem:[%s1131_s7 + $0x10] ss:$8 sps:$4 sm:$0xff] (!%p332_p10)   ;;  %v902_v37 = vld [vmem:[%s1131_s7 + $0x24] ss:$8 sps:$4 sm:$0xff] (!%p332_p10)   ;;  %v904_v38 = vld [vmem:[%s1131_s7 + $0x20] ss:$8 sps:$4 sm:$0xff] (!%p332_p10)  }
  0x2e   : > { %602 = vmatpush1.bf16.msra.mxu0 (!%p332_p10), %v898_v34  ;;  %v905_v39 = vld [vmem:[%s1131_s7 + $0x34] ss:$8 sps:$4 sm:$0xff] (!%p332_p10)   ;;  %v907_v40 = vld [vmem:[%s1131_s7 + $0x30] ss:$8 sps:$4 sm:$0xff] (!%p332_p10)   ;;  %v908_v41 = vld [vmem:[%s1131_s7 + $0x44] ss:$8 sps:$4 sm:$0xff] (!%p332_p10)  }
  0x2f   : > { %603 = vmatprep.subr.bf16.mxu0 (!%p332_p10), %v899_v35  ;;  %v910_v42 = vld [vmem:[%s1131_s7 + $0x40] ss:$8 sps:$4 sm:$0xff] (!%p332_p10)   ;;  %v911_v43 = vld [vmem:[%s1131_s7 + $0x54] ss:$8 sps:$4 sm:$0xff] (!%p332_p10)   ;;  %v913_v44 = vld [vmem:[%s1131_s7 + $0x50] ss:$8 sps:$4 sm:$0xff] (!%p332_p10)  }
  0x30   : > { %v914_v45 = vld [vmem:[%s1131_s7 + $0x64] ss:$8 sps:$4 sm:$0xff] (!%p332_p10)   ;;  %v916_v46 = vld [vmem:[%s1131_s7 + $0x60] ss:$8 sps:$4 sm:$0xff] (!%p332_p10)   ;;  %v917_v47 = vld [vmem:[%s1131_s7 + $0x74] ss:$8 sps:$4 sm:$0xff] (!%p332_p10)  }
  0x31   : > { %v919_v48 = vld [vmem:[%s1131_s7 + $0x70] ss:$8 sps:$4 sm:$0xff]   ;;  %v920_v49 = vld [vmem:[%s1131_s7 + $0x84] ss:$8 sps:$4 sm:$0xff]   ;;  %v922_v50 = vld [vmem:[%s1131_s7 + $0x80] ss:$8 sps:$4 sm:$0xff]  }
  0x32   : > { %604 = vmatpush1.bf16.msra.mxu0 %v901_v36  ;;  %v923_v51 = vld [vmem:[%s1131_s7 + $0x94] ss:$8 sps:$4 sm:$0xff]   ;;  %v925_v52 = vld [vmem:[%s1131_s7 + $0x90] ss:$8 sps:$4 sm:$0xff]   ;;  %v926_v53 = vld [vmem:[%s1131_s7 + $0xa4] ss:$8 sps:$4 sm:$0xff]  }
  0x33   : > { %605 = vmatprep.subr.bf16.mxu0 %v902_v37  ;;  %v928_v54 = vld [vmem:[%s1131_s7 + $0xa0] ss:$8 sps:$4 sm:$0xff]   ;;  %v929_v55 = vld [vmem:[%s1131_s7 + $0xb4] ss:$8 sps:$4 sm:$0xff]   ;;  %v931_v56 = vld [vmem:[%s1131_s7 + $0xb0] ss:$8 sps:$4 sm:$0xff]  }
  0x34   : > { %v932_v57 = vld [vmem:[%s1131_s7 + $0xc4] ss:$8 sps:$4 sm:$0xff]   ;;  %v934_v58 = vld [vmem:[%s1131_s7 + $0xc0] ss:$8 sps:$4 sm:$0xff]   ;;  %v935_v59 = vld [vmem:[%s1131_s7 + $0xd4] ss:$8 sps:$4 sm:$0xff]  }
  0x35   : > { %v937_v60 = vld [vmem:[%s1131_s7 + $0xd0] ss:$8 sps:$4 sm:$0xff]   ;;  %v938_v61 = vld [vmem:[%s1131_s7 + $0xe4] ss:$8 sps:$4 sm:$0xff]   ;;  %v940_v62 = vld [vmem:[%s1131_s7 + $0xe0] ss:$8 sps:$4 sm:$0xff]  }
  0x36   : > { %606 = vmatpush1.bf16.msra.mxu0 %v904_v38  ;;  %v941_v63 = vld [vmem:[%s1131_s7 + $0xf4] ss:$8 sps:$4 sm:$0xff]   ;;  %v943_v0 = vld [vmem:[%s1131_s7 + $0xf0] ss:$8 sps:$4 sm:$0xff]   ;;  %s1207_s10 = smov (!%p379_p11, %s810_s10), 3  ;;  %v423_v4 = vsub.s32 0, %v422_v3 }
  0x37   : > { %607 = vmatprep.subr.bf16.mxu0 %v905_v39  ;;  %s381_s19 = scalar_lea.vmem %s1197_s2, %s1207_s10  ;;  %v427_v6 = vsub.s32 1, %v422_v3  ;;  %s809_s20 = sshll.u32 %s338_s30, 4 }
  0x38   : > { %v419_v5 = vld [vmem:[%s381_s19] sm:$0x3]  ;;  %s369_s23 = scalar_lea.vmem [#allocation3], %s809_s20  ;;  %s855_s24 = sshll.u32 (%p1042_p6), %s977_s14, 3 }
  0x39   : > { %v424_v7 = vrot.slane %v419_v5, %v423_v4  ;;  %v428_v8 = vrot.slane %v419_v5, %v427_v6  ;;  %s670_s26 = scalar_lea.vmem (%p1042_p6), %s1198_s3, %s855_s24 }
  0x3a   : > { %608 = vmatpush1.bf16.msra.mxu0 %v907_v40 }
  0x3b   : > { %609 = vmatprep.subr.bf16.mxu0 %v908_v41 }
  0x3e   : > { %610 = vmatpush1.bf16.msra.mxu0 %v910_v42 }
  0x3f   : > { %611 = vmatprep.subr.bf16.mxu0 %v911_v43 }
  0x42   : > { %612 = vmatpush1.bf16.msra.mxu0 %v913_v44 }
  0x43   : > { %613 = vmatprep.subr.bf16.mxu0 %v914_v45 }
  0x46   : > { %614 = vmatpush1.bf16.msra.mxu0 %v916_v46 }
  0x47   : > { %615 = vmatprep.subr.bf16.mxu0 %v917_v47 }
  0x4a   : > { %616 = vmatpush1.bf16.msra.mxu0 %v919_v48 }
  0x4b   : > { %617 = vmatprep.subr.bf16.mxu0 %v920_v49 }
  0x4e   : > { %618 = vmatpush1.bf16.msra.mxu0 %v922_v50 }
  0x4f   : > { %619 = vmatprep.subr.bf16.mxu0 %v923_v51 }
  0x52   : > { %620 = vmatpush1.bf16.msra.mxu0 %v925_v52 }
  0x53   : > { %621 = vmatprep.subr.bf16.mxu0 %v926_v53 }
  0x56   : > { %622 = vmatpush1.bf16.msra.mxu0 %v928_v54 }
  0x57   : > { %623 = vmatprep.subr.bf16.mxu0 %v929_v55 }
  0x5a   : > { %624 = vmatpush1.bf16.msra.mxu0 %v931_v56 }
  0x5b   : > { %625 = vmatprep.subr.bf16.mxu0 %v932_v57 }
  0x5e   : > { %626 = vmatpush1.bf16.msra.mxu0 %v934_v58 }
  0x5f   : > { %627 = vmatprep.subr.bf16.mxu0 %v935_v59 }
  0x62   : > { %628 = vmatpush1.bf16.msra.mxu0 %v937_v60 }
  0x63   : > { %629 = vmatprep.subr.bf16.mxu0 %v938_v61 }
  0x66   : > { %630 = vmatpush1.bf16.msra.mxu0 %v940_v62 }
  0x67   : > { %631 = vmatprep.subr.bf16.mxu0 %v941_v63 }
  0x6a   : > { %632 = vmatpush1.bf16.msra.mxu0 %v943_v0 }
  0x6d   : > { %634 = vmatmul.mubr.bf16.vlgmr.msra.gmra.mrb[0].mxu0 %v944_v1 }
 0x140   : > { %v635_v9 = vpop.f32.mrb[0].mxu0 }
 0x141   : > { %v636_v10 = vadd.f32 %v635_v9, %v424_v7  ;;  %v637_v11 = vpop.f32.mrb[1].mxu0 }
 0x142   : > { %v638_v12 = vadd.f32 %v637_v11, %v428_v8  ;;  %v639_v13 = vpop.f32.mrb[2].mxu0  ;;  %664 = sbr.rel (!%p1042_p6) target bundleno = 337 (0x151), region = 74 }
 0x143   : > { %v640_v14 = vadd.f32 %v639_v13, %v424_v7  ;;  %v641_v15 = vpop.f32.mrb[3].mxu0 }
 0x144   : > { %v853_v16 = vpack.c.bf16 %v638_v12, %v636_v10  ;;  %v642_v17 = vadd.f32 %v641_v15, %v428_v8 }
 0x146   : > { %656 = vst [vmem:[%s369_s23] sm:$0xff] %v853_v16  ;;  %v854_v18 = vpack.c.bf16 %v642_v17, %v640_v14 }
 0x148   : > { %657 = vst [vmem:[%s369_s23 + $0x8] sm:$0xff] %v854_v18 }
 0x14d   : > { %v700_v19 = vld [vmem:[%s369_s23] sm:$0xff] }
 0x14e   : > { %701 = vst [vmem:[%s670_s26] sm:$0xff] %v700_v19 }
 0x14f   : > { %v702_v20 = vld [vmem:[%s369_s23 + $0x8] sm:$0xff] }
 0x150   : > { %703 = vst [vmem:[%s670_s26 + $0x10] sm:$0xff] %v702_v20 }
 0x151 PF: > { %s13_s16 = sadd.s32 1, %s985_s16   ;;  %s1200_s12 = smov %s973_s13 }
 0x152   : > { %p10_p12 = scmp.ge.s32.totalorder %s13_s16, 4   ;;  %s1201_s13 = smov %s1047_s22 }
 0x153   : > { %s1202_s14 = smov %s981_s15  ;;  %s1203_s15 = smov %s1205_s17 }
 0x154   :  { %12 = sbr.rel (!%p10_p12) target bundleno = 3 (0x3), region = 149 }

// kernel: _lambda_.40
= control target key start
LH: loop header
LB: loop body
LE: loop exit
PB: predicated region body
PF: predicated region fallthrough
CT: control target
= control target key end

     0   :  { %s2778_s0 = inlined_call_operand.vmem [shape: bf16[16,4608], index: 0, kind: input, shape index: {}]   ;;  %s2779_s1 = inlined_call_operand.vmem [shape: bf16[4608,512], index: 1, kind: input, shape index: {}]   ;;  %s2780_s2 = inlined_call_operand.vmem [shape: f32[1,512], index: 2, kind: input, shape index: {}]   ;;  %s2781_s3 = inlined_call_operand.vmem [shape: bf16[16,512], index: 3, kind: input, shape index: {}]   ;;  %s2782_s4 = inlined_call_operand.vmem [shape: bf16[16,512], index: 4, kind: output, shape index: {}]  }
   0x1   :  { %2785 = sst [smem:[#allocation9_spill]] %s2778_s0 }
   0x2   :  { %s2272_s15 = smov 0   ;;  %s2274_s16 = smov 0  }
   0x3   :  { %s2276_s17 = smov 0   ;;  %s2278_s18 = smov 0  }
   0x4   :  { %s2280_s19 = smov 0   ;;  %s2282_s20 = smov 0  }
   0x5   :  { %s2284_s21 = smov 0   ;;  %s2286_s22 = smov 0  }
   0x6   :  { %s2288_s23 = smov 0   ;;  %s2290_s24 = smov 0  }
   0x7   :  { %s2292_s25 = smov 0  }
   0x8 LB: > { %s1773_s26 = sadd.s32 4294967295, %s2245_s25   ;;  %s26_s27 = sadd.s32 1, %s2237_s23  ;;  %s2245_s25 = sphi %s2292_s25, %s14_s25   ;;  %s2241_s24 = sphi %s2290_s24, %s2804_s24   ;;  %s2237_s23 = sphi %s2288_s23, %s2803_s23   ;;  %s2233_s22 = sphi %s2286_s22, %s2802_s22   ;;  %s2229_s21 = sphi %s2284_s21, %s2801_s21   ;;  %s2225_s20 = sphi %s2282_s20, %s2800_s20   ;;  %s2221_s19 = sphi %s2280_s19, %s2799_s19   ;;  %s2217_s18 = sphi %s2278_s18, %s2798_s18   ;;  %s2213_s17 = sphi %s2276_s17, %s2797_s17   ;;  %s2209_s16 = sphi %s2274_s16, %s2796_s16   ;;  %s2205_s15 = sphi %s2272_s15, %s2795_s15  }
   0x9   : > { %p27_p0 = scmp.ge.s32.totalorder %s26_s27, 6  ;;  %s29_s28 = sadd.s32 1, %s2241_s24 }
   0xa   : > { %s42_s29 = sadd.s32 1, %s2225_s20  ;;  %p49_p1 = scmp.ne.s32.totalorder %s2225_s20, %s2221_s19 }
   0xb   : > { %s2806_s27 = smov (%p27_p0, %s26_s27), 0  ;;  %s2808_s28 = smov (!%p27_p0, %s29_s28), %s2241_s24 }
   0xc   : > { %2786 = sst [smem:[#allocation7_spill]] %s2806_s27  ;;  %s38_s30 = ssub.s32 %s2237_s23, %s2806_s27 }
   0xd   : > { %p50_p2 = scmp.eq.s32.totalorder %s2245_s25, 0  ;;  %p31_p3 = scmp.ge.s32.totalorder %s2808_s28, 2 }
   0xe   : > { %p40_p4 = scmp.eq.s32.totalorder %s38_s30, 0  ;;  %s70_s6 = sadd.s32 1, %s2217_s18 }
   0xf   : > { %p2341_p5 = por %p50_p2, %p49_p1  ;;  %s2810_s28 = smov (%p31_p3, %s2808_s28), 0 }
  0x10   : > { %2788 = sst [smem:[#allocation8_spill]] %s2810_s28  ;;  %s66_s8 = ssub.s32 %s2241_s24, %s2810_s28 }
  0x11   : > { %s2349_s7 = scalar_select %p40_p4, %s2225_s20, %s42_s29  }
  0x12   : > { %p77_p6 = scmp.ne.s32.totalorder %s2217_s18, %s2213_s17  ;;  %s67_s9 = sor.u32 %s66_s8, %s38_s30 }
  0x13   : > { %p122_p7 = scmp.eq.s32.totalorder %s66_s8, 0  ;;  %p68_p8 = scmp.eq.s32.totalorder %s67_s9, 0 }
  0x14   : > { %p2357_p9 = por %p77_p6, %p50_p2  ;;  %s124_s11 = sadd.s32 1, %s2209_s16 }
  0x15   : > { %p131_p10 = scmp.ne.s32.totalorder %s2209_s16, %s2205_s15  ;;  %p163_p12 = scmp.eq.s32.totalorder %s1773_s26, 11 }
  0x16   : > { %s2365_s12 = scalar_select %p68_p8, %s2217_s18, %s70_s6  }
  0x17   : > { %s2368_s13 = scalar_select %p122_p7, %s2209_s16, %s124_s11  }
  0x18   : > { %p2372_p11 = por %p131_p10, %p50_p2  ;;  %p2376_p13 = por %p163_p12, %p131_p10 }
  0x19   : > { %p1776_p0 = scmp.ge.s32.totalorder %s2245_s25, 12 }
  0x1b   : > { %185 = sbr.rel (%p1776_p0) target bundleno = 109 (0x6d), region = 16 }
  0x22   : > { %188 = sbr.rel (!%p2341_p5) target bundleno = 46 (0x2e), region = 20  ;;  %s190_s30 = sand.u32 (%p2341_p5), 1, %s2225_s20  }
  0x23   : > { %s1900_s6 = smul.u32 (%p2341_p5), 24, %s2237_s23  ;;  %s2792_s0 = sld [smem:[#allocation9_spill]] (%p2341_p5) }
  0x24   : > { %s1914_s8 = smul.u32 (%p2341_p5), 48, %s190_s30 }
  0x26   : > { %s192_s26 = scalar_lea.vmem (%p2341_p5), [#allocation3], %s1914_s8 }
  0x29   : > { %s198_s28 = scalar_lea.vmem %s2792_s0, %s1900_s6 }
  0x2a   : > { %v211_v0 = vld [vmem:[%s198_s28] sm:$0xff]  ;;  %v213_v1 = vld [vmem:[%s198_s28 + $0x8] sm:$0xff]  ;;  %v215_v2 = vld [vmem:[%s198_s28 + $0x10] sm:$0xff] }
  0x2b   : > { %212 = vst [vmem:[%s192_s26] sm:$0xff] %v211_v0  ;;  %214 = vst [vmem:[%s192_s26 + $0x8] sm:$0xff] %v213_v1  ;;  %v217_v3 = vld [vmem:[%s198_s28 + $0x90] sm:$0xff]  ;;  %v219_v4 = vld [vmem:[%s198_s28 + $0x98] sm:$0xff] }
  0x2c   : > { %216 = vst [vmem:[%s192_s26 + $0x10] sm:$0xff] %v215_v2  ;;  %v221_v5 = vld [vmem:[%s198_s28 + $0xa0] sm:$0xff]  ;;  %218 = vst [vmem:[%s192_s26 + $0x18] sm:$0xff] %v217_v3 }
  0x2d   : > { %220 = vst [vmem:[%s192_s26 + $0x20] sm:$0xff] %v219_v4  ;;  %222 = vst [vmem:[%s192_s26 + $0x28] sm:$0xff] %v221_v5 }
  0x2e PF: > { %228 = sbr.rel (!%p2357_p9) target bundleno = 102 (0x66), region = 43  ;;  %s230_s5 = sand.u32 (%p2357_p9), 1, %s2217_s18  }
  0x2f   : > { %s1915_s30 = smul.u32 (%p2357_p9), 768, %s230_s5  ;;  %s1778_s6 = sshll.u32 (%p2357_p9), %s2241_s24, 1 }
  0x30   : > { %s1901_s8 = smul.u32 (%p2357_p9), 384, %s2237_s23 }
  0x31   : > { %s2401_s10 = scalar_lea.vmem (%p2357_p9), [#allocation4], %s1915_s30 }
  0x32   : > { %s236_s9 = sadd.s32 (%p2357_p9), %s1901_s8, %s1778_s6 }
  0x33   : > { %s1780_s11 = sshll.u32 (%p2357_p9), %s236_s9, 2 }
  0x34   : > { %s2396_s28 = scalar_lea.vmem (%p2357_p9), %s2779_s1, %s1780_s11 }
  0x35   : > { %v456_v6 = vld [vmem:[%s2396_s28] sm:$0xff]  ;;  %v458_v7 = vld [vmem:[%s2396_s28 + $0x10] sm:$0xff] }
  0x36   : > { %v460_v8 = vld [vmem:[%s2396_s28 + $0x20] sm:$0xff]  ;;  %457 = vst [vmem:[%s2401_s10] sm:$0xff] %v456_v6  ;;  %459 = vst [vmem:[%s2401_s10 + $0x8] sm:$0xff] %v458_v7  ;;  %v462_v9 = vld [vmem:[%s2396_s28 + $0x30] sm:$0xff] }
  0x37   : > { %461 = vst [vmem:[%s2401_s10 + $0x10] sm:$0xff] %v460_v8  ;;  %v464_v10 = vld [vmem:[%s2396_s28 + $0x40] sm:$0xff]  ;;  %v466_v11 = vld [vmem:[%s2396_s28 + $0x50] sm:$0xff]  ;;  %463 = vst [vmem:[%s2401_s10 + $0x18] sm:$0xff] %v462_v9 }
  0x38   : > { %465 = vst [vmem:[%s2401_s10 + $0x20] sm:$0xff] %v464_v10  ;;  %467 = vst [vmem:[%s2401_s10 + $0x28] sm:$0xff] %v466_v11  ;;  %v468_v12 = vld [vmem:[%s2396_s28 + $0x60] sm:$0xff]  ;;  %v470_v13 = vld [vmem:[%s2396_s28 + $0x70] sm:$0xff] }
  0x39   : > { %v472_v14 = vld [vmem:[%s2396_s28 + $0x80] sm:$0xff]  ;;  %469 = vst [vmem:[%s2401_s10 + $0x30] sm:$0xff] %v468_v12  ;;  %471 = vst [vmem:[%s2401_s10 + $0x38] sm:$0xff] %v470_v13  ;;  %v474_v15 = vld [vmem:[%s2396_s28 + $0x90] sm:$0xff] }
  0x3a   : > { %473 = vst [vmem:[%s2401_s10 + $0x40] sm:$0xff] %v472_v14  ;;  %v476_v16 = vld [vmem:[%s2396_s28 + $0xa0] sm:$0xff]  ;;  %v478_v17 = vld [vmem:[%s2396_s28 + $0xb0] sm:$0xff]  ;;  %475 = vst [vmem:[%s2401_s10 + $0x48] sm:$0xff] %v474_v15 }
  0x3b   : > { %477 = vst [vmem:[%s2401_s10 + $0x50] sm:$0xff] %v476_v16  ;;  %479 = vst [vmem:[%s2401_s10 + $0x58] sm:$0xff] %v478_v17  ;;  %v480_v18 = vld [vmem:[%s2396_s28 + $0xc0] sm:$0xff]  ;;  %v482_v19 = vld [vmem:[%s2396_s28 + $0xd0] sm:$0xff] }
  0x3c   : > { %v484_v20 = vld [vmem:[%s2396_s28 + $0xe0] sm:$0xff]  ;;  %481 = vst [vmem:[%s2401_s10 + $0x60] sm:$0xff] %v480_v18  ;;  %483 = vst [vmem:[%s2401_s10 + $0x68] sm:$0xff] %v482_v19  ;;  %v486_v21 = vld [vmem:[%s2396_s28 + $0xf0] sm:$0xff] }
  0x3d   : > { %485 = vst [vmem:[%s2401_s10 + $0x70] sm:$0xff] %v484_v20  ;;  %v488_v22 = vld [vmem:[%s2396_s28 + $0x100] sm:$0xff]  ;;  %v490_v23 = vld [vmem:[%s2396_s28 + $0x110] sm:$0xff]  ;;  %487 = vst [vmem:[%s2401_s10 + $0x78] sm:$0xff] %v486_v21 }
  0x3e   : > { %489 = vst [vmem:[%s2401_s10 + $0x80] sm:$0xff] %v488_v22  ;;  %491 = vst [vmem:[%s2401_s10 + $0x88] sm:$0xff] %v490_v23  ;;  %v492_v24 = vld [vmem:[%s2396_s28 + $0x120] sm:$0xff]  ;;  %v494_v25 = vld [vmem:[%s2396_s28 + $0x130] sm:$0xff] }
  0x3f   : > { %v496_v26 = vld [vmem:[%s2396_s28 + $0x140] sm:$0xff]  ;;  %493 = vst [vmem:[%s2401_s10 + $0x90] sm:$0xff] %v492_v24  ;;  %495 = vst [vmem:[%s2401_s10 + $0x98] sm:$0xff] %v494_v25  ;;  %v498_v27 = vld [vmem:[%s2396_s28 + $0x150] sm:$0xff] }
  0x40   : > { %497 = vst [vmem:[%s2401_s10 + $0xa0] sm:$0xff] %v496_v26  ;;  %v500_v28 = vld [vmem:[%s2396_s28 + $0x160] sm:$0xff]  ;;  %v502_v29 = vld [vmem:[%s2396_s28 + $0x170] sm:$0xff]  ;;  %499 = vst [vmem:[%s2401_s10 + $0xa8] sm:$0xff] %v498_v27 }
  0x41   : > { %501 = vst [vmem:[%s2401_s10 + $0xb0] sm:$0xff] %v500_v28  ;;  %503 = vst [vmem:[%s2401_s10 + $0xb8] sm:$0xff] %v502_v29  ;;  %v504_v30 = vld [vmem:[%s2396_s28 + $0x180] sm:$0xff]  ;;  %v506_v31 = vld [vmem:[%s2396_s28 + $0x190] sm:$0xff] }
  0x42   : > { %v508_v32 = vld [vmem:[%s2396_s28 + $0x1a0] sm:$0xff]  ;;  %505 = vst [vmem:[%s2401_s10 + $0xc0] sm:$0xff] %v504_v30  ;;  %507 = vst [vmem:[%s2401_s10 + $0xc8] sm:$0xff] %v506_v31  ;;  %v510_v33 = vld [vmem:[%s2396_s28 + $0x1b0] sm:$0xff] }
  0x43   : > { %509 = vst [vmem:[%s2401_s10 + $0xd0] sm:$0xff] %v508_v32  ;;  %v512_v34 = vld [vmem:[%s2396_s28 + $0x1c0] sm:$0xff]  ;;  %v514_v35 = vld [vmem:[%s2396_s28 + $0x1d0] sm:$0xff]  ;;  %511 = vst [vmem:[%s2401_s10 + $0xd8] sm:$0xff] %v510_v33 }
  0x44   : > { %513 = vst [vmem:[%s2401_s10 + $0xe0] sm:$0xff] %v512_v34  ;;  %515 = vst [vmem:[%s2401_s10 + $0xe8] sm:$0xff] %v514_v35  ;;  %v516_v36 = vld [vmem:[%s2396_s28 + $0x1e0] sm:$0xff]  ;;  %v518_v37 = vld [vmem:[%s2396_s28 + $0x1f0] sm:$0xff] }
  0x45   : > { %v520_v38 = vld [vmem:[%s2396_s28 + $0x200] sm:$0xff]  ;;  %517 = vst [vmem:[%s2401_s10 + $0xf0] sm:$0xff] %v516_v36  ;;  %519 = vst [vmem:[%s2401_s10 + $0xf8] sm:$0xff] %v518_v37  ;;  %v522_v39 = vld [vmem:[%s2396_s28 + $0x210] sm:$0xff] }
  0x46   : > { %521 = vst [vmem:[%s2401_s10 + $0x100] sm:$0xff] %v520_v38  ;;  %v524_v40 = vld [vmem:[%s2396_s28 + $0x220] sm:$0xff]  ;;  %v526_v41 = vld [vmem:[%s2396_s28 + $0x230] sm:$0xff]  ;;  %523 = vst [vmem:[%s2401_s10 + $0x108] sm:$0xff] %v522_v39 }
  0x47   : > { %525 = vst [vmem:[%s2401_s10 + $0x110] sm:$0xff] %v524_v40  ;;  %527 = vst [vmem:[%s2401_s10 + $0x118] sm:$0xff] %v526_v41  ;;  %v528_v42 = vld [vmem:[%s2396_s28 + $0x240] sm:$0xff]  ;;  %v530_v43 = vld [vmem:[%s2396_s28 + $0x250] sm:$0xff] }
  0x48   : > { %v532_v44 = vld [vmem:[%s2396_s28 + $0x260] sm:$0xff]  ;;  %529 = vst [vmem:[%s2401_s10 + $0x120] sm:$0xff] %v528_v42  ;;  %531 = vst [vmem:[%s2401_s10 + $0x128] sm:$0xff] %v530_v43  ;;  %v534_v45 = vld [vmem:[%s2396_s28 + $0x270] sm:$0xff] }
  0x49   : > { %533 = vst [vmem:[%s2401_s10 + $0x130] sm:$0xff] %v532_v44  ;;  %v536_v46 = vld [vmem:[%s2396_s28 + $0x280] sm:$0xff]  ;;  %v538_v47 = vld [vmem:[%s2396_s28 + $0x290] sm:$0xff]  ;;  %535 = vst [vmem:[%s2401_s10 + $0x138] sm:$0xff] %v534_v45 }
  0x4a   : > { %537 = vst [vmem:[%s2401_s10 + $0x140] sm:$0xff] %v536_v46  ;;  %539 = vst [vmem:[%s2401_s10 + $0x148] sm:$0xff] %v538_v47  ;;  %v540_v48 = vld [vmem:[%s2396_s28 + $0x2a0] sm:$0xff]  ;;  %v542_v49 = vld [vmem:[%s2396_s28 + $0x2b0] sm:$0xff] }
  0x4b   : > { %v544_v50 = vld [vmem:[%s2396_s28 + $0x2c0] sm:$0xff]  ;;  %541 = vst [vmem:[%s2401_s10 + $0x150] sm:$0xff] %v540_v48  ;;  %543 = vst [vmem:[%s2401_s10 + $0x158] sm:$0xff] %v542_v49  ;;  %v546_v51 = vld [vmem:[%s2396_s28 + $0x2d0] sm:$0xff] }
  0x4c   : > { %545 = vst [vmem:[%s2401_s10 + $0x160] sm:$0xff] %v544_v50  ;;  %v548_v52 = vld [vmem:[%s2396_s28 + $0x2e0] sm:$0xff]  ;;  %v550_v53 = vld [vmem:[%s2396_s28 + $0x2f0] sm:$0xff]  ;;  %547 = vst [vmem:[%s2401_s10 + $0x168] sm:$0xff] %v546_v51 }
  0x4d   : > { %549 = vst [vmem:[%s2401_s10 + $0x170] sm:$0xff] %v548_v52  ;;  %551 = vst [vmem:[%s2401_s10 + $0x178] sm:$0xff] %v550_v53  ;;  %v552_v54 = vld [vmem:[%s2396_s28 + $0x300] sm:$0xff]  ;;  %v554_v55 = vld [vmem:[%s2396_s28 + $0x310] sm:$0xff] }
  0x4e   : > { %v556_v56 = vld [vmem:[%s2396_s28 + $0x320] sm:$0xff]  ;;  %553 = vst [vmem:[%s2401_s10 + $0x180] sm:$0xff] %v552_v54  ;;  %555 = vst [vmem:[%s2401_s10 + $0x188] sm:$0xff] %v554_v55  ;;  %v558_v57 = vld [vmem:[%s2396_s28 + $0x330] sm:$0xff] }
  0x4f   : > { %557 = vst [vmem:[%s2401_s10 + $0x190] sm:$0xff] %v556_v56  ;;  %v560_v58 = vld [vmem:[%s2396_s28 + $0x340] sm:$0xff]  ;;  %v562_v59 = vld [vmem:[%s2396_s28 + $0x350] sm:$0xff]  ;;  %559 = vst [vmem:[%s2401_s10 + $0x198] sm:$0xff] %v558_v57 }
  0x50   : > { %561 = vst [vmem:[%s2401_s10 + $0x1a0] sm:$0xff] %v560_v58  ;;  %563 = vst [vmem:[%s2401_s10 + $0x1a8] sm:$0xff] %v562_v59  ;;  %v564_v60 = vld [vmem:[%s2396_s28 + $0x360] sm:$0xff]  ;;  %v566_v61 = vld [vmem:[%s2396_s28 + $0x370] sm:$0xff] }
  0x51   : > { %v568_v62 = vld [vmem:[%s2396_s28 + $0x380] sm:$0xff]  ;;  %565 = vst [vmem:[%s2401_s10 + $0x1b0] sm:$0xff] %v564_v60  ;;  %567 = vst [vmem:[%s2401_s10 + $0x1b8] sm:$0xff] %v566_v61  ;;  %v570_v63 = vld [vmem:[%s2396_s28 + $0x390] sm:$0xff] }
  0x52   : > { %569 = vst [vmem:[%s2401_s10 + $0x1c0] sm:$0xff] %v568_v62  ;;  %v572_v0 = vld [vmem:[%s2396_s28 + $0x3a0] sm:$0xff]  ;;  %v574_v1 = vld [vmem:[%s2396_s28 + $0x3b0] sm:$0xff]  ;;  %571 = vst [vmem:[%s2401_s10 + $0x1c8] sm:$0xff] %v570_v63 }
  0x53   : > { %573 = vst [vmem:[%s2401_s10 + $0x1d0] sm:$0xff] %v572_v0  ;;  %575 = vst [vmem:[%s2401_s10 + $0x1d8] sm:$0xff] %v574_v1  ;;  %v576_v2 = vld [vmem:[%s2396_s28 + $0x3c0] sm:$0xff]  ;;  %v578_v3 = vld [vmem:[%s2396_s28 + $0x3d0] sm:$0xff] }
  0x54   : > { %v580_v4 = vld [vmem:[%s2396_s28 + $0x3e0] sm:$0xff]  ;;  %577 = vst [vmem:[%s2401_s10 + $0x1e0] sm:$0xff] %v576_v2  ;;  %579 = vst [vmem:[%s2401_s10 + $0x1e8] sm:$0xff] %v578_v3  ;;  %v582_v5 = vld [vmem:[%s2396_s28 + $0x3f0] sm:$0xff] }
  0x55   : > { %581 = vst [vmem:[%s2401_s10 + $0x1f0] sm:$0xff] %v580_v4  ;;  %v584_v6 = vld [vmem:[%s2396_s28 + $0x400] sm:$0xff]  ;;  %v586_v7 = vld [vmem:[%s2396_s28 + $0x410] sm:$0xff]  ;;  %583 = vst [vmem:[%s2401_s10 + $0x1f8] sm:$0xff] %v582_v5 }
  0x56   : > { %585 = vst [vmem:[%s2401_s10 + $0x200] sm:$0xff] %v584_v6  ;;  %587 = vst [vmem:[%s2401_s10 + $0x208] sm:$0xff] %v586_v7  ;;  %v588_v8 = vld [vmem:[%s2396_s28 + $0x420] sm:$0xff]  ;;  %v590_v9 = vld [vmem:[%s2396_s28 + $0x430] sm:$0xff] }
  0x57   : > { %v592_v10 = vld [vmem:[%s2396_s28 + $0x440] sm:$0xff]  ;;  %589 = vst [vmem:[%s2401_s10 + $0x210] sm:$0xff] %v588_v8  ;;  %591 = vst [vmem:[%s2401_s10 + $0x218] sm:$0xff] %v590_v9  ;;  %v594_v11 = vld [vmem:[%s2396_s28 + $0x450] sm:$0xff] }
  0x58   : > { %593 = vst [vmem:[%s2401_s10 + $0x220] sm:$0xff] %v592_v10  ;;  %v596_v12 = vld [vmem:[%s2396_s28 + $0x460] sm:$0xff]  ;;  %v598_v13 = vld [vmem:[%s2396_s28 + $0x470] sm:$0xff]  ;;  %595 = vst [vmem:[%s2401_s10 + $0x228] sm:$0xff] %v594_v11 }
  0x59   : > { %597 = vst [vmem:[%s2401_s10 + $0x230] sm:$0xff] %v596_v12  ;;  %599 = vst [vmem:[%s2401_s10 + $0x238] sm:$0xff] %v598_v13  ;;  %v600_v14 = vld [vmem:[%s2396_s28 + $0x480] sm:$0xff]  ;;  %v602_v15 = vld [vmem:[%s2396_s28 + $0x490] sm:$0xff] }
  0x5a   : > { %v604_v16 = vld [vmem:[%s2396_s28 + $0x4a0] sm:$0xff]  ;;  %601 = vst [vmem:[%s2401_s10 + $0x240] sm:$0xff] %v600_v14  ;;  %603 = vst [vmem:[%s2401_s10 + $0x248] sm:$0xff] %v602_v15  ;;  %v606_v17 = vld [vmem:[%s2396_s28 + $0x4b0] sm:$0xff] }
  0x5b   : > { %605 = vst [vmem:[%s2401_s10 + $0x250] sm:$0xff] %v604_v16  ;;  %v608_v18 = vld [vmem:[%s2396_s28 + $0x4c0] sm:$0xff]  ;;  %v610_v19 = vld [vmem:[%s2396_s28 + $0x4d0] sm:$0xff]  ;;  %607 = vst [vmem:[%s2401_s10 + $0x258] sm:$0xff] %v606_v17 }
  0x5c   : > { %609 = vst [vmem:[%s2401_s10 + $0x260] sm:$0xff] %v608_v18  ;;  %611 = vst [vmem:[%s2401_s10 + $0x268] sm:$0xff] %v610_v19  ;;  %v612_v20 = vld [vmem:[%s2396_s28 + $0x4e0] sm:$0xff]  ;;  %v614_v21 = vld [vmem:[%s2396_s28 + $0x4f0] sm:$0xff] }
  0x5d   : > { %v616_v22 = vld [vmem:[%s2396_s28 + $0x500] sm:$0xff]  ;;  %613 = vst [vmem:[%s2401_s10 + $0x270] sm:$0xff] %v612_v20  ;;  %615 = vst [vmem:[%s2401_s10 + $0x278] sm:$0xff] %v614_v21  ;;  %v618_v23 = vld [vmem:[%s2396_s28 + $0x510] sm:$0xff] }
  0x5e   : > { %617 = vst [vmem:[%s2401_s10 + $0x280] sm:$0xff] %v616_v22  ;;  %v620_v24 = vld [vmem:[%s2396_s28 + $0x520] sm:$0xff]  ;;  %v622_v25 = vld [vmem:[%s2396_s28 + $0x530] sm:$0xff]  ;;  %619 = vst [vmem:[%s2401_s10 + $0x288] sm:$0xff] %v618_v23 }
  0x5f   : > { %621 = vst [vmem:[%s2401_s10 + $0x290] sm:$0xff] %v620_v24  ;;  %623 = vst [vmem:[%s2401_s10 + $0x298] sm:$0xff] %v622_v25  ;;  %v624_v26 = vld [vmem:[%s2396_s28 + $0x540] sm:$0xff]  ;;  %v626_v27 = vld [vmem:[%s2396_s28 + $0x550] sm:$0xff] }
  0x60   : > { %v628_v28 = vld [vmem:[%s2396_s28 + $0x560] sm:$0xff]  ;;  %625 = vst [vmem:[%s2401_s10 + $0x2a0] sm:$0xff] %v624_v26  ;;  %627 = vst [vmem:[%s2401_s10 + $0x2a8] sm:$0xff] %v626_v27  ;;  %v630_v29 = vld [vmem:[%s2396_s28 + $0x570] sm:$0xff] }
  0x61   : > { %629 = vst [vmem:[%s2401_s10 + $0x2b0] sm:$0xff] %v628_v28  ;;  %v632_v30 = vld [vmem:[%s2396_s28 + $0x580] sm:$0xff]  ;;  %v634_v31 = vld [vmem:[%s2396_s28 + $0x590] sm:$0xff]  ;;  %631 = vst [vmem:[%s2401_s10 + $0x2b8] sm:$0xff] %v630_v29 }
  0x62   : > { %633 = vst [vmem:[%s2401_s10 + $0x2c0] sm:$0xff] %v632_v30  ;;  %635 = vst [vmem:[%s2401_s10 + $0x2c8] sm:$0xff] %v634_v31  ;;  %v636_v32 = vld [vmem:[%s2396_s28 + $0x5a0] sm:$0xff]  ;;  %v638_v33 = vld [vmem:[%s2396_s28 + $0x5b0] sm:$0xff] }
  0x63   : > { %v640_v34 = vld [vmem:[%s2396_s28 + $0x5c0] sm:$0xff]  ;;  %637 = vst [vmem:[%s2401_s10 + $0x2d0] sm:$0xff] %v636_v32  ;;  %639 = vst [vmem:[%s2401_s10 + $0x2d8] sm:$0xff] %v638_v33  ;;  %v642_v35 = vld [vmem:[%s2396_s28 + $0x5d0] sm:$0xff] }
  0x64   : > { %641 = vst [vmem:[%s2401_s10 + $0x2e0] sm:$0xff] %v640_v34  ;;  %v644_v36 = vld [vmem:[%s2396_s28 + $0x5e0] sm:$0xff]  ;;  %v646_v37 = vld [vmem:[%s2396_s28 + $0x5f0] sm:$0xff]  ;;  %643 = vst [vmem:[%s2401_s10 + $0x2e8] sm:$0xff] %v642_v35 }
  0x65   : > { %645 = vst [vmem:[%s2401_s10 + $0x2f0] sm:$0xff] %v644_v36  ;;  %647 = vst [vmem:[%s2401_s10 + $0x2f8] sm:$0xff] %v646_v37 }
  0x66 PF: > { %661 = sbr.rel (!%p2372_p11) target bundleno = 109 (0x6d), region = 85  ;;  %s663_s0 = sand.u32 (%p2372_p11), 1, %s2209_s16  }
  0x67   : > { %s1902_s27 = sshll.u32 (%p2372_p11), %s2241_s24, 3  ;;  %s1781_s26 = sshll.u32 (%p2372_p11), %s663_s0, 4 }
  0x68   : > { %s671_s6 = scalar_lea.vmem (%p2372_p11), %s2781_s3, %s1902_s27  ;;  %s665_s8 = scalar_lea.vmem (%p2372_p11), [#allocation5], %s1781_s26 }
  0x69   : > { %v701_v38 = vld [vmem:[%s671_s6] sm:$0xff] (%p2372_p11)  ;;  %v703_v39 = vld [vmem:[%s671_s6 + $0x10] sm:$0xff] (%p2372_p11) }
  0x6a   : > { %702 = vst [vmem:[%s665_s8] sm:$0xff] (%p2372_p11), %v701_v38  ;;  %704 = vst [vmem:[%s665_s8 + $0x8] sm:$0xff] (%p2372_p11), %v703_v39 }
  0x6d PF: > { %p1784_p1 = scmp.ge.s32.totalorder %s2245_s25, 1  ;;  %p709_p2 = scmp.lt.s32.totalorder %s2245_s25, 13 }
  0x6f   : > { %p710_p3 = pnand %p1784_p1, %p709_p2 }
  0x70   : > { %s723_s14 = sand.u32 (!%p710_p3), 1, %s2213_s17   ;;  %s730_s9 = sand.u32 (!%p710_p3), 1, %s2205_s15  }
  0x71   : > { %713 = sbr.rel (%p710_p3) target bundleno = 501 (0x1f5), region = 123  ;;  %s2603_s28 = sshll.u32 (!%p710_p3), %s730_s9, 4 }
  0x72   : > { %s1917_s11 = smul.u32 (!%p710_p3), 768, %s723_s14  ;;  %s1787_s10 = sshll.u32 (!%p710_p3), %s2233_s22, 1 }
  0x73   : > { %p771_p4 = scmp.lt.s32.totalorder (!%p710_p3), %s1787_s10, 3  ;;  %s716_s26 = sand.u32 (!%p710_p3), 1, %s2221_s19  }
  0x74   : > { %s2606_s0 = scalar_lea.vmem (!%p710_p3), [#allocation4], %s1917_s11  ;;  %s1916_s5 = smul.u32 (!%p710_p3), 48, %s716_s26 }
  0x75   : > { %v2006_v40 = vld [vmem:[%s2606_s0 + $0x104] ss:$8 sps:$4 sm:$0xff] (!%p710_p3)   ;;  %v2008_v41 = vld [vmem:[%s2606_s0 + $0x100] ss:$8 sps:$4 sm:$0xff] (!%p710_p3)   ;;  %v2009_v42 = vld [vmem:[%s2606_s0 + $0x114] ss:$8 sps:$4 sm:$0xff] (!%p710_p3)  }
  0x76   : > { %1434 = vmatprep.subr.bf16.mxu0 (!%p710_p3), %v2006_v40  ;;  %v2011_v43 = vld [vmem:[%s2606_s0 + $0x110] ss:$8 sps:$4 sm:$0xff] (!%p710_p3)   ;;  %v2012_v44 = vld [vmem:[%s2606_s0 + $0x124] ss:$8 sps:$4 sm:$0xff] (!%p710_p3)   ;;  %v2014_v45 = vld [vmem:[%s2606_s0 + $0x120] ss:$8 sps:$4 sm:$0xff] (!%p710_p3)  }
  0x77   : > { %1435 = vmatpush1.bf16.msra.mxu0 (!%p710_p3), %v2008_v41  ;;  %v2015_v46 = vld [vmem:[%s2606_s0 + $0x134] ss:$8 sps:$4 sm:$0xff] (!%p710_p3)   ;;  %v2017_v47 = vld [vmem:[%s2606_s0 + $0x130] ss:$8 sps:$4 sm:$0xff] (!%p710_p3)   ;;  %v2018_v48 = vld [vmem:[%s2606_s0 + $0x144] ss:$8 sps:$4 sm:$0xff] (!%p710_p3)  }
  0x78   : > { %s2812_s10 = smov (!%p771_p4, %s1787_s10), 3  ;;  %1436 = vmatprep.subr.bf16.mxu0 %v2009_v42  ;;  %v2020_v49 = vld [vmem:[%s2606_s0 + $0x140] ss:$8 sps:$4 sm:$0xff]   ;;  %v2021_v50 = vld [vmem:[%s2606_s0 + $0x154] ss:$8 sps:$4 sm:$0xff]   ;;  %s2630_s30 = scalar_lea.vmem [#allocation3], %s1916_s5 }
  0x79   : > { %s773_s27 = scalar_lea.vmem %s2780_s2, %s2812_s10  ;;  %v2023_v51 = vld [vmem:[%s2606_s0 + $0x150] ss:$8 sps:$4 sm:$0xff]   ;;  %v2024_v52 = vld [vmem:[%s2606_s0 + $0x164] ss:$8 sps:$4 sm:$0xff]   ;;  %v2056_v54 = vld [vmem:[%s2606_s0] ss:$8 sps:$4 sm:$0xff]  }
  0x7a   : > { %v2053_v53 = vld [vmem:[%s2606_s0 + $0x4] ss:$8 sps:$4 sm:$0xff]   ;;  %v2026_v55 = vld [vmem:[%s2606_s0 + $0x160] ss:$8 sps:$4 sm:$0xff]   ;;  %v2027_v57 = vld [vmem:[%s2606_s0 + $0x174] ss:$8 sps:$4 sm:$0xff]  }
  0x7b   : > { %1437 = vmatpush1.bf16.msra.mxu0 %v2011_v43  ;;  %1391 = vmatprep.subr.bf16.mxu1 %v2053_v53  ;;  %v2059_v56 = vld [vmem:[%s2630_s30 + $0xc] ss:$24 sps:$4 sm:$0xff]   ;;  %v2065_v59 = vld [vmem:[%s2606_s0 + $0x10] ss:$8 sps:$4 sm:$0xff]   ;;  %v2071_v63 = vld [vmem:[%s2606_s0 + $0x20] ss:$8 sps:$4 sm:$0xff]  }
  0x7c   : > { %1438 = vmatprep.subr.bf16.mxu0 %v2012_v44  ;;  %1392 = vmatpush1.bf16.msra.mxu1 %v2056_v54  ;;  %v2063_v58 = vld [vmem:[%s2606_s0 + $0x14] ss:$8 sps:$4 sm:$0xff]   ;;  %v2029_v60 = vld [vmem:[%s2606_s0 + $0x170] ss:$8 sps:$4 sm:$0xff]   ;;  %v2030_v61 = vld [vmem:[%s2606_s0 + $0x184] ss:$8 sps:$4 sm:$0xff]  }
  0x7d   : > { %1466 = vmatprep.mubr.bf16.mxu0 %v2059_v56  ;;  %1393 = vmatprep.subr.bf16.mxu1 %v2063_v58  ;;  %v2069_v62 = vld [vmem:[%s2606_s0 + $0x24] ss:$8 sps:$4 sm:$0xff]   ;;  %v2032_v0 = vld [vmem:[%s2606_s0 + $0x180] ss:$8 sps:$4 sm:$0xff]   ;;  %v2075_v1 = vld [vmem:[%s2606_s0 + $0x34] ss:$8 sps:$4 sm:$0xff]  }
  0x7e   : > { %v2033_v2 = vld [vmem:[%s2606_s0 + $0x194] ss:$8 sps:$4 sm:$0xff]   ;;  %v2077_v3 = vld [vmem:[%s2606_s0 + $0x30] ss:$8 sps:$4 sm:$0xff]   ;;  %v2081_v4 = vld [vmem:[%s2606_s0 + $0x44] ss:$8 sps:$4 sm:$0xff]  }
  0x7f   : > { %1439 = vmatpush1.bf16.msra.mxu0 %v2014_v45  ;;  %v2035_v5 = vld [vmem:[%s2606_s0 + $0x190] ss:$8 sps:$4 sm:$0xff]   ;;  %v2036_v6 = vld [vmem:[%s2606_s0 + $0x1a4] ss:$8 sps:$4 sm:$0xff]   ;;  %v2083_v7 = vld [vmem:[%s2606_s0 + $0x40] ss:$8 sps:$4 sm:$0xff]  }
  0x80   : > { %1440 = vmatprep.subr.bf16.mxu0 %v2015_v46  ;;  %1394 = vmatpush1.bf16.msra.mxu1 %v2065_v59  ;;  %v2087_v8 = vld [vmem:[%s2606_s0 + $0x54] ss:$8 sps:$4 sm:$0xff]   ;;  %v2038_v9 = vld [vmem:[%s2606_s0 + $0x1a0] ss:$8 sps:$4 sm:$0xff]   ;;  %v2089_v11 = vld [vmem:[%s2606_s0 + $0x50] ss:$8 sps:$4 sm:$0xff]  }
  0x81   : > { %1395 = vmatprep.subr.bf16.mxu1 %v2069_v62  ;;  %v2039_v10 = vld [vmem:[%s2606_s0 + $0x1b4] ss:$8 sps:$4 sm:$0xff]   ;;  %v2093_v12 = vld [vmem:[%s2606_s0 + $0x64] ss:$8 sps:$4 sm:$0xff]   ;;  %v2041_v13 = vld [vmem:[%s2606_s0 + $0x1b0] ss:$8 sps:$4 sm:$0xff]  }
  0x82   : > { %v2042_v14 = vld [vmem:[%s2606_s0 + $0x1c4] ss:$8 sps:$4 sm:$0xff]   ;;  %v2095_v15 = vld [vmem:[%s2606_s0 + $0x60] ss:$8 sps:$4 sm:$0xff]   ;;  %v2099_v16 = vld [vmem:[%s2606_s0 + $0x74] ss:$8 sps:$4 sm:$0xff]  }
  0x83   : > { %1441 = vmatpush1.bf16.msra.mxu0 %v2017_v47  ;;  %v2044_v17 = vld [vmem:[%s2606_s0 + $0x1c0] ss:$8 sps:$4 sm:$0xff]   ;;  %v2045_v18 = vld [vmem:[%s2606_s0 + $0x1d4] ss:$8 sps:$4 sm:$0xff]   ;;  %v2101_v19 = vld [vmem:[%s2606_s0 + $0x70] ss:$8 sps:$4 sm:$0xff]  }
  0x84   : > { %1442 = vmatprep.subr.bf16.mxu0 %v2018_v48  ;;  %1396 = vmatpush1.bf16.msra.mxu1 %v2071_v63  ;;  %v2105_v20 = vld [vmem:[%s2606_s0 + $0x84] ss:$8 sps:$4 sm:$0xff]   ;;  %v2047_v21 = vld [vmem:[%s2606_s0 + $0x1d0] ss:$8 sps:$4 sm:$0xff]   ;;  %v2107_v23 = vld [vmem:[%s2606_s0 + $0x80] ss:$8 sps:$4 sm:$0xff]  }
  0x85   : > { %1397 = vmatprep.subr.bf16.mxu1 %v2075_v1  ;;  %v2048_v22 = vld [vmem:[%s2606_s0 + $0x1e4] ss:$8 sps:$4 sm:$0xff]   ;;  %v2111_v24 = vld [vmem:[%s2606_s0 + $0x94] ss:$8 sps:$4 sm:$0xff]   ;;  %v2050_v25 = vld [vmem:[%s2606_s0 + $0x1e0] ss:$8 sps:$4 sm:$0xff]  }
  0x86   : > { %v2051_v26 = vld [vmem:[%s2606_s0 + $0x1f4] ss:$8 sps:$4 sm:$0xff]   ;;  %v2113_v27 = vld [vmem:[%s2606_s0 + $0x90] ss:$8 sps:$4 sm:$0xff]   ;;  %v2117_v28 = vld [vmem:[%s2606_s0 + $0xa4] ss:$8 sps:$4 sm:$0xff]  }
  0x87   : > { %1443 = vmatpush1.bf16.msra.mxu0 %v2020_v49  ;;  %v2055_v29 = vld [vmem:[%s2606_s0 + $0x1f0] ss:$8 sps:$4 sm:$0xff]   ;;  %v2062_v30 = vld [vmem:[%s2606_s0 + $0x204] ss:$8 sps:$4 sm:$0xff]   ;;  %v2119_v31 = vld [vmem:[%s2606_s0 + $0xa0] ss:$8 sps:$4 sm:$0xff]  }
  0x88   : > { %1444 = vmatprep.subr.bf16.mxu0 %v2021_v50  ;;  %1398 = vmatpush1.bf16.msra.mxu1 %v2077_v3  ;;  %v2057_v32 = vld [vmem:[%s2630_s30 + $0x8] ss:$24 sps:$4 sm:$0xff]   ;;  %v2123_v33 = vld [vmem:[%s2606_s0 + $0xb4] ss:$8 sps:$4 sm:$0xff]   ;;  %v2129_v38 = vld [vmem:[%s2606_s0 + $0xc4] ss:$8 sps:$4 sm:$0xff]  }
  0x89   : > { %1399 = vmatprep.subr.bf16.mxu1 %v2081_v4  ;;  %v2060_v34 = vld [vmem:[%s2606_s0 + $0x200] ss:$8 sps:$4 sm:$0xff]   ;;  %v2068_v35 = vld [vmem:[%s2606_s0 + $0x214] ss:$8 sps:$4 sm:$0xff]   ;;  %v2125_v36 = vld [vmem:[%s2606_s0 + $0xb0] ss:$8 sps:$4 sm:$0xff]  }
  0x8a   : > { %v2152_v37 = vld [vmem:[%s2630_s30 + $0x4] ss:$24 sps:$4 sm:$0xff]   ;;  %v2066_v39 = vld [vmem:[%s2606_s0 + $0x210] ss:$8 sps:$4 sm:$0xff]   ;;  %v2158_v40 = vld [vmem:[%s2630_s30 + $0x14] ss:$24 sps:$4 sm:$0xff]  }
  0x8b   : > { %1445 = vmatpush1.bf16.msra.mxu0 %v2023_v51  ;;  %1423 = vmatprep.mubr.bf16.mxu1 %v2152_v37  ;;  %v2074_v41 = vld [vmem:[%s2606_s0 + $0x224] ss:$8 sps:$4 sm:$0xff]   ;;  %v2131_v42 = vld [vmem:[%s2606_s0 + $0xc0] ss:$8 sps:$4 sm:$0xff]   ;;  %v2135_v43 = vld [vmem:[%s2606_s0 + $0xd4] ss:$8 sps:$4 sm:$0xff]  }
  0x8c   : > { %1446 = vmatprep.subr.bf16.mxu0 %v2024_v52  ;;  %1400 = vmatpush1.bf16.msra.mxu1 %v2083_v7  ;;  %v2072_v44 = vld [vmem:[%s2606_s0 + $0x220] ss:$8 sps:$4 sm:$0xff]   ;;  %v2080_v45 = vld [vmem:[%s2606_s0 + $0x234] ss:$8 sps:$4 sm:$0xff]   ;;  %v2137_v46 = vld [vmem:[%s2606_s0 + $0xd0] ss:$8 sps:$4 sm:$0xff]  }
  0x8d   : > { %1401 = vmatprep.subr.bf16.mxu1 %v2087_v8  ;;  %v2141_v47 = vld [vmem:[%s2606_s0 + $0xe4] ss:$8 sps:$4 sm:$0xff]   ;;  %v2078_v48 = vld [vmem:[%s2606_s0 + $0x230] ss:$8 sps:$4 sm:$0xff]   ;;  %v2143_v50 = vld [vmem:[%s2606_s0 + $0xe0] ss:$8 sps:$4 sm:$0xff]  }
  0x8e   : > { %v2086_v49 = vld [vmem:[%s2606_s0 + $0x244] ss:$8 sps:$4 sm:$0xff]   ;;  %v2147_v51 = vld [vmem:[%s2606_s0 + $0xf4] ss:$8 sps:$4 sm:$0xff]   ;;  %v2084_v52 = vld [vmem:[%s2606_s0 + $0x240] ss:$8 sps:$4 sm:$0xff]  }
  0x8f   : > { %1447 = vmatpush1.bf16.msra.mxu0 %v2026_v55  ;;  %v2092_v53 = vld [vmem:[%s2606_s0 + $0x254] ss:$8 sps:$4 sm:$0xff]   ;;  %v2149_v54 = vld [vmem:[%s2606_s0 + $0xf0] ss:$8 sps:$4 sm:$0xff]   ;;  %v2098_v56 = vld [vmem:[%s2606_s0 + $0x264] ss:$8 sps:$4 sm:$0xff]  }
  0x90   : > { %1448 = vmatprep.subr.bf16.mxu0 %v2027_v57  ;;  %1402 = vmatpush1.bf16.msra.mxu1 %v2089_v11  ;;  %v2090_v55 = vld [vmem:[%s2606_s0 + $0x250] ss:$8 sps:$4 sm:$0xff]   ;;  %v2096_v58 = vld [vmem:[%s2606_s0 + $0x260] ss:$8 sps:$4 sm:$0xff]   ;;  %v2104_v59 = vld [vmem:[%s2606_s0 + $0x274] ss:$8 sps:$4 sm:$0xff]  }
  0x91   : > { %1403 = vmatprep.subr.bf16.mxu1 %v2093_v12  ;;  %v2150_v57 = vld [vmem:[%s2630_s30] ss:$24 sps:$4 sm:$0xff]   ;;  %v2116_v63 = vld [vmem:[%s2606_s0 + $0x294] ss:$8 sps:$4 sm:$0xff]   ;;  %v2122_v1 = vld [vmem:[%s2606_s0 + $0x2a4] ss:$8 sps:$4 sm:$0xff]  }
  0x92   : > { %v2108_v62 = vld [vmem:[%s2606_s0 + $0x280] ss:$8 sps:$4 sm:$0xff]   ;;  %v2128_v3 = vld [vmem:[%s2606_s0 + $0x2b4] ss:$8 sps:$4 sm:$0xff]   ;;  %v2126_v4 = vld [vmem:[%s2606_s0 + $0x2b0] ss:$8 sps:$4 sm:$0xff]  }
  0x93   : > { %1449 = vmatpush1.bf16.msra.mxu0 %v2029_v60  ;;  %v2102_v60 = vld [vmem:[%s2606_s0 + $0x270] ss:$8 sps:$4 sm:$0xff]   ;;  %v2140_v7 = vld [vmem:[%s2606_s0 + $0x2d4] ss:$8 sps:$4 sm:$0xff]   ;;  %s732_s19 = scalar_lea.vmem [#allocation5], %s2603_s28  ;;  %s2721_s6 = scalar_lea.vmem [#allocation6], %s2603_s28 }
  0x94   : > { %1450 = vmatprep.subr.bf16.mxu0 %v2030_v61  ;;  %1404 = vmatpush1.bf16.msra.mxu1 %v2095_v15  ;;  %v2110_v61 = vld [vmem:[%s2606_s0 + $0x284] ss:$8 sps:$4 sm:$0xff]   ;;  %v2138_v8 = vld [vmem:[%s2606_s0 + $0x2d0] ss:$8 sps:$4 sm:$0xff]   ;;  %v2155_v11 = vld [vmem:[%s2606_s0 + $0x2f4] ss:$8 sps:$4 sm:$0xff]  }
  0x95   : > { %1405 = vmatprep.subr.bf16.mxu1 %v2099_v16  ;;  %v2153_v12 = vld [vmem:[%s2606_s0 + $0x2f0] ss:$8 sps:$4 sm:$0xff]   ;;  %p1890_p5 = scmp.ne.s32.totalorder %s2229_s21, 0 }
  0x97   : > { %1451 = vmatpush1.bf16.msra.mxu0 %v2032_v0  ;;  %v2114_v0 = vld [vmem:[%s2606_s0 + $0x290] ss:$8 sps:$4 sm:$0xff]  }
  0x98   : > { %1452 = vmatprep.subr.bf16.mxu0 %v2033_v2  ;;  %1406 = vmatpush1.bf16.msra.mxu1 %v2101_v19  ;;  %v2120_v2 = vld [vmem:[%s2606_s0 + $0x2a0] ss:$8 sps:$4 sm:$0xff]  }
  0x99   : > { %1407 = vmatprep.subr.bf16.mxu1 %v2105_v20 }
  0x9b   : > { %1453 = vmatpush1.bf16.msra.mxu0 %v2035_v5  ;;  %v2134_v5 = vld [vmem:[%s2606_s0 + $0x2c4] ss:$8 sps:$4 sm:$0xff]  }
  0x9c   : > { %1454 = vmatprep.subr.bf16.mxu0 %v2036_v6  ;;  %1408 = vmatpush1.bf16.msra.mxu1 %v2107_v23  ;;  %v2132_v6 = vld [vmem:[%s2606_s0 + $0x2c0] ss:$8 sps:$4 sm:$0xff]  }
  0x9d   : > { %1409 = vmatprep.subr.bf16.mxu1 %v2111_v24 }
  0x9f   : > { %1455 = vmatpush1.bf16.msra.mxu0 %v2038_v9  ;;  %v2146_v9 = vld [vmem:[%s2606_s0 + $0x2e4] ss:$8 sps:$4 sm:$0xff]  }
  0xa0   : > { %1456 = vmatprep.subr.bf16.mxu0 %v2039_v10  ;;  %1410 = vmatpush1.bf16.msra.mxu1 %v2113_v27  ;;  %v2144_v10 = vld [vmem:[%s2606_s0 + $0x2e0] ss:$8 sps:$4 sm:$0xff]  }
  0xa1   : > { %1411 = vmatprep.subr.bf16.mxu1 %v2117_v28 }
  0xa3   : > { %1457 = vmatpush1.bf16.msra.mxu0 %v2041_v13  ;;  %v2156_v13 = vld [vmem:[%s2630_s30 + $0x10] ss:$24 sps:$4 sm:$0xff]  }
  0xa4   : > { %1458 = vmatprep.subr.bf16.mxu0 %v2042_v14  ;;  %1412 = vmatpush1.bf16.msra.mxu1 %v2119_v31 }
  0xa5   : > { %1413 = vmatprep.subr.bf16.mxu1 %v2123_v33 }
  0xa7   : > { %1459 = vmatpush1.bf16.msra.mxu0 %v2044_v17 }
  0xa8   : > { %1460 = vmatprep.subr.bf16.mxu0 %v2045_v18  ;;  %1414 = vmatpush1.bf16.msra.mxu1 %v2125_v36 }
  0xa9   : > { %1415 = vmatprep.subr.bf16.mxu1 %v2129_v38 }
  0xab   : > { %1461 = vmatpush1.bf16.msra.mxu0 %v2047_v21 }
  0xac   : > { %1462 = vmatprep.subr.bf16.mxu0 %v2048_v22  ;;  %1416 = vmatpush1.bf16.msra.mxu1 %v2131_v42 }
  0xad   : > { %1417 = vmatprep.subr.bf16.mxu1 %v2135_v43 }
  0xaf   : > { %1463 = vmatpush1.bf16.msra.mxu0 %v2050_v25 }
  0xb0   : > { %1464 = vmatprep.subr.bf16.mxu0 %v2051_v26  ;;  %1418 = vmatpush1.bf16.msra.mxu1 %v2137_v46 }
  0xb1   : > { %1419 = vmatprep.subr.bf16.mxu1 %v2141_v47 }
  0xb3   : > { %1465 = vmatpush1.bf16.msra.mxu0 %v2055_v29 }
  0xb4   : > { %1477 = vmatprep.subr.bf16.mxu0 %v2062_v30  ;;  %1420 = vmatpush1.bf16.msra.mxu1 %v2143_v50 }
  0xb5   : > { %1421 = vmatprep.subr.bf16.mxu1 %v2147_v51 }
  0xb6   : > { %1467 = vmatmul.mubr.bf16.vlgmr.msra.gmra.mrb[0].mxu0 %v2057_v32 }
  0xb7   : > { %1478 = vmatpush1.bf16.msra.mxu0 %v2060_v34  ;;  %1509 = vmatprep.mubr.bf16.mxu0 %v2158_v40 }
  0xb8   : > { %1479 = vmatprep.subr.bf16.mxu0 %v2068_v35  ;;  %1422 = vmatpush1.bf16.msra.mxu1 %v2149_v54 }
  0xbb   : > { %1480 = vmatpush1.bf16.msra.mxu0 %v2066_v39  ;;  %1424 = vmatmul.mubr.bf16.vlgmr.msra.gmra.mrb[0].mxu1 %v2150_v57 }
  0xbc   : > { %1481 = vmatprep.subr.bf16.mxu0 %v2074_v41 }
  0xbf   : > { %1482 = vmatpush1.bf16.msra.mxu0 %v2072_v44 }
  0xc0   : > { %1483 = vmatprep.subr.bf16.mxu0 %v2080_v45 }
  0xc3   : > { %1484 = vmatpush1.bf16.msra.mxu0 %v2078_v48 }
  0xc4   : > { %1485 = vmatprep.subr.bf16.mxu0 %v2086_v49 }
  0xc7   : > { %1486 = vmatpush1.bf16.msra.mxu0 %v2084_v52 }
  0xc8   : > { %1487 = vmatprep.subr.bf16.mxu0 %v2092_v53 }
  0xcb   : > { %1488 = vmatpush1.bf16.msra.mxu0 %v2090_v55 }
  0xcc   : > { %1489 = vmatprep.subr.bf16.mxu0 %v2098_v56 }
  0xcf   : > { %1490 = vmatpush1.bf16.msra.mxu0 %v2096_v58 }
  0xd0   : > { %1491 = vmatprep.subr.bf16.mxu0 %v2104_v59 }
  0xd3   : > { %1492 = vmatpush1.bf16.msra.mxu0 %v2102_v60 }
  0xd4   : > { %1493 = vmatprep.subr.bf16.mxu0 %v2110_v61 }
  0xd7   : > { %1494 = vmatpush1.bf16.msra.mxu0 %v2108_v62 }
  0xd8   : > { %1495 = vmatprep.subr.bf16.mxu0 %v2116_v63 }
  0xdb   : > { %1496 = vmatpush1.bf16.msra.mxu0 %v2114_v0 }
  0xdc   : > { %1497 = vmatprep.subr.bf16.mxu0 %v2122_v1 }
  0xdf   : > { %1498 = vmatpush1.bf16.msra.mxu0 %v2120_v2 }
  0xe0   : > { %1499 = vmatprep.subr.bf16.mxu0 %v2128_v3 }
  0xe3   : > { %1500 = vmatpush1.bf16.msra.mxu0 %v2126_v4 }
  0xe4   : > { %1501 = vmatprep.subr.bf16.mxu0 %v2134_v5 }
  0xe7   : > { %1502 = vmatpush1.bf16.msra.mxu0 %v2132_v6 }
  0xe8   : > { %1503 = vmatprep.subr.bf16.mxu0 %v2140_v7 }
  0xeb   : > { %1504 = vmatpush1.bf16.msra.mxu0 %v2138_v8 }
  0xec   : > { %1505 = vmatprep.subr.bf16.mxu0 %v2146_v9 }
  0xef   : > { %1506 = vmatpush1.bf16.msra.mxu0 %v2144_v10 }
  0xf0   : > { %1507 = vmatprep.subr.bf16.mxu0 %v2155_v11 }
  0xf3   : > { %1508 = vmatpush1.bf16.msra.mxu0 %v2153_v12 }
  0xf6   : > { %1510 = vmatmul.mubr.bf16.vlgmr.msra.gmra.mrb[0].mxu0 %v2156_v13 }
 0x18e   : > { %v1425_v14 = vpop.f32.mrb[0].mxu1 }
 0x18f   : > { %v1427_v15 = vpop.f32.mrb[1].mxu1 }
 0x190   : > { %v1429_v16 = vpop.f32.mrb[2].mxu1 }
 0x191   : > { %v1431_v17 = vpop.f32.mrb[3].mxu1 }
 0x1c7   : > { %1523 = sbr.rel (%p1890_p5) target bundleno = 464 (0x1d0), region = 139 }
 0x1c9   : > { %v1511_v18 = vpop.f32.mrb[0].mxu0 }
 0x1ca   : > { %v1906_v19 = vadd.f32 %v1511_v18, %v1425_v14  ;;  %v1513_v20 = vpop.f32.mrb[1].mxu0 }
 0x1cb   : > { %v1907_v21 = vadd.f32 %v1513_v20, %v1427_v15  ;;  %v1515_v22 = vpop.f32.mrb[2].mxu0 }
 0x1cc   : > { %v1908_v23 = vadd.f32 %v1515_v22, %v1429_v16  ;;  %v1517_v24 = vpop.f32.mrb[3].mxu0  ;;  %1524 = vst [vmem:[#allocation2] sm:$0xff] (!%p1890_p5), %v1906_v19 }
 0x1cd   : > { %v1909_v25 = vadd.f32 %v1517_v24, %v1431_v17  ;;  %1525 = vst [vmem:[#allocation2 + $0x8] sm:$0xff] (!%p1890_p5), %v1907_v21 }
 0x1ce   : > { %1526 = vst [vmem:[#allocation2 + $0x10] sm:$0xff] %v1908_v23 }
 0x1cf   : > { %1527 = vst [vmem:[#allocation2 + $0x18] sm:$0xff] %v1909_v25 }
 0x1d0 PF: > { %p1891_p6 = scmp.le.s32.totalorder %s2229_s21, 0 }
 0x1d2   : > { %1531 = sbr.rel (%p1891_p6) target bundleno = 475 (0x1db), region = 143 }
 0x1d5   : > { %v1532_v26 = vld [vmem:[#allocation2] sm:$0xff] (!%p1891_p6) }
 0x1d6   : > { %v1533_v27 = vld [vmem:[#allocation2 + $0x8] sm:$0xff] (!%p1891_p6)  ;;  %v1536_v29 = vadd.f32 (!%p1891_p6), %v1906_v19, %v1532_v26  ;;  %v1535_v32 = vld [vmem:[#allocation2 + $0x18] sm:$0xff] (!%p1891_p6) }
 0x1d7   : > { %v1534_v28 = vld [vmem:[#allocation2 + $0x10] sm:$0xff] (!%p1891_p6)  ;;  %v1537_v30 = vadd.f32 (!%p1891_p6), %v1907_v21, %v1533_v27  ;;  %v1539_v33 = vadd.f32 (!%p1891_p6), %v1909_v25, %v1535_v32 }
 0x1d8   : > { %v1538_v31 = vadd.f32 (!%p1891_p6), %v1908_v23, %v1534_v28  ;;  %1540 = vst [vmem:[#allocation2] sm:$0xff] (!%p1891_p6), %v1536_v29 }
 0x1d9   : > { %1541 = vst [vmem:[#allocation2 + $0x8] sm:$0xff] %v1537_v30  ;;  %1543 = vst [vmem:[#allocation2 + $0x18] sm:$0xff] %v1539_v33 }
 0x1da   : > { %1542 = vst [vmem:[#allocation2 + $0x10] sm:$0xff] %v1538_v31 }
 0x1db PF: > { %p1892_p7 = scmp.ne.s32.totalorder %s2229_s21, 5 }
 0x1dc   : > { %v1554_v34 = vlaneseq (!%p1892_p7)  ;;  %v1568_v36 = vld [vmem:[%s732_s19] sm:$0xff] (!%p1892_p7)  ;;  %v1569_v38 = vld [vmem:[%s732_s19 + $0x8] sm:$0xff] (!%p1892_p7) }
 0x1dd   : > { %1547 = sbr.rel (%p1892_p7) target bundleno = 493 (0x1ed), region = 147  ;;  %v1552_v37 = vld [vmem:[%s773_s27] sm:$0x3] (!%p1892_p7)  ;;  %v1570_v43 = vunpack.c.l.bf16 (!%p1892_p7), %v1568_v36  ;;  %v1571_v44 = vunpack.c.h.bf16 (!%p1892_p7), %v1568_v36  ;;  %v1572_v49 = vunpack.c.l.bf16 (!%p1892_p7), %v1569_v38  ;;  %v1573_v50 = vunpack.c.h.bf16 (!%p1892_p7), %v1569_v38 }
 0x1de   : > { %v1555_v35 = vshrl.u32 (!%p1892_p7), %v1554_v34, 7 }
 0x1e0   : > { %v1556_v40 = vsub.s32 (!%p1892_p7), 0, %v1555_v35  ;;  %v1560_v41 = vsub.s32 (!%p1892_p7), 1, %v1555_v35 }
 0x1e1   : > { %v1548_v39 = vld [vmem:[#allocation2] sm:$0xff] (!%p1892_p7)  ;;  %v1550_v45 = vld [vmem:[#allocation2 + $0x10] sm:$0xff] (!%p1892_p7) }
 0x1e2   : > { %v1549_v42 = vld [vmem:[#allocation2 + $0x8] sm:$0xff] (!%p1892_p7)  ;;  %v1551_v46 = vld [vmem:[#allocation2 + $0x18] sm:$0xff] (!%p1892_p7)  ;;  %v1557_v47 = vrot.slane (!%p1892_p7), %v1552_v37, %v1556_v40  ;;  %v1561_v48 = vrot.slane (!%p1892_p7), %v1552_v37, %v1560_v41 }
 0x1e4   : > { %v1564_v51 = vadd.f32 %v1557_v47, %v1548_v39  ;;  %v1565_v52 = vadd.f32 %v1561_v48, %v1549_v42  ;;  %v1566_v53 = vadd.f32 %v1557_v47, %v1550_v45  ;;  %v1567_v54 = vadd.f32 %v1561_v48, %v1551_v46 }
 0x1e6   : > { %v1574_v55 = vadd.f32 %v1570_v43, %v1564_v51  ;;  %v1575_v56 = vadd.f32 %v1571_v44, %v1565_v52  ;;  %v1576_v57 = vadd.f32 %v1572_v49, %v1566_v53  ;;  %v1577_v58 = vadd.f32 %v1573_v50, %v1567_v54 }
 0x1e8   : > { %v1578_v59 = vmax.f32 %v1574_v55, 0.0  ;;  %v1579_v60 = vmax.f32 %v1575_v56, 0.0  ;;  %v1580_v61 = vmax.f32 %v1576_v57, 0.0  ;;  %v1581_v62 = vmax.f32 %v1577_v58, 0.0 }
 0x1ea   : > { %v1903_v63 = vpack.c.bf16 %v1579_v60, %v1578_v59  ;;  %v1904_v0 = vpack.c.bf16 %v1581_v62, %v1580_v61 }
 0x1ec   : > { %1594 = vst [vmem:[%s2721_s6] sm:$0xff] %v1903_v63  ;;  %1595 = vst [vmem:[%s2721_s6 + $0x8] sm:$0xff] %v1904_v0 }
 0x1ed PF: > { %1602 = sbr.rel (!%p2376_p13) target bundleno = 501 (0x1f5), region = 151  ;;  %s1905_s21 = sshll.u32 (%p2376_p13), %s2233_s22, 3 }
 0x1ee   : > { %s1608_s28 = scalar_lea.vmem (%p2376_p13), %s2782_s4, %s1905_s21 }
 0x1f3   : > { %v1638_v1 = vld [vmem:[%s2721_s6] sm:$0xff] (%p2376_p13)  ;;  %v1640_v2 = vld [vmem:[%s2721_s6 + $0x8] sm:$0xff] (%p2376_p13) }
 0x1f4   : > { %1639 = vst [vmem:[%s1608_s28] sm:$0xff] %v1638_v1  ;;  %1641 = vst [vmem:[%s1608_s28 + $0x10] sm:$0xff] %v1640_v2 }
 0x1f5 PF: > { %s14_s25 = sadd.s32 1, %s2245_s25   ;;  %s2793_s29 = sld [smem:[#allocation7_spill]] }
 0x1f6   : > { %p11_p8 = scmp.ge.s32.totalorder %s14_s25, 14   ;;  %s2794_s10 = sld [smem:[#allocation8_spill]] }
 0x1f7   : > { %s2795_s15 = smov %s2209_s16  ;;  %s2796_s16 = smov %s2368_s13 }
 0x1f8   : > { %s2797_s17 = smov %s2217_s18  ;;  %s2798_s18 = smov %s2365_s12 }
 0x1f9   : > { %s2799_s19 = smov %s2225_s20  ;;  %s2800_s20 = smov %s2349_s7 }
 0x1fa   : > { %s2801_s21 = smov %s2237_s23  ;;  %s2802_s22 = smov %s2241_s24 }
 0x1fb   : > { %s2803_s23 = smov %s2793_s29  ;;  %13 = sbr.rel (!%p11_p8) target bundleno = 8 (0x8), region = 239 }
 0x1fc   : > { %s2804_s24 = smov %s2794_s10 }

// kernel: _lambda_.41
= control target key start
LH: loop header
LB: loop body
LE: loop exit
PB: predicated region body
PF: predicated region fallthrough
CT: control target
= control target key end

     0   :  { %s2622_s0 = inlined_call_operand.vmem [shape: bf16[16,4608], index: 0, kind: input, shape index: {}]   ;;  %s2623_s1 = inlined_call_operand.vmem [shape: bf16[4608,512], index: 1, kind: input, shape index: {}]   ;;  %s2624_s2 = inlined_call_operand.vmem [shape: f32[1,512], index: 2, kind: input, shape index: {}]   ;;  %s2625_s3 = inlined_call_operand.vmem [shape: bf16[16,512], index: 3, kind: output, shape index: {}]  }
   0x1   :  { %2626 = sst [smem:[#allocation6_spill]] %s2622_s0 }
   0x2   :  { %s2138_s12 = smov 0   ;;  %s2140_s13 = smov 0  }
   0x3   :  { %s2142_s14 = smov 0   ;;  %s2144_s15 = smov 0  }
   0x4   :  { %s2146_s16 = smov 0   ;;  %s2148_s17 = smov 0  }
   0x5   :  { %s2150_s18 = smov 0   ;;  %s2152_s19 = smov 0  }
   0x6   :  { %s2154_s20 = smov 0   ;;  %s2156_s21 = smov 0  }
   0x7   :  { %s2158_s22 = smov 0  }
   0x8 LB: > { %s1649_s23 = sadd.s32 4294967295, %s2116_s22   ;;  %s25_s24 = sadd.s32 1, %s2108_s20  ;;  %s2116_s22 = sphi %s2158_s22, %s13_s22   ;;  %s2112_s21 = sphi %s2156_s21, %s2640_s21   ;;  %s2108_s20 = sphi %s2154_s20, %s2639_s20   ;;  %s2104_s19 = sphi %s2152_s19, %s2638_s19   ;;  %s2100_s18 = sphi %s2150_s18, %s2637_s18   ;;  %s2096_s17 = sphi %s2148_s17, %s2636_s17   ;;  %s2092_s16 = sphi %s2146_s16, %s2635_s16   ;;  %s2088_s15 = sphi %s2144_s15, %s2634_s15   ;;  %s2084_s14 = sphi %s2142_s14, %s2633_s14   ;;  %s2080_s13 = sphi %s2140_s13, %s2632_s13   ;;  %s2076_s12 = sphi %s2138_s12, %s2631_s12  }
   0x9   : > { %p26_p0 = scmp.ge.s32.totalorder %s25_s24, 6  ;;  %s28_s25 = sadd.s32 1, %s2112_s21 }
   0xa   : > { %s41_s26 = sadd.s32 1, %s2096_s17  ;;  %p48_p1 = scmp.ne.s32.totalorder %s2096_s17, %s2092_s16 }
   0xb   : > { %s2642_s24 = smov (%p26_p0, %s25_s24), 0  ;;  %s2644_s25 = smov (!%p26_p0, %s28_s25), %s2112_s21 }
   0xc   : > { %s37_s27 = ssub.s32 %s2108_s20, %s2642_s24  ;;  %p49_p2 = scmp.eq.s32.totalorder %s2116_s22, 0 }
   0xd   : > { %p30_p3 = scmp.ge.s32.totalorder %s2644_s25, 2  ;;  %p39_p4 = scmp.eq.s32.totalorder %s37_s27, 0 }
   0xe   : > { %p2205_p5 = por %p49_p2, %p48_p1  ;;  %s69_s29 = sadd.s32 1, %s2088_s15 }
   0xf   : > { %s2646_s25 = smov (%p30_p3, %s2644_s25), 0  ;;  %p76_p6 = scmp.ne.s32.totalorder %s2088_s15, %s2084_s14 }
  0x10   : > { %s2213_s30 = scalar_select %p39_p4, %s2096_s17, %s41_s26  }
  0x11   : > { %s65_s4 = ssub.s32 %s2112_s21, %s2646_s25  ;;  %p2219_p9 = por %p76_p6, %p49_p2 }
  0x12   : > { %s66_s5 = sor.u32 %s65_s4, %s37_s27  ;;  %p121_p7 = scmp.eq.s32.totalorder %s65_s4, 0 }
  0x13   : > { %p67_p8 = scmp.eq.s32.totalorder %s66_s5, 0  ;;  %s123_s7 = sadd.s32 1, %s2080_s13 }
  0x14   : > { %p133_p10 = scmp.ne.s32.totalorder %s2080_s13, %s2076_s12  ;;  %p134_p11 = scmp.eq.s32.totalorder %s1649_s23, 11 }
  0x15   : > { %s2227_s8 = scalar_select %p67_p8, %s2088_s15, %s69_s29  }
  0x16   : > { %s2230_s9 = scalar_select %p121_p7, %s2080_s13, %s123_s7  }
  0x17   : > { %p2232_p12 = por %p134_p11, %p133_p10  ;;  %p1652_p13 = scmp.ge.s32.totalorder %s2116_s22, 12 }
  0x19   : > { %156 = sbr.rel (%p1652_p13) target bundleno = 100 (0x64), region = 16 }
  0x20   : > { %159 = sbr.rel (!%p2205_p5) target bundleno = 44 (0x2c), region = 20  ;;  %s161_s11 = sand.u32 (%p2205_p5), 1, %s2096_s17  }
  0x21   : > { %s1772_s26 = smul.u32 (%p2205_p5), 24, %s2108_s20  ;;  %s2630_s0 = sld [smem:[#allocation6_spill]] (%p2205_p5) }
  0x22   : > { %s1785_s27 = smul.u32 (%p2205_p5), 48, %s161_s11 }
  0x24   : > { %s163_s23 = scalar_lea.vmem (%p2205_p5), [#allocation3], %s1785_s27 }
  0x27   : > { %s169_s5 = scalar_lea.vmem %s2630_s0, %s1772_s26 }
  0x28   : > { %v182_v0 = vld [vmem:[%s169_s5] sm:$0xff]  ;;  %v184_v1 = vld [vmem:[%s169_s5 + $0x8] sm:$0xff]  ;;  %v186_v2 = vld [vmem:[%s169_s5 + $0x10] sm:$0xff] }
  0x29   : > { %183 = vst [vmem:[%s163_s23] sm:$0xff] %v182_v0  ;;  %185 = vst [vmem:[%s163_s23 + $0x8] sm:$0xff] %v184_v1  ;;  %v188_v3 = vld [vmem:[%s169_s5 + $0x90] sm:$0xff]  ;;  %v190_v4 = vld [vmem:[%s169_s5 + $0x98] sm:$0xff] }
  0x2a   : > { %187 = vst [vmem:[%s163_s23 + $0x10] sm:$0xff] %v186_v2  ;;  %v192_v5 = vld [vmem:[%s169_s5 + $0xa0] sm:$0xff]  ;;  %189 = vst [vmem:[%s163_s23 + $0x18] sm:$0xff] %v188_v3 }
  0x2b   : > { %191 = vst [vmem:[%s163_s23 + $0x20] sm:$0xff] %v190_v4  ;;  %193 = vst [vmem:[%s163_s23 + $0x28] sm:$0xff] %v192_v5 }
  0x2c PF: > { %199 = sbr.rel (!%p2219_p9) target bundleno = 100 (0x64), region = 43  ;;  %s201_s28 = sand.u32 (%p2219_p9), 1, %s2088_s15  }
  0x2d   : > { %s1786_s7 = smul.u32 (%p2219_p9), 768, %s201_s28  ;;  %s1654_s11 = sshll.u32 (%p2219_p9), %s2112_s21, 1 }
  0x2e   : > { %s1773_s26 = smul.u32 (%p2219_p9), 384, %s2108_s20 }
  0x2f   : > { %s2257_s6 = scalar_lea.vmem (%p2219_p9), [#allocation4], %s1786_s7 }
  0x30   : > { %s207_s27 = sadd.s32 (%p2219_p9), %s1773_s26, %s1654_s11 }
  0x31   : > { %s1656_s29 = sshll.u32 (%p2219_p9), %s207_s27, 2 }
  0x32   : > { %s2252_s5 = scalar_lea.vmem (%p2219_p9), %s2623_s1, %s1656_s29 }
  0x33   : > { %v427_v6 = vld [vmem:[%s2252_s5] sm:$0xff]  ;;  %v429_v7 = vld [vmem:[%s2252_s5 + $0x10] sm:$0xff] }
  0x34   : > { %v431_v8 = vld [vmem:[%s2252_s5 + $0x20] sm:$0xff]  ;;  %428 = vst [vmem:[%s2257_s6] sm:$0xff] %v427_v6  ;;  %430 = vst [vmem:[%s2257_s6 + $0x8] sm:$0xff] %v429_v7  ;;  %v433_v9 = vld [vmem:[%s2252_s5 + $0x30] sm:$0xff] }
  0x35   : > { %432 = vst [vmem:[%s2257_s6 + $0x10] sm:$0xff] %v431_v8  ;;  %v435_v10 = vld [vmem:[%s2252_s5 + $0x40] sm:$0xff]  ;;  %v437_v11 = vld [vmem:[%s2252_s5 + $0x50] sm:$0xff]  ;;  %434 = vst [vmem:[%s2257_s6 + $0x18] sm:$0xff] %v433_v9 }
  0x36   : > { %436 = vst [vmem:[%s2257_s6 + $0x20] sm:$0xff] %v435_v10  ;;  %438 = vst [vmem:[%s2257_s6 + $0x28] sm:$0xff] %v437_v11  ;;  %v439_v12 = vld [vmem:[%s2252_s5 + $0x60] sm:$0xff]  ;;  %v441_v13 = vld [vmem:[%s2252_s5 + $0x70] sm:$0xff] }
  0x37   : > { %v443_v14 = vld [vmem:[%s2252_s5 + $0x80] sm:$0xff]  ;;  %440 = vst [vmem:[%s2257_s6 + $0x30] sm:$0xff] %v439_v12  ;;  %442 = vst [vmem:[%s2257_s6 + $0x38] sm:$0xff] %v441_v13  ;;  %v445_v15 = vld [vmem:[%s2252_s5 + $0x90] sm:$0xff] }
  0x38   : > { %444 = vst [vmem:[%s2257_s6 + $0x40] sm:$0xff] %v443_v14  ;;  %v447_v16 = vld [vmem:[%s2252_s5 + $0xa0] sm:$0xff]  ;;  %v449_v17 = vld [vmem:[%s2252_s5 + $0xb0] sm:$0xff]  ;;  %446 = vst [vmem:[%s2257_s6 + $0x48] sm:$0xff] %v445_v15 }
  0x39   : > { %448 = vst [vmem:[%s2257_s6 + $0x50] sm:$0xff] %v447_v16  ;;  %450 = vst [vmem:[%s2257_s6 + $0x58] sm:$0xff] %v449_v17  ;;  %v451_v18 = vld [vmem:[%s2252_s5 + $0xc0] sm:$0xff]  ;;  %v453_v19 = vld [vmem:[%s2252_s5 + $0xd0] sm:$0xff] }
  0x3a   : > { %v455_v20 = vld [vmem:[%s2252_s5 + $0xe0] sm:$0xff]  ;;  %452 = vst [vmem:[%s2257_s6 + $0x60] sm:$0xff] %v451_v18  ;;  %454 = vst [vmem:[%s2257_s6 + $0x68] sm:$0xff] %v453_v19  ;;  %v457_v21 = vld [vmem:[%s2252_s5 + $0xf0] sm:$0xff] }
  0x3b   : > { %456 = vst [vmem:[%s2257_s6 + $0x70] sm:$0xff] %v455_v20  ;;  %v459_v22 = vld [vmem:[%s2252_s5 + $0x100] sm:$0xff]  ;;  %v461_v23 = vld [vmem:[%s2252_s5 + $0x110] sm:$0xff]  ;;  %458 = vst [vmem:[%s2257_s6 + $0x78] sm:$0xff] %v457_v21 }
  0x3c   : > { %460 = vst [vmem:[%s2257_s6 + $0x80] sm:$0xff] %v459_v22  ;;  %462 = vst [vmem:[%s2257_s6 + $0x88] sm:$0xff] %v461_v23  ;;  %v463_v24 = vld [vmem:[%s2252_s5 + $0x120] sm:$0xff]  ;;  %v465_v25 = vld [vmem:[%s2252_s5 + $0x130] sm:$0xff] }
  0x3d   : > { %v467_v26 = vld [vmem:[%s2252_s5 + $0x140] sm:$0xff]  ;;  %464 = vst [vmem:[%s2257_s6 + $0x90] sm:$0xff] %v463_v24  ;;  %466 = vst [vmem:[%s2257_s6 + $0x98] sm:$0xff] %v465_v25  ;;  %v469_v27 = vld [vmem:[%s2252_s5 + $0x150] sm:$0xff] }
  0x3e   : > { %468 = vst [vmem:[%s2257_s6 + $0xa0] sm:$0xff] %v467_v26  ;;  %v471_v28 = vld [vmem:[%s2252_s5 + $0x160] sm:$0xff]  ;;  %v473_v29 = vld [vmem:[%s2252_s5 + $0x170] sm:$0xff]  ;;  %470 = vst [vmem:[%s2257_s6 + $0xa8] sm:$0xff] %v469_v27 }
  0x3f   : > { %472 = vst [vmem:[%s2257_s6 + $0xb0] sm:$0xff] %v471_v28  ;;  %474 = vst [vmem:[%s2257_s6 + $0xb8] sm:$0xff] %v473_v29  ;;  %v475_v30 = vld [vmem:[%s2252_s5 + $0x180] sm:$0xff]  ;;  %v477_v31 = vld [vmem:[%s2252_s5 + $0x190] sm:$0xff] }
  0x40   : > { %v479_v32 = vld [vmem:[%s2252_s5 + $0x1a0] sm:$0xff]  ;;  %476 = vst [vmem:[%s2257_s6 + $0xc0] sm:$0xff] %v475_v30  ;;  %478 = vst [vmem:[%s2257_s6 + $0xc8] sm:$0xff] %v477_v31  ;;  %v481_v33 = vld [vmem:[%s2252_s5 + $0x1b0] sm:$0xff] }
  0x41   : > { %480 = vst [vmem:[%s2257_s6 + $0xd0] sm:$0xff] %v479_v32  ;;  %v483_v34 = vld [vmem:[%s2252_s5 + $0x1c0] sm:$0xff]  ;;  %v485_v35 = vld [vmem:[%s2252_s5 + $0x1d0] sm:$0xff]  ;;  %482 = vst [vmem:[%s2257_s6 + $0xd8] sm:$0xff] %v481_v33 }
  0x42   : > { %484 = vst [vmem:[%s2257_s6 + $0xe0] sm:$0xff] %v483_v34  ;;  %486 = vst [vmem:[%s2257_s6 + $0xe8] sm:$0xff] %v485_v35  ;;  %v487_v36 = vld [vmem:[%s2252_s5 + $0x1e0] sm:$0xff]  ;;  %v489_v37 = vld [vmem:[%s2252_s5 + $0x1f0] sm:$0xff] }
  0x43   : > { %v491_v38 = vld [vmem:[%s2252_s5 + $0x200] sm:$0xff]  ;;  %488 = vst [vmem:[%s2257_s6 + $0xf0] sm:$0xff] %v487_v36  ;;  %490 = vst [vmem:[%s2257_s6 + $0xf8] sm:$0xff] %v489_v37  ;;  %v493_v39 = vld [vmem:[%s2252_s5 + $0x210] sm:$0xff] }
  0x44   : > { %492 = vst [vmem:[%s2257_s6 + $0x100] sm:$0xff] %v491_v38  ;;  %v495_v40 = vld [vmem:[%s2252_s5 + $0x220] sm:$0xff]  ;;  %v497_v41 = vld [vmem:[%s2252_s5 + $0x230] sm:$0xff]  ;;  %494 = vst [vmem:[%s2257_s6 + $0x108] sm:$0xff] %v493_v39 }
  0x45   : > { %496 = vst [vmem:[%s2257_s6 + $0x110] sm:$0xff] %v495_v40  ;;  %498 = vst [vmem:[%s2257_s6 + $0x118] sm:$0xff] %v497_v41  ;;  %v499_v42 = vld [vmem:[%s2252_s5 + $0x240] sm:$0xff]  ;;  %v501_v43 = vld [vmem:[%s2252_s5 + $0x250] sm:$0xff] }
  0x46   : > { %v503_v44 = vld [vmem:[%s2252_s5 + $0x260] sm:$0xff]  ;;  %500 = vst [vmem:[%s2257_s6 + $0x120] sm:$0xff] %v499_v42  ;;  %502 = vst [vmem:[%s2257_s6 + $0x128] sm:$0xff] %v501_v43  ;;  %v505_v45 = vld [vmem:[%s2252_s5 + $0x270] sm:$0xff] }
  0x47   : > { %504 = vst [vmem:[%s2257_s6 + $0x130] sm:$0xff] %v503_v44  ;;  %v507_v46 = vld [vmem:[%s2252_s5 + $0x280] sm:$0xff]  ;;  %v509_v47 = vld [vmem:[%s2252_s5 + $0x290] sm:$0xff]  ;;  %506 = vst [vmem:[%s2257_s6 + $0x138] sm:$0xff] %v505_v45 }
  0x48   : > { %508 = vst [vmem:[%s2257_s6 + $0x140] sm:$0xff] %v507_v46  ;;  %510 = vst [vmem:[%s2257_s6 + $0x148] sm:$0xff] %v509_v47  ;;  %v511_v48 = vld [vmem:[%s2252_s5 + $0x2a0] sm:$0xff]  ;;  %v513_v49 = vld [vmem:[%s2252_s5 + $0x2b0] sm:$0xff] }
  0x49   : > { %v515_v50 = vld [vmem:[%s2252_s5 + $0x2c0] sm:$0xff]  ;;  %512 = vst [vmem:[%s2257_s6 + $0x150] sm:$0xff] %v511_v48  ;;  %514 = vst [vmem:[%s2257_s6 + $0x158] sm:$0xff] %v513_v49  ;;  %v517_v51 = vld [vmem:[%s2252_s5 + $0x2d0] sm:$0xff] }
  0x4a   : > { %516 = vst [vmem:[%s2257_s6 + $0x160] sm:$0xff] %v515_v50  ;;  %v519_v52 = vld [vmem:[%s2252_s5 + $0x2e0] sm:$0xff]  ;;  %v521_v53 = vld [vmem:[%s2252_s5 + $0x2f0] sm:$0xff]  ;;  %518 = vst [vmem:[%s2257_s6 + $0x168] sm:$0xff] %v517_v51 }
  0x4b   : > { %520 = vst [vmem:[%s2257_s6 + $0x170] sm:$0xff] %v519_v52  ;;  %522 = vst [vmem:[%s2257_s6 + $0x178] sm:$0xff] %v521_v53  ;;  %v523_v54 = vld [vmem:[%s2252_s5 + $0x300] sm:$0xff]  ;;  %v525_v55 = vld [vmem:[%s2252_s5 + $0x310] sm:$0xff] }
  0x4c   : > { %v527_v56 = vld [vmem:[%s2252_s5 + $0x320] sm:$0xff]  ;;  %524 = vst [vmem:[%s2257_s6 + $0x180] sm:$0xff] %v523_v54  ;;  %526 = vst [vmem:[%s2257_s6 + $0x188] sm:$0xff] %v525_v55  ;;  %v529_v57 = vld [vmem:[%s2252_s5 + $0x330] sm:$0xff] }
  0x4d   : > { %528 = vst [vmem:[%s2257_s6 + $0x190] sm:$0xff] %v527_v56  ;;  %v531_v58 = vld [vmem:[%s2252_s5 + $0x340] sm:$0xff]  ;;  %v533_v59 = vld [vmem:[%s2252_s5 + $0x350] sm:$0xff]  ;;  %530 = vst [vmem:[%s2257_s6 + $0x198] sm:$0xff] %v529_v57 }
  0x4e   : > { %532 = vst [vmem:[%s2257_s6 + $0x1a0] sm:$0xff] %v531_v58  ;;  %534 = vst [vmem:[%s2257_s6 + $0x1a8] sm:$0xff] %v533_v59  ;;  %v535_v60 = vld [vmem:[%s2252_s5 + $0x360] sm:$0xff]  ;;  %v537_v61 = vld [vmem:[%s2252_s5 + $0x370] sm:$0xff] }
  0x4f   : > { %v539_v62 = vld [vmem:[%s2252_s5 + $0x380] sm:$0xff]  ;;  %536 = vst [vmem:[%s2257_s6 + $0x1b0] sm:$0xff] %v535_v60  ;;  %538 = vst [vmem:[%s2257_s6 + $0x1b8] sm:$0xff] %v537_v61  ;;  %v541_v63 = vld [vmem:[%s2252_s5 + $0x390] sm:$0xff] }
  0x50   : > { %540 = vst [vmem:[%s2257_s6 + $0x1c0] sm:$0xff] %v539_v62  ;;  %v543_v0 = vld [vmem:[%s2252_s5 + $0x3a0] sm:$0xff]  ;;  %v545_v1 = vld [vmem:[%s2252_s5 + $0x3b0] sm:$0xff]  ;;  %542 = vst [vmem:[%s2257_s6 + $0x1c8] sm:$0xff] %v541_v63 }
  0x51   : > { %544 = vst [vmem:[%s2257_s6 + $0x1d0] sm:$0xff] %v543_v0  ;;  %546 = vst [vmem:[%s2257_s6 + $0x1d8] sm:$0xff] %v545_v1  ;;  %v547_v2 = vld [vmem:[%s2252_s5 + $0x3c0] sm:$0xff]  ;;  %v549_v3 = vld [vmem:[%s2252_s5 + $0x3d0] sm:$0xff] }
  0x52   : > { %v551_v4 = vld [vmem:[%s2252_s5 + $0x3e0] sm:$0xff]  ;;  %548 = vst [vmem:[%s2257_s6 + $0x1e0] sm:$0xff] %v547_v2  ;;  %550 = vst [vmem:[%s2257_s6 + $0x1e8] sm:$0xff] %v549_v3  ;;  %v553_v5 = vld [vmem:[%s2252_s5 + $0x3f0] sm:$0xff] }
  0x53   : > { %552 = vst [vmem:[%s2257_s6 + $0x1f0] sm:$0xff] %v551_v4  ;;  %v555_v6 = vld [vmem:[%s2252_s5 + $0x400] sm:$0xff]  ;;  %v557_v7 = vld [vmem:[%s2252_s5 + $0x410] sm:$0xff]  ;;  %554 = vst [vmem:[%s2257_s6 + $0x1f8] sm:$0xff] %v553_v5 }
  0x54   : > { %556 = vst [vmem:[%s2257_s6 + $0x200] sm:$0xff] %v555_v6  ;;  %558 = vst [vmem:[%s2257_s6 + $0x208] sm:$0xff] %v557_v7  ;;  %v559_v8 = vld [vmem:[%s2252_s5 + $0x420] sm:$0xff]  ;;  %v561_v9 = vld [vmem:[%s2252_s5 + $0x430] sm:$0xff] }
  0x55   : > { %v563_v10 = vld [vmem:[%s2252_s5 + $0x440] sm:$0xff]  ;;  %560 = vst [vmem:[%s2257_s6 + $0x210] sm:$0xff] %v559_v8  ;;  %562 = vst [vmem:[%s2257_s6 + $0x218] sm:$0xff] %v561_v9  ;;  %v565_v11 = vld [vmem:[%s2252_s5 + $0x450] sm:$0xff] }
  0x56   : > { %564 = vst [vmem:[%s2257_s6 + $0x220] sm:$0xff] %v563_v10  ;;  %v567_v12 = vld [vmem:[%s2252_s5 + $0x460] sm:$0xff]  ;;  %v569_v13 = vld [vmem:[%s2252_s5 + $0x470] sm:$0xff]  ;;  %566 = vst [vmem:[%s2257_s6 + $0x228] sm:$0xff] %v565_v11 }
  0x57   : > { %568 = vst [vmem:[%s2257_s6 + $0x230] sm:$0xff] %v567_v12  ;;  %570 = vst [vmem:[%s2257_s6 + $0x238] sm:$0xff] %v569_v13  ;;  %v571_v14 = vld [vmem:[%s2252_s5 + $0x480] sm:$0xff]  ;;  %v573_v15 = vld [vmem:[%s2252_s5 + $0x490] sm:$0xff] }
  0x58   : > { %v575_v16 = vld [vmem:[%s2252_s5 + $0x4a0] sm:$0xff]  ;;  %572 = vst [vmem:[%s2257_s6 + $0x240] sm:$0xff] %v571_v14  ;;  %574 = vst [vmem:[%s2257_s6 + $0x248] sm:$0xff] %v573_v15  ;;  %v577_v17 = vld [vmem:[%s2252_s5 + $0x4b0] sm:$0xff] }
  0x59   : > { %576 = vst [vmem:[%s2257_s6 + $0x250] sm:$0xff] %v575_v16  ;;  %v579_v18 = vld [vmem:[%s2252_s5 + $0x4c0] sm:$0xff]  ;;  %v581_v19 = vld [vmem:[%s2252_s5 + $0x4d0] sm:$0xff]  ;;  %578 = vst [vmem:[%s2257_s6 + $0x258] sm:$0xff] %v577_v17 }
  0x5a   : > { %580 = vst [vmem:[%s2257_s6 + $0x260] sm:$0xff] %v579_v18  ;;  %582 = vst [vmem:[%s2257_s6 + $0x268] sm:$0xff] %v581_v19  ;;  %v583_v20 = vld [vmem:[%s2252_s5 + $0x4e0] sm:$0xff]  ;;  %v585_v21 = vld [vmem:[%s2252_s5 + $0x4f0] sm:$0xff] }
  0x5b   : > { %v587_v22 = vld [vmem:[%s2252_s5 + $0x500] sm:$0xff]  ;;  %584 = vst [vmem:[%s2257_s6 + $0x270] sm:$0xff] %v583_v20  ;;  %586 = vst [vmem:[%s2257_s6 + $0x278] sm:$0xff] %v585_v21  ;;  %v589_v23 = vld [vmem:[%s2252_s5 + $0x510] sm:$0xff] }
  0x5c   : > { %588 = vst [vmem:[%s2257_s6 + $0x280] sm:$0xff] %v587_v22  ;;  %v591_v24 = vld [vmem:[%s2252_s5 + $0x520] sm:$0xff]  ;;  %v593_v25 = vld [vmem:[%s2252_s5 + $0x530] sm:$0xff]  ;;  %590 = vst [vmem:[%s2257_s6 + $0x288] sm:$0xff] %v589_v23 }
  0x5d   : > { %592 = vst [vmem:[%s2257_s6 + $0x290] sm:$0xff] %v591_v24  ;;  %594 = vst [vmem:[%s2257_s6 + $0x298] sm:$0xff] %v593_v25  ;;  %v595_v26 = vld [vmem:[%s2252_s5 + $0x540] sm:$0xff]  ;;  %v597_v27 = vld [vmem:[%s2252_s5 + $0x550] sm:$0xff] }
  0x5e   : > { %v599_v28 = vld [vmem:[%s2252_s5 + $0x560] sm:$0xff]  ;;  %596 = vst [vmem:[%s2257_s6 + $0x2a0] sm:$0xff] %v595_v26  ;;  %598 = vst [vmem:[%s2257_s6 + $0x2a8] sm:$0xff] %v597_v27  ;;  %v601_v29 = vld [vmem:[%s2252_s5 + $0x570] sm:$0xff] }
  0x5f   : > { %600 = vst [vmem:[%s2257_s6 + $0x2b0] sm:$0xff] %v599_v28  ;;  %v603_v30 = vld [vmem:[%s2252_s5 + $0x580] sm:$0xff]  ;;  %v605_v31 = vld [vmem:[%s2252_s5 + $0x590] sm:$0xff]  ;;  %602 = vst [vmem:[%s2257_s6 + $0x2b8] sm:$0xff] %v601_v29 }
  0x60   : > { %604 = vst [vmem:[%s2257_s6 + $0x2c0] sm:$0xff] %v603_v30  ;;  %606 = vst [vmem:[%s2257_s6 + $0x2c8] sm:$0xff] %v605_v31  ;;  %v607_v32 = vld [vmem:[%s2252_s5 + $0x5a0] sm:$0xff]  ;;  %v609_v33 = vld [vmem:[%s2252_s5 + $0x5b0] sm:$0xff] }
  0x61   : > { %v611_v34 = vld [vmem:[%s2252_s5 + $0x5c0] sm:$0xff]  ;;  %608 = vst [vmem:[%s2257_s6 + $0x2d0] sm:$0xff] %v607_v32  ;;  %610 = vst [vmem:[%s2257_s6 + $0x2d8] sm:$0xff] %v609_v33  ;;  %v613_v35 = vld [vmem:[%s2252_s5 + $0x5d0] sm:$0xff] }
  0x62   : > { %612 = vst [vmem:[%s2257_s6 + $0x2e0] sm:$0xff] %v611_v34  ;;  %v615_v36 = vld [vmem:[%s2252_s5 + $0x5e0] sm:$0xff]  ;;  %v617_v37 = vld [vmem:[%s2252_s5 + $0x5f0] sm:$0xff]  ;;  %614 = vst [vmem:[%s2257_s6 + $0x2e8] sm:$0xff] %v613_v35 }
  0x63   : > { %616 = vst [vmem:[%s2257_s6 + $0x2f0] sm:$0xff] %v615_v36  ;;  %618 = vst [vmem:[%s2257_s6 + $0x2f8] sm:$0xff] %v617_v37 }
  0x64 PF: > { %p1657_p0 = scmp.ge.s32.totalorder %s2116_s22, 1  ;;  %p631_p1 = scmp.lt.s32.totalorder %s2116_s22, 13 }
  0x66   : > { %p632_p2 = pnand %p1657_p0, %p631_p1 }
  0x67   : > { %s645_s0 = sand.u32 (!%p632_p2), 1, %s2084_s14   ;;  %s672_s23 = sand.u32 (!%p632_p2), 1, %s2076_s12  }
  0x68   : > { %635 = sbr.rel (%p632_p2) target bundleno = 490 (0x1ea), region = 85  ;;  %s2452_s7 = sshll.u32 (!%p632_p2), %s672_s23, 4 }
  0x69   : > { %s1788_s28 = smul.u32 (!%p632_p2), 768, %s645_s0  ;;  %s1659_s11 = sshll.u32 (!%p632_p2), %s2104_s19, 1 }
  0x6a   : > { %p680_p3 = scmp.lt.s32.totalorder (!%p632_p2), %s1659_s11, 3  ;;  %s638_s29 = sand.u32 (!%p632_p2), 1, %s2092_s16  }
  0x6b   : > { %s2455_s26 = scalar_lea.vmem (!%p632_p2), [#allocation4], %s1788_s28  ;;  %s1787_s4 = smul.u32 (!%p632_p2), 48, %s638_s29 }
  0x6c   : > { %v1877_v38 = vld [vmem:[%s2455_s26 + $0x104] ss:$8 sps:$4 sm:$0xff] (!%p632_p2)   ;;  %v1879_v39 = vld [vmem:[%s2455_s26 + $0x100] ss:$8 sps:$4 sm:$0xff] (!%p632_p2)   ;;  %v1880_v40 = vld [vmem:[%s2455_s26 + $0x114] ss:$8 sps:$4 sm:$0xff] (!%p632_p2)  }
  0x6d   : > { %1341 = vmatprep.subr.bf16.mxu0 (!%p632_p2), %v1877_v38  ;;  %v1882_v41 = vld [vmem:[%s2455_s26 + $0x110] ss:$8 sps:$4 sm:$0xff] (!%p632_p2)   ;;  %v1883_v42 = vld [vmem:[%s2455_s26 + $0x124] ss:$8 sps:$4 sm:$0xff] (!%p632_p2)   ;;  %v1885_v43 = vld [vmem:[%s2455_s26 + $0x120] ss:$8 sps:$4 sm:$0xff] (!%p632_p2)  }
  0x6e   : > { %1342 = vmatpush1.bf16.msra.mxu0 (!%p632_p2), %v1879_v39  ;;  %v1886_v44 = vld [vmem:[%s2455_s26 + $0x134] ss:$8 sps:$4 sm:$0xff] (!%p632_p2)   ;;  %v1888_v45 = vld [vmem:[%s2455_s26 + $0x130] ss:$8 sps:$4 sm:$0xff] (!%p632_p2)   ;;  %v1889_v46 = vld [vmem:[%s2455_s26 + $0x144] ss:$8 sps:$4 sm:$0xff] (!%p632_p2)  }
  0x6f   : > { %s2648_s11 = smov (!%p680_p3, %s1659_s11), 3  ;;  %1343 = vmatprep.subr.bf16.mxu0 %v1880_v40  ;;  %v1891_v47 = vld [vmem:[%s2455_s26 + $0x140] ss:$8 sps:$4 sm:$0xff]   ;;  %v1892_v48 = vld [vmem:[%s2455_s26 + $0x154] ss:$8 sps:$4 sm:$0xff]   ;;  %s2479_s5 = scalar_lea.vmem [#allocation3], %s1787_s4 }
  0x70   : > { %s682_s27 = scalar_lea.vmem %s2624_s2, %s2648_s11  ;;  %v1894_v49 = vld [vmem:[%s2455_s26 + $0x150] ss:$8 sps:$4 sm:$0xff]   ;;  %v1895_v50 = vld [vmem:[%s2455_s26 + $0x164] ss:$8 sps:$4 sm:$0xff]   ;;  %v1927_v52 = vld [vmem:[%s2455_s26] ss:$8 sps:$4 sm:$0xff]  }
  0x71   : > { %v1924_v51 = vld [vmem:[%s2455_s26 + $0x4] ss:$8 sps:$4 sm:$0xff]   ;;  %v1897_v53 = vld [vmem:[%s2455_s26 + $0x160] ss:$8 sps:$4 sm:$0xff]   ;;  %v1898_v55 = vld [vmem:[%s2455_s26 + $0x174] ss:$8 sps:$4 sm:$0xff]  }
  0x72   : > { %1344 = vmatpush1.bf16.msra.mxu0 %v1882_v41  ;;  %1298 = vmatprep.subr.bf16.mxu1 %v1924_v51  ;;  %v1930_v54 = vld [vmem:[%s2479_s5 + $0xc] ss:$24 sps:$4 sm:$0xff]   ;;  %v1936_v57 = vld [vmem:[%s2455_s26 + $0x10] ss:$8 sps:$4 sm:$0xff]   ;;  %v1942_v61 = vld [vmem:[%s2455_s26 + $0x20] ss:$8 sps:$4 sm:$0xff]  }
  0x73   : > { %1345 = vmatprep.subr.bf16.mxu0 %v1883_v42  ;;  %1299 = vmatpush1.bf16.msra.mxu1 %v1927_v52  ;;  %v1934_v56 = vld [vmem:[%s2455_s26 + $0x14] ss:$8 sps:$4 sm:$0xff]   ;;  %v1900_v58 = vld [vmem:[%s2455_s26 + $0x170] ss:$8 sps:$4 sm:$0xff]   ;;  %v1901_v59 = vld [vmem:[%s2455_s26 + $0x184] ss:$8 sps:$4 sm:$0xff]  }
  0x74   : > { %1373 = vmatprep.mubr.bf16.mxu0 %v1930_v54  ;;  %1300 = vmatprep.subr.bf16.mxu1 %v1934_v56  ;;  %v1940_v60 = vld [vmem:[%s2455_s26 + $0x24] ss:$8 sps:$4 sm:$0xff]   ;;  %v1903_v62 = vld [vmem:[%s2455_s26 + $0x180] ss:$8 sps:$4 sm:$0xff]   ;;  %v1946_v63 = vld [vmem:[%s2455_s26 + $0x34] ss:$8 sps:$4 sm:$0xff]  }
  0x75   : > { %v1904_v0 = vld [vmem:[%s2455_s26 + $0x194] ss:$8 sps:$4 sm:$0xff]   ;;  %v1948_v1 = vld [vmem:[%s2455_s26 + $0x30] ss:$8 sps:$4 sm:$0xff]   ;;  %v1952_v2 = vld [vmem:[%s2455_s26 + $0x44] ss:$8 sps:$4 sm:$0xff]  }
  0x76   : > { %1346 = vmatpush1.bf16.msra.mxu0 %v1885_v43  ;;  %v1906_v3 = vld [vmem:[%s2455_s26 + $0x190] ss:$8 sps:$4 sm:$0xff]   ;;  %v1907_v4 = vld [vmem:[%s2455_s26 + $0x1a4] ss:$8 sps:$4 sm:$0xff]   ;;  %v1954_v5 = vld [vmem:[%s2455_s26 + $0x40] ss:$8 sps:$4 sm:$0xff]  }
  0x77   : > { %1347 = vmatprep.subr.bf16.mxu0 %v1886_v44  ;;  %1301 = vmatpush1.bf16.msra.mxu1 %v1936_v57  ;;  %v1958_v6 = vld [vmem:[%s2455_s26 + $0x54] ss:$8 sps:$4 sm:$0xff]   ;;  %v1909_v7 = vld [vmem:[%s2455_s26 + $0x1a0] ss:$8 sps:$4 sm:$0xff]   ;;  %v1960_v9 = vld [vmem:[%s2455_s26 + $0x50] ss:$8 sps:$4 sm:$0xff]  }
  0x78   : > { %1302 = vmatprep.subr.bf16.mxu1 %v1940_v60  ;;  %v1910_v8 = vld [vmem:[%s2455_s26 + $0x1b4] ss:$8 sps:$4 sm:$0xff]   ;;  %v1964_v10 = vld [vmem:[%s2455_s26 + $0x64] ss:$8 sps:$4 sm:$0xff]   ;;  %v1912_v11 = vld [vmem:[%s2455_s26 + $0x1b0] ss:$8 sps:$4 sm:$0xff]  }
  0x79   : > { %v1913_v12 = vld [vmem:[%s2455_s26 + $0x1c4] ss:$8 sps:$4 sm:$0xff]   ;;  %v1966_v13 = vld [vmem:[%s2455_s26 + $0x60] ss:$8 sps:$4 sm:$0xff]   ;;  %v1970_v14 = vld [vmem:[%s2455_s26 + $0x74] ss:$8 sps:$4 sm:$0xff]  }
  0x7a   : > { %1348 = vmatpush1.bf16.msra.mxu0 %v1888_v45  ;;  %v1915_v15 = vld [vmem:[%s2455_s26 + $0x1c0] ss:$8 sps:$4 sm:$0xff]   ;;  %v1916_v16 = vld [vmem:[%s2455_s26 + $0x1d4] ss:$8 sps:$4 sm:$0xff]   ;;  %v1972_v17 = vld [vmem:[%s2455_s26 + $0x70] ss:$8 sps:$4 sm:$0xff]  }
  0x7b   : > { %1349 = vmatprep.subr.bf16.mxu0 %v1889_v46  ;;  %1303 = vmatpush1.bf16.msra.mxu1 %v1942_v61  ;;  %v1976_v18 = vld [vmem:[%s2455_s26 + $0x84] ss:$8 sps:$4 sm:$0xff]   ;;  %v1918_v19 = vld [vmem:[%s2455_s26 + $0x1d0] ss:$8 sps:$4 sm:$0xff]   ;;  %v1978_v21 = vld [vmem:[%s2455_s26 + $0x80] ss:$8 sps:$4 sm:$0xff]  }
  0x7c   : > { %1304 = vmatprep.subr.bf16.mxu1 %v1946_v63  ;;  %v1919_v20 = vld [vmem:[%s2455_s26 + $0x1e4] ss:$8 sps:$4 sm:$0xff]   ;;  %v1982_v22 = vld [vmem:[%s2455_s26 + $0x94] ss:$8 sps:$4 sm:$0xff]   ;;  %v1921_v23 = vld [vmem:[%s2455_s26 + $0x1e0] ss:$8 sps:$4 sm:$0xff]  }
  0x7d   : > { %v1922_v24 = vld [vmem:[%s2455_s26 + $0x1f4] ss:$8 sps:$4 sm:$0xff]   ;;  %v1984_v25 = vld [vmem:[%s2455_s26 + $0x90] ss:$8 sps:$4 sm:$0xff]   ;;  %v1988_v26 = vld [vmem:[%s2455_s26 + $0xa4] ss:$8 sps:$4 sm:$0xff]  }
  0x7e   : > { %1350 = vmatpush1.bf16.msra.mxu0 %v1891_v47  ;;  %v1926_v27 = vld [vmem:[%s2455_s26 + $0x1f0] ss:$8 sps:$4 sm:$0xff]   ;;  %v1933_v28 = vld [vmem:[%s2455_s26 + $0x204] ss:$8 sps:$4 sm:$0xff]   ;;  %v1990_v29 = vld [vmem:[%s2455_s26 + $0xa0] ss:$8 sps:$4 sm:$0xff]  }
  0x7f   : > { %1351 = vmatprep.subr.bf16.mxu0 %v1892_v48  ;;  %1305 = vmatpush1.bf16.msra.mxu1 %v1948_v1  ;;  %v1928_v30 = vld [vmem:[%s2479_s5 + $0x8] ss:$24 sps:$4 sm:$0xff]   ;;  %v1994_v31 = vld [vmem:[%s2455_s26 + $0xb4] ss:$8 sps:$4 sm:$0xff]   ;;  %v2000_v36 = vld [vmem:[%s2455_s26 + $0xc4] ss:$8 sps:$4 sm:$0xff]  }
  0x80   : > { %1306 = vmatprep.subr.bf16.mxu1 %v1952_v2  ;;  %v1931_v32 = vld [vmem:[%s2455_s26 + $0x200] ss:$8 sps:$4 sm:$0xff]   ;;  %v1939_v33 = vld [vmem:[%s2455_s26 + $0x214] ss:$8 sps:$4 sm:$0xff]   ;;  %v1996_v34 = vld [vmem:[%s2455_s26 + $0xb0] ss:$8 sps:$4 sm:$0xff]  }
  0x81   : > { %v2023_v35 = vld [vmem:[%s2479_s5 + $0x4] ss:$24 sps:$4 sm:$0xff]   ;;  %v1937_v37 = vld [vmem:[%s2455_s26 + $0x210] ss:$8 sps:$4 sm:$0xff]   ;;  %v2029_v38 = vld [vmem:[%s2479_s5 + $0x14] ss:$24 sps:$4 sm:$0xff]  }
  0x82   : > { %1352 = vmatpush1.bf16.msra.mxu0 %v1894_v49  ;;  %1330 = vmatprep.mubr.bf16.mxu1 %v2023_v35  ;;  %v1945_v39 = vld [vmem:[%s2455_s26 + $0x224] ss:$8 sps:$4 sm:$0xff]   ;;  %v2002_v40 = vld [vmem:[%s2455_s26 + $0xc0] ss:$8 sps:$4 sm:$0xff]   ;;  %v2006_v41 = vld [vmem:[%s2455_s26 + $0xd4] ss:$8 sps:$4 sm:$0xff]  }
  0x83   : > { %1353 = vmatprep.subr.bf16.mxu0 %v1895_v50  ;;  %1307 = vmatpush1.bf16.msra.mxu1 %v1954_v5  ;;  %v1943_v42 = vld [vmem:[%s2455_s26 + $0x220] ss:$8 sps:$4 sm:$0xff]   ;;  %v1951_v43 = vld [vmem:[%s2455_s26 + $0x234] ss:$8 sps:$4 sm:$0xff]   ;;  %v2008_v44 = vld [vmem:[%s2455_s26 + $0xd0] ss:$8 sps:$4 sm:$0xff]  }
  0x84   : > { %1308 = vmatprep.subr.bf16.mxu1 %v1958_v6  ;;  %v2012_v45 = vld [vmem:[%s2455_s26 + $0xe4] ss:$8 sps:$4 sm:$0xff]   ;;  %v1949_v46 = vld [vmem:[%s2455_s26 + $0x230] ss:$8 sps:$4 sm:$0xff]   ;;  %v2014_v48 = vld [vmem:[%s2455_s26 + $0xe0] ss:$8 sps:$4 sm:$0xff]  }
  0x85   : > { %v1957_v47 = vld [vmem:[%s2455_s26 + $0x244] ss:$8 sps:$4 sm:$0xff]   ;;  %v2018_v49 = vld [vmem:[%s2455_s26 + $0xf4] ss:$8 sps:$4 sm:$0xff]   ;;  %v1955_v50 = vld [vmem:[%s2455_s26 + $0x240] ss:$8 sps:$4 sm:$0xff]  }
  0x86   : > { %1354 = vmatpush1.bf16.msra.mxu0 %v1897_v53  ;;  %v1963_v51 = vld [vmem:[%s2455_s26 + $0x254] ss:$8 sps:$4 sm:$0xff]   ;;  %v2020_v52 = vld [vmem:[%s2455_s26 + $0xf0] ss:$8 sps:$4 sm:$0xff]   ;;  %v1969_v54 = vld [vmem:[%s2455_s26 + $0x264] ss:$8 sps:$4 sm:$0xff]  }
  0x87   : > { %1355 = vmatprep.subr.bf16.mxu0 %v1898_v55  ;;  %1309 = vmatpush1.bf16.msra.mxu1 %v1960_v9  ;;  %v1961_v53 = vld [vmem:[%s2455_s26 + $0x250] ss:$8 sps:$4 sm:$0xff]   ;;  %v1967_v56 = vld [vmem:[%s2455_s26 + $0x260] ss:$8 sps:$4 sm:$0xff]   ;;  %v1975_v57 = vld [vmem:[%s2455_s26 + $0x274] ss:$8 sps:$4 sm:$0xff]  }
  0x88   : > { %1310 = vmatprep.subr.bf16.mxu1 %v1964_v10  ;;  %v2021_v55 = vld [vmem:[%s2479_s5] ss:$24 sps:$4 sm:$0xff]   ;;  %v1987_v61 = vld [vmem:[%s2455_s26 + $0x294] ss:$8 sps:$4 sm:$0xff]   ;;  %v1993_v63 = vld [vmem:[%s2455_s26 + $0x2a4] ss:$8 sps:$4 sm:$0xff]  }
  0x89   : > { %v1979_v60 = vld [vmem:[%s2455_s26 + $0x280] ss:$8 sps:$4 sm:$0xff]   ;;  %v1999_v1 = vld [vmem:[%s2455_s26 + $0x2b4] ss:$8 sps:$4 sm:$0xff]   ;;  %v1997_v2 = vld [vmem:[%s2455_s26 + $0x2b0] ss:$8 sps:$4 sm:$0xff]  }
  0x8a   : > { %1356 = vmatpush1.bf16.msra.mxu0 %v1900_v58  ;;  %v1973_v58 = vld [vmem:[%s2455_s26 + $0x270] ss:$8 sps:$4 sm:$0xff]   ;;  %v2011_v5 = vld [vmem:[%s2455_s26 + $0x2d4] ss:$8 sps:$4 sm:$0xff]   ;;  %s2569_s16 = scalar_lea.vmem [#allocation5], %s2452_s7  ;;  %p1762_p4 = scmp.ne.s32.totalorder %s2100_s18, 0 }
  0x8b   : > { %1357 = vmatprep.subr.bf16.mxu0 %v1901_v59  ;;  %1311 = vmatpush1.bf16.msra.mxu1 %v1966_v13  ;;  %v1981_v59 = vld [vmem:[%s2455_s26 + $0x284] ss:$8 sps:$4 sm:$0xff]   ;;  %v2009_v6 = vld [vmem:[%s2455_s26 + $0x2d0] ss:$8 sps:$4 sm:$0xff]   ;;  %v2026_v9 = vld [vmem:[%s2455_s26 + $0x2f4] ss:$8 sps:$4 sm:$0xff]  }
  0x8c   : > { %1312 = vmatprep.subr.bf16.mxu1 %v1970_v14  ;;  %v2024_v10 = vld [vmem:[%s2455_s26 + $0x2f0] ss:$8 sps:$4 sm:$0xff]  }
  0x8e   : > { %1358 = vmatpush1.bf16.msra.mxu0 %v1903_v62  ;;  %v1985_v62 = vld [vmem:[%s2455_s26 + $0x290] ss:$8 sps:$4 sm:$0xff]  }
  0x8f   : > { %1359 = vmatprep.subr.bf16.mxu0 %v1904_v0  ;;  %1313 = vmatpush1.bf16.msra.mxu1 %v1972_v17  ;;  %v1991_v0 = vld [vmem:[%s2455_s26 + $0x2a0] ss:$8 sps:$4 sm:$0xff]  }
  0x90   : > { %1314 = vmatprep.subr.bf16.mxu1 %v1976_v18 }
  0x92   : > { %1360 = vmatpush1.bf16.msra.mxu0 %v1906_v3  ;;  %v2005_v3 = vld [vmem:[%s2455_s26 + $0x2c4] ss:$8 sps:$4 sm:$0xff]  }
  0x93   : > { %1361 = vmatprep.subr.bf16.mxu0 %v1907_v4  ;;  %1315 = vmatpush1.bf16.msra.mxu1 %v1978_v21  ;;  %v2003_v4 = vld [vmem:[%s2455_s26 + $0x2c0] ss:$8 sps:$4 sm:$0xff]  }
  0x94   : > { %1316 = vmatprep.subr.bf16.mxu1 %v1982_v22 }
  0x96   : > { %1362 = vmatpush1.bf16.msra.mxu0 %v1909_v7  ;;  %v2017_v7 = vld [vmem:[%s2455_s26 + $0x2e4] ss:$8 sps:$4 sm:$0xff]  }
  0x97   : > { %1363 = vmatprep.subr.bf16.mxu0 %v1910_v8  ;;  %1317 = vmatpush1.bf16.msra.mxu1 %v1984_v25  ;;  %v2015_v8 = vld [vmem:[%s2455_s26 + $0x2e0] ss:$8 sps:$4 sm:$0xff]  }
  0x98   : > { %1318 = vmatprep.subr.bf16.mxu1 %v1988_v26 }
  0x9a   : > { %1364 = vmatpush1.bf16.msra.mxu0 %v1912_v11  ;;  %v2027_v11 = vld [vmem:[%s2479_s5 + $0x10] ss:$24 sps:$4 sm:$0xff]  }
  0x9b   : > { %1365 = vmatprep.subr.bf16.mxu0 %v1913_v12  ;;  %1319 = vmatpush1.bf16.msra.mxu1 %v1990_v29 }
  0x9c   : > { %1320 = vmatprep.subr.bf16.mxu1 %v1994_v31 }
  0x9e   : > { %1366 = vmatpush1.bf16.msra.mxu0 %v1915_v15 }
  0x9f   : > { %1367 = vmatprep.subr.bf16.mxu0 %v1916_v16  ;;  %1321 = vmatpush1.bf16.msra.mxu1 %v1996_v34 }
  0xa0   : > { %1322 = vmatprep.subr.bf16.mxu1 %v2000_v36 }
  0xa2   : > { %1368 = vmatpush1.bf16.msra.mxu0 %v1918_v19 }
  0xa3   : > { %1369 = vmatprep.subr.bf16.mxu0 %v1919_v20  ;;  %1323 = vmatpush1.bf16.msra.mxu1 %v2002_v40 }
  0xa4   : > { %1324 = vmatprep.subr.bf16.mxu1 %v2006_v41 }
  0xa6   : > { %1370 = vmatpush1.bf16.msra.mxu0 %v1921_v23 }
  0xa7   : > { %1371 = vmatprep.subr.bf16.mxu0 %v1922_v24  ;;  %1325 = vmatpush1.bf16.msra.mxu1 %v2008_v44 }
  0xa8   : > { %1326 = vmatprep.subr.bf16.mxu1 %v2012_v45 }
  0xaa   : > { %1372 = vmatpush1.bf16.msra.mxu0 %v1926_v27 }
  0xab   : > { %1384 = vmatprep.subr.bf16.mxu0 %v1933_v28  ;;  %1327 = vmatpush1.bf16.msra.mxu1 %v2014_v48 }
  0xac   : > { %1328 = vmatprep.subr.bf16.mxu1 %v2018_v49 }
  0xad   : > { %1374 = vmatmul.mubr.bf16.vlgmr.msra.gmra.mrb[0].mxu0 %v1928_v30 }
  0xae   : > { %1385 = vmatpush1.bf16.msra.mxu0 %v1931_v32  ;;  %1416 = vmatprep.mubr.bf16.mxu0 %v2029_v38 }
  0xaf   : > { %1386 = vmatprep.subr.bf16.mxu0 %v1939_v33  ;;  %1329 = vmatpush1.bf16.msra.mxu1 %v2020_v52 }
  0xb2   : > { %1387 = vmatpush1.bf16.msra.mxu0 %v1937_v37  ;;  %1331 = vmatmul.mubr.bf16.vlgmr.msra.gmra.mrb[0].mxu1 %v2021_v55 }
  0xb3   : > { %1388 = vmatprep.subr.bf16.mxu0 %v1945_v39 }
  0xb6   : > { %1389 = vmatpush1.bf16.msra.mxu0 %v1943_v42 }
  0xb7   : > { %1390 = vmatprep.subr.bf16.mxu0 %v1951_v43 }
  0xba   : > { %1391 = vmatpush1.bf16.msra.mxu0 %v1949_v46 }
  0xbb   : > { %1392 = vmatprep.subr.bf16.mxu0 %v1957_v47 }
  0xbe   : > { %1393 = vmatpush1.bf16.msra.mxu0 %v1955_v50 }
  0xbf   : > { %1394 = vmatprep.subr.bf16.mxu0 %v1963_v51 }
  0xc2   : > { %1395 = vmatpush1.bf16.msra.mxu0 %v1961_v53 }
  0xc3   : > { %1396 = vmatprep.subr.bf16.mxu0 %v1969_v54 }
  0xc6   : > { %1397 = vmatpush1.bf16.msra.mxu0 %v1967_v56 }
  0xc7   : > { %1398 = vmatprep.subr.bf16.mxu0 %v1975_v57 }
  0xca   : > { %1399 = vmatpush1.bf16.msra.mxu0 %v1973_v58 }
  0xcb   : > { %1400 = vmatprep.subr.bf16.mxu0 %v1981_v59 }
  0xce   : > { %1401 = vmatpush1.bf16.msra.mxu0 %v1979_v60 }
  0xcf   : > { %1402 = vmatprep.subr.bf16.mxu0 %v1987_v61 }
  0xd2   : > { %1403 = vmatpush1.bf16.msra.mxu0 %v1985_v62 }
  0xd3   : > { %1404 = vmatprep.subr.bf16.mxu0 %v1993_v63 }
  0xd6   : > { %1405 = vmatpush1.bf16.msra.mxu0 %v1991_v0 }
  0xd7   : > { %1406 = vmatprep.subr.bf16.mxu0 %v1999_v1 }
  0xda   : > { %1407 = vmatpush1.bf16.msra.mxu0 %v1997_v2 }
  0xdb   : > { %1408 = vmatprep.subr.bf16.mxu0 %v2005_v3 }
  0xde   : > { %1409 = vmatpush1.bf16.msra.mxu0 %v2003_v4 }
  0xdf   : > { %1410 = vmatprep.subr.bf16.mxu0 %v2011_v5 }
  0xe2   : > { %1411 = vmatpush1.bf16.msra.mxu0 %v2009_v6 }
  0xe3   : > { %1412 = vmatprep.subr.bf16.mxu0 %v2017_v7 }
  0xe6   : > { %1413 = vmatpush1.bf16.msra.mxu0 %v2015_v8 }
  0xe7   : > { %1414 = vmatprep.subr.bf16.mxu0 %v2026_v9 }
  0xea   : > { %1415 = vmatpush1.bf16.msra.mxu0 %v2024_v10 }
  0xed   : > { %1417 = vmatmul.mubr.bf16.vlgmr.msra.gmra.mrb[0].mxu0 %v2027_v11 }
 0x185   : > { %v1332_v12 = vpop.f32.mrb[0].mxu1 }
 0x186   : > { %v1334_v13 = vpop.f32.mrb[1].mxu1 }
 0x187   : > { %v1336_v14 = vpop.f32.mrb[2].mxu1 }
 0x188   : > { %v1338_v15 = vpop.f32.mrb[3].mxu1 }
 0x1be   : > { %1430 = sbr.rel (%p1762_p4) target bundleno = 455 (0x1c7), region = 97 }
 0x1c0   : > { %v1418_v16 = vpop.f32.mrb[0].mxu0 }
 0x1c1   : > { %v1777_v17 = vadd.f32 %v1418_v16, %v1332_v12  ;;  %v1420_v18 = vpop.f32.mrb[1].mxu0 }
 0x1c2   : > { %v1778_v19 = vadd.f32 %v1420_v18, %v1334_v13  ;;  %v1422_v20 = vpop.f32.mrb[2].mxu0 }
 0x1c3   : > { %v1779_v21 = vadd.f32 %v1422_v20, %v1336_v14  ;;  %v1424_v22 = vpop.f32.mrb[3].mxu0  ;;  %1431 = vst [vmem:[#allocation2] sm:$0xff] (!%p1762_p4), %v1777_v17 }
 0x1c4   : > { %v1780_v23 = vadd.f32 %v1424_v22, %v1338_v15  ;;  %1432 = vst [vmem:[#allocation2 + $0x8] sm:$0xff] (!%p1762_p4), %v1778_v19 }
 0x1c5   : > { %1433 = vst [vmem:[#allocation2 + $0x10] sm:$0xff] %v1779_v21 }
 0x1c6   : > { %1434 = vst [vmem:[#allocation2 + $0x18] sm:$0xff] %v1780_v23 }
 0x1c7 PF: > { %p1763_p5 = scmp.le.s32.totalorder %s2100_s18, 0 }
 0x1c9   : > { %1438 = sbr.rel (%p1763_p5) target bundleno = 466 (0x1d2), region = 101 }
 0x1cc   : > { %v1439_v24 = vld [vmem:[#allocation2] sm:$0xff] (!%p1763_p5) }
 0x1cd   : > { %v1440_v25 = vld [vmem:[#allocation2 + $0x8] sm:$0xff] (!%p1763_p5)  ;;  %v1443_v27 = vadd.f32 (!%p1763_p5), %v1777_v17, %v1439_v24  ;;  %v1442_v30 = vld [vmem:[#allocation2 + $0x18] sm:$0xff] (!%p1763_p5) }
 0x1ce   : > { %v1441_v26 = vld [vmem:[#allocation2 + $0x10] sm:$0xff] (!%p1763_p5)  ;;  %v1444_v28 = vadd.f32 (!%p1763_p5), %v1778_v19, %v1440_v25  ;;  %v1446_v31 = vadd.f32 (!%p1763_p5), %v1780_v23, %v1442_v30 }
 0x1cf   : > { %v1445_v29 = vadd.f32 (!%p1763_p5), %v1779_v21, %v1441_v26  ;;  %1447 = vst [vmem:[#allocation2] sm:$0xff] (!%p1763_p5), %v1443_v27 }
 0x1d0   : > { %1448 = vst [vmem:[#allocation2 + $0x8] sm:$0xff] %v1444_v28  ;;  %1450 = vst [vmem:[#allocation2 + $0x18] sm:$0xff] %v1446_v31 }
 0x1d1   : > { %1449 = vst [vmem:[#allocation2 + $0x10] sm:$0xff] %v1445_v29 }
 0x1d2 PF: > { %p1764_p6 = scmp.ne.s32.totalorder %s2100_s18, 5 }
 0x1d3   : > { %v1461_v32 = vlaneseq (!%p1764_p6)  ;;  %v1459_v34 = vld [vmem:[%s682_s27] sm:$0x3] (!%p1764_p6) }
 0x1d4   : > { %1454 = sbr.rel (%p1764_p6) target bundleno = 482 (0x1e2), region = 105 }
 0x1d5   : > { %v1462_v33 = vshrl.u32 (!%p1764_p6), %v1461_v32, 7 }
 0x1d7   : > { %v1463_v36 = vsub.s32 (!%p1764_p6), 0, %v1462_v33  ;;  %v1467_v37 = vsub.s32 (!%p1764_p6), 1, %v1462_v33 }
 0x1d8   : > { %v1455_v35 = vld [vmem:[#allocation2] sm:$0xff] (!%p1764_p6)  ;;  %v1457_v39 = vld [vmem:[#allocation2 + $0x10] sm:$0xff] (!%p1764_p6) }
 0x1d9   : > { %v1456_v38 = vld [vmem:[#allocation2 + $0x8] sm:$0xff] (!%p1764_p6)  ;;  %v1458_v40 = vld [vmem:[#allocation2 + $0x18] sm:$0xff] (!%p1764_p6)  ;;  %v1464_v41 = vrot.slane (!%p1764_p6), %v1459_v34, %v1463_v36  ;;  %v1468_v42 = vrot.slane (!%p1764_p6), %v1459_v34, %v1467_v37 }
 0x1db   : > { %v1471_v43 = vadd.f32 %v1464_v41, %v1455_v35  ;;  %v1472_v44 = vadd.f32 %v1468_v42, %v1456_v38  ;;  %v1473_v45 = vadd.f32 %v1464_v41, %v1457_v39  ;;  %v1474_v46 = vadd.f32 %v1468_v42, %v1458_v40 }
 0x1dd   : > { %v1475_v47 = vmax.f32 %v1471_v43, 0.0  ;;  %v1476_v48 = vmax.f32 %v1472_v44, 0.0  ;;  %v1477_v49 = vmax.f32 %v1473_v45, 0.0  ;;  %v1478_v50 = vmax.f32 %v1474_v46, 0.0 }
 0x1df   : > { %v1774_v51 = vpack.c.bf16 %v1476_v48, %v1475_v47  ;;  %v1775_v52 = vpack.c.bf16 %v1478_v50, %v1477_v49 }
 0x1e1   : > { %1491 = vst [vmem:[%s2569_s16] sm:$0xff] %v1774_v51  ;;  %1492 = vst [vmem:[%s2569_s16 + $0x8] sm:$0xff] %v1775_v52 }
 0x1e2 PF: > { %1499 = sbr.rel (!%p2232_p12) target bundleno = 490 (0x1ea), region = 109  ;;  %s1776_s18 = sshll.u32 (%p2232_p12), %s2104_s19, 3 }
 0x1e3   : > { %s1505_s7 = scalar_lea.vmem (%p2232_p12), %s2625_s3, %s1776_s18 }
 0x1e8   : > { %v1535_v53 = vld [vmem:[%s2569_s16] sm:$0xff] (%p2232_p12)  ;;  %v1537_v54 = vld [vmem:[%s2569_s16 + $0x8] sm:$0xff] (%p2232_p12) }
 0x1e9   : > { %1536 = vst [vmem:[%s1505_s7] sm:$0xff] %v1535_v53  ;;  %1538 = vst [vmem:[%s1505_s7 + $0x10] sm:$0xff] %v1537_v54 }
 0x1ea PF: > { %s13_s22 = sadd.s32 1, %s2116_s22   ;;  %s2631_s12 = smov %s2080_s13 }
 0x1eb   : > { %p10_p7 = scmp.ge.s32.totalorder %s13_s22, 14   ;;  %s2632_s13 = smov %s2230_s9 }
 0x1ec   : > { %s2633_s14 = smov %s2088_s15  ;;  %s2634_s15 = smov %s2227_s8 }
 0x1ed   : > { %s2635_s16 = smov %s2096_s17  ;;  %s2636_s17 = smov %s2213_s30 }
 0x1ee   : > { %s2637_s18 = smov %s2108_s20  ;;  %s2638_s19 = smov %s2112_s21 }
 0x1ef   : > { %s2639_s20 = smov %s2642_s24  ;;  %s2640_s21 = smov %s2646_s25 }
 0x1f0   :  { %12 = sbr.rel (!%p10_p7) target bundleno = 8 (0x8), region = 189 }

// kernel: _lambda_.43
= control target key start
LH: loop header
LB: loop body
LE: loop exit
PB: predicated region body
PF: predicated region fallthrough
CT: control target
= control target key end

     0   :  { %v94_v51 = vlaneseq  ;;  %s695_s0 = inlined_call_operand.vmem [shape: bf16[2,1,512], index: 0, kind: input, shape index: {}]   ;;  %s696_s1 = inlined_call_operand.vmem [shape: f32[512,128], index: 1, kind: input, shape index: {}]   ;;  %s697_s2 = inlined_call_operand.vmem [shape: f32[1,128], index: 2, kind: input, shape index: {}]   ;;  %s698_s3 = inlined_call_operand.hbm [shape: f32[2,128], index: 3, kind: output, shape index: {}]  }
   0x1   :  { %v37_v0 = vld [vmem:[%s696_s1 + $0x80] sm:$0xff]  ;;  %v38_v1 = vld [vmem:[%s696_s1 + $0x88] sm:$0xff]  ;;  %v39_v11 = vld [vmem:[%s696_s1 + $0x90] sm:$0xff] }
   0x2   :  { %v21_v2 = vld [vmem:[%s696_s1] sm:$0xff]  ;;  %v365_v3 = vpack.c.bf16 %v38_v1, %v37_v0  ;;  %v22_v4 = vld [vmem:[%s696_s1 + $0x8] sm:$0xff]  ;;  %v40_v13 = vld [vmem:[%s696_s1 + $0x98] sm:$0xff]  ;;  %v607_v0 = vshrl.u32 %v94_v51, 7 }
   0x3   :  { %v69_v5 = vld [vmem:[%s696_s1 + $0x180] sm:$0xff]  ;;  %v70_v6 = vld [vmem:[%s696_s1 + $0x188] sm:$0xff]  ;;  %v367_v7 = vpack.c.bf16 %v22_v4, %v21_v2  ;;  %v23_v14 = vld [vmem:[%s696_s1 + $0x10] sm:$0xff]  ;;  %v369_v16 = vpack.c.bf16 %v40_v13, %v39_v11 }
   0x4   :  { %v397_v8 = vpack.c.bf16 %v70_v6, %v69_v5  ;;  %v53_v9 = vld [vmem:[%s696_s1 + $0x100] sm:$0xff]  ;;  %v54_v10 = vld [vmem:[%s696_s1 + $0x108] sm:$0xff]  ;;  %366 = vmatprep.subr.bf16.mxu0 %v365_v3  ;;  %v24_v15 = vld [vmem:[%s696_s1 + $0x18] sm:$0xff] }
   0x5   :  { %v399_v12 = vpack.c.bf16 %v54_v10, %v53_v9  ;;  %368 = vmatpush3.bf16.msra.mxu0 %v367_v7  ;;  %v371_v17 = vpack.c.bf16 %v24_v15, %v23_v14  ;;  %v71_v18 = vld [vmem:[%s696_s1 + $0x190] sm:$0xff]  ;;  %v72_v19 = vld [vmem:[%s696_s1 + $0x198] sm:$0xff]  ;;  %v41_v23 = vld [vmem:[%s696_s1 + $0xa0] sm:$0xff] }
   0x6   :  { %398 = vmatprep.subr.bf16.mxu1 %v397_v8  ;;  %v55_v20 = vld [vmem:[%s696_s1 + $0x110] sm:$0xff]  ;;  %v401_v21 = vpack.c.bf16 %v72_v19, %v71_v18  ;;  %v56_v22 = vld [vmem:[%s696_s1 + $0x118] sm:$0xff]  ;;  %v42_v24 = vld [vmem:[%s696_s1 + $0xa8] sm:$0xff]  ;;  %370 = vmatprep.subr.bf16.mxu0 %v369_v16  ;;  %v100_v16 = vsub.s32 2, %v607_v0 }
   0x7   :  { %400 = vmatpush3.bf16.msra.mxu1 %v399_v12  ;;  %v403_v25 = vpack.c.bf16 %v56_v22, %v55_v20  ;;  %v373_v26 = vpack.c.bf16 %v42_v24, %v41_v23  ;;  %v25_v27 = vld [vmem:[%s696_s1 + $0x20] sm:$0xff]  ;;  %v26_v28 = vld [vmem:[%s696_s1 + $0x28] sm:$0xff]  ;;  %v43_v35 = vld [vmem:[%s696_s1 + $0xb0] sm:$0xff] }
   0x8   :  { %v73_v29 = vld [vmem:[%s696_s1 + $0x1a0] sm:$0xff]  ;;  %402 = vmatprep.subr.bf16.mxu1 %v401_v21  ;;  %v74_v30 = vld [vmem:[%s696_s1 + $0x1a8] sm:$0xff]  ;;  %v375_v33 = vpack.c.bf16 %v26_v28, %v25_v27  ;;  %v44_v36 = vld [vmem:[%s696_s1 + $0xb8] sm:$0xff]  ;;  %v108_v21 = vsub.s32 6, %v607_v0 }
   0x9   :  { %v57_v31 = vld [vmem:[%s696_s1 + $0x120] sm:$0xff]  ;;  %v58_v32 = vld [vmem:[%s696_s1 + $0x128] sm:$0xff]  ;;  %372 = vmatpush3.bf16.msra.mxu0 %v371_v17  ;;  %v405_v34 = vpack.c.bf16 %v74_v30, %v73_v29  ;;  %v27_v37 = vld [vmem:[%s696_s1 + $0x30] sm:$0xff]  ;;  %v377_v39 = vpack.c.bf16 %v44_v36, %v43_v35 }
   0xa   :  { %374 = vmatprep.subr.bf16.mxu0 %v373_v26  ;;  %v407_v38 = vpack.c.bf16 %v58_v32, %v57_v31  ;;  %v28_v40 = vld [vmem:[%s696_s1 + $0x38] sm:$0xff]  ;;  %v75_v41 = vld [vmem:[%s696_s1 + $0x1b0] sm:$0xff]  ;;  %v45_v46 = vld [vmem:[%s696_s1 + $0xc0] sm:$0xff] }
   0xb   :  { %404 = vmatpush3.bf16.msra.mxu1 %v403_v25  ;;  %v76_v42 = vld [vmem:[%s696_s1 + $0x1b8] sm:$0xff]  ;;  %v59_v44 = vld [vmem:[%s696_s1 + $0x130] sm:$0xff]  ;;  %v46_v47 = vld [vmem:[%s696_s1 + $0xc8] sm:$0xff]  ;;  %v379_v48 = vpack.c.bf16 %v28_v40, %v27_v37 }
   0xc   :  { %406 = vmatprep.subr.bf16.mxu1 %v405_v34  ;;  %v409_v43 = vpack.c.bf16 %v76_v42, %v75_v41  ;;  %v60_v45 = vld [vmem:[%s696_s1 + $0x138] sm:$0xff]  ;;  %v77_v49 = vld [vmem:[%s696_s1 + $0x1c0] sm:$0xff]  ;;  %v78_v50 = vld [vmem:[%s696_s1 + $0x1c8] sm:$0xff]  ;;  %v381_v53 = vpack.c.bf16 %v46_v47, %v45_v46 }
   0xd   :  { %376 = vmatpush3.bf16.msra.mxu0 %v375_v33  ;;  %v411_v52 = vpack.c.bf16 %v60_v45, %v59_v44  ;;  %v29_v54 = vld [vmem:[%s696_s1 + $0x40] sm:$0xff]  ;;  %v30_v55 = vld [vmem:[%s696_s1 + $0x48] sm:$0xff]  ;;  %v413_v57 = vpack.c.bf16 %v78_v50, %v77_v49  ;;  %v47_v59 = vld [vmem:[%s696_s1 + $0xd0] sm:$0xff] }
   0xe   :  { %378 = vmatprep.subr.bf16.mxu0 %v377_v39  ;;  %v61_v56 = vld [vmem:[%s696_s1 + $0x140] sm:$0xff]  ;;  %v62_v58 = vld [vmem:[%s696_s1 + $0x148] sm:$0xff]  ;;  %v48_v60 = vld [vmem:[%s696_s1 + $0xd8] sm:$0xff]  ;;  %v383_v63 = vpack.c.bf16 %v30_v55, %v29_v54 }
   0xf   :  { %408 = vmatpush3.bf16.msra.mxu1 %v407_v38  ;;  %v79_v61 = vld [vmem:[%s696_s1 + $0x1d0] sm:$0xff]  ;;  %v80_v62 = vld [vmem:[%s696_s1 + $0x1d8] sm:$0xff]  ;;  %v415_v1 = vpack.c.bf16 %v62_v58, %v61_v56  ;;  %v385_v2 = vpack.c.bf16 %v48_v60, %v47_v59  ;;  %v49_v8 = vld [vmem:[%s696_s1 + $0xe0] sm:$0xff] }
  0x10   :  { %410 = vmatprep.subr.bf16.mxu1 %v409_v43  ;;  %v31_v3 = vld [vmem:[%s696_s1 + $0x50] sm:$0xff]  ;;  %v32_v4 = vld [vmem:[%s696_s1 + $0x58] sm:$0xff]  ;;  %v417_v6 = vpack.c.bf16 %v80_v62, %v79_v61  ;;  %v50_v9 = vld [vmem:[%s696_s1 + $0xe8] sm:$0xff] }
  0x11   :  { %380 = vmatpush3.bf16.msra.mxu0 %v379_v48  ;;  %v63_v5 = vld [vmem:[%s696_s1 + $0x150] sm:$0xff]  ;;  %v64_v7 = vld [vmem:[%s696_s1 + $0x158] sm:$0xff]  ;;  %v81_v10 = vld [vmem:[%s696_s1 + $0x1e0] sm:$0xff]  ;;  %v387_v12 = vpack.c.bf16 %v32_v4, %v31_v3  ;;  %v389_v18 = vpack.c.bf16 %v50_v9, %v49_v8 }
  0x12   :  { %382 = vmatprep.subr.bf16.mxu0 %v381_v53  ;;  %v82_v11 = vld [vmem:[%s696_s1 + $0x1e8] sm:$0xff]  ;;  %v33_v13 = vld [vmem:[%s696_s1 + $0x60] sm:$0xff]  ;;  %v419_v17 = vpack.c.bf16 %v64_v7, %v63_v5 }
  0x13   :  { %412 = vmatpush3.bf16.msra.mxu1 %v411_v52  ;;  %v34_v14 = vld [vmem:[%s696_s1 + $0x68] sm:$0xff]  ;;  %v65_v15 = vld [vmem:[%s696_s1 + $0x160] sm:$0xff] }
  0x14   :  { %414 = vmatprep.subr.bf16.mxu1 %v413_v57  ;;  %v66_v19 = vld [vmem:[%s696_s1 + $0x168] sm:$0xff]  ;;  %v292_v20 = vld [vmem:[%s695_s0] sm:$0xff]  }
  0x15   :  { %384 = vmatpush3.bf16.msra.mxu0 %v383_v63 }
  0x16   :  { %386 = vmatprep.subr.bf16.mxu0 %v385_v2 }
  0x17   :  { %416 = vmatpush3.bf16.msra.mxu1 %v415_v1 }
  0x18   :  { %8 = vsyncpa [#allocation3], 0  ;;  %418 = vmatprep.subr.bf16.mxu1 %v417_v6  ;;  %v421_v22 = vpack.c.bf16 %v82_v11, %v81_v10  ;;  %v51_v23 = vld [vmem:[%s696_s1 + $0xf0] sm:$0xff]  ;;  %v52_v24 = vld [vmem:[%s696_s1 + $0xf8] sm:$0xff]  ;;  %v293_v25 = vunpack.c.l.bf16 %v292_v20  ;;  %v294_v26 = vunpack.c.h.bf16 %v292_v20  ;;  %vm126_vm0 = vcmask 1041409   ;;  %s454_s7 = smov [#allocation2]  }
  0x19   :  { %v83_v27 = vld [vmem:[%s696_s1 + $0x1f0] sm:$0xff]  ;;  %v84_v28 = vld [vmem:[%s696_s1 + $0x1f8] sm:$0xff]  ;;  %v96_v29 = vsub.s32 0, %v607_v0  ;;  %388 = vmatpush3.bf16.msra.mxu0 %v387_v12  ;;  %v391_v30 = vpack.c.bf16 %v34_v14, %v33_v13  ;;  %v423_v31 = vpack.c.bf16 %v66_v19, %v65_v15  ;;  %v393_v34 = vpack.c.bf16 %v52_v24, %v51_v23  ;;  %v290_v54 = vld [vmem:[%s697_s2] ss:$0 sm:$0xff]  ;;  %s282_s8 = sshll.u32 %s454_s7, 4  ;;  %s283_s8 = int_to_ptr.vmem [resolvable:$true] %s282_s8 }
  0x1a   :  { %v101_v32 = vrot.slane %v293_v25, %v100_v16  ;;  %v117_v33 = vrot.slane %v294_v26, %v100_v16  ;;  %390 = vmatprep.subr.bf16.mxu0 %v389_v18  ;;  %v35_v35 = vld [vmem:[%s696_s1 + $0x70] sm:$0xff]  ;;  %v36_v36 = vld [vmem:[%s696_s1 + $0x78] sm:$0xff]  ;;  %v109_v37 = vrot.slane %v293_v25, %v108_v21  ;;  %v125_v38 = vrot.slane %v294_v26, %v108_v21  ;;  %s430_s9 = scalar_lea.vmem %s283_s8, 32  ;;  %p435_p1 = scmp.lt.s32.totalorder %s283_s8, %s283_s8 }
  0x1b   :  { %420 = vmatpush3.bf16.msra.mxu1 %v419_v17  ;;  %v104_v39 = vsub.s32 4, %v607_v0  ;;  %v425_v40 = vpack.c.bf16 %v84_v28, %v83_v27  ;;  %v67_v41 = vld [vmem:[%s696_s1 + $0x170] sm:$0xff]  ;;  %v68_v42 = vld [vmem:[%s696_s1 + $0x178] sm:$0xff]  ;;  %v395_v45 = vpack.c.bf16 %v36_v36, %v35_v35  ;;  %v97_v46 = vrot.slane %v293_v25, %v96_v29  ;;  %p431_p0 = scmp.ne.s32.totalorder %s283_s8, %s430_s9  ;;  %p436_p2 = scmp.lt.s32.totalorder %s430_s9, %s430_s9 }
  0x1c   :  { %422 = vmatprep.subr.bf16.mxu1 %v421_v22  ;;  %v128_v43 = vsel %vm126_vm0, %v117_v33, %v101_v32  ;;  %v130_v44 = vsel %vm126_vm0, %v125_v38, %v109_v37  ;;  %v113_v47 = vrot.slane %v294_v26, %v96_v29  ;;  %v427_v48 = vpack.c.bf16 %v68_v42, %v67_v41 }
  0x1d   :  { %199 = vmatprep.mubr.f32.mxu0 %v128_v43  ;;  %392 = vmatpush3.bf16.msra.mxu0 %v391_v30  ;;  %v105_v49 = vrot.slane %v293_v25, %v104_v39  ;;  %v121_v50 = vrot.slane %v294_v26, %v104_v39  ;;  %p437_p3 = por %p436_p2, %p435_p1 }
  0x1e   :  { %269 = vmatprep.mubr.f32.mxu1 %v130_v44  ;;  %394 = vmatprep.subr.bf16.mxu0 %v393_v34  ;;  %v127_v51 = vsel %vm126_vm0, %v113_v47, %v97_v46 }
  0x1f   :  { %424 = vmatpush3.bf16.msra.mxu1 %v423_v31  ;;  %v129_v52 = vsel %vm126_vm0, %v121_v50, %v105_v49  ;;  %p438_p4 = pnand %p437_p3, %p431_p0 }
  0x20   :  { %426 = vmatprep.subr.bf16.mxu1 %v425_v40 }
  0x21   :  { %396 = vmatpush3.bf16.msra.mxu0 %v395_v45 }
  0x23   :  { %428 = vmatpush3.bf16.msra.mxu1 %v427_v48 }
  0x24   :  { %200 = vmatmul.mubr.f32.vlgmr.msra.gmra.mrb[0].mxu0 %v127_v51 }
  0x26   :  { %270 = vmatmul.mubr.f32.vlgmr.msra.gmra.mrb[0].mxu1 %v129_v52 }
  0xf7   :  { %v327_v53 = vpop.f32.mrb[0].mxu0 }
  0xf8   :  { %v328_v55 = vpop.f32.mrb[1].mxu0 }
  0xf9   :  { %v362_v56 = vpop.f32.mrb[0].mxu1  ;;  %v329_v57 = vadd.f32 %v328_v55, %v327_v53 }
  0xfa   :  { %v363_v58 = vpop.f32.mrb[1].mxu1 }
  0xfb   :  { %v364_v59 = vadd.f32 %v363_v58, %v362_v56  ;;  %v202_v60 = vadd.f32 %v329_v57, %v290_v54 }
  0xfd   :  { %v272_v61 = vadd.f32 %v364_v59, %v202_v60 }
  0xff   :  { %275 = vst [vmem:[#allocation2] sm:$0x3] %v272_v61 }
 0x100   :  { %441 = shalt.err (!%p438_p4)
}
 0x101   :  { %s442_s11 = scalar_lea.hbm %s698_s3, 32 }
 0x102   :  { %p443_p5 = scmp.ne.s32.totalorder %s698_s3, %s442_s11  ;;  %p446_p6 = scmp.lt.u32.totalorder %s442_s11, %s698_s3 }
 0x104   :  { %p448_p7 = pnand %p446_p6, %p443_p5 }
 0x106   :  { %451 = shalt.err (!%p448_p7)
}
 0x107   :  { %285 = dma.vmem_to_hbm [thread:$0]  %s283_s8, 32, %s698_s3, [#allocation3]  }
 0x108   :  { %452 = dma.done.wait [#allocation3], 32  }
 0x109   :  { %453 = vsyncadd [#allocation3], 4294967264 }
 0x10a   :  { %289 = vsyncpa [#allocation3], 1 }

</bundles_post_ra>
